<compile_context>
chip_gen: v7x
topology: tpu7x:2x2x1
jax: 0.10.0
libtpu: 0.0.40
codegen_flags: <defaults>
</compile_context>

<pallas_src>
import numpy as np
import jax
import jax.numpy as jnp
from jax import lax
from jax.experimental import pallas as pl
from jax.experimental.pallas import tpu as pltpu

# ---- hyperparameters implied by the torch test (y.reshape(15, 1, 10) must hold) ----
IN_CH, OUT_CH = 1, 3
H, W = 10, 10
KH, KW = 3, 3
STR_H, STR_W = 2, 1
PAD_H, PAD_W = 2, 1
DIL_H, DIL_W = 2, 1
H_OUT = (H + 2 * PAD_H - DIL_H * (KH - 1) - 1) // STR_H + 1   # 5
W_OUT = (W + 2 * PAD_W - DIL_W * (KW - 1) - 1) // STR_W + 1   # 10
SEQ = OUT_CH * H_OUT          # 15
LSTM_IN = W_OUT               # 10
HID = 2
NUM_LAYERS = 2
NGATE = 4 * HID               # 8   gates per direction (i, f, g, o)
NDIR_GATE = 2 * NGATE         # 16  [forward | reverse]


def harm(shape):
    """Replicates init_net_harm: sin(linspace(1, numel, numel)).reshape(shape)."""
    n = int(np.prod(shape))
    return jnp.sin(jnp.linspace(1.0, float(n), n)).reshape(shape).astype(jnp.float32)


# ------------------------------ fused forward kernel ------------------------------
def mnet_kernel(x_ref, cw_ref, cb_ref,
                wih0_ref, whh0_ref, b0_ref,
                wih1_ref, whh1_ref, b1_ref,
                out_ref, gx0_ref, gx1_ref):
    # x_ref   : (1, 1, 10, 10) VMEM  raw NCHW image
    # cw_ref  : (27,) SMEM           flat conv weight, index = c*9 + kh*3 + kw
    # cb_ref  : (3,)  SMEM           conv bias
    # wih*_ref: (d_in, 16) VMEM      [W_ih_fwd^T | W_ih_rev^T]
    # whh*_ref: (2, 16)   VMEM       [W_hh_fwd^T | W_hh_rev^T]
    # b*_ref  : (1, 16)   VMEM       [b_ih+b_hh fwd | rev]
    # out_ref : (15, 4)   VMEM       final output
    # gx*_ref : (15, 16)  VMEM scratch (per-layer gate pre-activations, both directions)
    f32 = jnp.float32
    x = x_ref[0, 0]                                                  # (10, 10)

    # ---------- Conv2d: padding / stride / dilation via 0/1 selection matmuls ----------
    # tap(kh,kw)[oh,ow] = X[STR_H*oh + DIL_H*kh - PAD_H, STR_W*ow + DIL_W*kw - PAD_W]
    # (zero outside the image) -- boundary zeros come for free from the selection matrices.
    oh_i = lax.broadcasted_iota(jnp.int32, (H_OUT, H), 0)
    ir_i = lax.broadcasted_iota(jnp.int32, (H_OUT, H), 1)
    ic_i = lax.broadcasted_iota(jnp.int32, (W, W_OUT), 0)
    oc_i = lax.broadcasted_iota(jnp.int32, (W, W_OUT), 1)
    col_sel = [(ic_i == STR_W * oc_i + DIL_W * kw - PAD_W).astype(f32) for kw in range(KW)]

    taps = []
    for kh in range(KH):
        row_sel = (ir_i == STR_H * oh_i + DIL_H * kh - PAD_H).astype(f32)   # (5, 10)
        rows = jnp.dot(row_sel, x, preferred_element_type=f32)              # (5, 10)
        taps.append([jnp.dot(rows, col_sel[kw], preferred_element_type=f32)
                     for kw in range(KW)])

    # Per-channel accumulation on the VPU; conv output rows [c*5, c*5+5) are already in
    # the LSTM (seq, feature) layout, so fuse them straight into the layer-0 gate
    # pre-activations gx0 = x_seq @ [W_ih_f^T | W_ih_r^T] + b  (one small matmul each).
    wih0 = wih0_ref[...]                                                    # (10, 16)
    b0 = b0_ref[...]                                                        # (1, 16)
    for c in range(OUT_CH):
        acc = jnp.full((H_OUT, W_OUT), cb_ref[c], f32)
        for kh in range(KH):
            for kw in range(KW):
                acc = acc + cw_ref[c * KH * KW + kh * KW + kw] * taps[kh][kw]
        gx0_ref[c * H_OUT:(c + 1) * H_OUT, :] = (
            jnp.dot(acc, wih0, preferred_element_type=f32) + b0)            # (5, 16)

    # ---------------- bidirectional LSTM, fully unrolled, recurrence on the VPU --------
    def run_direction(gx_ref, col_off, whh_dir, reverse):
        # whh_dir: (2, 8) = W_hh^T for this direction; recurrent term via broadcast MACs.
        w0 = whh_dir[0:1, :]
        w1 = whh_dir[1:2, :]
        h = jnp.zeros((1, HID), f32)
        c = jnp.zeros((1, HID), f32)
        hs = [None] * SEQ                                  # hidden state indexed by time
        for s in range(SEQ):
            t = SEQ - 1 - s if reverse else s
            g = gx_ref[t:t + 1, :][:, col_off:col_off + NGATE]              # (1, 8)
            g = g + h[:, 0:1] * w0 + h[:, 1:2] * w1
            sg = jax.nn.sigmoid(g)
            tg = jnp.tanh(g)
            i_g = sg[:, 0:HID]
            f_g = sg[:, HID:2 * HID]
            g_g = tg[:, 2 * HID:3 * HID]
            o_g = sg[:, 3 * HID:4 * HID]
            c = f_g * c + i_g * g_g
            h = o_g * jnp.tanh(c)
            hs[t] = h
        return hs

    whh0 = whh0_ref[...]                                                    # (2, 16)
    h0f = run_direction(gx0_ref, 0, whh0[:, 0:NGATE], reverse=False)
    h0r = run_direction(gx0_ref, NGATE, whh0[:, NGATE:NDIR_GATE], reverse=True)

    # Layer-1 gate pre-activations: [h0_fwd(t) | h0_rev(t)] @ W_ih1^T + b1  (pure VPU MACs)
    wih1 = wih1_ref[...]                                                    # (4, 16)
    b1 = b1_ref[...]
    for t in range(SEQ):
        hf, hr = h0f[t], h0r[t]
        gx1_ref[t:t + 1, :] = (
            b1
            + hf[:, 0:1] * wih1[0:1, :] + hf[:, 1:2] * wih1[1:2, :]
            + hr[:, 0:1] * wih1[2:3, :] + hr[:, 1:2] * wih1[3:4, :])

    whh1 = whh1_ref[...]
    h1f = run_direction(gx1_ref, 0, whh1[:, 0:NGATE], reverse=False)
    h1r = run_direction(gx1_ref, NGATE, whh1[:, NGATE:NDIR_GATE], reverse=True)

    # ---------------- assemble (15, 4) output in vregs; single dense store -------------
    lane = lax.broadcasted_iota(jnp.int32, (1, 2 * HID), 1)                 # (1, 4)
    e = [(lane == k).astype(f32) for k in range(2 * HID)]                   # one-hot rows
    row_id = lax.broadcasted_iota(jnp.int32, (SEQ, 1), 0)                   # (15, 1)
    out = jnp.zeros((SEQ, 2 * HID), f32)
    for t in range(SEQ):
        hf, hr = h1f[t], h1r[t]
        row = (hf[:, 0:1] * e[0] + hf[:, 1:2] * e[1]
               + hr[:, 0:1] * e[2] + hr[:, 1:2] * e[3])                     # (1, 4)
        out = out + (row_id == t).astype(f32) * row
    out_ref[...] = out


# ------------------------------ parameters & wrapper ------------------------------
def pack_lstm_layer(params_fwd, params_rev):
    (wf_ih, wf_hh, bf_i, bf_h) = params_fwd
    (wr_ih, wr_hh, br_i, br_h) = params_rev
    wih_t = jnp.concatenate([wf_ih.T, wr_ih.T], axis=1)            # (d_in, 16)
    whh_t = jnp.concatenate([wf_hh.T, wr_hh.T], axis=1)            # (2, 16)
    b = jnp.concatenate([bf_i + bf_h, br_i + br_h]).reshape(1, NDIR_GATE)
    return wih_t, whh_t, b


def init_params():
    conv_w = harm((OUT_CH, IN_CH, KH, KW))                         # Conv2d.weight
    conv_b = harm((OUT_CH,))                                       # Conv2d.bias
    layers = []
    for layer in range(NUM_LAYERS):
        d_in = LSTM_IN if layer == 0 else 2 * HID
        dirs = []
        for _direction in range(2):                                # 0 = forward, 1 = reverse
            w_ih = harm((NGATE, d_in))
            w_hh = harm((NGATE, HID))
            b_ih = harm((NGATE,))
            b_hh = harm((NGATE,))
            dirs.append((w_ih, w_hh, b_ih, b_hh))
        layers.append(pack_lstm_layer(dirs[0], dirs[1]))
    return conv_w, conv_b, layers


def mnet_forward(x, conv_w, conv_b, lstm_layers):
    (wih0, whh0, b0), (wih1, whh1, b1) = lstm_layers
    vmem = pl.BlockSpec(memory_space=pltpu.MemorySpace.VMEM)
    smem = pl.BlockSpec(memory_space=pltpu.MemorySpace.SMEM)
    return pl.pallas_call(
        mnet_kernel,
        out_shape=jax.ShapeDtypeStruct((SEQ, 2 * HID), jnp.float32),
        in_specs=[vmem, smem, smem, vmem, vmem, vmem, vmem, vmem, vmem],
        out_specs=vmem,
        scratch_shapes=[pltpu.VMEM((SEQ, NDIR_GATE), jnp.float32),   # layer-0 gx
                        pltpu.VMEM((SEQ, NDIR_GATE), jnp.float32)],  # layer-1 gx
    )(x, conv_w.reshape(-1), conv_b, wih0, whh0, b0, wih1, whh1, b1)


if __name__ == "__main__":
    key = jax.random.PRNGKey(0)
    x = jax.random.normal(key, (1, IN_CH, H, W), dtype=jnp.float32)
    conv_w, conv_b, lstm_layers = init_params()

    fwd = jax.jit(lambda xx: mnet_forward(xx, conv_w, conv_b, lstm_layers))
    y = jax.block_until_ready(fwd(x))
    assert y.shape == (SEQ, 2 * HID), y.shape
    assert bool(jnp.all(jnp.isfinite(y)))
    print("KERNEL_OK")
</pallas_src>

<mosaic_0001>
module attributes {stable_mosaic.version = 11 : i64} {
  func.func @mnet_kernel(%arg0: memref<1x1x10x10xf32, #tpu.memory_space<vmem>>, %arg1: memref<27xf32, #tpu.memory_space<smem>>, %arg2: memref<3xf32, #tpu.memory_space<smem>>, %arg3: memref<10x16xf32, #tpu.memory_space<vmem>>, %arg4: memref<2x16xf32, #tpu.memory_space<vmem>>, %arg5: memref<1x16xf32, #tpu.memory_space<vmem>>, %arg6: memref<4x16xf32, #tpu.memory_space<vmem>>, %arg7: memref<2x16xf32, #tpu.memory_space<vmem>>, %arg8: memref<1x16xf32, #tpu.memory_space<vmem>>, %arg9: memref<15x4xf32, #tpu.memory_space<vmem>>, %arg10: memref<15x16xf32, #tpu.memory_space<vmem>>, %arg11: memref<15x16xf32, #tpu.memory_space<vmem>>) attributes {dimension_semantics = [], scalar_prefetch = 0 : i64, scratch_operands = 2 : i64, tpu.core_type = #tpu.core_type<tc>} {
    %c0 = arith.constant 0 : index
    %c0_0 = arith.constant 0 : index
    %c0_1 = arith.constant 0 : index
    %c0_2 = arith.constant 0 : index
    %0 = vector.load %arg0[%c0, %c0_0, %c0_1, %c0_2] : memref<1x1x10x10xf32, #tpu.memory_space<vmem>>, vector<1x1x10x10xf32>
    %1 = vector.shape_cast %0 : vector<1x1x10x10xf32> to vector<10x10xf32>
    %2 = tpu.iota {dimensions = array<i32: 0>} : vector<5x10xi32>
    %3 = tpu.iota {dimensions = array<i32: 1>} : vector<5x10xi32>
    %4 = tpu.iota {dimensions = array<i32: 0>} : vector<10x10xi32>
    %5 = tpu.iota {dimensions = array<i32: 1>} : vector<10x10xi32>
    %c1_i32 = arith.constant 1 : i32
    %6 = vector.broadcast %c1_i32 : i32 to vector<10x10xi32>
    %7 = arith.muli %6, %5 : vector<10x10xi32>
    %c0_i32 = arith.constant 0 : i32
    %8 = vector.broadcast %c0_i32 : i32 to vector<10x10xi32>
    %9 = arith.addi %7, %8 : vector<10x10xi32>
    %c1_i32_3 = arith.constant 1 : i32
    %10 = vector.broadcast %c1_i32_3 : i32 to vector<10x10xi32>
    %11 = arith.subi %9, %10 : vector<10x10xi32>
    %12 = arith.cmpi eq, %4, %11 : vector<10x10xi32>
    %13 = arith.extui %12 : vector<10x10xi1> to vector<10x10xi32>
    %14 = arith.sitofp %13 : vector<10x10xi32> to vector<10x10xf32>
    %c1_i32_4 = arith.constant 1 : i32
    %15 = vector.broadcast %c1_i32_4 : i32 to vector<10x10xi32>
    %16 = arith.muli %15, %5 : vector<10x10xi32>
    %c1_i32_5 = arith.constant 1 : i32
    %17 = vector.broadcast %c1_i32_5 : i32 to vector<10x10xi32>
    %18 = arith.addi %16, %17 : vector<10x10xi32>
    %c1_i32_6 = arith.constant 1 : i32
    %19 = vector.broadcast %c1_i32_6 : i32 to vector<10x10xi32>
    %20 = arith.subi %18, %19 : vector<10x10xi32>
    %21 = arith.cmpi eq, %4, %20 : vector<10x10xi32>
    %22 = arith.extui %21 : vector<10x10xi1> to vector<10x10xi32>
    %23 = arith.sitofp %22 : vector<10x10xi32> to vector<10x10xf32>
    %c1_i32_7 = arith.constant 1 : i32
    %24 = vector.broadcast %c1_i32_7 : i32 to vector<10x10xi32>
    %25 = arith.muli %24, %5 : vector<10x10xi32>
    %c2_i32 = arith.constant 2 : i32
    %26 = vector.broadcast %c2_i32 : i32 to vector<10x10xi32>
    %27 = arith.addi %25, %26 : vector<10x10xi32>
    %c1_i32_8 = arith.constant 1 : i32
    %28 = vector.broadcast %c1_i32_8 : i32 to vector<10x10xi32>
    %29 = arith.subi %27, %28 : vector<10x10xi32>
    %30 = arith.cmpi eq, %4, %29 : vector<10x10xi32>
    %31 = arith.extui %30 : vector<10x10xi1> to vector<10x10xi32>
    %32 = arith.sitofp %31 : vector<10x10xi32> to vector<10x10xf32>
    %c2_i32_9 = arith.constant 2 : i32
    %33 = vector.broadcast %c2_i32_9 : i32 to vector<5x10xi32>
    %34 = arith.muli %33, %2 : vector<5x10xi32>
    %c0_i32_10 = arith.constant 0 : i32
    %35 = vector.broadcast %c0_i32_10 : i32 to vector<5x10xi32>
    %36 = arith.addi %34, %35 : vector<5x10xi32>
    %c2_i32_11 = arith.constant 2 : i32
    %37 = vector.broadcast %c2_i32_11 : i32 to vector<5x10xi32>
    %38 = arith.subi %36, %37 : vector<5x10xi32>
    %39 = arith.cmpi eq, %3, %38 : vector<5x10xi32>
    %40 = arith.extui %39 : vector<5x10xi1> to vector<5x10xi32>
    %41 = arith.sitofp %40 : vector<5x10xi32> to vector<5x10xf32>
    %cst = arith.constant dense<0.000000e+00> : vector<5x10xf32>
    %42 = tpu.matmul %41, %1, %cst {dimension_numbers = #tpu.dot_dimension_numbers<[1], [0], [0], [1], [0, 0, 1, 1], [], []>} : vector<5x10xf32>, vector<10x10xf32>, vector<5x10xf32> -> vector<5x10xf32>
    %cst_12 = arith.constant dense<0.000000e+00> : vector<5x10xf32>
    %43 = tpu.matmul %42, %14, %cst_12 {dimension_numbers = #tpu.dot_dimension_numbers<[1], [0], [0], [1], [0, 0, 1, 1], [], []>} : vector<5x10xf32>, vector<10x10xf32>, vector<5x10xf32> -> vector<5x10xf32>
    %cst_13 = arith.constant dense<0.000000e+00> : vector<5x10xf32>
    %44 = tpu.matmul %42, %23, %cst_13 {dimension_numbers = #tpu.dot_dimension_numbers<[1], [0], [0], [1], [0, 0, 1, 1], [], []>} : vector<5x10xf32>, vector<10x10xf32>, vector<5x10xf32> -> vector<5x10xf32>
    %cst_14 = arith.constant dense<0.000000e+00> : vector<5x10xf32>
    %45 = tpu.matmul %42, %32, %cst_14 {dimension_numbers = #tpu.dot_dimension_numbers<[1], [0], [0], [1], [0, 0, 1, 1], [], []>} : vector<5x10xf32>, vector<10x10xf32>, vector<5x10xf32> -> vector<5x10xf32>
    %c2_i32_15 = arith.constant 2 : i32
    %46 = vector.broadcast %c2_i32_15 : i32 to vector<5x10xi32>
    %47 = arith.muli %46, %2 : vector<5x10xi32>
    %c2_i32_16 = arith.constant 2 : i32
    %48 = vector.broadcast %c2_i32_16 : i32 to vector<5x10xi32>
    %49 = arith.addi %47, %48 : vector<5x10xi32>
    %c2_i32_17 = arith.constant 2 : i32
    %50 = vector.broadcast %c2_i32_17 : i32 to vector<5x10xi32>
    %51 = arith.subi %49, %50 : vector<5x10xi32>
    %52 = arith.cmpi eq, %3, %51 : vector<5x10xi32>
    %53 = arith.extui %52 : vector<5x10xi1> to vector<5x10xi32>
    %54 = arith.sitofp %53 : vector<5x10xi32> to vector<5x10xf32>
    %cst_18 = arith.constant dense<0.000000e+00> : vector<5x10xf32>
    %55 = tpu.matmul %54, %1, %cst_18 {dimension_numbers = #tpu.dot_dimension_numbers<[1], [0], [0], [1], [0, 0, 1, 1], [], []>} : vector<5x10xf32>, vector<10x10xf32>, vector<5x10xf32> -> vector<5x10xf32>
    %cst_19 = arith.constant dense<0.000000e+00> : vector<5x10xf32>
    %56 = tpu.matmul %55, %14, %cst_19 {dimension_numbers = #tpu.dot_dimension_numbers<[1], [0], [0], [1], [0, 0, 1, 1], [], []>} : vector<5x10xf32>, vector<10x10xf32>, vector<5x10xf32> -> vector<5x10xf32>
    %cst_20 = arith.constant dense<0.000000e+00> : vector<5x10xf32>
    %57 = tpu.matmul %55, %23, %cst_20 {dimension_numbers = #tpu.dot_dimension_numbers<[1], [0], [0], [1], [0, 0, 1, 1], [], []>} : vector<5x10xf32>, vector<10x10xf32>, vector<5x10xf32> -> vector<5x10xf32>
    %cst_21 = arith.constant dense<0.000000e+00> : vector<5x10xf32>
    %58 = tpu.matmul %55, %32, %cst_21 {dimension_numbers = #tpu.dot_dimension_numbers<[1], [0], [0], [1], [0, 0, 1, 1], [], []>} : vector<5x10xf32>, vector<10x10xf32>, vector<5x10xf32> -> vector<5x10xf32>
    %c2_i32_22 = arith.constant 2 : i32
    %59 = vector.broadcast %c2_i32_22 : i32 to vector<5x10xi32>
    %60 = arith.muli %59, %2 : vector<5x10xi32>
    %c4_i32 = arith.constant 4 : i32
    %61 = vector.broadcast %c4_i32 : i32 to vector<5x10xi32>
    %62 = arith.addi %60, %61 : vector<5x10xi32>
    %c2_i32_23 = arith.constant 2 : i32
    %63 = vector.broadcast %c2_i32_23 : i32 to vector<5x10xi32>
    %64 = arith.subi %62, %63 : vector<5x10xi32>
    %65 = arith.cmpi eq, %3, %64 : vector<5x10xi32>
    %66 = arith.extui %65 : vector<5x10xi1> to vector<5x10xi32>
    %67 = arith.sitofp %66 : vector<5x10xi32> to vector<5x10xf32>
    %cst_24 = arith.constant dense<0.000000e+00> : vector<5x10xf32>
    %68 = tpu.matmul %67, %1, %cst_24 {dimension_numbers = #tpu.dot_dimension_numbers<[1], [0], [0], [1], [0, 0, 1, 1], [], []>} : vector<5x10xf32>, vector<10x10xf32>, vector<5x10xf32> -> vector<5x10xf32>
    %cst_25 = arith.constant dense<0.000000e+00> : vector<5x10xf32>
    %69 = tpu.matmul %68, %14, %cst_25 {dimension_numbers = #tpu.dot_dimension_numbers<[1], [0], [0], [1], [0, 0, 1, 1], [], []>} : vector<5x10xf32>, vector<10x10xf32>, vector<5x10xf32> -> vector<5x10xf32>
    %cst_26 = arith.constant dense<0.000000e+00> : vector<5x10xf32>
    %70 = tpu.matmul %68, %23, %cst_26 {dimension_numbers = #tpu.dot_dimension_numbers<[1], [0], [0], [1], [0, 0, 1, 1], [], []>} : vector<5x10xf32>, vector<10x10xf32>, vector<5x10xf32> -> vector<5x10xf32>
    %cst_27 = arith.constant dense<0.000000e+00> : vector<5x10xf32>
    %71 = tpu.matmul %68, %32, %cst_27 {dimension_numbers = #tpu.dot_dimension_numbers<[1], [0], [0], [1], [0, 0, 1, 1], [], []>} : vector<5x10xf32>, vector<10x10xf32>, vector<5x10xf32> -> vector<5x10xf32>
    %c0_28 = arith.constant 0 : index
    %c0_29 = arith.constant 0 : index
    %72 = vector.load %arg3[%c0_28, %c0_29] : memref<10x16xf32, #tpu.memory_space<vmem>>, vector<10x16xf32>
    %c0_30 = arith.constant 0 : index
    %c0_31 = arith.constant 0 : index
    %73 = vector.load %arg5[%c0_30, %c0_31] : memref<1x16xf32, #tpu.memory_space<vmem>>, vector<1x16xf32>
    %c0_32 = arith.constant 0 : index
    %74 = memref.load %arg2[%c0_32] : memref<3xf32, #tpu.memory_space<smem>>
    %75 = vector.broadcast %74 : f32 to vector<5x10xf32>
    %c0_33 = arith.constant 0 : index
    %76 = memref.load %arg1[%c0_33] : memref<27xf32, #tpu.memory_space<smem>>
    %77 = vector.broadcast %76 : f32 to vector<5x10xf32>
    %78 = arith.mulf %77, %43 : vector<5x10xf32>
    %79 = arith.addf %75, %78 : vector<5x10xf32>
    %c1 = arith.constant 1 : index
    %80 = memref.load %arg1[%c1] : memref<27xf32, #tpu.memory_space<smem>>
    %81 = vector.broadcast %80 : f32 to vector<5x10xf32>
    %82 = arith.mulf %81, %44 : vector<5x10xf32>
    %83 = arith.addf %79, %82 : vector<5x10xf32>
    %c2 = arith.constant 2 : index
    %84 = memref.load %arg1[%c2] : memref<27xf32, #tpu.memory_space<smem>>
    %85 = vector.broadcast %84 : f32 to vector<5x10xf32>
    %86 = arith.mulf %85, %45 : vector<5x10xf32>
    %87 = arith.addf %83, %86 : vector<5x10xf32>
    %c3 = arith.constant 3 : index
    %88 = memref.load %arg1[%c3] : memref<27xf32, #tpu.memory_space<smem>>
    %89 = vector.broadcast %88 : f32 to vector<5x10xf32>
    %90 = arith.mulf %89, %56 : vector<5x10xf32>
    %91 = arith.addf %87, %90 : vector<5x10xf32>
    %c4 = arith.constant 4 : index
    %92 = memref.load %arg1[%c4] : memref<27xf32, #tpu.memory_space<smem>>
    %93 = vector.broadcast %92 : f32 to vector<5x10xf32>
    %94 = arith.mulf %93, %57 : vector<5x10xf32>
    %95 = arith.addf %91, %94 : vector<5x10xf32>
    %c5 = arith.constant 5 : index
    %96 = memref.load %arg1[%c5] : memref<27xf32, #tpu.memory_space<smem>>
    %97 = vector.broadcast %96 : f32 to vector<5x10xf32>
    %98 = arith.mulf %97, %58 : vector<5x10xf32>
    %99 = arith.addf %95, %98 : vector<5x10xf32>
    %c6 = arith.constant 6 : index
    %100 = memref.load %arg1[%c6] : memref<27xf32, #tpu.memory_space<smem>>
    %101 = vector.broadcast %100 : f32 to vector<5x10xf32>
    %102 = arith.mulf %101, %69 : vector<5x10xf32>
    %103 = arith.addf %99, %102 : vector<5x10xf32>
    %c7 = arith.constant 7 : index
    %104 = memref.load %arg1[%c7] : memref<27xf32, #tpu.memory_space<smem>>
    %105 = vector.broadcast %104 : f32 to vector<5x10xf32>
    %106 = arith.mulf %105, %70 : vector<5x10xf32>
    %107 = arith.addf %103, %106 : vector<5x10xf32>
    %c8 = arith.constant 8 : index
    %108 = memref.load %arg1[%c8] : memref<27xf32, #tpu.memory_space<smem>>
    %109 = vector.broadcast %108 : f32 to vector<5x10xf32>
    %110 = arith.mulf %109, %71 : vector<5x10xf32>
    %111 = arith.addf %107, %110 : vector<5x10xf32>
    %cst_34 = arith.constant dense<0.000000e+00> : vector<5x16xf32>
    %112 = tpu.matmul %111, %72, %cst_34 {dimension_numbers = #tpu.dot_dimension_numbers<[1], [0], [0], [1], [0, 0, 1, 1], [], []>} : vector<5x10xf32>, vector<10x16xf32>, vector<5x16xf32> -> vector<5x16xf32>
    %113 = vector.broadcast %73 : vector<1x16xf32> to vector<5x16xf32>
    %114 = arith.addf %112, %113 : vector<5x16xf32>
    %c0_35 = arith.constant 0 : index
    %c0_36 = arith.constant 0 : index
    %115 = vector.load %arg10[%c0_35, %c0_36] : memref<15x16xf32, #tpu.memory_space<vmem>>, vector<5x16xf32>
    tpu.vector_store %arg10[%c0_35, %c0_36], %114 {strides = array<i32>} : memref<15x16xf32, #tpu.memory_space<vmem>>, vector<5x16xf32>,
    %c1_37 = arith.constant 1 : index
    %116 = memref.load %arg2[%c1_37] : memref<3xf32, #tpu.memory_space<smem>>
    %117 = vector.broadcast %116 : f32 to vector<5x10xf32>
    %c9 = arith.constant 9 : index
    %118 = memref.load %arg1[%c9] : memref<27xf32, #tpu.memory_space<smem>>
    %119 = vector.broadcast %118 : f32 to vector<5x10xf32>
    %120 = arith.mulf %119, %43 : vector<5x10xf32>
    %121 = arith.addf %117, %120 : vector<5x10xf32>
    %c10 = arith.constant 10 : index
    %122 = memref.load %arg1[%c10] : memref<27xf32, #tpu.memory_space<smem>>
    %123 = vector.broadcast %122 : f32 to vector<5x10xf32>
    %124 = arith.mulf %123, %44 : vector<5x10xf32>
    %125 = arith.addf %121, %124 : vector<5x10xf32>
    %c11 = arith.constant 11 : index
    %126 = memref.load %arg1[%c11] : memref<27xf32, #tpu.memory_space<smem>>
    %127 = vector.broadcast %126 : f32 to vector<5x10xf32>
    %128 = arith.mulf %127, %45 : vector<5x10xf32>
    %129 = arith.addf %125, %128 : vector<5x10xf32>
    %c12 = arith.constant 12 : index
    %130 = memref.load %arg1[%c12] : memref<27xf32, #tpu.memory_space<smem>>
    %131 = vector.broadcast %130 : f32 to vector<5x10xf32>
    %132 = arith.mulf %131, %56 : vector<5x10xf32>
    %133 = arith.addf %129, %132 : vector<5x10xf32>
    %c13 = arith.constant 13 : index
    %134 = memref.load %arg1[%c13] : memref<27xf32, #tpu.memory_space<smem>>
    %135 = vector.broadcast %134 : f32 to vector<5x10xf32>
    %136 = arith.mulf %135, %57 : vector<5x10xf32>
    %137 = arith.addf %133, %136 : vector<5x10xf32>
    %c14 = arith.constant 14 : index
    %138 = memref.load %arg1[%c14] : memref<27xf32, #tpu.memory_space<smem>>
    %139 = vector.broadcast %138 : f32 to vector<5x10xf32>
    %140 = arith.mulf %139, %58 : vector<5x10xf32>
    %141 = arith.addf %137, %140 : vector<5x10xf32>
    %c15 = arith.constant 15 : index
    %142 = memref.load %arg1[%c15] : memref<27xf32, #tpu.memory_space<smem>>
    %143 = vector.broadcast %142 : f32 to vector<5x10xf32>
    %144 = arith.mulf %143, %69 : vector<5x10xf32>
    %145 = arith.addf %141, %144 : vector<5x10xf32>
    %c16 = arith.constant 16 : index
    %146 = memref.load %arg1[%c16] : memref<27xf32, #tpu.memory_space<smem>>
    %147 = vector.broadcast %146 : f32 to vector<5x10xf32>
    %148 = arith.mulf %147, %70 : vector<5x10xf32>
    %149 = arith.addf %145, %148 : vector<5x10xf32>
    %c17 = arith.constant 17 : index
    %150 = memref.load %arg1[%c17] : memref<27xf32, #tpu.memory_space<smem>>
    %151 = vector.broadcast %150 : f32 to vector<5x10xf32>
    %152 = arith.mulf %151, %71 : vector<5x10xf32>
    %153 = arith.addf %149, %152 : vector<5x10xf32>
    %cst_38 = arith.constant dense<0.000000e+00> : vector<5x16xf32>
    %154 = tpu.matmul %153, %72, %cst_38 {dimension_numbers = #tpu.dot_dimension_numbers<[1], [0], [0], [1], [0, 0, 1, 1], [], []>} : vector<5x10xf32>, vector<10x16xf32>, vector<5x16xf32> -> vector<5x16xf32>
    %155 = vector.broadcast %73 : vector<1x16xf32> to vector<5x16xf32>
    %156 = arith.addf %154, %155 : vector<5x16xf32>
    %c5_39 = arith.constant 5 : index
    %c0_40 = arith.constant 0 : index
    %157 = vector.load %arg10[%c5_39, %c0_40] : memref<15x16xf32, #tpu.memory_space<vmem>>, vector<5x16xf32>
    tpu.vector_store %arg10[%c5_39, %c0_40], %156 {strides = array<i32>} : memref<15x16xf32, #tpu.memory_space<vmem>>, vector<5x16xf32>,
    %c2_41 = arith.constant 2 : index
    %158 = memref.load %arg2[%c2_41] : memref<3xf32, #tpu.memory_space<smem>>
    %159 = vector.broadcast %158 : f32 to vector<5x10xf32>
    %c18 = arith.constant 18 : index
    %160 = memref.load %arg1[%c18] : memref<27xf32, #tpu.memory_space<smem>>
    %161 = vector.broadcast %160 : f32 to vector<5x10xf32>
    %162 = arith.mulf %161, %43 : vector<5x10xf32>
    %163 = arith.addf %159, %162 : vector<5x10xf32>
    %c19 = arith.constant 19 : index
    %164 = memref.load %arg1[%c19] : memref<27xf32, #tpu.memory_space<smem>>
    %165 = vector.broadcast %164 : f32 to vector<5x10xf32>
    %166 = arith.mulf %165, %44 : vector<5x10xf32>
    %167 = arith.addf %163, %166 : vector<5x10xf32>
    %c20 = arith.constant 20 : index
    %168 = memref.load %arg1[%c20] : memref<27xf32, #tpu.memory_space<smem>>
    %169 = vector.broadcast %168 : f32 to vector<5x10xf32>
    %170 = arith.mulf %169, %45 : vector<5x10xf32>
    %171 = arith.addf %167, %170 : vector<5x10xf32>
    %c21 = arith.constant 21 : index
    %172 = memref.load %arg1[%c21] : memref<27xf32, #tpu.memory_space<smem>>
    %173 = vector.broadcast %172 : f32 to vector<5x10xf32>
    %174 = arith.mulf %173, %56 : vector<5x10xf32>
    %175 = arith.addf %171, %174 : vector<5x10xf32>
    %c22 = arith.constant 22 : index
    %176 = memref.load %arg1[%c22] : memref<27xf32, #tpu.memory_space<smem>>
    %177 = vector.broadcast %176 : f32 to vector<5x10xf32>
    %178 = arith.mulf %177, %57 : vector<5x10xf32>
    %179 = arith.addf %175, %178 : vector<5x10xf32>
    %c23 = arith.constant 23 : index
    %180 = memref.load %arg1[%c23] : memref<27xf32, #tpu.memory_space<smem>>
    %181 = vector.broadcast %180 : f32 to vector<5x10xf32>
    %182 = arith.mulf %181, %58 : vector<5x10xf32>
    %183 = arith.addf %179, %182 : vector<5x10xf32>
    %c24 = arith.constant 24 : index
    %184 = memref.load %arg1[%c24] : memref<27xf32, #tpu.memory_space<smem>>
    %185 = vector.broadcast %184 : f32 to vector<5x10xf32>
    %186 = arith.mulf %185, %69 : vector<5x10xf32>
    %187 = arith.addf %183, %186 : vector<5x10xf32>
    %c25 = arith.constant 25 : index
    %188 = memref.load %arg1[%c25] : memref<27xf32, #tpu.memory_space<smem>>
    %189 = vector.broadcast %188 : f32 to vector<5x10xf32>
    %190 = arith.mulf %189, %70 : vector<5x10xf32>
    %191 = arith.addf %187, %190 : vector<5x10xf32>
    %c26 = arith.constant 26 : index
    %192 = memref.load %arg1[%c26] : memref<27xf32, #tpu.memory_space<smem>>
    %193 = vector.broadcast %192 : f32 to vector<5x10xf32>
    %194 = arith.mulf %193, %71 : vector<5x10xf32>
    %195 = arith.addf %191, %194 : vector<5x10xf32>
    %cst_42 = arith.constant dense<0.000000e+00> : vector<5x16xf32>
    %196 = tpu.matmul %195, %72, %cst_42 {dimension_numbers = #tpu.dot_dimension_numbers<[1], [0], [0], [1], [0, 0, 1, 1], [], []>} : vector<5x10xf32>, vector<10x16xf32>, vector<5x16xf32> -> vector<5x16xf32>
    %197 = vector.broadcast %73 : vector<1x16xf32> to vector<5x16xf32>
    %198 = arith.addf %196, %197 : vector<5x16xf32>
    %c10_43 = arith.constant 10 : index
    %c0_44 = arith.constant 0 : index
    %199 = vector.load %arg10[%c10_43, %c0_44] : memref<15x16xf32, #tpu.memory_space<vmem>>, vector<5x16xf32>
    tpu.vector_store %arg10[%c10_43, %c0_44], %198 {strides = array<i32>} : memref<15x16xf32, #tpu.memory_space<vmem>>, vector<5x16xf32>,
    %c0_45 = arith.constant 0 : index
    %c0_46 = arith.constant 0 : index
    %200 = vector.load %arg4[%c0_45, %c0_46] : memref<2x16xf32, #tpu.memory_space<vmem>>, vector<2x16xf32>
    %201 = vector.extract_strided_slice %200 {offsets = [0, 0], sizes = [2, 8], strides = [1, 1]} : vector<2x16xf32> to vector<2x8xf32>
    %202 = vector.extract_strided_slice %201 {offsets = [0, 0], sizes = [1, 8], strides = [1, 1]} : vector<2x8xf32> to vector<1x8xf32>
    %203 = vector.extract_strided_slice %201 {offsets = [1, 0], sizes = [1, 8], strides = [1, 1]} : vector<2x8xf32> to vector<1x8xf32>
    %cst_47 = arith.constant 0.000000e+00 : f32
    %204 = vector.broadcast %cst_47 : f32 to vector<1x2xf32>
    %cst_48 = arith.constant 0.000000e+00 : f32
    %205 = vector.broadcast %cst_48 : f32 to vector<1x2xf32>
    %c0_49 = arith.constant 0 : index
    %c0_50 = arith.constant 0 : index
    %206 = vector.load %arg10[%c0_49, %c0_50] : memref<15x16xf32, #tpu.memory_space<vmem>>, vector<1x16xf32>
    %207 = vector.extract_strided_slice %206 {offsets = [0, 0], sizes = [1, 8], strides = [1, 1]} : vector<1x16xf32> to vector<1x8xf32>
    %208 = vector.extract_strided_slice %204 {offsets = [0, 0], sizes = [1, 1], strides = [1, 1]} : vector<1x2xf32> to vector<1x1xf32>
    %209 = vector.broadcast %208 : vector<1x1xf32> to vector<1x8xf32>
    %210 = arith.mulf %209, %202 : vector<1x8xf32>
    %211 = arith.addf %207, %210 : vector<1x8xf32>
    %212 = vector.extract_strided_slice %204 {offsets = [0, 1], sizes = [1, 1], strides = [1, 1]} : vector<1x2xf32> to vector<1x1xf32>
    %213 = vector.broadcast %212 : vector<1x1xf32> to vector<1x8xf32>
    %214 = arith.mulf %213, %203 : vector<1x8xf32>
    %215 = arith.addf %211, %214 : vector<1x8xf32>
    %216 = arith.negf %215 : vector<1x8xf32>
    %217 = math.exp %216 : vector<1x8xf32>
    %cst_51 = arith.constant 1.000000e+00 : f32
    %218 = vector.broadcast %cst_51 : f32 to vector<1x8xf32>
    %219 = arith.addf %218, %217 : vector<1x8xf32>
    %220 = arith.divf %218, %219 : vector<1x8xf32>
    %221 = math.tanh %215 : vector<1x8xf32>
    %222 = vector.extract_strided_slice %220 {offsets = [0, 0], sizes = [1, 2], strides = [1, 1]} : vector<1x8xf32> to vector<1x2xf32>
    %223 = vector.extract_strided_slice %220 {offsets = [0, 2], sizes = [1, 2], strides = [1, 1]} : vector<1x8xf32> to vector<1x2xf32>
    %224 = vector.extract_strided_slice %221 {offsets = [0, 4], sizes = [1, 2], strides = [1, 1]} : vector<1x8xf32> to vector<1x2xf32>
    %225 = vector.extract_strided_slice %220 {offsets = [0, 6], sizes = [1, 2], strides = [1, 1]} : vector<1x8xf32> to vector<1x2xf32>
    %226 = arith.mulf %223, %205 : vector<1x2xf32>
    %227 = arith.mulf %222, %224 : vector<1x2xf32>
    %228 = arith.addf %226, %227 : vector<1x2xf32>
    %229 = math.tanh %228 : vector<1x2xf32>
    %230 = arith.mulf %225, %229 : vector<1x2xf32>
    %c1_52 = arith.constant 1 : index
    %c0_53 = arith.constant 0 : index
    %231 = vector.load %arg10[%c1_52, %c0_53] : memref<15x16xf32, #tpu.memory_space<vmem>>, vector<1x16xf32>
    %232 = vector.extract_strided_slice %231 {offsets = [0, 0], sizes = [1, 8], strides = [1, 1]} : vector<1x16xf32> to vector<1x8xf32>
    %233 = vector.extract_strided_slice %230 {offsets = [0, 0], sizes = [1, 1], strides = [1, 1]} : vector<1x2xf32> to vector<1x1xf32>
    %234 = vector.broadcast %233 : vector<1x1xf32> to vector<1x8xf32>
    %235 = arith.mulf %234, %202 : vector<1x8xf32>
    %236 = arith.addf %232, %235 : vector<1x8xf32>
    %237 = vector.extract_strided_slice %230 {offsets = [0, 1], sizes = [1, 1], strides = [1, 1]} : vector<1x2xf32> to vector<1x1xf32>
    %238 = vector.broadcast %237 : vector<1x1xf32> to vector<1x8xf32>
    %239 = arith.mulf %238, %203 : vector<1x8xf32>
    %240 = arith.addf %236, %239 : vector<1x8xf32>
    %241 = arith.negf %240 : vector<1x8xf32>
    %242 = math.exp %241 : vector<1x8xf32>
    %cst_54 = arith.constant 1.000000e+00 : f32
    %243 = vector.broadcast %cst_54 : f32 to vector<1x8xf32>
    %244 = arith.addf %243, %242 : vector<1x8xf32>
    %245 = arith.divf %243, %244 : vector<1x8xf32>
    %246 = math.tanh %240 : vector<1x8xf32>
    %247 = vector.extract_strided_slice %245 {offsets = [0, 0], sizes = [1, 2], strides = [1, 1]} : vector<1x8xf32> to vector<1x2xf32>
    %248 = vector.extract_strided_slice %245 {offsets = [0, 2], sizes = [1, 2], strides = [1, 1]} : vector<1x8xf32> to vector<1x2xf32>
    %249 = vector.extract_strided_slice %246 {offsets = [0, 4], sizes = [1, 2], strides = [1, 1]} : vector<1x8xf32> to vector<1x2xf32>
    %250 = vector.extract_strided_slice %245 {offsets = [0, 6], sizes = [1, 2], strides = [1, 1]} : vector<1x8xf32> to vector<1x2xf32>
    %251 = arith.mulf %248, %228 : vector<1x2xf32>
    %252 = arith.mulf %247, %249 : vector<1x2xf32>
    %253 = arith.addf %251, %252 : vector<1x2xf32>
    %254 = math.tanh %253 : vector<1x2xf32>
    %255 = arith.mulf %250, %254 : vector<1x2xf32>
    %c2_55 = arith.constant 2 : index
    %c0_56 = arith.constant 0 : index
    %256 = vector.load %arg10[%c2_55, %c0_56] : memref<15x16xf32, #tpu.memory_space<vmem>>, vector<1x16xf32>
    %257 = vector.extract_strided_slice %256 {offsets = [0, 0], sizes = [1, 8], strides = [1, 1]} : vector<1x16xf32> to vector<1x8xf32>
    %258 = vector.extract_strided_slice %255 {offsets = [0, 0], sizes = [1, 1], strides = [1, 1]} : vector<1x2xf32> to vector<1x1xf32>
    %259 = vector.broadcast %258 : vector<1x1xf32> to vector<1x8xf32>
    %260 = arith.mulf %259, %202 : vector<1x8xf32>
    %261 = arith.addf %257, %260 : vector<1x8xf32>
    %262 = vector.extract_strided_slice %255 {offsets = [0, 1], sizes = [1, 1], strides = [1, 1]} : vector<1x2xf32> to vector<1x1xf32>
    %263 = vector.broadcast %262 : vector<1x1xf32> to vector<1x8xf32>
    %264 = arith.mulf %263, %203 : vector<1x8xf32>
    %265 = arith.addf %261, %264 : vector<1x8xf32>
    %266 = arith.negf %265 : vector<1x8xf32>
    %267 = math.exp %266 : vector<1x8xf32>
    %cst_57 = arith.constant 1.000000e+00 : f32
    %268 = vector.broadcast %cst_57 : f32 to vector<1x8xf32>
    %269 = arith.addf %268, %267 : vector<1x8xf32>
    %270 = arith.divf %268, %269 : vector<1x8xf32>
    %271 = math.tanh %265 : vector<1x8xf32>
    %272 = vector.extract_strided_slice %270 {offsets = [0, 0], sizes = [1, 2], strides = [1, 1]} : vector<1x8xf32> to vector<1x2xf32>
    %273 = vector.extract_strided_slice %270 {offsets = [0, 2], sizes = [1, 2], strides = [1, 1]} : vector<1x8xf32> to vector<1x2xf32>
    %274 = vector.extract_strided_slice %271 {offsets = [0, 4], sizes = [1, 2], strides = [1, 1]} : vector<1x8xf32> to vector<1x2xf32>
    %275 = vector.extract_strided_slice %270 {offsets = [0, 6], sizes = [1, 2], strides = [1, 1]} : vector<1x8xf32> to vector<1x2xf32>
    %276 = arith.mulf %273, %253 : vector<1x2xf32>
    %277 = arith.mulf %272, %274 : vector<1x2xf32>
    %278 = arith.addf %276, %277 : vector<1x2xf32>
    %279 = math.tanh %278 : vector<1x2xf32>
    %280 = arith.mulf %275, %279 : vector<1x2xf32>
    %c3_58 = arith.constant 3 : index
    %c0_59 = arith.constant 0 : index
    %281 = vector.load %arg10[%c3_58, %c0_59] : memref<15x16xf32, #tpu.memory_space<vmem>>, vector<1x16xf32>
    %282 = vector.extract_strided_slice %281 {offsets = [0, 0], sizes = [1, 8], strides = [1, 1]} : vector<1x16xf32> to vector<1x8xf32>
    %283 = vector.extract_strided_slice %280 {offsets = [0, 0], sizes = [1, 1], strides = [1, 1]} : vector<1x2xf32> to vector<1x1xf32>
    %284 = vector.broadcast %283 : vector<1x1xf32> to vector<1x8xf32>
    %285 = arith.mulf %284, %202 : vector<1x8xf32>
    %286 = arith.addf %282, %285 : vector<1x8xf32>
    %287 = vector.extract_strided_slice %280 {offsets = [0, 1], sizes = [1, 1], strides = [1, 1]} : vector<1x2xf32> to vector<1x1xf32>
    %288 = vector.broadcast %287 : vector<1x1xf32> to vector<1x8xf32>
    %289 = arith.mulf %288, %203 : vector<1x8xf32>
    %290 = arith.addf %286, %289 : vector<1x8xf32>
    %291 = arith.negf %290 : vector<1x8xf32>
    %292 = math.exp %291 : vector<1x8xf32>
    %cst_60 = arith.constant 1.000000e+00 : f32
    %293 = vector.broadcast %cst_60 : f32 to vector<1x8xf32>
    %294 = arith.addf %293, %292 : vector<1x8xf32>
    %295 = arith.divf %293, %294 : vector<1x8xf32>
    %296 = math.tanh %290 : vector<1x8xf32>
    %297 = vector.extract_strided_slice %295 {offsets = [0, 0], sizes = [1, 2], strides = [1, 1]} : vector<1x8xf32> to vector<1x2xf32>
    %298 = vector.extract_strided_slice %295 {offsets = [0, 2], sizes = [1, 2], strides = [1, 1]} : vector<1x8xf32> to vector<1x2xf32>
    %299 = vector.extract_strided_slice %296 {offsets = [0, 4], sizes = [1, 2], strides = [1, 1]} : vector<1x8xf32> to vector<1x2xf32>
    %300 = vector.extract_strided_slice %295 {offsets = [0, 6], sizes = [1, 2], strides = [1, 1]} : vector<1x8xf32> to vector<1x2xf32>
    %301 = arith.mulf %298, %278 : vector<1x2xf32>
    %302 = arith.mulf %297, %299 : vector<1x2xf32>
    %303 = arith.addf %301, %302 : vector<1x2xf32>
    %304 = math.tanh %303 : vector<1x2xf32>
    %305 = arith.mulf %300, %304 : vector<1x2xf32>
    %c4_61 = arith.constant 4 : index
    %c0_62 = arith.constant 0 : index
    %306 = vector.load %arg10[%c4_61, %c0_62] : memref<15x16xf32, #tpu.memory_space<vmem>>, vector<1x16xf32>
    %307 = vector.extract_strided_slice %306 {offsets = [0, 0], sizes = [1, 8], strides = [1, 1]} : vector<1x16xf32> to vector<1x8xf32>
    %308 = vector.extract_strided_slice %305 {offsets = [0, 0], sizes = [1, 1], strides = [1, 1]} : vector<1x2xf32> to vector<1x1xf32>
    %309 = vector.broadcast %308 : vector<1x1xf32> to vector<1x8xf32>
    %310 = arith.mulf %309, %202 : vector<1x8xf32>
    %311 = arith.addf %307, %310 : vector<1x8xf32>
    %312 = vector.extract_strided_slice %305 {offsets = [0, 1], sizes = [1, 1], strides = [1, 1]} : vector<1x2xf32> to vector<1x1xf32>
    %313 = vector.broadcast %312 : vector<1x1xf32> to vector<1x8xf32>
    %314 = arith.mulf %313, %203 : vector<1x8xf32>
    %315 = arith.addf %311, %314 : vector<1x8xf32>
    %316 = arith.negf %315 : vector<1x8xf32>
    %317 = math.exp %316 : vector<1x8xf32>
    %cst_63 = arith.constant 1.000000e+00 : f32
    %318 = vector.broadcast %cst_63 : f32 to vector<1x8xf32>
    %319 = arith.addf %318, %317 : vector<1x8xf32>
    %320 = arith.divf %318, %319 : vector<1x8xf32>
    %321 = math.tanh %315 : vector<1x8xf32>
    %322 = vector.extract_strided_slice %320 {offsets = [0, 0], sizes = [1, 2], strides = [1, 1]} : vector<1x8xf32> to vector<1x2xf32>
    %323 = vector.extract_strided_slice %320 {offsets = [0, 2], sizes = [1, 2], strides = [1, 1]} : vector<1x8xf32> to vector<1x2xf32>
    %324 = vector.extract_strided_slice %321 {offsets = [0, 4], sizes = [1, 2], strides = [1, 1]} : vector<1x8xf32> to vector<1x2xf32>
    %325 = vector.extract_strided_slice %320 {offsets = [0, 6], sizes = [1, 2], strides = [1, 1]} : vector<1x8xf32> to vector<1x2xf32>
    %326 = arith.mulf %323, %303 : vector<1x2xf32>
    %327 = arith.mulf %322, %324 : vector<1x2xf32>
    %328 = arith.addf %326, %327 : vector<1x2xf32>
    %329 = math.tanh %328 : vector<1x2xf32>
    %330 = arith.mulf %325, %329 : vector<1x2xf32>
    %c5_64 = arith.constant 5 : index
    %c0_65 = arith.constant 0 : index
    %331 = vector.load %arg10[%c5_64, %c0_65] : memref<15x16xf32, #tpu.memory_space<vmem>>, vector<1x16xf32>
    %332 = vector.extract_strided_slice %331 {offsets = [0, 0], sizes = [1, 8], strides = [1, 1]} : vector<1x16xf32> to vector<1x8xf32>
    %333 = vector.extract_strided_slice %330 {offsets = [0, 0], sizes = [1, 1], strides = [1, 1]} : vector<1x2xf32> to vector<1x1xf32>
    %334 = vector.broadcast %333 : vector<1x1xf32> to vector<1x8xf32>
    %335 = arith.mulf %334, %202 : vector<1x8xf32>
    %336 = arith.addf %332, %335 : vector<1x8xf32>
    %337 = vector.extract_strided_slice %330 {offsets = [0, 1], sizes = [1, 1], strides = [1, 1]} : vector<1x2xf32> to vector<1x1xf32>
    %338 = vector.broadcast %337 : vector<1x1xf32> to vector<1x8xf32>
    %339 = arith.mulf %338, %203 : vector<1x8xf32>
    %340 = arith.addf %336, %339 : vector<1x8xf32>
    %341 = arith.negf %340 : vector<1x8xf32>
    %342 = math.exp %341 : vector<1x8xf32>
    %cst_66 = arith.constant 1.000000e+00 : f32
    %343 = vector.broadcast %cst_66 : f32 to vector<1x8xf32>
    %344 = arith.addf %343, %342 : vector<1x8xf32>
    %345 = arith.divf %343, %344 : vector<1x8xf32>
    %346 = math.tanh %340 : vector<1x8xf32>
    %347 = vector.extract_strided_slice %345 {offsets = [0, 0], sizes = [1, 2], strides = [1, 1]} : vector<1x8xf32> to vector<1x2xf32>
    %348 = vector.extract_strided_slice %345 {offsets = [0, 2], sizes = [1, 2], strides = [1, 1]} : vector<1x8xf32> to vector<1x2xf32>
    %349 = vector.extract_strided_slice %346 {offsets = [0, 4], sizes = [1, 2], strides = [1, 1]} : vector<1x8xf32> to vector<1x2xf32>
    %350 = vector.extract_strided_slice %345 {offsets = [0, 6], sizes = [1, 2], strides = [1, 1]} : vector<1x8xf32> to vector<1x2xf32>
    %351 = arith.mulf %348, %328 : vector<1x2xf32>
    %352 = arith.mulf %347, %349 : vector<1x2xf32>
    %353 = arith.addf %351, %352 : vector<1x2xf32>
    %354 = math.tanh %353 : vector<1x2xf32>
    %355 = arith.mulf %350, %354 : vector<1x2xf32>
    %c6_67 = arith.constant 6 : index
    %c0_68 = arith.constant 0 : index
    %356 = vector.load %arg10[%c6_67, %c0_68] : memref<15x16xf32, #tpu.memory_space<vmem>>, vector<1x16xf32>
    %357 = vector.extract_strided_slice %356 {offsets = [0, 0], sizes = [1, 8], strides = [1, 1]} : vector<1x16xf32> to vector<1x8xf32>
    %358 = vector.extract_strided_slice %355 {offsets = [0, 0], sizes = [1, 1], strides = [1, 1]} : vector<1x2xf32> to vector<1x1xf32>
    %359 = vector.broadcast %358 : vector<1x1xf32> to vector<1x8xf32>
    %360 = arith.mulf %359, %202 : vector<1x8xf32>
    %361 = arith.addf %357, %360 : vector<1x8xf32>
    %362 = vector.extract_strided_slice %355 {offsets = [0, 1], sizes = [1, 1], strides = [1, 1]} : vector<1x2xf32> to vector<1x1xf32>
    %363 = vector.broadcast %362 : vector<1x1xf32> to vector<1x8xf32>
    %364 = arith.mulf %363, %203 : vector<1x8xf32>
    %365 = arith.addf %361, %364 : vector<1x8xf32>
    %366 = arith.negf %365 : vector<1x8xf32>
    %367 = math.exp %366 : vector<1x8xf32>
    %cst_69 = arith.constant 1.000000e+00 : f32
    %368 = vector.broadcast %cst_69 : f32 to vector<1x8xf32>
    %369 = arith.addf %368, %367 : vector<1x8xf32>
    %370 = arith.divf %368, %369 : vector<1x8xf32>
    %371 = math.tanh %365 : vector<1x8xf32>
    %372 = vector.extract_strided_slice %370 {offsets = [0, 0], sizes = [1, 2], strides = [1, 1]} : vector<1x8xf32> to vector<1x2xf32>
    %373 = vector.extract_strided_slice %370 {offsets = [0, 2], sizes = [1, 2], strides = [1, 1]} : vector<1x8xf32> to vector<1x2xf32>
    %374 = vector.extract_strided_slice %371 {offsets = [0, 4], sizes = [1, 2], strides = [1, 1]} : vector<1x8xf32> to vector<1x2xf32>
    %375 = vector.extract_strided_slice %370 {offsets = [0, 6], sizes = [1, 2], strides = [1, 1]} : vector<1x8xf32> to vector<1x2xf32>
    %376 = arith.mulf %373, %353 : vector<1x2xf32>
    %377 = arith.mulf %372, %374 : vector<1x2xf32>
    %378 = arith.addf %376, %377 : vector<1x2xf32>
    %379 = math.tanh %378 : vector<1x2xf32>
    %380 = arith.mulf %375, %379 : vector<1x2xf32>
    %c7_70 = arith.constant 7 : index
    %c0_71 = arith.constant 0 : index
    %381 = vector.load %arg10[%c7_70, %c0_71] : memref<15x16xf32, #tpu.memory_space<vmem>>, vector<1x16xf32>
    %382 = vector.extract_strided_slice %381 {offsets = [0, 0], sizes = [1, 8], strides = [1, 1]} : vector<1x16xf32> to vector<1x8xf32>
    %383 = vector.extract_strided_slice %380 {offsets = [0, 0], sizes = [1, 1], strides = [1, 1]} : vector<1x2xf32> to vector<1x1xf32>
    %384 = vector.broadcast %383 : vector<1x1xf32> to vector<1x8xf32>
    %385 = arith.mulf %384, %202 : vector<1x8xf32>
    %386 = arith.addf %382, %385 : vector<1x8xf32>
    %387 = vector.extract_strided_slice %380 {offsets = [0, 1], sizes = [1, 1], strides = [1, 1]} : vector<1x2xf32> to vector<1x1xf32>
    %388 = vector.broadcast %387 : vector<1x1xf32> to vector<1x8xf32>
    %389 = arith.mulf %388, %203 : vector<1x8xf32>
    %390 = arith.addf %386, %389 : vector<1x8xf32>
    %391 = arith.negf %390 : vector<1x8xf32>
    %392 = math.exp %391 : vector<1x8xf32>
    %cst_72 = arith.constant 1.000000e+00 : f32
    %393 = vector.broadcast %cst_72 : f32 to vector<1x8xf32>
    %394 = arith.addf %393, %392 : vector<1x8xf32>
    %395 = arith.divf %393, %394 : vector<1x8xf32>
    %396 = math.tanh %390 : vector<1x8xf32>
    %397 = vector.extract_strided_slice %395 {offsets = [0, 0], sizes = [1, 2], strides = [1, 1]} : vector<1x8xf32> to vector<1x2xf32>
    %398 = vector.extract_strided_slice %395 {offsets = [0, 2], sizes = [1, 2], strides = [1, 1]} : vector<1x8xf32> to vector<1x2xf32>
    %399 = vector.extract_strided_slice %396 {offsets = [0, 4], sizes = [1, 2], strides = [1, 1]} : vector<1x8xf32> to vector<1x2xf32>
    %400 = vector.extract_strided_slice %395 {offsets = [0, 6], sizes = [1, 2], strides = [1, 1]} : vector<1x8xf32> to vector<1x2xf32>
    %401 = arith.mulf %398, %378 : vector<1x2xf32>
    %402 = arith.mulf %397, %399 : vector<1x2xf32>
    %403 = arith.addf %401, %402 : vector<1x2xf32>
    %404 = math.tanh %403 : vector<1x2xf32>
    %405 = arith.mulf %400, %404 : vector<1x2xf32>
    %c8_73 = arith.constant 8 : index
    %c0_74 = arith.constant 0 : index
    %406 = vector.load %arg10[%c8_73, %c0_74] : memref<15x16xf32, #tpu.memory_space<vmem>>, vector<1x16xf32>
    %407 = vector.extract_strided_slice %406 {offsets = [0, 0], sizes = [1, 8], strides = [1, 1]} : vector<1x16xf32> to vector<1x8xf32>
    %408 = vector.extract_strided_slice %405 {offsets = [0, 0], sizes = [1, 1], strides = [1, 1]} : vector<1x2xf32> to vector<1x1xf32>
    %409 = vector.broadcast %408 : vector<1x1xf32> to vector<1x8xf32>
    %410 = arith.mulf %409, %202 : vector<1x8xf32>
    %411 = arith.addf %407, %410 : vector<1x8xf32>
    %412 = vector.extract_strided_slice %405 {offsets = [0, 1], sizes = [1, 1], strides = [1, 1]} : vector<1x2xf32> to vector<1x1xf32>
    %413 = vector.broadcast %412 : vector<1x1xf32> to vector<1x8xf32>
    %414 = arith.mulf %413, %203 : vector<1x8xf32>
    %415 = arith.addf %411, %414 : vector<1x8xf32>
    %416 = arith.negf %415 : vector<1x8xf32>
    %417 = math.exp %416 : vector<1x8xf32>
    %cst_75 = arith.constant 1.000000e+00 : f32
    %418 = vector.broadcast %cst_75 : f32 to vector<1x8xf32>
    %419 = arith.addf %418, %417 : vector<1x8xf32>
    %420 = arith.divf %418, %419 : vector<1x8xf32>
    %421 = math.tanh %415 : vector<1x8xf32>
    %422 = vector.extract_strided_slice %420 {offsets = [0, 0], sizes = [1, 2], strides = [1, 1]} : vector<1x8xf32> to vector<1x2xf32>
    %423 = vector.extract_strided_slice %420 {offsets = [0, 2], sizes = [1, 2], strides = [1, 1]} : vector<1x8xf32> to vector<1x2xf32>
    %424 = vector.extract_strided_slice %421 {offsets = [0, 4], sizes = [1, 2], strides = [1, 1]} : vector<1x8xf32> to vector<1x2xf32>
    %425 = vector.extract_strided_slice %420 {offsets = [0, 6], sizes = [1, 2], strides = [1, 1]} : vector<1x8xf32> to vector<1x2xf32>
    %426 = arith.mulf %423, %403 : vector<1x2xf32>
    %427 = arith.mulf %422, %424 : vector<1x2xf32>
    %428 = arith.addf %426, %427 : vector<1x2xf32>
    %429 = math.tanh %428 : vector<1x2xf32>
    %430 = arith.mulf %425, %429 : vector<1x2xf32>
    %c9_76 = arith.constant 9 : index
    %c0_77 = arith.constant 0 : index
    %431 = vector.load %arg10[%c9_76, %c0_77] : memref<15x16xf32, #tpu.memory_space<vmem>>, vector<1x16xf32>
    %432 = vector.extract_strided_slice %431 {offsets = [0, 0], sizes = [1, 8], strides = [1, 1]} : vector<1x16xf32> to vector<1x8xf32>
    %433 = vector.extract_strided_slice %430 {offsets = [0, 0], sizes = [1, 1], strides = [1, 1]} : vector<1x2xf32> to vector<1x1xf32>
    %434 = vector.broadcast %433 : vector<1x1xf32> to vector<1x8xf32>
    %435 = arith.mulf %434, %202 : vector<1x8xf32>
    %436 = arith.addf %432, %435 : vector<1x8xf32>
    %437 = vector.extract_strided_slice %430 {offsets = [0, 1], sizes = [1, 1], strides = [1, 1]} : vector<1x2xf32> to vector<1x1xf32>
    %438 = vector.broadcast %437 : vector<1x1xf32> to vector<1x8xf32>
    %439 = arith.mulf %438, %203 : vector<1x8xf32>
    %440 = arith.addf %436, %439 : vector<1x8xf32>
    %441 = arith.negf %440 : vector<1x8xf32>
    %442 = math.exp %441 : vector<1x8xf32>
    %cst_78 = arith.constant 1.000000e+00 : f32
    %443 = vector.broadcast %cst_78 : f32 to vector<1x8xf32>
    %444 = arith.addf %443, %442 : vector<1x8xf32>
    %445 = arith.divf %443, %444 : vector<1x8xf32>
    %446 = math.tanh %440 : vector<1x8xf32>
    %447 = vector.extract_strided_slice %445 {offsets = [0, 0], sizes = [1, 2], strides = [1, 1]} : vector<1x8xf32> to vector<1x2xf32>
    %448 = vector.extract_strided_slice %445 {offsets = [0, 2], sizes = [1, 2], strides = [1, 1]} : vector<1x8xf32> to vector<1x2xf32>
    %449 = vector.extract_strided_slice %446 {offsets = [0, 4], sizes = [1, 2], strides = [1, 1]} : vector<1x8xf32> to vector<1x2xf32>
    %450 = vector.extract_strided_slice %445 {offsets = [0, 6], sizes = [1, 2], strides = [1, 1]} : vector<1x8xf32> to vector<1x2xf32>
    %451 = arith.mulf %448, %428 : vector<1x2xf32>
    %452 = arith.mulf %447, %449 : vector<1x2xf32>
    %453 = arith.addf %451, %452 : vector<1x2xf32>
    %454 = math.tanh %453 : vector<1x2xf32>
    %455 = arith.mulf %450, %454 : vector<1x2xf32>
    %c10_79 = arith.constant 10 : index
    %c0_80 = arith.constant 0 : index
    %456 = vector.load %arg10[%c10_79, %c0_80] : memref<15x16xf32, #tpu.memory_space<vmem>>, vector<1x16xf32>
    %457 = vector.extract_strided_slice %456 {offsets = [0, 0], sizes = [1, 8], strides = [1, 1]} : vector<1x16xf32> to vector<1x8xf32>
    %458 = vector.extract_strided_slice %455 {offsets = [0, 0], sizes = [1, 1], strides = [1, 1]} : vector<1x2xf32> to vector<1x1xf32>
    %459 = vector.broadcast %458 : vector<1x1xf32> to vector<1x8xf32>
    %460 = arith.mulf %459, %202 : vector<1x8xf32>
    %461 = arith.addf %457, %460 : vector<1x8xf32>
    %462 = vector.extract_strided_slice %455 {offsets = [0, 1], sizes = [1, 1], strides = [1, 1]} : vector<1x2xf32> to vector<1x1xf32>
    %463 = vector.broadcast %462 : vector<1x1xf32> to vector<1x8xf32>
    %464 = arith.mulf %463, %203 : vector<1x8xf32>
    %465 = arith.addf %461, %464 : vector<1x8xf32>
    %466 = arith.negf %465 : vector<1x8xf32>
    %467 = math.exp %466 : vector<1x8xf32>
    %cst_81 = arith.constant 1.000000e+00 : f32
    %468 = vector.broadcast %cst_81 : f32 to vector<1x8xf32>
    %469 = arith.addf %468, %467 : vector<1x8xf32>
    %470 = arith.divf %468, %469 : vector<1x8xf32>
    %471 = math.tanh %465 : vector<1x8xf32>
    %472 = vector.extract_strided_slice %470 {offsets = [0, 0], sizes = [1, 2], strides = [1, 1]} : vector<1x8xf32> to vector<1x2xf32>
    %473 = vector.extract_strided_slice %470 {offsets = [0, 2], sizes = [1, 2], strides = [1, 1]} : vector<1x8xf32> to vector<1x2xf32>
    %474 = vector.extract_strided_slice %471 {offsets = [0, 4], sizes = [1, 2], strides = [1, 1]} : vector<1x8xf32> to vector<1x2xf32>
    %475 = vector.extract_strided_slice %470 {offsets = [0, 6], sizes = [1, 2], strides = [1, 1]} : vector<1x8xf32> to vector<1x2xf32>
    %476 = arith.mulf %473, %453 : vector<1x2xf32>
    %477 = arith.mulf %472, %474 : vector<1x2xf32>
    %478 = arith.addf %476, %477 : vector<1x2xf32>
    %479 = math.tanh %478 : vector<1x2xf32>
    %480 = arith.mulf %475, %479 : vector<1x2xf32>
    %c11_82 = arith.constant 11 : index
    %c0_83 = arith.constant 0 : index
    %481 = vector.load %arg10[%c11_82, %c0_83] : memref<15x16xf32, #tpu.memory_space<vmem>>, vector<1x16xf32>
    %482 = vector.extract_strided_slice %481 {offsets = [0, 0], sizes = [1, 8], strides = [1, 1]} : vector<1x16xf32> to vector<1x8xf32>
    %483 = vector.extract_strided_slice %480 {offsets = [0, 0], sizes = [1, 1], strides = [1, 1]} : vector<1x2xf32> to vector<1x1xf32>
    %484 = vector.broadcast %483 : vector<1x1xf32> to vector<1x8xf32>
    %485 = arith.mulf %484, %202 : vector<1x8xf32>
    %486 = arith.addf %482, %485 : vector<1x8xf32>
    %487 = vector.extract_strided_slice %480 {offsets = [0, 1], sizes = [1, 1], strides = [1, 1]} : vector<1x2xf32> to vector<1x1xf32>
    %488 = vector.broadcast %487 : vector<1x1xf32> to vector<1x8xf32>
    %489 = arith.mulf %488, %203 : vector<1x8xf32>
    %490 = arith.addf %486, %489 : vector<1x8xf32>
    %491 = arith.negf %490 : vector<1x8xf32>
    %492 = math.exp %491 : vector<1x8xf32>
    %cst_84 = arith.constant 1.000000e+00 : f32
    %493 = vector.broadcast %cst_84 : f32 to vector<1x8xf32>
    %494 = arith.addf %493, %492 : vector<1x8xf32>
    %495 = arith.divf %493, %494 : vector<1x8xf32>
    %496 = math.tanh %490 : vector<1x8xf32>
    %497 = vector.extract_strided_slice %495 {offsets = [0, 0], sizes = [1, 2], strides = [1, 1]} : vector<1x8xf32> to vector<1x2xf32>
    %498 = vector.extract_strided_slice %495 {offsets = [0, 2], sizes = [1, 2], strides = [1, 1]} : vector<1x8xf32> to vector<1x2xf32>
    %499 = vector.extract_strided_slice %496 {offsets = [0, 4], sizes = [1, 2], strides = [1, 1]} : vector<1x8xf32> to vector<1x2xf32>
    %500 = vector.extract_strided_slice %495 {offsets = [0, 6], sizes = [1, 2], strides = [1, 1]} : vector<1x8xf32> to vector<1x2xf32>
    %501 = arith.mulf %498, %478 : vector<1x2xf32>
    %502 = arith.mulf %497, %499 : vector<1x2xf32>
    %503 = arith.addf %501, %502 : vector<1x2xf32>
    %504 = math.tanh %503 : vector<1x2xf32>
    %505 = arith.mulf %500, %504 : vector<1x2xf32>
    %c12_85 = arith.constant 12 : index
    %c0_86 = arith.constant 0 : index
    %506 = vector.load %arg10[%c12_85, %c0_86] : memref<15x16xf32, #tpu.memory_space<vmem>>, vector<1x16xf32>
    %507 = vector.extract_strided_slice %506 {offsets = [0, 0], sizes = [1, 8], strides = [1, 1]} : vector<1x16xf32> to vector<1x8xf32>
    %508 = vector.extract_strided_slice %505 {offsets = [0, 0], sizes = [1, 1], strides = [1, 1]} : vector<1x2xf32> to vector<1x1xf32>
    %509 = vector.broadcast %508 : vector<1x1xf32> to vector<1x8xf32>
    %510 = arith.mulf %509, %202 : vector<1x8xf32>
    %511 = arith.addf %507, %510 : vector<1x8xf32>
    %512 = vector.extract_strided_slice %505 {offsets = [0, 1], sizes = [1, 1], strides = [1, 1]} : vector<1x2xf32> to vector<1x1xf32>
    %513 = vector.broadcast %512 : vector<1x1xf32> to vector<1x8xf32>
    %514 = arith.mulf %513, %203 : vector<1x8xf32>
    %515 = arith.addf %511, %514 : vector<1x8xf32>
    %516 = arith.negf %515 : vector<1x8xf32>
    %517 = math.exp %516 : vector<1x8xf32>
    %cst_87 = arith.constant 1.000000e+00 : f32
    %518 = vector.broadcast %cst_87 : f32 to vector<1x8xf32>
    %519 = arith.addf %518, %517 : vector<1x8xf32>
    %520 = arith.divf %518, %519 : vector<1x8xf32>
    %521 = math.tanh %515 : vector<1x8xf32>
    %522 = vector.extract_strided_slice %520 {offsets = [0, 0], sizes = [1, 2], strides = [1, 1]} : vector<1x8xf32> to vector<1x2xf32>
    %523 = vector.extract_strided_slice %520 {offsets = [0, 2], sizes = [1, 2], strides = [1, 1]} : vector<1x8xf32> to vector<1x2xf32>
    %524 = vector.extract_strided_slice %521 {offsets = [0, 4], sizes = [1, 2], strides = [1, 1]} : vector<1x8xf32> to vector<1x2xf32>
    %525 = vector.extract_strided_slice %520 {offsets = [0, 6], sizes = [1, 2], strides = [1, 1]} : vector<1x8xf32> to vector<1x2xf32>
    %526 = arith.mulf %523, %503 : vector<1x2xf32>
    %527 = arith.mulf %522, %524 : vector<1x2xf32>
    %528 = arith.addf %526, %527 : vector<1x2xf32>
    %529 = math.tanh %528 : vector<1x2xf32>
    %530 = arith.mulf %525, %529 : vector<1x2xf32>
    %c13_88 = arith.constant 13 : index
    %c0_89 = arith.constant 0 : index
    %531 = vector.load %arg10[%c13_88, %c0_89] : memref<15x16xf32, #tpu.memory_space<vmem>>, vector<1x16xf32>
    %532 = vector.extract_strided_slice %531 {offsets = [0, 0], sizes = [1, 8], strides = [1, 1]} : vector<1x16xf32> to vector<1x8xf32>
    %533 = vector.extract_strided_slice %530 {offsets = [0, 0], sizes = [1, 1], strides = [1, 1]} : vector<1x2xf32> to vector<1x1xf32>
    %534 = vector.broadcast %533 : vector<1x1xf32> to vector<1x8xf32>
    %535 = arith.mulf %534, %202 : vector<1x8xf32>
    %536 = arith.addf %532, %535 : vector<1x8xf32>
    %537 = vector.extract_strided_slice %530 {offsets = [0, 1], sizes = [1, 1], strides = [1, 1]} : vector<1x2xf32> to vector<1x1xf32>
    %538 = vector.broadcast %537 : vector<1x1xf32> to vector<1x8xf32>
    %539 = arith.mulf %538, %203 : vector<1x8xf32>
    %540 = arith.addf %536, %539 : vector<1x8xf32>
    %541 = arith.negf %540 : vector<1x8xf32>
    %542 = math.exp %541 : vector<1x8xf32>
    %cst_90 = arith.constant 1.000000e+00 : f32
    %543 = vector.broadcast %cst_90 : f32 to vector<1x8xf32>
    %544 = arith.addf %543, %542 : vector<1x8xf32>
    %545 = arith.divf %543, %544 : vector<1x8xf32>
    %546 = math.tanh %540 : vector<1x8xf32>
    %547 = vector.extract_strided_slice %545 {offsets = [0, 0], sizes = [1, 2], strides = [1, 1]} : vector<1x8xf32> to vector<1x2xf32>
    %548 = vector.extract_strided_slice %545 {offsets = [0, 2], sizes = [1, 2], strides = [1, 1]} : vector<1x8xf32> to vector<1x2xf32>
    %549 = vector.extract_strided_slice %546 {offsets = [0, 4], sizes = [1, 2], strides = [1, 1]} : vector<1x8xf32> to vector<1x2xf32>
    %550 = vector.extract_strided_slice %545 {offsets = [0, 6], sizes = [1, 2], strides = [1, 1]} : vector<1x8xf32> to vector<1x2xf32>
    %551 = arith.mulf %548, %528 : vector<1x2xf32>
    %552 = arith.mulf %547, %549 : vector<1x2xf32>
    %553 = arith.addf %551, %552 : vector<1x2xf32>
    %554 = math.tanh %553 : vector<1x2xf32>
    %555 = arith.mulf %550, %554 : vector<1x2xf32>
    %c14_91 = arith.constant 14 : index
    %c0_92 = arith.constant 0 : index
    %556 = vector.load %arg10[%c14_91, %c0_92] : memref<15x16xf32, #tpu.memory_space<vmem>>, vector<1x16xf32>
    %557 = vector.extract_strided_slice %556 {offsets = [0, 0], sizes = [1, 8], strides = [1, 1]} : vector<1x16xf32> to vector<1x8xf32>
    %558 = vector.extract_strided_slice %555 {offsets = [0, 0], sizes = [1, 1], strides = [1, 1]} : vector<1x2xf32> to vector<1x1xf32>
    %559 = vector.broadcast %558 : vector<1x1xf32> to vector<1x8xf32>
    %560 = arith.mulf %559, %202 : vector<1x8xf32>
    %561 = arith.addf %557, %560 : vector<1x8xf32>
    %562 = vector.extract_strided_slice %555 {offsets = [0, 1], sizes = [1, 1], strides = [1, 1]} : vector<1x2xf32> to vector<1x1xf32>
    %563 = vector.broadcast %562 : vector<1x1xf32> to vector<1x8xf32>
    %564 = arith.mulf %563, %203 : vector<1x8xf32>
    %565 = arith.addf %561, %564 : vector<1x8xf32>
    %566 = arith.negf %565 : vector<1x8xf32>
    %567 = math.exp %566 : vector<1x8xf32>
    %cst_93 = arith.constant 1.000000e+00 : f32
    %568 = vector.broadcast %cst_93 : f32 to vector<1x8xf32>
    %569 = arith.addf %568, %567 : vector<1x8xf32>
    %570 = arith.divf %568, %569 : vector<1x8xf32>
    %571 = math.tanh %565 : vector<1x8xf32>
    %572 = vector.extract_strided_slice %570 {offsets = [0, 0], sizes = [1, 2], strides = [1, 1]} : vector<1x8xf32> to vector<1x2xf32>
    %573 = vector.extract_strided_slice %570 {offsets = [0, 2], sizes = [1, 2], strides = [1, 1]} : vector<1x8xf32> to vector<1x2xf32>
    %574 = vector.extract_strided_slice %571 {offsets = [0, 4], sizes = [1, 2], strides = [1, 1]} : vector<1x8xf32> to vector<1x2xf32>
    %575 = vector.extract_strided_slice %570 {offsets = [0, 6], sizes = [1, 2], strides = [1, 1]} : vector<1x8xf32> to vector<1x2xf32>
    %576 = arith.mulf %573, %553 : vector<1x2xf32>
    %577 = arith.mulf %572, %574 : vector<1x2xf32>
    %578 = arith.addf %576, %577 : vector<1x2xf32>
    %579 = math.tanh %578 : vector<1x2xf32>
    %580 = arith.mulf %575, %579 : vector<1x2xf32>
    %581 = vector.extract_strided_slice %200 {offsets = [0, 8], sizes = [2, 8], strides = [1, 1]} : vector<2x16xf32> to vector<2x8xf32>
    %582 = vector.extract_strided_slice %581 {offsets = [0, 0], sizes = [1, 8], strides = [1, 1]} : vector<2x8xf32> to vector<1x8xf32>
    %583 = vector.extract_strided_slice %581 {offsets = [1, 0], sizes = [1, 8], strides = [1, 1]} : vector<2x8xf32> to vector<1x8xf32>
    %cst_94 = arith.constant 0.000000e+00 : f32
    %584 = vector.broadcast %cst_94 : f32 to vector<1x2xf32>
    %cst_95 = arith.constant 0.000000e+00 : f32
    %585 = vector.broadcast %cst_95 : f32 to vector<1x2xf32>
    %c14_96 = arith.constant 14 : index
    %c0_97 = arith.constant 0 : index
    %586 = vector.load %arg10[%c14_96, %c0_97] : memref<15x16xf32, #tpu.memory_space<vmem>>, vector<1x16xf32>
    %587 = vector.extract_strided_slice %586 {offsets = [0, 8], sizes = [1, 8], strides = [1, 1]} : vector<1x16xf32> to vector<1x8xf32>
    %588 = vector.extract_strided_slice %584 {offsets = [0, 0], sizes = [1, 1], strides = [1, 1]} : vector<1x2xf32> to vector<1x1xf32>
    %589 = vector.broadcast %588 : vector<1x1xf32> to vector<1x8xf32>
    %590 = arith.mulf %589, %582 : vector<1x8xf32>
    %591 = arith.addf %587, %590 : vector<1x8xf32>
    %592 = vector.extract_strided_slice %584 {offsets = [0, 1], sizes = [1, 1], strides = [1, 1]} : vector<1x2xf32> to vector<1x1xf32>
    %593 = vector.broadcast %592 : vector<1x1xf32> to vector<1x8xf32>
    %594 = arith.mulf %593, %583 : vector<1x8xf32>
    %595 = arith.addf %591, %594 : vector<1x8xf32>
    %596 = arith.negf %595 : vector<1x8xf32>
    %597 = math.exp %596 : vector<1x8xf32>
    %cst_98 = arith.constant 1.000000e+00 : f32
    %598 = vector.broadcast %cst_98 : f32 to vector<1x8xf32>
    %599 = arith.addf %598, %597 : vector<1x8xf32>
    %600 = arith.divf %598, %599 : vector<1x8xf32>
    %601 = math.tanh %595 : vector<1x8xf32>
    %602 = vector.extract_strided_slice %600 {offsets = [0, 0], sizes = [1, 2], strides = [1, 1]} : vector<1x8xf32> to vector<1x2xf32>
    %603 = vector.extract_strided_slice %600 {offsets = [0, 2], sizes = [1, 2], strides = [1, 1]} : vector<1x8xf32> to vector<1x2xf32>
    %604 = vector.extract_strided_slice %601 {offsets = [0, 4], sizes = [1, 2], strides = [1, 1]} : vector<1x8xf32> to vector<1x2xf32>
    %605 = vector.extract_strided_slice %600 {offsets = [0, 6], sizes = [1, 2], strides = [1, 1]} : vector<1x8xf32> to vector<1x2xf32>
    %606 = arith.mulf %603, %585 : vector<1x2xf32>
    %607 = arith.mulf %602, %604 : vector<1x2xf32>
    %608 = arith.addf %606, %607 : vector<1x2xf32>
    %609 = math.tanh %608 : vector<1x2xf32>
    %610 = arith.mulf %605, %609 : vector<1x2xf32>
    %c13_99 = arith.constant 13 : index
    %c0_100 = arith.constant 0 : index
    %611 = vector.load %arg10[%c13_99, %c0_100] : memref<15x16xf32, #tpu.memory_space<vmem>>, vector<1x16xf32>
    %612 = vector.extract_strided_slice %611 {offsets = [0, 8], sizes = [1, 8], strides = [1, 1]} : vector<1x16xf32> to vector<1x8xf32>
    %613 = vector.extract_strided_slice %610 {offsets = [0, 0], sizes = [1, 1], strides = [1, 1]} : vector<1x2xf32> to vector<1x1xf32>
    %614 = vector.broadcast %613 : vector<1x1xf32> to vector<1x8xf32>
    %615 = arith.mulf %614, %582 : vector<1x8xf32>
    %616 = arith.addf %612, %615 : vector<1x8xf32>
    %617 = vector.extract_strided_slice %610 {offsets = [0, 1], sizes = [1, 1], strides = [1, 1]} : vector<1x2xf32> to vector<1x1xf32>
    %618 = vector.broadcast %617 : vector<1x1xf32> to vector<1x8xf32>
    %619 = arith.mulf %618, %583 : vector<1x8xf32>
    %620 = arith.addf %616, %619 : vector<1x8xf32>
    %621 = arith.negf %620 : vector<1x8xf32>
    %622 = math.exp %621 : vector<1x8xf32>
    %cst_101 = arith.constant 1.000000e+00 : f32
    %623 = vector.broadcast %cst_101 : f32 to vector<1x8xf32>
    %624 = arith.addf %623, %622 : vector<1x8xf32>
    %625 = arith.divf %623, %624 : vector<1x8xf32>
    %626 = math.tanh %620 : vector<1x8xf32>
    %627 = vector.extract_strided_slice %625 {offsets = [0, 0], sizes = [1, 2], strides = [1, 1]} : vector<1x8xf32> to vector<1x2xf32>
    %628 = vector.extract_strided_slice %625 {offsets = [0, 2], sizes = [1, 2], strides = [1, 1]} : vector<1x8xf32> to vector<1x2xf32>
    %629 = vector.extract_strided_slice %626 {offsets = [0, 4], sizes = [1, 2], strides = [1, 1]} : vector<1x8xf32> to vector<1x2xf32>
    %630 = vector.extract_strided_slice %625 {offsets = [0, 6], sizes = [1, 2], strides = [1, 1]} : vector<1x8xf32> to vector<1x2xf32>
    %631 = arith.mulf %628, %608 : vector<1x2xf32>
    %632 = arith.mulf %627, %629 : vector<1x2xf32>
    %633 = arith.addf %631, %632 : vector<1x2xf32>
    %634 = math.tanh %633 : vector<1x2xf32>
    %635 = arith.mulf %630, %634 : vector<1x2xf32>
    %c12_102 = arith.constant 12 : index
    %c0_103 = arith.constant 0 : index
    %636 = vector.load %arg10[%c12_102, %c0_103] : memref<15x16xf32, #tpu.memory_space<vmem>>, vector<1x16xf32>
    %637 = vector.extract_strided_slice %636 {offsets = [0, 8], sizes = [1, 8], strides = [1, 1]} : vector<1x16xf32> to vector<1x8xf32>
    %638 = vector.extract_strided_slice %635 {offsets = [0, 0], sizes = [1, 1], strides = [1, 1]} : vector<1x2xf32> to vector<1x1xf32>
    %639 = vector.broadcast %638 : vector<1x1xf32> to vector<1x8xf32>
    %640 = arith.mulf %639, %582 : vector<1x8xf32>
    %641 = arith.addf %637, %640 : vector<1x8xf32>
    %642 = vector.extract_strided_slice %635 {offsets = [0, 1], sizes = [1, 1], strides = [1, 1]} : vector<1x2xf32> to vector<1x1xf32>
    %643 = vector.broadcast %642 : vector<1x1xf32> to vector<1x8xf32>
    %644 = arith.mulf %643, %583 : vector<1x8xf32>
    %645 = arith.addf %641, %644 : vector<1x8xf32>
    %646 = arith.negf %645 : vector<1x8xf32>
    %647 = math.exp %646 : vector<1x8xf32>
    %cst_104 = arith.constant 1.000000e+00 : f32
    %648 = vector.broadcast %cst_104 : f32 to vector<1x8xf32>
    %649 = arith.addf %648, %647 : vector<1x8xf32>
    %650 = arith.divf %648, %649 : vector<1x8xf32>
    %651 = math.tanh %645 : vector<1x8xf32>
    %652 = vector.extract_strided_slice %650 {offsets = [0, 0], sizes = [1, 2], strides = [1, 1]} : vector<1x8xf32> to vector<1x2xf32>
    %653 = vector.extract_strided_slice %650 {offsets = [0, 2], sizes = [1, 2], strides = [1, 1]} : vector<1x8xf32> to vector<1x2xf32>
    %654 = vector.extract_strided_slice %651 {offsets = [0, 4], sizes = [1, 2], strides = [1, 1]} : vector<1x8xf32> to vector<1x2xf32>
    %655 = vector.extract_strided_slice %650 {offsets = [0, 6], sizes = [1, 2], strides = [1, 1]} : vector<1x8xf32> to vector<1x2xf32>
    %656 = arith.mulf %653, %633 : vector<1x2xf32>
    %657 = arith.mulf %652, %654 : vector<1x2xf32>
    %658 = arith.addf %656, %657 : vector<1x2xf32>
    %659 = math.tanh %658 : vector<1x2xf32>
    %660 = arith.mulf %655, %659 : vector<1x2xf32>
    %c11_105 = arith.constant 11 : index
    %c0_106 = arith.constant 0 : index
    %661 = vector.load %arg10[%c11_105, %c0_106] : memref<15x16xf32, #tpu.memory_space<vmem>>, vector<1x16xf32>
    %662 = vector.extract_strided_slice %661 {offsets = [0, 8], sizes = [1, 8], strides = [1, 1]} : vector<1x16xf32> to vector<1x8xf32>
    %663 = vector.extract_strided_slice %660 {offsets = [0, 0], sizes = [1, 1], strides = [1, 1]} : vector<1x2xf32> to vector<1x1xf32>
    %664 = vector.broadcast %663 : vector<1x1xf32> to vector<1x8xf32>
    %665 = arith.mulf %664, %582 : vector<1x8xf32>
    %666 = arith.addf %662, %665 : vector<1x8xf32>
    %667 = vector.extract_strided_slice %660 {offsets = [0, 1], sizes = [1, 1], strides = [1, 1]} : vector<1x2xf32> to vector<1x1xf32>
    %668 = vector.broadcast %667 : vector<1x1xf32> to vector<1x8xf32>
    %669 = arith.mulf %668, %583 : vector<1x8xf32>
    %670 = arith.addf %666, %669 : vector<1x8xf32>
    %671 = arith.negf %670 : vector<1x8xf32>
    %672 = math.exp %671 : vector<1x8xf32>
    %cst_107 = arith.constant 1.000000e+00 : f32
    %673 = vector.broadcast %cst_107 : f32 to vector<1x8xf32>
    %674 = arith.addf %673, %672 : vector<1x8xf32>
    %675 = arith.divf %673, %674 : vector<1x8xf32>
    %676 = math.tanh %670 : vector<1x8xf32>
    %677 = vector.extract_strided_slice %675 {offsets = [0, 0], sizes = [1, 2], strides = [1, 1]} : vector<1x8xf32> to vector<1x2xf32>
    %678 = vector.extract_strided_slice %675 {offsets = [0, 2], sizes = [1, 2], strides = [1, 1]} : vector<1x8xf32> to vector<1x2xf32>
    %679 = vector.extract_strided_slice %676 {offsets = [0, 4], sizes = [1, 2], strides = [1, 1]} : vector<1x8xf32> to vector<1x2xf32>
    %680 = vector.extract_strided_slice %675 {offsets = [0, 6], sizes = [1, 2], strides = [1, 1]} : vector<1x8xf32> to vector<1x2xf32>
    %681 = arith.mulf %678, %658 : vector<1x2xf32>
    %682 = arith.mulf %677, %679 : vector<1x2xf32>
    %683 = arith.addf %681, %682 : vector<1x2xf32>
    %684 = math.tanh %683 : vector<1x2xf32>
    %685 = arith.mulf %680, %684 : vector<1x2xf32>
    %c10_108 = arith.constant 10 : index
    %c0_109 = arith.constant 0 : index
    %686 = vector.load %arg10[%c10_108, %c0_109] : memref<15x16xf32, #tpu.memory_space<vmem>>, vector<1x16xf32>
    %687 = vector.extract_strided_slice %686 {offsets = [0, 8], sizes = [1, 8], strides = [1, 1]} : vector<1x16xf32> to vector<1x8xf32>
    %688 = vector.extract_strided_slice %685 {offsets = [0, 0], sizes = [1, 1], strides = [1, 1]} : vector<1x2xf32> to vector<1x1xf32>
    %689 = vector.broadcast %688 : vector<1x1xf32> to vector<1x8xf32>
    %690 = arith.mulf %689, %582 : vector<1x8xf32>
    %691 = arith.addf %687, %690 : vector<1x8xf32>
    %692 = vector.extract_strided_slice %685 {offsets = [0, 1], sizes = [1, 1], strides = [1, 1]} : vector<1x2xf32> to vector<1x1xf32>
    %693 = vector.broadcast %692 : vector<1x1xf32> to vector<1x8xf32>
    %694 = arith.mulf %693, %583 : vector<1x8xf32>
    %695 = arith.addf %691, %694 : vector<1x8xf32>
    %696 = arith.negf %695 : vector<1x8xf32>
    %697 = math.exp %696 : vector<1x8xf32>
    %cst_110 = arith.constant 1.000000e+00 : f32
    %698 = vector.broadcast %cst_110 : f32 to vector<1x8xf32>
    %699 = arith.addf %698, %697 : vector<1x8xf32>
    %700 = arith.divf %698, %699 : vector<1x8xf32>
    %701 = math.tanh %695 : vector<1x8xf32>
    %702 = vector.extract_strided_slice %700 {offsets = [0, 0], sizes = [1, 2], strides = [1, 1]} : vector<1x8xf32> to vector<1x2xf32>
    %703 = vector.extract_strided_slice %700 {offsets = [0, 2], sizes = [1, 2], strides = [1, 1]} : vector<1x8xf32> to vector<1x2xf32>
    %704 = vector.extract_strided_slice %701 {offsets = [0, 4], sizes = [1, 2], strides = [1, 1]} : vector<1x8xf32> to vector<1x2xf32>
    %705 = vector.extract_strided_slice %700 {offsets = [0, 6], sizes = [1, 2], strides = [1, 1]} : vector<1x8xf32> to vector<1x2xf32>
    %706 = arith.mulf %703, %683 : vector<1x2xf32>
    %707 = arith.mulf %702, %704 : vector<1x2xf32>
    %708 = arith.addf %706, %707 : vector<1x2xf32>
    %709 = math.tanh %708 : vector<1x2xf32>
    %710 = arith.mulf %705, %709 : vector<1x2xf32>
    %c9_111 = arith.constant 9 : index
    %c0_112 = arith.constant 0 : index
    %711 = vector.load %arg10[%c9_111, %c0_112] : memref<15x16xf32, #tpu.memory_space<vmem>>, vector<1x16xf32>
    %712 = vector.extract_strided_slice %711 {offsets = [0, 8], sizes = [1, 8], strides = [1, 1]} : vector<1x16xf32> to vector<1x8xf32>
    %713 = vector.extract_strided_slice %710 {offsets = [0, 0], sizes = [1, 1], strides = [1, 1]} : vector<1x2xf32> to vector<1x1xf32>
    %714 = vector.broadcast %713 : vector<1x1xf32> to vector<1x8xf32>
    %715 = arith.mulf %714, %582 : vector<1x8xf32>
    %716 = arith.addf %712, %715 : vector<1x8xf32>
    %717 = vector.extract_strided_slice %710 {offsets = [0, 1], sizes = [1, 1], strides = [1, 1]} : vector<1x2xf32> to vector<1x1xf32>
    %718 = vector.broadcast %717 : vector<1x1xf32> to vector<1x8xf32>
    %719 = arith.mulf %718, %583 : vector<1x8xf32>
    %720 = arith.addf %716, %719 : vector<1x8xf32>
    %721 = arith.negf %720 : vector<1x8xf32>
    %722 = math.exp %721 : vector<1x8xf32>
    %cst_113 = arith.constant 1.000000e+00 : f32
    %723 = vector.broadcast %cst_113 : f32 to vector<1x8xf32>
    %724 = arith.addf %723, %722 : vector<1x8xf32>
    %725 = arith.divf %723, %724 : vector<1x8xf32>
    %726 = math.tanh %720 : vector<1x8xf32>
    %727 = vector.extract_strided_slice %725 {offsets = [0, 0], sizes = [1, 2], strides = [1, 1]} : vector<1x8xf32> to vector<1x2xf32>
    %728 = vector.extract_strided_slice %725 {offsets = [0, 2], sizes = [1, 2], strides = [1, 1]} : vector<1x8xf32> to vector<1x2xf32>
    %729 = vector.extract_strided_slice %726 {offsets = [0, 4], sizes = [1, 2], strides = [1, 1]} : vector<1x8xf32> to vector<1x2xf32>
    %730 = vector.extract_strided_slice %725 {offsets = [0, 6], sizes = [1, 2], strides = [1, 1]} : vector<1x8xf32> to vector<1x2xf32>
    %731 = arith.mulf %728, %708 : vector<1x2xf32>
    %732 = arith.mulf %727, %729 : vector<1x2xf32>
    %733 = arith.addf %731, %732 : vector<1x2xf32>
    %734 = math.tanh %733 : vector<1x2xf32>
    %735 = arith.mulf %730, %734 : vector<1x2xf32>
    %c8_114 = arith.constant 8 : index
    %c0_115 = arith.constant 0 : index
    %736 = vector.load %arg10[%c8_114, %c0_115] : memref<15x16xf32, #tpu.memory_space<vmem>>, vector<1x16xf32>
    %737 = vector.extract_strided_slice %736 {offsets = [0, 8], sizes = [1, 8], strides = [1, 1]} : vector<1x16xf32> to vector<1x8xf32>
    %738 = vector.extract_strided_slice %735 {offsets = [0, 0], sizes = [1, 1], strides = [1, 1]} : vector<1x2xf32> to vector<1x1xf32>
    %739 = vector.broadcast %738 : vector<1x1xf32> to vector<1x8xf32>
    %740 = arith.mulf %739, %582 : vector<1x8xf32>
    %741 = arith.addf %737, %740 : vector<1x8xf32>
    %742 = vector.extract_strided_slice %735 {offsets = [0, 1], sizes = [1, 1], strides = [1, 1]} : vector<1x2xf32> to vector<1x1xf32>
    %743 = vector.broadcast %742 : vector<1x1xf32> to vector<1x8xf32>
    %744 = arith.mulf %743, %583 : vector<1x8xf32>
    %745 = arith.addf %741, %744 : vector<1x8xf32>
    %746 = arith.negf %745 : vector<1x8xf32>
    %747 = math.exp %746 : vector<1x8xf32>
    %cst_116 = arith.constant 1.000000e+00 : f32
    %748 = vector.broadcast %cst_116 : f32 to vector<1x8xf32>
    %749 = arith.addf %748, %747 : vector<1x8xf32>
    %750 = arith.divf %748, %749 : vector<1x8xf32>
    %751 = math.tanh %745 : vector<1x8xf32>
    %752 = vector.extract_strided_slice %750 {offsets = [0, 0], sizes = [1, 2], strides = [1, 1]} : vector<1x8xf32> to vector<1x2xf32>
    %753 = vector.extract_strided_slice %750 {offsets = [0, 2], sizes = [1, 2], strides = [1, 1]} : vector<1x8xf32> to vector<1x2xf32>
    %754 = vector.extract_strided_slice %751 {offsets = [0, 4], sizes = [1, 2], strides = [1, 1]} : vector<1x8xf32> to vector<1x2xf32>
    %755 = vector.extract_strided_slice %750 {offsets = [0, 6], sizes = [1, 2], strides = [1, 1]} : vector<1x8xf32> to vector<1x2xf32>
    %756 = arith.mulf %753, %733 : vector<1x2xf32>
    %757 = arith.mulf %752, %754 : vector<1x2xf32>
    %758 = arith.addf %756, %757 : vector<1x2xf32>
    %759 = math.tanh %758 : vector<1x2xf32>
    %760 = arith.mulf %755, %759 : vector<1x2xf32>
    %c7_117 = arith.constant 7 : index
    %c0_118 = arith.constant 0 : index
    %761 = vector.load %arg10[%c7_117, %c0_118] : memref<15x16xf32, #tpu.memory_space<vmem>>, vector<1x16xf32>
    %762 = vector.extract_strided_slice %761 {offsets = [0, 8], sizes = [1, 8], strides = [1, 1]} : vector<1x16xf32> to vector<1x8xf32>
    %763 = vector.extract_strided_slice %760 {offsets = [0, 0], sizes = [1, 1], strides = [1, 1]} : vector<1x2xf32> to vector<1x1xf32>
    %764 = vector.broadcast %763 : vector<1x1xf32> to vector<1x8xf32>
    %765 = arith.mulf %764, %582 : vector<1x8xf32>
    %766 = arith.addf %762, %765 : vector<1x8xf32>
    %767 = vector.extract_strided_slice %760 {offsets = [0, 1], sizes = [1, 1], strides = [1, 1]} : vector<1x2xf32> to vector<1x1xf32>
    %768 = vector.broadcast %767 : vector<1x1xf32> to vector<1x8xf32>
    %769 = arith.mulf %768, %583 : vector<1x8xf32>
    %770 = arith.addf %766, %769 : vector<1x8xf32>
    %771 = arith.negf %770 : vector<1x8xf32>
    %772 = math.exp %771 : vector<1x8xf32>
    %cst_119 = arith.constant 1.000000e+00 : f32
    %773 = vector.broadcast %cst_119 : f32 to vector<1x8xf32>
    %774 = arith.addf %773, %772 : vector<1x8xf32>
    %775 = arith.divf %773, %774 : vector<1x8xf32>
    %776 = math.tanh %770 : vector<1x8xf32>
    %777 = vector.extract_strided_slice %775 {offsets = [0, 0], sizes = [1, 2], strides = [1, 1]} : vector<1x8xf32> to vector<1x2xf32>
    %778 = vector.extract_strided_slice %775 {offsets = [0, 2], sizes = [1, 2], strides = [1, 1]} : vector<1x8xf32> to vector<1x2xf32>
    %779 = vector.extract_strided_slice %776 {offsets = [0, 4], sizes = [1, 2], strides = [1, 1]} : vector<1x8xf32> to vector<1x2xf32>
    %780 = vector.extract_strided_slice %775 {offsets = [0, 6], sizes = [1, 2], strides = [1, 1]} : vector<1x8xf32> to vector<1x2xf32>
    %781 = arith.mulf %778, %758 : vector<1x2xf32>
    %782 = arith.mulf %777, %779 : vector<1x2xf32>
    %783 = arith.addf %781, %782 : vector<1x2xf32>
    %784 = math.tanh %783 : vector<1x2xf32>
    %785 = arith.mulf %780, %784 : vector<1x2xf32>
    %c6_120 = arith.constant 6 : index
    %c0_121 = arith.constant 0 : index
    %786 = vector.load %arg10[%c6_120, %c0_121] : memref<15x16xf32, #tpu.memory_space<vmem>>, vector<1x16xf32>
    %787 = vector.extract_strided_slice %786 {offsets = [0, 8], sizes = [1, 8], strides = [1, 1]} : vector<1x16xf32> to vector<1x8xf32>
    %788 = vector.extract_strided_slice %785 {offsets = [0, 0], sizes = [1, 1], strides = [1, 1]} : vector<1x2xf32> to vector<1x1xf32>
    %789 = vector.broadcast %788 : vector<1x1xf32> to vector<1x8xf32>
    %790 = arith.mulf %789, %582 : vector<1x8xf32>
    %791 = arith.addf %787, %790 : vector<1x8xf32>
    %792 = vector.extract_strided_slice %785 {offsets = [0, 1], sizes = [1, 1], strides = [1, 1]} : vector<1x2xf32> to vector<1x1xf32>
    %793 = vector.broadcast %792 : vector<1x1xf32> to vector<1x8xf32>
    %794 = arith.mulf %793, %583 : vector<1x8xf32>
    %795 = arith.addf %791, %794 : vector<1x8xf32>
    %796 = arith.negf %795 : vector<1x8xf32>
    %797 = math.exp %796 : vector<1x8xf32>
    %cst_122 = arith.constant 1.000000e+00 : f32
    %798 = vector.broadcast %cst_122 : f32 to vector<1x8xf32>
    %799 = arith.addf %798, %797 : vector<1x8xf32>
    %800 = arith.divf %798, %799 : vector<1x8xf32>
    %801 = math.tanh %795 : vector<1x8xf32>
    %802 = vector.extract_strided_slice %800 {offsets = [0, 0], sizes = [1, 2], strides = [1, 1]} : vector<1x8xf32> to vector<1x2xf32>
    %803 = vector.extract_strided_slice %800 {offsets = [0, 2], sizes = [1, 2], strides = [1, 1]} : vector<1x8xf32> to vector<1x2xf32>
    %804 = vector.extract_strided_slice %801 {offsets = [0, 4], sizes = [1, 2], strides = [1, 1]} : vector<1x8xf32> to vector<1x2xf32>
    %805 = vector.extract_strided_slice %800 {offsets = [0, 6], sizes = [1, 2], strides = [1, 1]} : vector<1x8xf32> to vector<1x2xf32>
    %806 = arith.mulf %803, %783 : vector<1x2xf32>
    %807 = arith.mulf %802, %804 : vector<1x2xf32>
    %808 = arith.addf %806, %807 : vector<1x2xf32>
    %809 = math.tanh %808 : vector<1x2xf32>
    %810 = arith.mulf %805, %809 : vector<1x2xf32>
    %c5_123 = arith.constant 5 : index
    %c0_124 = arith.constant 0 : index
    %811 = vector.load %arg10[%c5_123, %c0_124] : memref<15x16xf32, #tpu.memory_space<vmem>>, vector<1x16xf32>
    %812 = vector.extract_strided_slice %811 {offsets = [0, 8], sizes = [1, 8], strides = [1, 1]} : vector<1x16xf32> to vector<1x8xf32>
    %813 = vector.extract_strided_slice %810 {offsets = [0, 0], sizes = [1, 1], strides = [1, 1]} : vector<1x2xf32> to vector<1x1xf32>
    %814 = vector.broadcast %813 : vector<1x1xf32> to vector<1x8xf32>
    %815 = arith.mulf %814, %582 : vector<1x8xf32>
    %816 = arith.addf %812, %815 : vector<1x8xf32>
    %817 = vector.extract_strided_slice %810 {offsets = [0, 1], sizes = [1, 1], strides = [1, 1]} : vector<1x2xf32> to vector<1x1xf32>
    %818 = vector.broadcast %817 : vector<1x1xf32> to vector<1x8xf32>
    %819 = arith.mulf %818, %583 : vector<1x8xf32>
    %820 = arith.addf %816, %819 : vector<1x8xf32>
    %821 = arith.negf %820 : vector<1x8xf32>
    %822 = math.exp %821 : vector<1x8xf32>
    %cst_125 = arith.constant 1.000000e+00 : f32
    %823 = vector.broadcast %cst_125 : f32 to vector<1x8xf32>
    %824 = arith.addf %823, %822 : vector<1x8xf32>
    %825 = arith.divf %823, %824 : vector<1x8xf32>
    %826 = math.tanh %820 : vector<1x8xf32>
    %827 = vector.extract_strided_slice %825 {offsets = [0, 0], sizes = [1, 2], strides = [1, 1]} : vector<1x8xf32> to vector<1x2xf32>
    %828 = vector.extract_strided_slice %825 {offsets = [0, 2], sizes = [1, 2], strides = [1, 1]} : vector<1x8xf32> to vector<1x2xf32>
    %829 = vector.extract_strided_slice %826 {offsets = [0, 4], sizes = [1, 2], strides = [1, 1]} : vector<1x8xf32> to vector<1x2xf32>
    %830 = vector.extract_strided_slice %825 {offsets = [0, 6], sizes = [1, 2], strides = [1, 1]} : vector<1x8xf32> to vector<1x2xf32>
    %831 = arith.mulf %828, %808 : vector<1x2xf32>
    %832 = arith.mulf %827, %829 : vector<1x2xf32>
    %833 = arith.addf %831, %832 : vector<1x2xf32>
    %834 = math.tanh %833 : vector<1x2xf32>
    %835 = arith.mulf %830, %834 : vector<1x2xf32>
    %c4_126 = arith.constant 4 : index
    %c0_127 = arith.constant 0 : index
    %836 = vector.load %arg10[%c4_126, %c0_127] : memref<15x16xf32, #tpu.memory_space<vmem>>, vector<1x16xf32>
    %837 = vector.extract_strided_slice %836 {offsets = [0, 8], sizes = [1, 8], strides = [1, 1]} : vector<1x16xf32> to vector<1x8xf32>
    %838 = vector.extract_strided_slice %835 {offsets = [0, 0], sizes = [1, 1], strides = [1, 1]} : vector<1x2xf32> to vector<1x1xf32>
    %839 = vector.broadcast %838 : vector<1x1xf32> to vector<1x8xf32>
    %840 = arith.mulf %839, %582 : vector<1x8xf32>
    %841 = arith.addf %837, %840 : vector<1x8xf32>
    %842 = vector.extract_strided_slice %835 {offsets = [0, 1], sizes = [1, 1], strides = [1, 1]} : vector<1x2xf32> to vector<1x1xf32>
    %843 = vector.broadcast %842 : vector<1x1xf32> to vector<1x8xf32>
    %844 = arith.mulf %843, %583 : vector<1x8xf32>
    %845 = arith.addf %841, %844 : vector<1x8xf32>
    %846 = arith.negf %845 : vector<1x8xf32>
    %847 = math.exp %846 : vector<1x8xf32>
    %cst_128 = arith.constant 1.000000e+00 : f32
    %848 = vector.broadcast %cst_128 : f32 to vector<1x8xf32>
    %849 = arith.addf %848, %847 : vector<1x8xf32>
    %850 = arith.divf %848, %849 : vector<1x8xf32>
    %851 = math.tanh %845 : vector<1x8xf32>
    %852 = vector.extract_strided_slice %850 {offsets = [0, 0], sizes = [1, 2], strides = [1, 1]} : vector<1x8xf32> to vector<1x2xf32>
    %853 = vector.extract_strided_slice %850 {offsets = [0, 2], sizes = [1, 2], strides = [1, 1]} : vector<1x8xf32> to vector<1x2xf32>
    %854 = vector.extract_strided_slice %851 {offsets = [0, 4], sizes = [1, 2], strides = [1, 1]} : vector<1x8xf32> to vector<1x2xf32>
    %855 = vector.extract_strided_slice %850 {offsets = [0, 6], sizes = [1, 2], strides = [1, 1]} : vector<1x8xf32> to vector<1x2xf32>
    %856 = arith.mulf %853, %833 : vector<1x2xf32>
    %857 = arith.mulf %852, %854 : vector<1x2xf32>
    %858 = arith.addf %856, %857 : vector<1x2xf32>
    %859 = math.tanh %858 : vector<1x2xf32>
    %860 = arith.mulf %855, %859 : vector<1x2xf32>
    %c3_129 = arith.constant 3 : index
    %c0_130 = arith.constant 0 : index
    %861 = vector.load %arg10[%c3_129, %c0_130] : memref<15x16xf32, #tpu.memory_space<vmem>>, vector<1x16xf32>
    %862 = vector.extract_strided_slice %861 {offsets = [0, 8], sizes = [1, 8], strides = [1, 1]} : vector<1x16xf32> to vector<1x8xf32>
    %863 = vector.extract_strided_slice %860 {offsets = [0, 0], sizes = [1, 1], strides = [1, 1]} : vector<1x2xf32> to vector<1x1xf32>
    %864 = vector.broadcast %863 : vector<1x1xf32> to vector<1x8xf32>
    %865 = arith.mulf %864, %582 : vector<1x8xf32>
    %866 = arith.addf %862, %865 : vector<1x8xf32>
    %867 = vector.extract_strided_slice %860 {offsets = [0, 1], sizes = [1, 1], strides = [1, 1]} : vector<1x2xf32> to vector<1x1xf32>
    %868 = vector.broadcast %867 : vector<1x1xf32> to vector<1x8xf32>
    %869 = arith.mulf %868, %583 : vector<1x8xf32>
    %870 = arith.addf %866, %869 : vector<1x8xf32>
    %871 = arith.negf %870 : vector<1x8xf32>
    %872 = math.exp %871 : vector<1x8xf32>
    %cst_131 = arith.constant 1.000000e+00 : f32
    %873 = vector.broadcast %cst_131 : f32 to vector<1x8xf32>
    %874 = arith.addf %873, %872 : vector<1x8xf32>
    %875 = arith.divf %873, %874 : vector<1x8xf32>
    %876 = math.tanh %870 : vector<1x8xf32>
    %877 = vector.extract_strided_slice %875 {offsets = [0, 0], sizes = [1, 2], strides = [1, 1]} : vector<1x8xf32> to vector<1x2xf32>
    %878 = vector.extract_strided_slice %875 {offsets = [0, 2], sizes = [1, 2], strides = [1, 1]} : vector<1x8xf32> to vector<1x2xf32>
    %879 = vector.extract_strided_slice %876 {offsets = [0, 4], sizes = [1, 2], strides = [1, 1]} : vector<1x8xf32> to vector<1x2xf32>
    %880 = vector.extract_strided_slice %875 {offsets = [0, 6], sizes = [1, 2], strides = [1, 1]} : vector<1x8xf32> to vector<1x2xf32>
    %881 = arith.mulf %878, %858 : vector<1x2xf32>
    %882 = arith.mulf %877, %879 : vector<1x2xf32>
    %883 = arith.addf %881, %882 : vector<1x2xf32>
    %884 = math.tanh %883 : vector<1x2xf32>
    %885 = arith.mulf %880, %884 : vector<1x2xf32>
    %c2_132 = arith.constant 2 : index
    %c0_133 = arith.constant 0 : index
    %886 = vector.load %arg10[%c2_132, %c0_133] : memref<15x16xf32, #tpu.memory_space<vmem>>, vector<1x16xf32>
    %887 = vector.extract_strided_slice %886 {offsets = [0, 8], sizes = [1, 8], strides = [1, 1]} : vector<1x16xf32> to vector<1x8xf32>
    %888 = vector.extract_strided_slice %885 {offsets = [0, 0], sizes = [1, 1], strides = [1, 1]} : vector<1x2xf32> to vector<1x1xf32>
    %889 = vector.broadcast %888 : vector<1x1xf32> to vector<1x8xf32>
    %890 = arith.mulf %889, %582 : vector<1x8xf32>
    %891 = arith.addf %887, %890 : vector<1x8xf32>
    %892 = vector.extract_strided_slice %885 {offsets = [0, 1], sizes = [1, 1], strides = [1, 1]} : vector<1x2xf32> to vector<1x1xf32>
    %893 = vector.broadcast %892 : vector<1x1xf32> to vector<1x8xf32>
    %894 = arith.mulf %893, %583 : vector<1x8xf32>
    %895 = arith.addf %891, %894 : vector<1x8xf32>
    %896 = arith.negf %895 : vector<1x8xf32>
    %897 = math.exp %896 : vector<1x8xf32>
    %cst_134 = arith.constant 1.000000e+00 : f32
    %898 = vector.broadcast %cst_134 : f32 to vector<1x8xf32>
    %899 = arith.addf %898, %897 : vector<1x8xf32>
    %900 = arith.divf %898, %899 : vector<1x8xf32>
    %901 = math.tanh %895 : vector<1x8xf32>
    %902 = vector.extract_strided_slice %900 {offsets = [0, 0], sizes = [1, 2], strides = [1, 1]} : vector<1x8xf32> to vector<1x2xf32>
    %903 = vector.extract_strided_slice %900 {offsets = [0, 2], sizes = [1, 2], strides = [1, 1]} : vector<1x8xf32> to vector<1x2xf32>
    %904 = vector.extract_strided_slice %901 {offsets = [0, 4], sizes = [1, 2], strides = [1, 1]} : vector<1x8xf32> to vector<1x2xf32>
    %905 = vector.extract_strided_slice %900 {offsets = [0, 6], sizes = [1, 2], strides = [1, 1]} : vector<1x8xf32> to vector<1x2xf32>
    %906 = arith.mulf %903, %883 : vector<1x2xf32>
    %907 = arith.mulf %902, %904 : vector<1x2xf32>
    %908 = arith.addf %906, %907 : vector<1x2xf32>
    %909 = math.tanh %908 : vector<1x2xf32>
    %910 = arith.mulf %905, %909 : vector<1x2xf32>
    %c1_135 = arith.constant 1 : index
    %c0_136 = arith.constant 0 : index
    %911 = vector.load %arg10[%c1_135, %c0_136] : memref<15x16xf32, #tpu.memory_space<vmem>>, vector<1x16xf32>
    %912 = vector.extract_strided_slice %911 {offsets = [0, 8], sizes = [1, 8], strides = [1, 1]} : vector<1x16xf32> to vector<1x8xf32>
    %913 = vector.extract_strided_slice %910 {offsets = [0, 0], sizes = [1, 1], strides = [1, 1]} : vector<1x2xf32> to vector<1x1xf32>
    %914 = vector.broadcast %913 : vector<1x1xf32> to vector<1x8xf32>
    %915 = arith.mulf %914, %582 : vector<1x8xf32>
    %916 = arith.addf %912, %915 : vector<1x8xf32>
    %917 = vector.extract_strided_slice %910 {offsets = [0, 1], sizes = [1, 1], strides = [1, 1]} : vector<1x2xf32> to vector<1x1xf32>
    %918 = vector.broadcast %917 : vector<1x1xf32> to vector<1x8xf32>
    %919 = arith.mulf %918, %583 : vector<1x8xf32>
    %920 = arith.addf %916, %919 : vector<1x8xf32>
    %921 = arith.negf %920 : vector<1x8xf32>
    %922 = math.exp %921 : vector<1x8xf32>
    %cst_137 = arith.constant 1.000000e+00 : f32
    %923 = vector.broadcast %cst_137 : f32 to vector<1x8xf32>
    %924 = arith.addf %923, %922 : vector<1x8xf32>
    %925 = arith.divf %923, %924 : vector<1x8xf32>
    %926 = math.tanh %920 : vector<1x8xf32>
    %927 = vector.extract_strided_slice %925 {offsets = [0, 0], sizes = [1, 2], strides = [1, 1]} : vector<1x8xf32> to vector<1x2xf32>
    %928 = vector.extract_strided_slice %925 {offsets = [0, 2], sizes = [1, 2], strides = [1, 1]} : vector<1x8xf32> to vector<1x2xf32>
    %929 = vector.extract_strided_slice %926 {offsets = [0, 4], sizes = [1, 2], strides = [1, 1]} : vector<1x8xf32> to vector<1x2xf32>
    %930 = vector.extract_strided_slice %925 {offsets = [0, 6], sizes = [1, 2], strides = [1, 1]} : vector<1x8xf32> to vector<1x2xf32>
    %931 = arith.mulf %928, %908 : vector<1x2xf32>
    %932 = arith.mulf %927, %929 : vector<1x2xf32>
    %933 = arith.addf %931, %932 : vector<1x2xf32>
    %934 = math.tanh %933 : vector<1x2xf32>
    %935 = arith.mulf %930, %934 : vector<1x2xf32>
    %c0_138 = arith.constant 0 : index
    %c0_139 = arith.constant 0 : index
    %936 = vector.load %arg10[%c0_138, %c0_139] : memref<15x16xf32, #tpu.memory_space<vmem>>, vector<1x16xf32>
    %937 = vector.extract_strided_slice %936 {offsets = [0, 8], sizes = [1, 8], strides = [1, 1]} : vector<1x16xf32> to vector<1x8xf32>
    %938 = vector.extract_strided_slice %935 {offsets = [0, 0], sizes = [1, 1], strides = [1, 1]} : vector<1x2xf32> to vector<1x1xf32>
    %939 = vector.broadcast %938 : vector<1x1xf32> to vector<1x8xf32>
    %940 = arith.mulf %939, %582 : vector<1x8xf32>
    %941 = arith.addf %937, %940 : vector<1x8xf32>
    %942 = vector.extract_strided_slice %935 {offsets = [0, 1], sizes = [1, 1], strides = [1, 1]} : vector<1x2xf32> to vector<1x1xf32>
    %943 = vector.broadcast %942 : vector<1x1xf32> to vector<1x8xf32>
    %944 = arith.mulf %943, %583 : vector<1x8xf32>
    %945 = arith.addf %941, %944 : vector<1x8xf32>
    %946 = arith.negf %945 : vector<1x8xf32>
    %947 = math.exp %946 : vector<1x8xf32>
    %cst_140 = arith.constant 1.000000e+00 : f32
    %948 = vector.broadcast %cst_140 : f32 to vector<1x8xf32>
    %949 = arith.addf %948, %947 : vector<1x8xf32>
    %950 = arith.divf %948, %949 : vector<1x8xf32>
    %951 = math.tanh %945 : vector<1x8xf32>
    %952 = vector.extract_strided_slice %950 {offsets = [0, 0], sizes = [1, 2], strides = [1, 1]} : vector<1x8xf32> to vector<1x2xf32>
    %953 = vector.extract_strided_slice %950 {offsets = [0, 2], sizes = [1, 2], strides = [1, 1]} : vector<1x8xf32> to vector<1x2xf32>
    %954 = vector.extract_strided_slice %951 {offsets = [0, 4], sizes = [1, 2], strides = [1, 1]} : vector<1x8xf32> to vector<1x2xf32>
    %955 = vector.extract_strided_slice %950 {offsets = [0, 6], sizes = [1, 2], strides = [1, 1]} : vector<1x8xf32> to vector<1x2xf32>
    %956 = arith.mulf %953, %933 : vector<1x2xf32>
    %957 = arith.mulf %952, %954 : vector<1x2xf32>
    %958 = arith.addf %956, %957 : vector<1x2xf32>
    %959 = math.tanh %958 : vector<1x2xf32>
    %960 = arith.mulf %955, %959 : vector<1x2xf32>
    %c0_141 = arith.constant 0 : index
    %c0_142 = arith.constant 0 : index
    %961 = vector.load %arg6[%c0_141, %c0_142] : memref<4x16xf32, #tpu.memory_space<vmem>>, vector<4x16xf32>
    %c0_143 = arith.constant 0 : index
    %c0_144 = arith.constant 0 : index
    %962 = vector.load %arg8[%c0_143, %c0_144] : memref<1x16xf32, #tpu.memory_space<vmem>>, vector<1x16xf32>
    %963 = vector.extract_strided_slice %230 {offsets = [0, 0], sizes = [1, 1], strides = [1, 1]} : vector<1x2xf32> to vector<1x1xf32>
    %964 = vector.extract_strided_slice %961 {offsets = [0, 0], sizes = [1, 16], strides = [1, 1]} : vector<4x16xf32> to vector<1x16xf32>
    %965 = vector.broadcast %963 : vector<1x1xf32> to vector<1x16xf32>
    %966 = arith.mulf %965, %964 : vector<1x16xf32>
    %967 = arith.addf %962, %966 : vector<1x16xf32>
    %968 = vector.extract_strided_slice %230 {offsets = [0, 1], sizes = [1, 1], strides = [1, 1]} : vector<1x2xf32> to vector<1x1xf32>
    %969 = vector.extract_strided_slice %961 {offsets = [1, 0], sizes = [1, 16], strides = [1, 1]} : vector<4x16xf32> to vector<1x16xf32>
    %970 = vector.broadcast %968 : vector<1x1xf32> to vector<1x16xf32>
    %971 = arith.mulf %970, %969 : vector<1x16xf32>
    %972 = arith.addf %967, %971 : vector<1x16xf32>
    %973 = vector.extract_strided_slice %960 {offsets = [0, 0], sizes = [1, 1], strides = [1, 1]} : vector<1x2xf32> to vector<1x1xf32>
    %974 = vector.extract_strided_slice %961 {offsets = [2, 0], sizes = [1, 16], strides = [1, 1]} : vector<4x16xf32> to vector<1x16xf32>
    %975 = vector.broadcast %973 : vector<1x1xf32> to vector<1x16xf32>
    %976 = arith.mulf %975, %974 : vector<1x16xf32>
    %977 = arith.addf %972, %976 : vector<1x16xf32>
    %978 = vector.extract_strided_slice %960 {offsets = [0, 1], sizes = [1, 1], strides = [1, 1]} : vector<1x2xf32> to vector<1x1xf32>
    %979 = vector.extract_strided_slice %961 {offsets = [3, 0], sizes = [1, 16], strides = [1, 1]} : vector<4x16xf32> to vector<1x16xf32>
    %980 = vector.broadcast %978 : vector<1x1xf32> to vector<1x16xf32>
    %981 = arith.mulf %980, %979 : vector<1x16xf32>
    %982 = arith.addf %977, %981 : vector<1x16xf32>
    %c0_145 = arith.constant 0 : index
    %c0_146 = arith.constant 0 : index
    %983 = vector.load %arg11[%c0_145, %c0_146] : memref<15x16xf32, #tpu.memory_space<vmem>>, vector<1x16xf32>
    tpu.vector_store %arg11[%c0_145, %c0_146], %982 {strides = array<i32>} : memref<15x16xf32, #tpu.memory_space<vmem>>, vector<1x16xf32>,
    %984 = vector.extract_strided_slice %255 {offsets = [0, 0], sizes = [1, 1], strides = [1, 1]} : vector<1x2xf32> to vector<1x1xf32>
    %985 = vector.extract_strided_slice %961 {offsets = [0, 0], sizes = [1, 16], strides = [1, 1]} : vector<4x16xf32> to vector<1x16xf32>
    %986 = vector.broadcast %984 : vector<1x1xf32> to vector<1x16xf32>
    %987 = arith.mulf %986, %985 : vector<1x16xf32>
    %988 = arith.addf %962, %987 : vector<1x16xf32>
    %989 = vector.extract_strided_slice %255 {offsets = [0, 1], sizes = [1, 1], strides = [1, 1]} : vector<1x2xf32> to vector<1x1xf32>
    %990 = vector.extract_strided_slice %961 {offsets = [1, 0], sizes = [1, 16], strides = [1, 1]} : vector<4x16xf32> to vector<1x16xf32>
    %991 = vector.broadcast %989 : vector<1x1xf32> to vector<1x16xf32>
    %992 = arith.mulf %991, %990 : vector<1x16xf32>
    %993 = arith.addf %988, %992 : vector<1x16xf32>
    %994 = vector.extract_strided_slice %935 {offsets = [0, 0], sizes = [1, 1], strides = [1, 1]} : vector<1x2xf32> to vector<1x1xf32>
    %995 = vector.extract_strided_slice %961 {offsets = [2, 0], sizes = [1, 16], strides = [1, 1]} : vector<4x16xf32> to vector<1x16xf32>
    %996 = vector.broadcast %994 : vector<1x1xf32> to vector<1x16xf32>
    %997 = arith.mulf %996, %995 : vector<1x16xf32>
    %998 = arith.addf %993, %997 : vector<1x16xf32>
    %999 = vector.extract_strided_slice %935 {offsets = [0, 1], sizes = [1, 1], strides = [1, 1]} : vector<1x2xf32> to vector<1x1xf32>
    %1000 = vector.extract_strided_slice %961 {offsets = [3, 0], sizes = [1, 16], strides = [1, 1]} : vector<4x16xf32> to vector<1x16xf32>
    %1001 = vector.broadcast %999 : vector<1x1xf32> to vector<1x16xf32>
    %1002 = arith.mulf %1001, %1000 : vector<1x16xf32>
    %1003 = arith.addf %998, %1002 : vector<1x16xf32>
    %c1_147 = arith.constant 1 : index
    %c0_148 = arith.constant 0 : index
    %1004 = vector.load %arg11[%c1_147, %c0_148] : memref<15x16xf32, #tpu.memory_space<vmem>>, vector<1x16xf32>
    tpu.vector_store %arg11[%c1_147, %c0_148], %1003 {strides = array<i32>} : memref<15x16xf32, #tpu.memory_space<vmem>>, vector<1x16xf32>,
    %1005 = vector.extract_strided_slice %280 {offsets = [0, 0], sizes = [1, 1], strides = [1, 1]} : vector<1x2xf32> to vector<1x1xf32>
    %1006 = vector.extract_strided_slice %961 {offsets = [0, 0], sizes = [1, 16], strides = [1, 1]} : vector<4x16xf32> to vector<1x16xf32>
    %1007 = vector.broadcast %1005 : vector<1x1xf32> to vector<1x16xf32>
    %1008 = arith.mulf %1007, %1006 : vector<1x16xf32>
    %1009 = arith.addf %962, %1008 : vector<1x16xf32>
    %1010 = vector.extract_strided_slice %280 {offsets = [0, 1], sizes = [1, 1], strides = [1, 1]} : vector<1x2xf32> to vector<1x1xf32>
    %1011 = vector.extract_strided_slice %961 {offsets = [1, 0], sizes = [1, 16], strides = [1, 1]} : vector<4x16xf32> to vector<1x16xf32>
    %1012 = vector.broadcast %1010 : vector<1x1xf32> to vector<1x16xf32>
    %1013 = arith.mulf %1012, %1011 : vector<1x16xf32>
    %1014 = arith.addf %1009, %1013 : vector<1x16xf32>
    %1015 = vector.extract_strided_slice %910 {offsets = [0, 0], sizes = [1, 1], strides = [1, 1]} : vector<1x2xf32> to vector<1x1xf32>
    %1016 = vector.extract_strided_slice %961 {offsets = [2, 0], sizes = [1, 16], strides = [1, 1]} : vector<4x16xf32> to vector<1x16xf32>
    %1017 = vector.broadcast %1015 : vector<1x1xf32> to vector<1x16xf32>
    %1018 = arith.mulf %1017, %1016 : vector<1x16xf32>
    %1019 = arith.addf %1014, %1018 : vector<1x16xf32>
    %1020 = vector.extract_strided_slice %910 {offsets = [0, 1], sizes = [1, 1], strides = [1, 1]} : vector<1x2xf32> to vector<1x1xf32>
    %1021 = vector.extract_strided_slice %961 {offsets = [3, 0], sizes = [1, 16], strides = [1, 1]} : vector<4x16xf32> to vector<1x16xf32>
    %1022 = vector.broadcast %1020 : vector<1x1xf32> to vector<1x16xf32>
    %1023 = arith.mulf %1022, %1021 : vector<1x16xf32>
    %1024 = arith.addf %1019, %1023 : vector<1x16xf32>
    %c2_149 = arith.constant 2 : index
    %c0_150 = arith.constant 0 : index
    %1025 = vector.load %arg11[%c2_149, %c0_150] : memref<15x16xf32, #tpu.memory_space<vmem>>, vector<1x16xf32>
    tpu.vector_store %arg11[%c2_149, %c0_150], %1024 {strides = array<i32>} : memref<15x16xf32, #tpu.memory_space<vmem>>, vector<1x16xf32>,
    %1026 = vector.extract_strided_slice %305 {offsets = [0, 0], sizes = [1, 1], strides = [1, 1]} : vector<1x2xf32> to vector<1x1xf32>
    %1027 = vector.extract_strided_slice %961 {offsets = [0, 0], sizes = [1, 16], strides = [1, 1]} : vector<4x16xf32> to vector<1x16xf32>
    %1028 = vector.broadcast %1026 : vector<1x1xf32> to vector<1x16xf32>
    %1029 = arith.mulf %1028, %1027 : vector<1x16xf32>
    %1030 = arith.addf %962, %1029 : vector<1x16xf32>
    %1031 = vector.extract_strided_slice %305 {offsets = [0, 1], sizes = [1, 1], strides = [1, 1]} : vector<1x2xf32> to vector<1x1xf32>
    %1032 = vector.extract_strided_slice %961 {offsets = [1, 0], sizes = [1, 16], strides = [1, 1]} : vector<4x16xf32> to vector<1x16xf32>
    %1033 = vector.broadcast %1031 : vector<1x1xf32> to vector<1x16xf32>
    %1034 = arith.mulf %1033, %1032 : vector<1x16xf32>
    %1035 = arith.addf %1030, %1034 : vector<1x16xf32>
    %1036 = vector.extract_strided_slice %885 {offsets = [0, 0], sizes = [1, 1], strides = [1, 1]} : vector<1x2xf32> to vector<1x1xf32>
    %1037 = vector.extract_strided_slice %961 {offsets = [2, 0], sizes = [1, 16], strides = [1, 1]} : vector<4x16xf32> to vector<1x16xf32>
    %1038 = vector.broadcast %1036 : vector<1x1xf32> to vector<1x16xf32>
    %1039 = arith.mulf %1038, %1037 : vector<1x16xf32>
    %1040 = arith.addf %1035, %1039 : vector<1x16xf32>
    %1041 = vector.extract_strided_slice %885 {offsets = [0, 1], sizes = [1, 1], strides = [1, 1]} : vector<1x2xf32> to vector<1x1xf32>
    %1042 = vector.extract_strided_slice %961 {offsets = [3, 0], sizes = [1, 16], strides = [1, 1]} : vector<4x16xf32> to vector<1x16xf32>
    %1043 = vector.broadcast %1041 : vector<1x1xf32> to vector<1x16xf32>
    %1044 = arith.mulf %1043, %1042 : vector<1x16xf32>
    %1045 = arith.addf %1040, %1044 : vector<1x16xf32>
    %c3_151 = arith.constant 3 : index
    %c0_152 = arith.constant 0 : index
    %1046 = vector.load %arg11[%c3_151, %c0_152] : memref<15x16xf32, #tpu.memory_space<vmem>>, vector<1x16xf32>
    tpu.vector_store %arg11[%c3_151, %c0_152], %1045 {strides = array<i32>} : memref<15x16xf32, #tpu.memory_space<vmem>>, vector<1x16xf32>,
    %1047 = vector.extract_strided_slice %330 {offsets = [0, 0], sizes = [1, 1], strides = [1, 1]} : vector<1x2xf32> to vector<1x1xf32>
    %1048 = vector.extract_strided_slice %961 {offsets = [0, 0], sizes = [1, 16], strides = [1, 1]} : vector<4x16xf32> to vector<1x16xf32>
    %1049 = vector.broadcast %1047 : vector<1x1xf32> to vector<1x16xf32>
    %1050 = arith.mulf %1049, %1048 : vector<1x16xf32>
    %1051 = arith.addf %962, %1050 : vector<1x16xf32>
    %1052 = vector.extract_strided_slice %330 {offsets = [0, 1], sizes = [1, 1], strides = [1, 1]} : vector<1x2xf32> to vector<1x1xf32>
    %1053 = vector.extract_strided_slice %961 {offsets = [1, 0], sizes = [1, 16], strides = [1, 1]} : vector<4x16xf32> to vector<1x16xf32>
    %1054 = vector.broadcast %1052 : vector<1x1xf32> to vector<1x16xf32>
    %1055 = arith.mulf %1054, %1053 : vector<1x16xf32>
    %1056 = arith.addf %1051, %1055 : vector<1x16xf32>
    %1057 = vector.extract_strided_slice %860 {offsets = [0, 0], sizes = [1, 1], strides = [1, 1]} : vector<1x2xf32> to vector<1x1xf32>
    %1058 = vector.extract_strided_slice %961 {offsets = [2, 0], sizes = [1, 16], strides = [1, 1]} : vector<4x16xf32> to vector<1x16xf32>
    %1059 = vector.broadcast %1057 : vector<1x1xf32> to vector<1x16xf32>
    %1060 = arith.mulf %1059, %1058 : vector<1x16xf32>
    %1061 = arith.addf %1056, %1060 : vector<1x16xf32>
    %1062 = vector.extract_strided_slice %860 {offsets = [0, 1], sizes = [1, 1], strides = [1, 1]} : vector<1x2xf32> to vector<1x1xf32>
    %1063 = vector.extract_strided_slice %961 {offsets = [3, 0], sizes = [1, 16], strides = [1, 1]} : vector<4x16xf32> to vector<1x16xf32>
    %1064 = vector.broadcast %1062 : vector<1x1xf32> to vector<1x16xf32>
    %1065 = arith.mulf %1064, %1063 : vector<1x16xf32>
    %1066 = arith.addf %1061, %1065 : vector<1x16xf32>
    %c4_153 = arith.constant 4 : index
    %c0_154 = arith.constant 0 : index
    %1067 = vector.load %arg11[%c4_153, %c0_154] : memref<15x16xf32, #tpu.memory_space<vmem>>, vector<1x16xf32>
    tpu.vector_store %arg11[%c4_153, %c0_154], %1066 {strides = array<i32>} : memref<15x16xf32, #tpu.memory_space<vmem>>, vector<1x16xf32>,
    %1068 = vector.extract_strided_slice %355 {offsets = [0, 0], sizes = [1, 1], strides = [1, 1]} : vector<1x2xf32> to vector<1x1xf32>
    %1069 = vector.extract_strided_slice %961 {offsets = [0, 0], sizes = [1, 16], strides = [1, 1]} : vector<4x16xf32> to vector<1x16xf32>
    %1070 = vector.broadcast %1068 : vector<1x1xf32> to vector<1x16xf32>
    %1071 = arith.mulf %1070, %1069 : vector<1x16xf32>
    %1072 = arith.addf %962, %1071 : vector<1x16xf32>
    %1073 = vector.extract_strided_slice %355 {offsets = [0, 1], sizes = [1, 1], strides = [1, 1]} : vector<1x2xf32> to vector<1x1xf32>
    %1074 = vector.extract_strided_slice %961 {offsets = [1, 0], sizes = [1, 16], strides = [1, 1]} : vector<4x16xf32> to vector<1x16xf32>
    %1075 = vector.broadcast %1073 : vector<1x1xf32> to vector<1x16xf32>
    %1076 = arith.mulf %1075, %1074 : vector<1x16xf32>
    %1077 = arith.addf %1072, %1076 : vector<1x16xf32>
    %1078 = vector.extract_strided_slice %835 {offsets = [0, 0], sizes = [1, 1], strides = [1, 1]} : vector<1x2xf32> to vector<1x1xf32>
    %1079 = vector.extract_strided_slice %961 {offsets = [2, 0], sizes = [1, 16], strides = [1, 1]} : vector<4x16xf32> to vector<1x16xf32>
    %1080 = vector.broadcast %1078 : vector<1x1xf32> to vector<1x16xf32>
    %1081 = arith.mulf %1080, %1079 : vector<1x16xf32>
    %1082 = arith.addf %1077, %1081 : vector<1x16xf32>
    %1083 = vector.extract_strided_slice %835 {offsets = [0, 1], sizes = [1, 1], strides = [1, 1]} : vector<1x2xf32> to vector<1x1xf32>
    %1084 = vector.extract_strided_slice %961 {offsets = [3, 0], sizes = [1, 16], strides = [1, 1]} : vector<4x16xf32> to vector<1x16xf32>
    %1085 = vector.broadcast %1083 : vector<1x1xf32> to vector<1x16xf32>
    %1086 = arith.mulf %1085, %1084 : vector<1x16xf32>
    %1087 = arith.addf %1082, %1086 : vector<1x16xf32>
    %c5_155 = arith.constant 5 : index
    %c0_156 = arith.constant 0 : index
    %1088 = vector.load %arg11[%c5_155, %c0_156] : memref<15x16xf32, #tpu.memory_space<vmem>>, vector<1x16xf32>
    tpu.vector_store %arg11[%c5_155, %c0_156], %1087 {strides = array<i32>} : memref<15x16xf32, #tpu.memory_space<vmem>>, vector<1x16xf32>,
    %1089 = vector.extract_strided_slice %380 {offsets = [0, 0], sizes = [1, 1], strides = [1, 1]} : vector<1x2xf32> to vector<1x1xf32>
    %1090 = vector.extract_strided_slice %961 {offsets = [0, 0], sizes = [1, 16], strides = [1, 1]} : vector<4x16xf32> to vector<1x16xf32>
    %1091 = vector.broadcast %1089 : vector<1x1xf32> to vector<1x16xf32>
    %1092 = arith.mulf %1091, %1090 : vector<1x16xf32>
    %1093 = arith.addf %962, %1092 : vector<1x16xf32>
    %1094 = vector.extract_strided_slice %380 {offsets = [0, 1], sizes = [1, 1], strides = [1, 1]} : vector<1x2xf32> to vector<1x1xf32>
    %1095 = vector.extract_strided_slice %961 {offsets = [1, 0], sizes = [1, 16], strides = [1, 1]} : vector<4x16xf32> to vector<1x16xf32>
    %1096 = vector.broadcast %1094 : vector<1x1xf32> to vector<1x16xf32>
    %1097 = arith.mulf %1096, %1095 : vector<1x16xf32>
    %1098 = arith.addf %1093, %1097 : vector<1x16xf32>
    %1099 = vector.extract_strided_slice %810 {offsets = [0, 0], sizes = [1, 1], strides = [1, 1]} : vector<1x2xf32> to vector<1x1xf32>
    %1100 = vector.extract_strided_slice %961 {offsets = [2, 0], sizes = [1, 16], strides = [1, 1]} : vector<4x16xf32> to vector<1x16xf32>
    %1101 = vector.broadcast %1099 : vector<1x1xf32> to vector<1x16xf32>
    %1102 = arith.mulf %1101, %1100 : vector<1x16xf32>
    %1103 = arith.addf %1098, %1102 : vector<1x16xf32>
    %1104 = vector.extract_strided_slice %810 {offsets = [0, 1], sizes = [1, 1], strides = [1, 1]} : vector<1x2xf32> to vector<1x1xf32>
    %1105 = vector.extract_strided_slice %961 {offsets = [3, 0], sizes = [1, 16], strides = [1, 1]} : vector<4x16xf32> to vector<1x16xf32>
    %1106 = vector.broadcast %1104 : vector<1x1xf32> to vector<1x16xf32>
    %1107 = arith.mulf %1106, %1105 : vector<1x16xf32>
    %1108 = arith.addf %1103, %1107 : vector<1x16xf32>
    %c6_157 = arith.constant 6 : index
    %c0_158 = arith.constant 0 : index
    %1109 = vector.load %arg11[%c6_157, %c0_158] : memref<15x16xf32, #tpu.memory_space<vmem>>, vector<1x16xf32>
    tpu.vector_store %arg11[%c6_157, %c0_158], %1108 {strides = array<i32>} : memref<15x16xf32, #tpu.memory_space<vmem>>, vector<1x16xf32>,
    %1110 = vector.extract_strided_slice %405 {offsets = [0, 0], sizes = [1, 1], strides = [1, 1]} : vector<1x2xf32> to vector<1x1xf32>
    %1111 = vector.extract_strided_slice %961 {offsets = [0, 0], sizes = [1, 16], strides = [1, 1]} : vector<4x16xf32> to vector<1x16xf32>
    %1112 = vector.broadcast %1110 : vector<1x1xf32> to vector<1x16xf32>
    %1113 = arith.mulf %1112, %1111 : vector<1x16xf32>
    %1114 = arith.addf %962, %1113 : vector<1x16xf32>
    %1115 = vector.extract_strided_slice %405 {offsets = [0, 1], sizes = [1, 1], strides = [1, 1]} : vector<1x2xf32> to vector<1x1xf32>
    %1116 = vector.extract_strided_slice %961 {offsets = [1, 0], sizes = [1, 16], strides = [1, 1]} : vector<4x16xf32> to vector<1x16xf32>
    %1117 = vector.broadcast %1115 : vector<1x1xf32> to vector<1x16xf32>
    %1118 = arith.mulf %1117, %1116 : vector<1x16xf32>
    %1119 = arith.addf %1114, %1118 : vector<1x16xf32>
    %1120 = vector.extract_strided_slice %785 {offsets = [0, 0], sizes = [1, 1], strides = [1, 1]} : vector<1x2xf32> to vector<1x1xf32>
    %1121 = vector.extract_strided_slice %961 {offsets = [2, 0], sizes = [1, 16], strides = [1, 1]} : vector<4x16xf32> to vector<1x16xf32>
    %1122 = vector.broadcast %1120 : vector<1x1xf32> to vector<1x16xf32>
    %1123 = arith.mulf %1122, %1121 : vector<1x16xf32>
    %1124 = arith.addf %1119, %1123 : vector<1x16xf32>
    %1125 = vector.extract_strided_slice %785 {offsets = [0, 1], sizes = [1, 1], strides = [1, 1]} : vector<1x2xf32> to vector<1x1xf32>
    %1126 = vector.extract_strided_slice %961 {offsets = [3, 0], sizes = [1, 16], strides = [1, 1]} : vector<4x16xf32> to vector<1x16xf32>
    %1127 = vector.broadcast %1125 : vector<1x1xf32> to vector<1x16xf32>
    %1128 = arith.mulf %1127, %1126 : vector<1x16xf32>
    %1129 = arith.addf %1124, %1128 : vector<1x16xf32>
    %c7_159 = arith.constant 7 : index
    %c0_160 = arith.constant 0 : index
    %1130 = vector.load %arg11[%c7_159, %c0_160] : memref<15x16xf32, #tpu.memory_space<vmem>>, vector<1x16xf32>
    tpu.vector_store %arg11[%c7_159, %c0_160], %1129 {strides = array<i32>} : memref<15x16xf32, #tpu.memory_space<vmem>>, vector<1x16xf32>,
    %1131 = vector.extract_strided_slice %430 {offsets = [0, 0], sizes = [1, 1], strides = [1, 1]} : vector<1x2xf32> to vector<1x1xf32>
    %1132 = vector.extract_strided_slice %961 {offsets = [0, 0], sizes = [1, 16], strides = [1, 1]} : vector<4x16xf32> to vector<1x16xf32>
    %1133 = vector.broadcast %1131 : vector<1x1xf32> to vector<1x16xf32>
    %1134 = arith.mulf %1133, %1132 : vector<1x16xf32>
    %1135 = arith.addf %962, %1134 : vector<1x16xf32>
    %1136 = vector.extract_strided_slice %430 {offsets = [0, 1], sizes = [1, 1], strides = [1, 1]} : vector<1x2xf32> to vector<1x1xf32>
    %1137 = vector.extract_strided_slice %961 {offsets = [1, 0], sizes = [1, 16], strides = [1, 1]} : vector<4x16xf32> to vector<1x16xf32>
    %1138 = vector.broadcast %1136 : vector<1x1xf32> to vector<1x16xf32>
    %1139 = arith.mulf %1138, %1137 : vector<1x16xf32>
    %1140 = arith.addf %1135, %1139 : vector<1x16xf32>
    %1141 = vector.extract_strided_slice %760 {offsets = [0, 0], sizes = [1, 1], strides = [1, 1]} : vector<1x2xf32> to vector<1x1xf32>
    %1142 = vector.extract_strided_slice %961 {offsets = [2, 0], sizes = [1, 16], strides = [1, 1]} : vector<4x16xf32> to vector<1x16xf32>
    %1143 = vector.broadcast %1141 : vector<1x1xf32> to vector<1x16xf32>
    %1144 = arith.mulf %1143, %1142 : vector<1x16xf32>
    %1145 = arith.addf %1140, %1144 : vector<1x16xf32>
    %1146 = vector.extract_strided_slice %760 {offsets = [0, 1], sizes = [1, 1], strides = [1, 1]} : vector<1x2xf32> to vector<1x1xf32>
    %1147 = vector.extract_strided_slice %961 {offsets = [3, 0], sizes = [1, 16], strides = [1, 1]} : vector<4x16xf32> to vector<1x16xf32>
    %1148 = vector.broadcast %1146 : vector<1x1xf32> to vector<1x16xf32>
    %1149 = arith.mulf %1148, %1147 : vector<1x16xf32>
    %1150 = arith.addf %1145, %1149 : vector<1x16xf32>
    %c8_161 = arith.constant 8 : index
    %c0_162 = arith.constant 0 : index
    %1151 = vector.load %arg11[%c8_161, %c0_162] : memref<15x16xf32, #tpu.memory_space<vmem>>, vector<1x16xf32>
    tpu.vector_store %arg11[%c8_161, %c0_162], %1150 {strides = array<i32>} : memref<15x16xf32, #tpu.memory_space<vmem>>, vector<1x16xf32>,
    %1152 = vector.extract_strided_slice %455 {offsets = [0, 0], sizes = [1, 1], strides = [1, 1]} : vector<1x2xf32> to vector<1x1xf32>
    %1153 = vector.extract_strided_slice %961 {offsets = [0, 0], sizes = [1, 16], strides = [1, 1]} : vector<4x16xf32> to vector<1x16xf32>
    %1154 = vector.broadcast %1152 : vector<1x1xf32> to vector<1x16xf32>
    %1155 = arith.mulf %1154, %1153 : vector<1x16xf32>
    %1156 = arith.addf %962, %1155 : vector<1x16xf32>
    %1157 = vector.extract_strided_slice %455 {offsets = [0, 1], sizes = [1, 1], strides = [1, 1]} : vector<1x2xf32> to vector<1x1xf32>
    %1158 = vector.extract_strided_slice %961 {offsets = [1, 0], sizes = [1, 16], strides = [1, 1]} : vector<4x16xf32> to vector<1x16xf32>
    %1159 = vector.broadcast %1157 : vector<1x1xf32> to vector<1x16xf32>
    %1160 = arith.mulf %1159, %1158 : vector<1x16xf32>
    %1161 = arith.addf %1156, %1160 : vector<1x16xf32>
    %1162 = vector.extract_strided_slice %735 {offsets = [0, 0], sizes = [1, 1], strides = [1, 1]} : vector<1x2xf32> to vector<1x1xf32>
    %1163 = vector.extract_strided_slice %961 {offsets = [2, 0], sizes = [1, 16], strides = [1, 1]} : vector<4x16xf32> to vector<1x16xf32>
    %1164 = vector.broadcast %1162 : vector<1x1xf32> to vector<1x16xf32>
    %1165 = arith.mulf %1164, %1163 : vector<1x16xf32>
    %1166 = arith.addf %1161, %1165 : vector<1x16xf32>
    %1167 = vector.extract_strided_slice %735 {offsets = [0, 1], sizes = [1, 1], strides = [1, 1]} : vector<1x2xf32> to vector<1x1xf32>
    %1168 = vector.extract_strided_slice %961 {offsets = [3, 0], sizes = [1, 16], strides = [1, 1]} : vector<4x16xf32> to vector<1x16xf32>
    %1169 = vector.broadcast %1167 : vector<1x1xf32> to vector<1x16xf32>
    %1170 = arith.mulf %1169, %1168 : vector<1x16xf32>
    %1171 = arith.addf %1166, %1170 : vector<1x16xf32>
    %c9_163 = arith.constant 9 : index
    %c0_164 = arith.constant 0 : index
    %1172 = vector.load %arg11[%c9_163, %c0_164] : memref<15x16xf32, #tpu.memory_space<vmem>>, vector<1x16xf32>
    tpu.vector_store %arg11[%c9_163, %c0_164], %1171 {strides = array<i32>} : memref<15x16xf32, #tpu.memory_space<vmem>>, vector<1x16xf32>,
    %1173 = vector.extract_strided_slice %480 {offsets = [0, 0], sizes = [1, 1], strides = [1, 1]} : vector<1x2xf32> to vector<1x1xf32>
    %1174 = vector.extract_strided_slice %961 {offsets = [0, 0], sizes = [1, 16], strides = [1, 1]} : vector<4x16xf32> to vector<1x16xf32>
    %1175 = vector.broadcast %1173 : vector<1x1xf32> to vector<1x16xf32>
    %1176 = arith.mulf %1175, %1174 : vector<1x16xf32>
    %1177 = arith.addf %962, %1176 : vector<1x16xf32>
    %1178 = vector.extract_strided_slice %480 {offsets = [0, 1], sizes = [1, 1], strides = [1, 1]} : vector<1x2xf32> to vector<1x1xf32>
    %1179 = vector.extract_strided_slice %961 {offsets = [1, 0], sizes = [1, 16], strides = [1, 1]} : vector<4x16xf32> to vector<1x16xf32>
    %1180 = vector.broadcast %1178 : vector<1x1xf32> to vector<1x16xf32>
    %1181 = arith.mulf %1180, %1179 : vector<1x16xf32>
    %1182 = arith.addf %1177, %1181 : vector<1x16xf32>
    %1183 = vector.extract_strided_slice %710 {offsets = [0, 0], sizes = [1, 1], strides = [1, 1]} : vector<1x2xf32> to vector<1x1xf32>
    %1184 = vector.extract_strided_slice %961 {offsets = [2, 0], sizes = [1, 16], strides = [1, 1]} : vector<4x16xf32> to vector<1x16xf32>
    %1185 = vector.broadcast %1183 : vector<1x1xf32> to vector<1x16xf32>
    %1186 = arith.mulf %1185, %1184 : vector<1x16xf32>
    %1187 = arith.addf %1182, %1186 : vector<1x16xf32>
    %1188 = vector.extract_strided_slice %710 {offsets = [0, 1], sizes = [1, 1], strides = [1, 1]} : vector<1x2xf32> to vector<1x1xf32>
    %1189 = vector.extract_strided_slice %961 {offsets = [3, 0], sizes = [1, 16], strides = [1, 1]} : vector<4x16xf32> to vector<1x16xf32>
    %1190 = vector.broadcast %1188 : vector<1x1xf32> to vector<1x16xf32>
    %1191 = arith.mulf %1190, %1189 : vector<1x16xf32>
    %1192 = arith.addf %1187, %1191 : vector<1x16xf32>
    %c10_165 = arith.constant 10 : index
    %c0_166 = arith.constant 0 : index
    %1193 = vector.load %arg11[%c10_165, %c0_166] : memref<15x16xf32, #tpu.memory_space<vmem>>, vector<1x16xf32>
    tpu.vector_store %arg11[%c10_165, %c0_166], %1192 {strides = array<i32>} : memref<15x16xf32, #tpu.memory_space<vmem>>, vector<1x16xf32>,
    %1194 = vector.extract_strided_slice %505 {offsets = [0, 0], sizes = [1, 1], strides = [1, 1]} : vector<1x2xf32> to vector<1x1xf32>
    %1195 = vector.extract_strided_slice %961 {offsets = [0, 0], sizes = [1, 16], strides = [1, 1]} : vector<4x16xf32> to vector<1x16xf32>
    %1196 = vector.broadcast %1194 : vector<1x1xf32> to vector<1x16xf32>
    %1197 = arith.mulf %1196, %1195 : vector<1x16xf32>
    %1198 = arith.addf %962, %1197 : vector<1x16xf32>
    %1199 = vector.extract_strided_slice %505 {offsets = [0, 1], sizes = [1, 1], strides = [1, 1]} : vector<1x2xf32> to vector<1x1xf32>
    %1200 = vector.extract_strided_slice %961 {offsets = [1, 0], sizes = [1, 16], strides = [1, 1]} : vector<4x16xf32> to vector<1x16xf32>
    %1201 = vector.broadcast %1199 : vector<1x1xf32> to vector<1x16xf32>
    %1202 = arith.mulf %1201, %1200 : vector<1x16xf32>
    %1203 = arith.addf %1198, %1202 : vector<1x16xf32>
    %1204 = vector.extract_strided_slice %685 {offsets = [0, 0], sizes = [1, 1], strides = [1, 1]} : vector<1x2xf32> to vector<1x1xf32>
    %1205 = vector.extract_strided_slice %961 {offsets = [2, 0], sizes = [1, 16], strides = [1, 1]} : vector<4x16xf32> to vector<1x16xf32>
    %1206 = vector.broadcast %1204 : vector<1x1xf32> to vector<1x16xf32>
    %1207 = arith.mulf %1206, %1205 : vector<1x16xf32>
    %1208 = arith.addf %1203, %1207 : vector<1x16xf32>
    %1209 = vector.extract_strided_slice %685 {offsets = [0, 1], sizes = [1, 1], strides = [1, 1]} : vector<1x2xf32> to vector<1x1xf32>
    %1210 = vector.extract_strided_slice %961 {offsets = [3, 0], sizes = [1, 16], strides = [1, 1]} : vector<4x16xf32> to vector<1x16xf32>
    %1211 = vector.broadcast %1209 : vector<1x1xf32> to vector<1x16xf32>
    %1212 = arith.mulf %1211, %1210 : vector<1x16xf32>
    %1213 = arith.addf %1208, %1212 : vector<1x16xf32>
    %c11_167 = arith.constant 11 : index
    %c0_168 = arith.constant 0 : index
    %1214 = vector.load %arg11[%c11_167, %c0_168] : memref<15x16xf32, #tpu.memory_space<vmem>>, vector<1x16xf32>
    tpu.vector_store %arg11[%c11_167, %c0_168], %1213 {strides = array<i32>} : memref<15x16xf32, #tpu.memory_space<vmem>>, vector<1x16xf32>,
    %1215 = vector.extract_strided_slice %530 {offsets = [0, 0], sizes = [1, 1], strides = [1, 1]} : vector<1x2xf32> to vector<1x1xf32>
    %1216 = vector.extract_strided_slice %961 {offsets = [0, 0], sizes = [1, 16], strides = [1, 1]} : vector<4x16xf32> to vector<1x16xf32>
    %1217 = vector.broadcast %1215 : vector<1x1xf32> to vector<1x16xf32>
    %1218 = arith.mulf %1217, %1216 : vector<1x16xf32>
    %1219 = arith.addf %962, %1218 : vector<1x16xf32>
    %1220 = vector.extract_strided_slice %530 {offsets = [0, 1], sizes = [1, 1], strides = [1, 1]} : vector<1x2xf32> to vector<1x1xf32>
    %1221 = vector.extract_strided_slice %961 {offsets = [1, 0], sizes = [1, 16], strides = [1, 1]} : vector<4x16xf32> to vector<1x16xf32>
    %1222 = vector.broadcast %1220 : vector<1x1xf32> to vector<1x16xf32>
    %1223 = arith.mulf %1222, %1221 : vector<1x16xf32>
    %1224 = arith.addf %1219, %1223 : vector<1x16xf32>
    %1225 = vector.extract_strided_slice %660 {offsets = [0, 0], sizes = [1, 1], strides = [1, 1]} : vector<1x2xf32> to vector<1x1xf32>
    %1226 = vector.extract_strided_slice %961 {offsets = [2, 0], sizes = [1, 16], strides = [1, 1]} : vector<4x16xf32> to vector<1x16xf32>
    %1227 = vector.broadcast %1225 : vector<1x1xf32> to vector<1x16xf32>
    %1228 = arith.mulf %1227, %1226 : vector<1x16xf32>
    %1229 = arith.addf %1224, %1228 : vector<1x16xf32>
    %1230 = vector.extract_strided_slice %660 {offsets = [0, 1], sizes = [1, 1], strides = [1, 1]} : vector<1x2xf32> to vector<1x1xf32>
    %1231 = vector.extract_strided_slice %961 {offsets = [3, 0], sizes = [1, 16], strides = [1, 1]} : vector<4x16xf32> to vector<1x16xf32>
    %1232 = vector.broadcast %1230 : vector<1x1xf32> to vector<1x16xf32>
    %1233 = arith.mulf %1232, %1231 : vector<1x16xf32>
    %1234 = arith.addf %1229, %1233 : vector<1x16xf32>
    %c12_169 = arith.constant 12 : index
    %c0_170 = arith.constant 0 : index
    %1235 = vector.load %arg11[%c12_169, %c0_170] : memref<15x16xf32, #tpu.memory_space<vmem>>, vector<1x16xf32>
    tpu.vector_store %arg11[%c12_169, %c0_170], %1234 {strides = array<i32>} : memref<15x16xf32, #tpu.memory_space<vmem>>, vector<1x16xf32>,
    %1236 = vector.extract_strided_slice %555 {offsets = [0, 0], sizes = [1, 1], strides = [1, 1]} : vector<1x2xf32> to vector<1x1xf32>
    %1237 = vector.extract_strided_slice %961 {offsets = [0, 0], sizes = [1, 16], strides = [1, 1]} : vector<4x16xf32> to vector<1x16xf32>
    %1238 = vector.broadcast %1236 : vector<1x1xf32> to vector<1x16xf32>
    %1239 = arith.mulf %1238, %1237 : vector<1x16xf32>
    %1240 = arith.addf %962, %1239 : vector<1x16xf32>
    %1241 = vector.extract_strided_slice %555 {offsets = [0, 1], sizes = [1, 1], strides = [1, 1]} : vector<1x2xf32> to vector<1x1xf32>
    %1242 = vector.extract_strided_slice %961 {offsets = [1, 0], sizes = [1, 16], strides = [1, 1]} : vector<4x16xf32> to vector<1x16xf32>
    %1243 = vector.broadcast %1241 : vector<1x1xf32> to vector<1x16xf32>
    %1244 = arith.mulf %1243, %1242 : vector<1x16xf32>
    %1245 = arith.addf %1240, %1244 : vector<1x16xf32>
    %1246 = vector.extract_strided_slice %635 {offsets = [0, 0], sizes = [1, 1], strides = [1, 1]} : vector<1x2xf32> to vector<1x1xf32>
    %1247 = vector.extract_strided_slice %961 {offsets = [2, 0], sizes = [1, 16], strides = [1, 1]} : vector<4x16xf32> to vector<1x16xf32>
    %1248 = vector.broadcast %1246 : vector<1x1xf32> to vector<1x16xf32>
    %1249 = arith.mulf %1248, %1247 : vector<1x16xf32>
    %1250 = arith.addf %1245, %1249 : vector<1x16xf32>
    %1251 = vector.extract_strided_slice %635 {offsets = [0, 1], sizes = [1, 1], strides = [1, 1]} : vector<1x2xf32> to vector<1x1xf32>
    %1252 = vector.extract_strided_slice %961 {offsets = [3, 0], sizes = [1, 16], strides = [1, 1]} : vector<4x16xf32> to vector<1x16xf32>
    %1253 = vector.broadcast %1251 : vector<1x1xf32> to vector<1x16xf32>
    %1254 = arith.mulf %1253, %1252 : vector<1x16xf32>
    %1255 = arith.addf %1250, %1254 : vector<1x16xf32>
    %c13_171 = arith.constant 13 : index
    %c0_172 = arith.constant 0 : index
    %1256 = vector.load %arg11[%c13_171, %c0_172] : memref<15x16xf32, #tpu.memory_space<vmem>>, vector<1x16xf32>
    tpu.vector_store %arg11[%c13_171, %c0_172], %1255 {strides = array<i32>} : memref<15x16xf32, #tpu.memory_space<vmem>>, vector<1x16xf32>,
    %1257 = vector.extract_strided_slice %580 {offsets = [0, 0], sizes = [1, 1], strides = [1, 1]} : vector<1x2xf32> to vector<1x1xf32>
    %1258 = vector.extract_strided_slice %961 {offsets = [0, 0], sizes = [1, 16], strides = [1, 1]} : vector<4x16xf32> to vector<1x16xf32>
    %1259 = vector.broadcast %1257 : vector<1x1xf32> to vector<1x16xf32>
    %1260 = arith.mulf %1259, %1258 : vector<1x16xf32>
    %1261 = arith.addf %962, %1260 : vector<1x16xf32>
    %1262 = vector.extract_strided_slice %580 {offsets = [0, 1], sizes = [1, 1], strides = [1, 1]} : vector<1x2xf32> to vector<1x1xf32>
    %1263 = vector.extract_strided_slice %961 {offsets = [1, 0], sizes = [1, 16], strides = [1, 1]} : vector<4x16xf32> to vector<1x16xf32>
    %1264 = vector.broadcast %1262 : vector<1x1xf32> to vector<1x16xf32>
    %1265 = arith.mulf %1264, %1263 : vector<1x16xf32>
    %1266 = arith.addf %1261, %1265 : vector<1x16xf32>
    %1267 = vector.extract_strided_slice %610 {offsets = [0, 0], sizes = [1, 1], strides = [1, 1]} : vector<1x2xf32> to vector<1x1xf32>
    %1268 = vector.extract_strided_slice %961 {offsets = [2, 0], sizes = [1, 16], strides = [1, 1]} : vector<4x16xf32> to vector<1x16xf32>
    %1269 = vector.broadcast %1267 : vector<1x1xf32> to vector<1x16xf32>
    %1270 = arith.mulf %1269, %1268 : vector<1x16xf32>
    %1271 = arith.addf %1266, %1270 : vector<1x16xf32>
    %1272 = vector.extract_strided_slice %610 {offsets = [0, 1], sizes = [1, 1], strides = [1, 1]} : vector<1x2xf32> to vector<1x1xf32>
    %1273 = vector.extract_strided_slice %961 {offsets = [3, 0], sizes = [1, 16], strides = [1, 1]} : vector<4x16xf32> to vector<1x16xf32>
    %1274 = vector.broadcast %1272 : vector<1x1xf32> to vector<1x16xf32>
    %1275 = arith.mulf %1274, %1273 : vector<1x16xf32>
    %1276 = arith.addf %1271, %1275 : vector<1x16xf32>
    %c14_173 = arith.constant 14 : index
    %c0_174 = arith.constant 0 : index
    %1277 = vector.load %arg11[%c14_173, %c0_174] : memref<15x16xf32, #tpu.memory_space<vmem>>, vector<1x16xf32>
    tpu.vector_store %arg11[%c14_173, %c0_174], %1276 {strides = array<i32>} : memref<15x16xf32, #tpu.memory_space<vmem>>, vector<1x16xf32>,
    %c0_175 = arith.constant 0 : index
    %c0_176 = arith.constant 0 : index
    %1278 = vector.load %arg7[%c0_175, %c0_176] : memref<2x16xf32, #tpu.memory_space<vmem>>, vector<2x16xf32>
    %1279 = vector.extract_strided_slice %1278 {offsets = [0, 0], sizes = [2, 8], strides = [1, 1]} : vector<2x16xf32> to vector<2x8xf32>
    %1280 = vector.extract_strided_slice %1279 {offsets = [0, 0], sizes = [1, 8], strides = [1, 1]} : vector<2x8xf32> to vector<1x8xf32>
    %1281 = vector.extract_strided_slice %1279 {offsets = [1, 0], sizes = [1, 8], strides = [1, 1]} : vector<2x8xf32> to vector<1x8xf32>
    %cst_177 = arith.constant 0.000000e+00 : f32
    %1282 = vector.broadcast %cst_177 : f32 to vector<1x2xf32>
    %cst_178 = arith.constant 0.000000e+00 : f32
    %1283 = vector.broadcast %cst_178 : f32 to vector<1x2xf32>
    %c0_179 = arith.constant 0 : index
    %c0_180 = arith.constant 0 : index
    %1284 = vector.load %arg11[%c0_179, %c0_180] : memref<15x16xf32, #tpu.memory_space<vmem>>, vector<1x16xf32>
    %1285 = vector.extract_strided_slice %1284 {offsets = [0, 0], sizes = [1, 8], strides = [1, 1]} : vector<1x16xf32> to vector<1x8xf32>
    %1286 = vector.extract_strided_slice %1282 {offsets = [0, 0], sizes = [1, 1], strides = [1, 1]} : vector<1x2xf32> to vector<1x1xf32>
    %1287 = vector.broadcast %1286 : vector<1x1xf32> to vector<1x8xf32>
    %1288 = arith.mulf %1287, %1280 : vector<1x8xf32>
    %1289 = arith.addf %1285, %1288 : vector<1x8xf32>
    %1290 = vector.extract_strided_slice %1282 {offsets = [0, 1], sizes = [1, 1], strides = [1, 1]} : vector<1x2xf32> to vector<1x1xf32>
    %1291 = vector.broadcast %1290 : vector<1x1xf32> to vector<1x8xf32>
    %1292 = arith.mulf %1291, %1281 : vector<1x8xf32>
    %1293 = arith.addf %1289, %1292 : vector<1x8xf32>
    %1294 = arith.negf %1293 : vector<1x8xf32>
    %1295 = math.exp %1294 : vector<1x8xf32>
    %cst_181 = arith.constant 1.000000e+00 : f32
    %1296 = vector.broadcast %cst_181 : f32 to vector<1x8xf32>
    %1297 = arith.addf %1296, %1295 : vector<1x8xf32>
    %1298 = arith.divf %1296, %1297 : vector<1x8xf32>
    %1299 = math.tanh %1293 : vector<1x8xf32>
    %1300 = vector.extract_strided_slice %1298 {offsets = [0, 0], sizes = [1, 2], strides = [1, 1]} : vector<1x8xf32> to vector<1x2xf32>
    %1301 = vector.extract_strided_slice %1298 {offsets = [0, 2], sizes = [1, 2], strides = [1, 1]} : vector<1x8xf32> to vector<1x2xf32>
    %1302 = vector.extract_strided_slice %1299 {offsets = [0, 4], sizes = [1, 2], strides = [1, 1]} : vector<1x8xf32> to vector<1x2xf32>
    %1303 = vector.extract_strided_slice %1298 {offsets = [0, 6], sizes = [1, 2], strides = [1, 1]} : vector<1x8xf32> to vector<1x2xf32>
    %1304 = arith.mulf %1301, %1283 : vector<1x2xf32>
    %1305 = arith.mulf %1300, %1302 : vector<1x2xf32>
    %1306 = arith.addf %1304, %1305 : vector<1x2xf32>
    %1307 = math.tanh %1306 : vector<1x2xf32>
    %1308 = arith.mulf %1303, %1307 : vector<1x2xf32>
    %c1_182 = arith.constant 1 : index
    %c0_183 = arith.constant 0 : index
    %1309 = vector.load %arg11[%c1_182, %c0_183] : memref<15x16xf32, #tpu.memory_space<vmem>>, vector<1x16xf32>
    %1310 = vector.extract_strided_slice %1309 {offsets = [0, 0], sizes = [1, 8], strides = [1, 1]} : vector<1x16xf32> to vector<1x8xf32>
    %1311 = vector.extract_strided_slice %1308 {offsets = [0, 0], sizes = [1, 1], strides = [1, 1]} : vector<1x2xf32> to vector<1x1xf32>
    %1312 = vector.broadcast %1311 : vector<1x1xf32> to vector<1x8xf32>
    %1313 = arith.mulf %1312, %1280 : vector<1x8xf32>
    %1314 = arith.addf %1310, %1313 : vector<1x8xf32>
    %1315 = vector.extract_strided_slice %1308 {offsets = [0, 1], sizes = [1, 1], strides = [1, 1]} : vector<1x2xf32> to vector<1x1xf32>
    %1316 = vector.broadcast %1315 : vector<1x1xf32> to vector<1x8xf32>
    %1317 = arith.mulf %1316, %1281 : vector<1x8xf32>
    %1318 = arith.addf %1314, %1317 : vector<1x8xf32>
    %1319 = arith.negf %1318 : vector<1x8xf32>
    %1320 = math.exp %1319 : vector<1x8xf32>
    %cst_184 = arith.constant 1.000000e+00 : f32
    %1321 = vector.broadcast %cst_184 : f32 to vector<1x8xf32>
    %1322 = arith.addf %1321, %1320 : vector<1x8xf32>
    %1323 = arith.divf %1321, %1322 : vector<1x8xf32>
    %1324 = math.tanh %1318 : vector<1x8xf32>
    %1325 = vector.extract_strided_slice %1323 {offsets = [0, 0], sizes = [1, 2], strides = [1, 1]} : vector<1x8xf32> to vector<1x2xf32>
    %1326 = vector.extract_strided_slice %1323 {offsets = [0, 2], sizes = [1, 2], strides = [1, 1]} : vector<1x8xf32> to vector<1x2xf32>
    %1327 = vector.extract_strided_slice %1324 {offsets = [0, 4], sizes = [1, 2], strides = [1, 1]} : vector<1x8xf32> to vector<1x2xf32>
    %1328 = vector.extract_strided_slice %1323 {offsets = [0, 6], sizes = [1, 2], strides = [1, 1]} : vector<1x8xf32> to vector<1x2xf32>
    %1329 = arith.mulf %1326, %1306 : vector<1x2xf32>
    %1330 = arith.mulf %1325, %1327 : vector<1x2xf32>
    %1331 = arith.addf %1329, %1330 : vector<1x2xf32>
    %1332 = math.tanh %1331 : vector<1x2xf32>
    %1333 = arith.mulf %1328, %1332 : vector<1x2xf32>
    %c2_185 = arith.constant 2 : index
    %c0_186 = arith.constant 0 : index
    %1334 = vector.load %arg11[%c2_185, %c0_186] : memref<15x16xf32, #tpu.memory_space<vmem>>, vector<1x16xf32>
    %1335 = vector.extract_strided_slice %1334 {offsets = [0, 0], sizes = [1, 8], strides = [1, 1]} : vector<1x16xf32> to vector<1x8xf32>
    %1336 = vector.extract_strided_slice %1333 {offsets = [0, 0], sizes = [1, 1], strides = [1, 1]} : vector<1x2xf32> to vector<1x1xf32>
    %1337 = vector.broadcast %1336 : vector<1x1xf32> to vector<1x8xf32>
    %1338 = arith.mulf %1337, %1280 : vector<1x8xf32>
    %1339 = arith.addf %1335, %1338 : vector<1x8xf32>
    %1340 = vector.extract_strided_slice %1333 {offsets = [0, 1], sizes = [1, 1], strides = [1, 1]} : vector<1x2xf32> to vector<1x1xf32>
    %1341 = vector.broadcast %1340 : vector<1x1xf32> to vector<1x8xf32>
    %1342 = arith.mulf %1341, %1281 : vector<1x8xf32>
    %1343 = arith.addf %1339, %1342 : vector<1x8xf32>
    %1344 = arith.negf %1343 : vector<1x8xf32>
    %1345 = math.exp %1344 : vector<1x8xf32>
    %cst_187 = arith.constant 1.000000e+00 : f32
    %1346 = vector.broadcast %cst_187 : f32 to vector<1x8xf32>
    %1347 = arith.addf %1346, %1345 : vector<1x8xf32>
    %1348 = arith.divf %1346, %1347 : vector<1x8xf32>
    %1349 = math.tanh %1343 : vector<1x8xf32>
    %1350 = vector.extract_strided_slice %1348 {offsets = [0, 0], sizes = [1, 2], strides = [1, 1]} : vector<1x8xf32> to vector<1x2xf32>
    %1351 = vector.extract_strided_slice %1348 {offsets = [0, 2], sizes = [1, 2], strides = [1, 1]} : vector<1x8xf32> to vector<1x2xf32>
    %1352 = vector.extract_strided_slice %1349 {offsets = [0, 4], sizes = [1, 2], strides = [1, 1]} : vector<1x8xf32> to vector<1x2xf32>
    %1353 = vector.extract_strided_slice %1348 {offsets = [0, 6], sizes = [1, 2], strides = [1, 1]} : vector<1x8xf32> to vector<1x2xf32>
    %1354 = arith.mulf %1351, %1331 : vector<1x2xf32>
    %1355 = arith.mulf %1350, %1352 : vector<1x2xf32>
    %1356 = arith.addf %1354, %1355 : vector<1x2xf32>
    %1357 = math.tanh %1356 : vector<1x2xf32>
    %1358 = arith.mulf %1353, %1357 : vector<1x2xf32>
    %c3_188 = arith.constant 3 : index
    %c0_189 = arith.constant 0 : index
    %1359 = vector.load %arg11[%c3_188, %c0_189] : memref<15x16xf32, #tpu.memory_space<vmem>>, vector<1x16xf32>
    %1360 = vector.extract_strided_slice %1359 {offsets = [0, 0], sizes = [1, 8], strides = [1, 1]} : vector<1x16xf32> to vector<1x8xf32>
    %1361 = vector.extract_strided_slice %1358 {offsets = [0, 0], sizes = [1, 1], strides = [1, 1]} : vector<1x2xf32> to vector<1x1xf32>
    %1362 = vector.broadcast %1361 : vector<1x1xf32> to vector<1x8xf32>
    %1363 = arith.mulf %1362, %1280 : vector<1x8xf32>
    %1364 = arith.addf %1360, %1363 : vector<1x8xf32>
    %1365 = vector.extract_strided_slice %1358 {offsets = [0, 1], sizes = [1, 1], strides = [1, 1]} : vector<1x2xf32> to vector<1x1xf32>
    %1366 = vector.broadcast %1365 : vector<1x1xf32> to vector<1x8xf32>
    %1367 = arith.mulf %1366, %1281 : vector<1x8xf32>
    %1368 = arith.addf %1364, %1367 : vector<1x8xf32>
    %1369 = arith.negf %1368 : vector<1x8xf32>
    %1370 = math.exp %1369 : vector<1x8xf32>
    %cst_190 = arith.constant 1.000000e+00 : f32
    %1371 = vector.broadcast %cst_190 : f32 to vector<1x8xf32>
    %1372 = arith.addf %1371, %1370 : vector<1x8xf32>
    %1373 = arith.divf %1371, %1372 : vector<1x8xf32>
    %1374 = math.tanh %1368 : vector<1x8xf32>
    %1375 = vector.extract_strided_slice %1373 {offsets = [0, 0], sizes = [1, 2], strides = [1, 1]} : vector<1x8xf32> to vector<1x2xf32>
    %1376 = vector.extract_strided_slice %1373 {offsets = [0, 2], sizes = [1, 2], strides = [1, 1]} : vector<1x8xf32> to vector<1x2xf32>
    %1377 = vector.extract_strided_slice %1374 {offsets = [0, 4], sizes = [1, 2], strides = [1, 1]} : vector<1x8xf32> to vector<1x2xf32>
    %1378 = vector.extract_strided_slice %1373 {offsets = [0, 6], sizes = [1, 2], strides = [1, 1]} : vector<1x8xf32> to vector<1x2xf32>
    %1379 = arith.mulf %1376, %1356 : vector<1x2xf32>
    %1380 = arith.mulf %1375, %1377 : vector<1x2xf32>
    %1381 = arith.addf %1379, %1380 : vector<1x2xf32>
    %1382 = math.tanh %1381 : vector<1x2xf32>
    %1383 = arith.mulf %1378, %1382 : vector<1x2xf32>
    %c4_191 = arith.constant 4 : index
    %c0_192 = arith.constant 0 : index
    %1384 = vector.load %arg11[%c4_191, %c0_192] : memref<15x16xf32, #tpu.memory_space<vmem>>, vector<1x16xf32>
    %1385 = vector.extract_strided_slice %1384 {offsets = [0, 0], sizes = [1, 8], strides = [1, 1]} : vector<1x16xf32> to vector<1x8xf32>
    %1386 = vector.extract_strided_slice %1383 {offsets = [0, 0], sizes = [1, 1], strides = [1, 1]} : vector<1x2xf32> to vector<1x1xf32>
    %1387 = vector.broadcast %1386 : vector<1x1xf32> to vector<1x8xf32>
    %1388 = arith.mulf %1387, %1280 : vector<1x8xf32>
    %1389 = arith.addf %1385, %1388 : vector<1x8xf32>
    %1390 = vector.extract_strided_slice %1383 {offsets = [0, 1], sizes = [1, 1], strides = [1, 1]} : vector<1x2xf32> to vector<1x1xf32>
    %1391 = vector.broadcast %1390 : vector<1x1xf32> to vector<1x8xf32>
    %1392 = arith.mulf %1391, %1281 : vector<1x8xf32>
    %1393 = arith.addf %1389, %1392 : vector<1x8xf32>
    %1394 = arith.negf %1393 : vector<1x8xf32>
    %1395 = math.exp %1394 : vector<1x8xf32>
    %cst_193 = arith.constant 1.000000e+00 : f32
    %1396 = vector.broadcast %cst_193 : f32 to vector<1x8xf32>
    %1397 = arith.addf %1396, %1395 : vector<1x8xf32>
    %1398 = arith.divf %1396, %1397 : vector<1x8xf32>
    %1399 = math.tanh %1393 : vector<1x8xf32>
    %1400 = vector.extract_strided_slice %1398 {offsets = [0, 0], sizes = [1, 2], strides = [1, 1]} : vector<1x8xf32> to vector<1x2xf32>
    %1401 = vector.extract_strided_slice %1398 {offsets = [0, 2], sizes = [1, 2], strides = [1, 1]} : vector<1x8xf32> to vector<1x2xf32>
    %1402 = vector.extract_strided_slice %1399 {offsets = [0, 4], sizes = [1, 2], strides = [1, 1]} : vector<1x8xf32> to vector<1x2xf32>
    %1403 = vector.extract_strided_slice %1398 {offsets = [0, 6], sizes = [1, 2], strides = [1, 1]} : vector<1x8xf32> to vector<1x2xf32>
    %1404 = arith.mulf %1401, %1381 : vector<1x2xf32>
    %1405 = arith.mulf %1400, %1402 : vector<1x2xf32>
    %1406 = arith.addf %1404, %1405 : vector<1x2xf32>
    %1407 = math.tanh %1406 : vector<1x2xf32>
    %1408 = arith.mulf %1403, %1407 : vector<1x2xf32>
    %c5_194 = arith.constant 5 : index
    %c0_195 = arith.constant 0 : index
    %1409 = vector.load %arg11[%c5_194, %c0_195] : memref<15x16xf32, #tpu.memory_space<vmem>>, vector<1x16xf32>
    %1410 = vector.extract_strided_slice %1409 {offsets = [0, 0], sizes = [1, 8], strides = [1, 1]} : vector<1x16xf32> to vector<1x8xf32>
    %1411 = vector.extract_strided_slice %1408 {offsets = [0, 0], sizes = [1, 1], strides = [1, 1]} : vector<1x2xf32> to vector<1x1xf32>
    %1412 = vector.broadcast %1411 : vector<1x1xf32> to vector<1x8xf32>
    %1413 = arith.mulf %1412, %1280 : vector<1x8xf32>
    %1414 = arith.addf %1410, %1413 : vector<1x8xf32>
    %1415 = vector.extract_strided_slice %1408 {offsets = [0, 1], sizes = [1, 1], strides = [1, 1]} : vector<1x2xf32> to vector<1x1xf32>
    %1416 = vector.broadcast %1415 : vector<1x1xf32> to vector<1x8xf32>
    %1417 = arith.mulf %1416, %1281 : vector<1x8xf32>
    %1418 = arith.addf %1414, %1417 : vector<1x8xf32>
    %1419 = arith.negf %1418 : vector<1x8xf32>
    %1420 = math.exp %1419 : vector<1x8xf32>
    %cst_196 = arith.constant 1.000000e+00 : f32
    %1421 = vector.broadcast %cst_196 : f32 to vector<1x8xf32>
    %1422 = arith.addf %1421, %1420 : vector<1x8xf32>
    %1423 = arith.divf %1421, %1422 : vector<1x8xf32>
    %1424 = math.tanh %1418 : vector<1x8xf32>
    %1425 = vector.extract_strided_slice %1423 {offsets = [0, 0], sizes = [1, 2], strides = [1, 1]} : vector<1x8xf32> to vector<1x2xf32>
    %1426 = vector.extract_strided_slice %1423 {offsets = [0, 2], sizes = [1, 2], strides = [1, 1]} : vector<1x8xf32> to vector<1x2xf32>
    %1427 = vector.extract_strided_slice %1424 {offsets = [0, 4], sizes = [1, 2], strides = [1, 1]} : vector<1x8xf32> to vector<1x2xf32>
    %1428 = vector.extract_strided_slice %1423 {offsets = [0, 6], sizes = [1, 2], strides = [1, 1]} : vector<1x8xf32> to vector<1x2xf32>
    %1429 = arith.mulf %1426, %1406 : vector<1x2xf32>
    %1430 = arith.mulf %1425, %1427 : vector<1x2xf32>
    %1431 = arith.addf %1429, %1430 : vector<1x2xf32>
    %1432 = math.tanh %1431 : vector<1x2xf32>
    %1433 = arith.mulf %1428, %1432 : vector<1x2xf32>
    %c6_197 = arith.constant 6 : index
    %c0_198 = arith.constant 0 : index
    %1434 = vector.load %arg11[%c6_197, %c0_198] : memref<15x16xf32, #tpu.memory_space<vmem>>, vector<1x16xf32>
    %1435 = vector.extract_strided_slice %1434 {offsets = [0, 0], sizes = [1, 8], strides = [1, 1]} : vector<1x16xf32> to vector<1x8xf32>
    %1436 = vector.extract_strided_slice %1433 {offsets = [0, 0], sizes = [1, 1], strides = [1, 1]} : vector<1x2xf32> to vector<1x1xf32>
    %1437 = vector.broadcast %1436 : vector<1x1xf32> to vector<1x8xf32>
    %1438 = arith.mulf %1437, %1280 : vector<1x8xf32>
    %1439 = arith.addf %1435, %1438 : vector<1x8xf32>
    %1440 = vector.extract_strided_slice %1433 {offsets = [0, 1], sizes = [1, 1], strides = [1, 1]} : vector<1x2xf32> to vector<1x1xf32>
    %1441 = vector.broadcast %1440 : vector<1x1xf32> to vector<1x8xf32>
    %1442 = arith.mulf %1441, %1281 : vector<1x8xf32>
    %1443 = arith.addf %1439, %1442 : vector<1x8xf32>
    %1444 = arith.negf %1443 : vector<1x8xf32>
    %1445 = math.exp %1444 : vector<1x8xf32>
    %cst_199 = arith.constant 1.000000e+00 : f32
    %1446 = vector.broadcast %cst_199 : f32 to vector<1x8xf32>
    %1447 = arith.addf %1446, %1445 : vector<1x8xf32>
    %1448 = arith.divf %1446, %1447 : vector<1x8xf32>
    %1449 = math.tanh %1443 : vector<1x8xf32>
    %1450 = vector.extract_strided_slice %1448 {offsets = [0, 0], sizes = [1, 2], strides = [1, 1]} : vector<1x8xf32> to vector<1x2xf32>
    %1451 = vector.extract_strided_slice %1448 {offsets = [0, 2], sizes = [1, 2], strides = [1, 1]} : vector<1x8xf32> to vector<1x2xf32>
    %1452 = vector.extract_strided_slice %1449 {offsets = [0, 4], sizes = [1, 2], strides = [1, 1]} : vector<1x8xf32> to vector<1x2xf32>
    %1453 = vector.extract_strided_slice %1448 {offsets = [0, 6], sizes = [1, 2], strides = [1, 1]} : vector<1x8xf32> to vector<1x2xf32>
    %1454 = arith.mulf %1451, %1431 : vector<1x2xf32>
    %1455 = arith.mulf %1450, %1452 : vector<1x2xf32>
    %1456 = arith.addf %1454, %1455 : vector<1x2xf32>
    %1457 = math.tanh %1456 : vector<1x2xf32>
    %1458 = arith.mulf %1453, %1457 : vector<1x2xf32>
    %c7_200 = arith.constant 7 : index
    %c0_201 = arith.constant 0 : index
    %1459 = vector.load %arg11[%c7_200, %c0_201] : memref<15x16xf32, #tpu.memory_space<vmem>>, vector<1x16xf32>
    %1460 = vector.extract_strided_slice %1459 {offsets = [0, 0], sizes = [1, 8], strides = [1, 1]} : vector<1x16xf32> to vector<1x8xf32>
    %1461 = vector.extract_strided_slice %1458 {offsets = [0, 0], sizes = [1, 1], strides = [1, 1]} : vector<1x2xf32> to vector<1x1xf32>
    %1462 = vector.broadcast %1461 : vector<1x1xf32> to vector<1x8xf32>
    %1463 = arith.mulf %1462, %1280 : vector<1x8xf32>
    %1464 = arith.addf %1460, %1463 : vector<1x8xf32>
    %1465 = vector.extract_strided_slice %1458 {offsets = [0, 1], sizes = [1, 1], strides = [1, 1]} : vector<1x2xf32> to vector<1x1xf32>
    %1466 = vector.broadcast %1465 : vector<1x1xf32> to vector<1x8xf32>
    %1467 = arith.mulf %1466, %1281 : vector<1x8xf32>
    %1468 = arith.addf %1464, %1467 : vector<1x8xf32>
    %1469 = arith.negf %1468 : vector<1x8xf32>
    %1470 = math.exp %1469 : vector<1x8xf32>
    %cst_202 = arith.constant 1.000000e+00 : f32
    %1471 = vector.broadcast %cst_202 : f32 to vector<1x8xf32>
    %1472 = arith.addf %1471, %1470 : vector<1x8xf32>
    %1473 = arith.divf %1471, %1472 : vector<1x8xf32>
    %1474 = math.tanh %1468 : vector<1x8xf32>
    %1475 = vector.extract_strided_slice %1473 {offsets = [0, 0], sizes = [1, 2], strides = [1, 1]} : vector<1x8xf32> to vector<1x2xf32>
    %1476 = vector.extract_strided_slice %1473 {offsets = [0, 2], sizes = [1, 2], strides = [1, 1]} : vector<1x8xf32> to vector<1x2xf32>
    %1477 = vector.extract_strided_slice %1474 {offsets = [0, 4], sizes = [1, 2], strides = [1, 1]} : vector<1x8xf32> to vector<1x2xf32>
    %1478 = vector.extract_strided_slice %1473 {offsets = [0, 6], sizes = [1, 2], strides = [1, 1]} : vector<1x8xf32> to vector<1x2xf32>
    %1479 = arith.mulf %1476, %1456 : vector<1x2xf32>
    %1480 = arith.mulf %1475, %1477 : vector<1x2xf32>
    %1481 = arith.addf %1479, %1480 : vector<1x2xf32>
    %1482 = math.tanh %1481 : vector<1x2xf32>
    %1483 = arith.mulf %1478, %1482 : vector<1x2xf32>
    %c8_203 = arith.constant 8 : index
    %c0_204 = arith.constant 0 : index
    %1484 = vector.load %arg11[%c8_203, %c0_204] : memref<15x16xf32, #tpu.memory_space<vmem>>, vector<1x16xf32>
    %1485 = vector.extract_strided_slice %1484 {offsets = [0, 0], sizes = [1, 8], strides = [1, 1]} : vector<1x16xf32> to vector<1x8xf32>
    %1486 = vector.extract_strided_slice %1483 {offsets = [0, 0], sizes = [1, 1], strides = [1, 1]} : vector<1x2xf32> to vector<1x1xf32>
    %1487 = vector.broadcast %1486 : vector<1x1xf32> to vector<1x8xf32>
    %1488 = arith.mulf %1487, %1280 : vector<1x8xf32>
    %1489 = arith.addf %1485, %1488 : vector<1x8xf32>
    %1490 = vector.extract_strided_slice %1483 {offsets = [0, 1], sizes = [1, 1], strides = [1, 1]} : vector<1x2xf32> to vector<1x1xf32>
    %1491 = vector.broadcast %1490 : vector<1x1xf32> to vector<1x8xf32>
    %1492 = arith.mulf %1491, %1281 : vector<1x8xf32>
    %1493 = arith.addf %1489, %1492 : vector<1x8xf32>
    %1494 = arith.negf %1493 : vector<1x8xf32>
    %1495 = math.exp %1494 : vector<1x8xf32>
    %cst_205 = arith.constant 1.000000e+00 : f32
    %1496 = vector.broadcast %cst_205 : f32 to vector<1x8xf32>
    %1497 = arith.addf %1496, %1495 : vector<1x8xf32>
    %1498 = arith.divf %1496, %1497 : vector<1x8xf32>
    %1499 = math.tanh %1493 : vector<1x8xf32>
    %1500 = vector.extract_strided_slice %1498 {offsets = [0, 0], sizes = [1, 2], strides = [1, 1]} : vector<1x8xf32> to vector<1x2xf32>
    %1501 = vector.extract_strided_slice %1498 {offsets = [0, 2], sizes = [1, 2], strides = [1, 1]} : vector<1x8xf32> to vector<1x2xf32>
    %1502 = vector.extract_strided_slice %1499 {offsets = [0, 4], sizes = [1, 2], strides = [1, 1]} : vector<1x8xf32> to vector<1x2xf32>
    %1503 = vector.extract_strided_slice %1498 {offsets = [0, 6], sizes = [1, 2], strides = [1, 1]} : vector<1x8xf32> to vector<1x2xf32>
    %1504 = arith.mulf %1501, %1481 : vector<1x2xf32>
    %1505 = arith.mulf %1500, %1502 : vector<1x2xf32>
    %1506 = arith.addf %1504, %1505 : vector<1x2xf32>
    %1507 = math.tanh %1506 : vector<1x2xf32>
    %1508 = arith.mulf %1503, %1507 : vector<1x2xf32>
    %c9_206 = arith.constant 9 : index
    %c0_207 = arith.constant 0 : index
    %1509 = vector.load %arg11[%c9_206, %c0_207] : memref<15x16xf32, #tpu.memory_space<vmem>>, vector<1x16xf32>
    %1510 = vector.extract_strided_slice %1509 {offsets = [0, 0], sizes = [1, 8], strides = [1, 1]} : vector<1x16xf32> to vector<1x8xf32>
    %1511 = vector.extract_strided_slice %1508 {offsets = [0, 0], sizes = [1, 1], strides = [1, 1]} : vector<1x2xf32> to vector<1x1xf32>
    %1512 = vector.broadcast %1511 : vector<1x1xf32> to vector<1x8xf32>
    %1513 = arith.mulf %1512, %1280 : vector<1x8xf32>
    %1514 = arith.addf %1510, %1513 : vector<1x8xf32>
    %1515 = vector.extract_strided_slice %1508 {offsets = [0, 1], sizes = [1, 1], strides = [1, 1]} : vector<1x2xf32> to vector<1x1xf32>
    %1516 = vector.broadcast %1515 : vector<1x1xf32> to vector<1x8xf32>
    %1517 = arith.mulf %1516, %1281 : vector<1x8xf32>
    %1518 = arith.addf %1514, %1517 : vector<1x8xf32>
    %1519 = arith.negf %1518 : vector<1x8xf32>
    %1520 = math.exp %1519 : vector<1x8xf32>
    %cst_208 = arith.constant 1.000000e+00 : f32
    %1521 = vector.broadcast %cst_208 : f32 to vector<1x8xf32>
    %1522 = arith.addf %1521, %1520 : vector<1x8xf32>
    %1523 = arith.divf %1521, %1522 : vector<1x8xf32>
    %1524 = math.tanh %1518 : vector<1x8xf32>
    %1525 = vector.extract_strided_slice %1523 {offsets = [0, 0], sizes = [1, 2], strides = [1, 1]} : vector<1x8xf32> to vector<1x2xf32>
    %1526 = vector.extract_strided_slice %1523 {offsets = [0, 2], sizes = [1, 2], strides = [1, 1]} : vector<1x8xf32> to vector<1x2xf32>
    %1527 = vector.extract_strided_slice %1524 {offsets = [0, 4], sizes = [1, 2], strides = [1, 1]} : vector<1x8xf32> to vector<1x2xf32>
    %1528 = vector.extract_strided_slice %1523 {offsets = [0, 6], sizes = [1, 2], strides = [1, 1]} : vector<1x8xf32> to vector<1x2xf32>
    %1529 = arith.mulf %1526, %1506 : vector<1x2xf32>
    %1530 = arith.mulf %1525, %1527 : vector<1x2xf32>
    %1531 = arith.addf %1529, %1530 : vector<1x2xf32>
    %1532 = math.tanh %1531 : vector<1x2xf32>
    %1533 = arith.mulf %1528, %1532 : vector<1x2xf32>
    %c10_209 = arith.constant 10 : index
    %c0_210 = arith.constant 0 : index
    %1534 = vector.load %arg11[%c10_209, %c0_210] : memref<15x16xf32, #tpu.memory_space<vmem>>, vector<1x16xf32>
    %1535 = vector.extract_strided_slice %1534 {offsets = [0, 0], sizes = [1, 8], strides = [1, 1]} : vector<1x16xf32> to vector<1x8xf32>
    %1536 = vector.extract_strided_slice %1533 {offsets = [0, 0], sizes = [1, 1], strides = [1, 1]} : vector<1x2xf32> to vector<1x1xf32>
    %1537 = vector.broadcast %1536 : vector<1x1xf32> to vector<1x8xf32>
    %1538 = arith.mulf %1537, %1280 : vector<1x8xf32>
    %1539 = arith.addf %1535, %1538 : vector<1x8xf32>
    %1540 = vector.extract_strided_slice %1533 {offsets = [0, 1], sizes = [1, 1], strides = [1, 1]} : vector<1x2xf32> to vector<1x1xf32>
    %1541 = vector.broadcast %1540 : vector<1x1xf32> to vector<1x8xf32>
    %1542 = arith.mulf %1541, %1281 : vector<1x8xf32>
    %1543 = arith.addf %1539, %1542 : vector<1x8xf32>
    %1544 = arith.negf %1543 : vector<1x8xf32>
    %1545 = math.exp %1544 : vector<1x8xf32>
    %cst_211 = arith.constant 1.000000e+00 : f32
    %1546 = vector.broadcast %cst_211 : f32 to vector<1x8xf32>
    %1547 = arith.addf %1546, %1545 : vector<1x8xf32>
    %1548 = arith.divf %1546, %1547 : vector<1x8xf32>
    %1549 = math.tanh %1543 : vector<1x8xf32>
    %1550 = vector.extract_strided_slice %1548 {offsets = [0, 0], sizes = [1, 2], strides = [1, 1]} : vector<1x8xf32> to vector<1x2xf32>
    %1551 = vector.extract_strided_slice %1548 {offsets = [0, 2], sizes = [1, 2], strides = [1, 1]} : vector<1x8xf32> to vector<1x2xf32>
    %1552 = vector.extract_strided_slice %1549 {offsets = [0, 4], sizes = [1, 2], strides = [1, 1]} : vector<1x8xf32> to vector<1x2xf32>
    %1553 = vector.extract_strided_slice %1548 {offsets = [0, 6], sizes = [1, 2], strides = [1, 1]} : vector<1x8xf32> to vector<1x2xf32>
    %1554 = arith.mulf %1551, %1531 : vector<1x2xf32>
    %1555 = arith.mulf %1550, %1552 : vector<1x2xf32>
    %1556 = arith.addf %1554, %1555 : vector<1x2xf32>
    %1557 = math.tanh %1556 : vector<1x2xf32>
    %1558 = arith.mulf %1553, %1557 : vector<1x2xf32>
    %c11_212 = arith.constant 11 : index
    %c0_213 = arith.constant 0 : index
    %1559 = vector.load %arg11[%c11_212, %c0_213] : memref<15x16xf32, #tpu.memory_space<vmem>>, vector<1x16xf32>
    %1560 = vector.extract_strided_slice %1559 {offsets = [0, 0], sizes = [1, 8], strides = [1, 1]} : vector<1x16xf32> to vector<1x8xf32>
    %1561 = vector.extract_strided_slice %1558 {offsets = [0, 0], sizes = [1, 1], strides = [1, 1]} : vector<1x2xf32> to vector<1x1xf32>
    %1562 = vector.broadcast %1561 : vector<1x1xf32> to vector<1x8xf32>
    %1563 = arith.mulf %1562, %1280 : vector<1x8xf32>
    %1564 = arith.addf %1560, %1563 : vector<1x8xf32>
    %1565 = vector.extract_strided_slice %1558 {offsets = [0, 1], sizes = [1, 1], strides = [1, 1]} : vector<1x2xf32> to vector<1x1xf32>
    %1566 = vector.broadcast %1565 : vector<1x1xf32> to vector<1x8xf32>
    %1567 = arith.mulf %1566, %1281 : vector<1x8xf32>
    %1568 = arith.addf %1564, %1567 : vector<1x8xf32>
    %1569 = arith.negf %1568 : vector<1x8xf32>
    %1570 = math.exp %1569 : vector<1x8xf32>
    %cst_214 = arith.constant 1.000000e+00 : f32
    %1571 = vector.broadcast %cst_214 : f32 to vector<1x8xf32>
    %1572 = arith.addf %1571, %1570 : vector<1x8xf32>
    %1573 = arith.divf %1571, %1572 : vector<1x8xf32>
    %1574 = math.tanh %1568 : vector<1x8xf32>
    %1575 = vector.extract_strided_slice %1573 {offsets = [0, 0], sizes = [1, 2], strides = [1, 1]} : vector<1x8xf32> to vector<1x2xf32>
    %1576 = vector.extract_strided_slice %1573 {offsets = [0, 2], sizes = [1, 2], strides = [1, 1]} : vector<1x8xf32> to vector<1x2xf32>
    %1577 = vector.extract_strided_slice %1574 {offsets = [0, 4], sizes = [1, 2], strides = [1, 1]} : vector<1x8xf32> to vector<1x2xf32>
    %1578 = vector.extract_strided_slice %1573 {offsets = [0, 6], sizes = [1, 2], strides = [1, 1]} : vector<1x8xf32> to vector<1x2xf32>
    %1579 = arith.mulf %1576, %1556 : vector<1x2xf32>
    %1580 = arith.mulf %1575, %1577 : vector<1x2xf32>
    %1581 = arith.addf %1579, %1580 : vector<1x2xf32>
    %1582 = math.tanh %1581 : vector<1x2xf32>
    %1583 = arith.mulf %1578, %1582 : vector<1x2xf32>
    %c12_215 = arith.constant 12 : index
    %c0_216 = arith.constant 0 : index
    %1584 = vector.load %arg11[%c12_215, %c0_216] : memref<15x16xf32, #tpu.memory_space<vmem>>, vector<1x16xf32>
    %1585 = vector.extract_strided_slice %1584 {offsets = [0, 0], sizes = [1, 8], strides = [1, 1]} : vector<1x16xf32> to vector<1x8xf32>
    %1586 = vector.extract_strided_slice %1583 {offsets = [0, 0], sizes = [1, 1], strides = [1, 1]} : vector<1x2xf32> to vector<1x1xf32>
    %1587 = vector.broadcast %1586 : vector<1x1xf32> to vector<1x8xf32>
    %1588 = arith.mulf %1587, %1280 : vector<1x8xf32>
    %1589 = arith.addf %1585, %1588 : vector<1x8xf32>
    %1590 = vector.extract_strided_slice %1583 {offsets = [0, 1], sizes = [1, 1], strides = [1, 1]} : vector<1x2xf32> to vector<1x1xf32>
    %1591 = vector.broadcast %1590 : vector<1x1xf32> to vector<1x8xf32>
    %1592 = arith.mulf %1591, %1281 : vector<1x8xf32>
    %1593 = arith.addf %1589, %1592 : vector<1x8xf32>
    %1594 = arith.negf %1593 : vector<1x8xf32>
    %1595 = math.exp %1594 : vector<1x8xf32>
    %cst_217 = arith.constant 1.000000e+00 : f32
    %1596 = vector.broadcast %cst_217 : f32 to vector<1x8xf32>
    %1597 = arith.addf %1596, %1595 : vector<1x8xf32>
    %1598 = arith.divf %1596, %1597 : vector<1x8xf32>
    %1599 = math.tanh %1593 : vector<1x8xf32>
    %1600 = vector.extract_strided_slice %1598 {offsets = [0, 0], sizes = [1, 2], strides = [1, 1]} : vector<1x8xf32> to vector<1x2xf32>
    %1601 = vector.extract_strided_slice %1598 {offsets = [0, 2], sizes = [1, 2], strides = [1, 1]} : vector<1x8xf32> to vector<1x2xf32>
    %1602 = vector.extract_strided_slice %1599 {offsets = [0, 4], sizes = [1, 2], strides = [1, 1]} : vector<1x8xf32> to vector<1x2xf32>
    %1603 = vector.extract_strided_slice %1598 {offsets = [0, 6], sizes = [1, 2], strides = [1, 1]} : vector<1x8xf32> to vector<1x2xf32>
    %1604 = arith.mulf %1601, %1581 : vector<1x2xf32>
    %1605 = arith.mulf %1600, %1602 : vector<1x2xf32>
    %1606 = arith.addf %1604, %1605 : vector<1x2xf32>
    %1607 = math.tanh %1606 : vector<1x2xf32>
    %1608 = arith.mulf %1603, %1607 : vector<1x2xf32>
    %c13_218 = arith.constant 13 : index
    %c0_219 = arith.constant 0 : index
    %1609 = vector.load %arg11[%c13_218, %c0_219] : memref<15x16xf32, #tpu.memory_space<vmem>>, vector<1x16xf32>
    %1610 = vector.extract_strided_slice %1609 {offsets = [0, 0], sizes = [1, 8], strides = [1, 1]} : vector<1x16xf32> to vector<1x8xf32>
    %1611 = vector.extract_strided_slice %1608 {offsets = [0, 0], sizes = [1, 1], strides = [1, 1]} : vector<1x2xf32> to vector<1x1xf32>
    %1612 = vector.broadcast %1611 : vector<1x1xf32> to vector<1x8xf32>
    %1613 = arith.mulf %1612, %1280 : vector<1x8xf32>
    %1614 = arith.addf %1610, %1613 : vector<1x8xf32>
    %1615 = vector.extract_strided_slice %1608 {offsets = [0, 1], sizes = [1, 1], strides = [1, 1]} : vector<1x2xf32> to vector<1x1xf32>
    %1616 = vector.broadcast %1615 : vector<1x1xf32> to vector<1x8xf32>
    %1617 = arith.mulf %1616, %1281 : vector<1x8xf32>
    %1618 = arith.addf %1614, %1617 : vector<1x8xf32>
    %1619 = arith.negf %1618 : vector<1x8xf32>
    %1620 = math.exp %1619 : vector<1x8xf32>
    %cst_220 = arith.constant 1.000000e+00 : f32
    %1621 = vector.broadcast %cst_220 : f32 to vector<1x8xf32>
    %1622 = arith.addf %1621, %1620 : vector<1x8xf32>
    %1623 = arith.divf %1621, %1622 : vector<1x8xf32>
    %1624 = math.tanh %1618 : vector<1x8xf32>
    %1625 = vector.extract_strided_slice %1623 {offsets = [0, 0], sizes = [1, 2], strides = [1, 1]} : vector<1x8xf32> to vector<1x2xf32>
    %1626 = vector.extract_strided_slice %1623 {offsets = [0, 2], sizes = [1, 2], strides = [1, 1]} : vector<1x8xf32> to vector<1x2xf32>
    %1627 = vector.extract_strided_slice %1624 {offsets = [0, 4], sizes = [1, 2], strides = [1, 1]} : vector<1x8xf32> to vector<1x2xf32>
    %1628 = vector.extract_strided_slice %1623 {offsets = [0, 6], sizes = [1, 2], strides = [1, 1]} : vector<1x8xf32> to vector<1x2xf32>
    %1629 = arith.mulf %1626, %1606 : vector<1x2xf32>
    %1630 = arith.mulf %1625, %1627 : vector<1x2xf32>
    %1631 = arith.addf %1629, %1630 : vector<1x2xf32>
    %1632 = math.tanh %1631 : vector<1x2xf32>
    %1633 = arith.mulf %1628, %1632 : vector<1x2xf32>
    %c14_221 = arith.constant 14 : index
    %c0_222 = arith.constant 0 : index
    %1634 = vector.load %arg11[%c14_221, %c0_222] : memref<15x16xf32, #tpu.memory_space<vmem>>, vector<1x16xf32>
    %1635 = vector.extract_strided_slice %1634 {offsets = [0, 0], sizes = [1, 8], strides = [1, 1]} : vector<1x16xf32> to vector<1x8xf32>
    %1636 = vector.extract_strided_slice %1633 {offsets = [0, 0], sizes = [1, 1], strides = [1, 1]} : vector<1x2xf32> to vector<1x1xf32>
    %1637 = vector.broadcast %1636 : vector<1x1xf32> to vector<1x8xf32>
    %1638 = arith.mulf %1637, %1280 : vector<1x8xf32>
    %1639 = arith.addf %1635, %1638 : vector<1x8xf32>
    %1640 = vector.extract_strided_slice %1633 {offsets = [0, 1], sizes = [1, 1], strides = [1, 1]} : vector<1x2xf32> to vector<1x1xf32>
    %1641 = vector.broadcast %1640 : vector<1x1xf32> to vector<1x8xf32>
    %1642 = arith.mulf %1641, %1281 : vector<1x8xf32>
    %1643 = arith.addf %1639, %1642 : vector<1x8xf32>
    %1644 = arith.negf %1643 : vector<1x8xf32>
    %1645 = math.exp %1644 : vector<1x8xf32>
    %cst_223 = arith.constant 1.000000e+00 : f32
    %1646 = vector.broadcast %cst_223 : f32 to vector<1x8xf32>
    %1647 = arith.addf %1646, %1645 : vector<1x8xf32>
    %1648 = arith.divf %1646, %1647 : vector<1x8xf32>
    %1649 = math.tanh %1643 : vector<1x8xf32>
    %1650 = vector.extract_strided_slice %1648 {offsets = [0, 0], sizes = [1, 2], strides = [1, 1]} : vector<1x8xf32> to vector<1x2xf32>
    %1651 = vector.extract_strided_slice %1648 {offsets = [0, 2], sizes = [1, 2], strides = [1, 1]} : vector<1x8xf32> to vector<1x2xf32>
    %1652 = vector.extract_strided_slice %1649 {offsets = [0, 4], sizes = [1, 2], strides = [1, 1]} : vector<1x8xf32> to vector<1x2xf32>
    %1653 = vector.extract_strided_slice %1648 {offsets = [0, 6], sizes = [1, 2], strides = [1, 1]} : vector<1x8xf32> to vector<1x2xf32>
    %1654 = arith.mulf %1651, %1631 : vector<1x2xf32>
    %1655 = arith.mulf %1650, %1652 : vector<1x2xf32>
    %1656 = arith.addf %1654, %1655 : vector<1x2xf32>
    %1657 = math.tanh %1656 : vector<1x2xf32>
    %1658 = arith.mulf %1653, %1657 : vector<1x2xf32>
    %1659 = vector.extract_strided_slice %1278 {offsets = [0, 8], sizes = [2, 8], strides = [1, 1]} : vector<2x16xf32> to vector<2x8xf32>
    %1660 = vector.extract_strided_slice %1659 {offsets = [0, 0], sizes = [1, 8], strides = [1, 1]} : vector<2x8xf32> to vector<1x8xf32>
    %1661 = vector.extract_strided_slice %1659 {offsets = [1, 0], sizes = [1, 8], strides = [1, 1]} : vector<2x8xf32> to vector<1x8xf32>
    %cst_224 = arith.constant 0.000000e+00 : f32
    %1662 = vector.broadcast %cst_224 : f32 to vector<1x2xf32>
    %cst_225 = arith.constant 0.000000e+00 : f32
    %1663 = vector.broadcast %cst_225 : f32 to vector<1x2xf32>
    %c14_226 = arith.constant 14 : index
    %c0_227 = arith.constant 0 : index
    %1664 = vector.load %arg11[%c14_226, %c0_227] : memref<15x16xf32, #tpu.memory_space<vmem>>, vector<1x16xf32>
    %1665 = vector.extract_strided_slice %1664 {offsets = [0, 8], sizes = [1, 8], strides = [1, 1]} : vector<1x16xf32> to vector<1x8xf32>
    %1666 = vector.extract_strided_slice %1662 {offsets = [0, 0], sizes = [1, 1], strides = [1, 1]} : vector<1x2xf32> to vector<1x1xf32>
    %1667 = vector.broadcast %1666 : vector<1x1xf32> to vector<1x8xf32>
    %1668 = arith.mulf %1667, %1660 : vector<1x8xf32>
    %1669 = arith.addf %1665, %1668 : vector<1x8xf32>
    %1670 = vector.extract_strided_slice %1662 {offsets = [0, 1], sizes = [1, 1], strides = [1, 1]} : vector<1x2xf32> to vector<1x1xf32>
    %1671 = vector.broadcast %1670 : vector<1x1xf32> to vector<1x8xf32>
    %1672 = arith.mulf %1671, %1661 : vector<1x8xf32>
    %1673 = arith.addf %1669, %1672 : vector<1x8xf32>
    %1674 = arith.negf %1673 : vector<1x8xf32>
    %1675 = math.exp %1674 : vector<1x8xf32>
    %cst_228 = arith.constant 1.000000e+00 : f32
    %1676 = vector.broadcast %cst_228 : f32 to vector<1x8xf32>
    %1677 = arith.addf %1676, %1675 : vector<1x8xf32>
    %1678 = arith.divf %1676, %1677 : vector<1x8xf32>
    %1679 = math.tanh %1673 : vector<1x8xf32>
    %1680 = vector.extract_strided_slice %1678 {offsets = [0, 0], sizes = [1, 2], strides = [1, 1]} : vector<1x8xf32> to vector<1x2xf32>
    %1681 = vector.extract_strided_slice %1678 {offsets = [0, 2], sizes = [1, 2], strides = [1, 1]} : vector<1x8xf32> to vector<1x2xf32>
    %1682 = vector.extract_strided_slice %1679 {offsets = [0, 4], sizes = [1, 2], strides = [1, 1]} : vector<1x8xf32> to vector<1x2xf32>
    %1683 = vector.extract_strided_slice %1678 {offsets = [0, 6], sizes = [1, 2], strides = [1, 1]} : vector<1x8xf32> to vector<1x2xf32>
    %1684 = arith.mulf %1681, %1663 : vector<1x2xf32>
    %1685 = arith.mulf %1680, %1682 : vector<1x2xf32>
    %1686 = arith.addf %1684, %1685 : vector<1x2xf32>
    %1687 = math.tanh %1686 : vector<1x2xf32>
    %1688 = arith.mulf %1683, %1687 : vector<1x2xf32>
    %c13_229 = arith.constant 13 : index
    %c0_230 = arith.constant 0 : index
    %1689 = vector.load %arg11[%c13_229, %c0_230] : memref<15x16xf32, #tpu.memory_space<vmem>>, vector<1x16xf32>
    %1690 = vector.extract_strided_slice %1689 {offsets = [0, 8], sizes = [1, 8], strides = [1, 1]} : vector<1x16xf32> to vector<1x8xf32>
    %1691 = vector.extract_strided_slice %1688 {offsets = [0, 0], sizes = [1, 1], strides = [1, 1]} : vector<1x2xf32> to vector<1x1xf32>
    %1692 = vector.broadcast %1691 : vector<1x1xf32> to vector<1x8xf32>
    %1693 = arith.mulf %1692, %1660 : vector<1x8xf32>
    %1694 = arith.addf %1690, %1693 : vector<1x8xf32>
    %1695 = vector.extract_strided_slice %1688 {offsets = [0, 1], sizes = [1, 1], strides = [1, 1]} : vector<1x2xf32> to vector<1x1xf32>
    %1696 = vector.broadcast %1695 : vector<1x1xf32> to vector<1x8xf32>
    %1697 = arith.mulf %1696, %1661 : vector<1x8xf32>
    %1698 = arith.addf %1694, %1697 : vector<1x8xf32>
    %1699 = arith.negf %1698 : vector<1x8xf32>
    %1700 = math.exp %1699 : vector<1x8xf32>
    %cst_231 = arith.constant 1.000000e+00 : f32
    %1701 = vector.broadcast %cst_231 : f32 to vector<1x8xf32>
    %1702 = arith.addf %1701, %1700 : vector<1x8xf32>
    %1703 = arith.divf %1701, %1702 : vector<1x8xf32>
    %1704 = math.tanh %1698 : vector<1x8xf32>
    %1705 = vector.extract_strided_slice %1703 {offsets = [0, 0], sizes = [1, 2], strides = [1, 1]} : vector<1x8xf32> to vector<1x2xf32>
    %1706 = vector.extract_strided_slice %1703 {offsets = [0, 2], sizes = [1, 2], strides = [1, 1]} : vector<1x8xf32> to vector<1x2xf32>
    %1707 = vector.extract_strided_slice %1704 {offsets = [0, 4], sizes = [1, 2], strides = [1, 1]} : vector<1x8xf32> to vector<1x2xf32>
    %1708 = vector.extract_strided_slice %1703 {offsets = [0, 6], sizes = [1, 2], strides = [1, 1]} : vector<1x8xf32> to vector<1x2xf32>
    %1709 = arith.mulf %1706, %1686 : vector<1x2xf32>
    %1710 = arith.mulf %1705, %1707 : vector<1x2xf32>
    %1711 = arith.addf %1709, %1710 : vector<1x2xf32>
    %1712 = math.tanh %1711 : vector<1x2xf32>
    %1713 = arith.mulf %1708, %1712 : vector<1x2xf32>
    %c12_232 = arith.constant 12 : index
    %c0_233 = arith.constant 0 : index
    %1714 = vector.load %arg11[%c12_232, %c0_233] : memref<15x16xf32, #tpu.memory_space<vmem>>, vector<1x16xf32>
    %1715 = vector.extract_strided_slice %1714 {offsets = [0, 8], sizes = [1, 8], strides = [1, 1]} : vector<1x16xf32> to vector<1x8xf32>
    %1716 = vector.extract_strided_slice %1713 {offsets = [0, 0], sizes = [1, 1], strides = [1, 1]} : vector<1x2xf32> to vector<1x1xf32>
    %1717 = vector.broadcast %1716 : vector<1x1xf32> to vector<1x8xf32>
    %1718 = arith.mulf %1717, %1660 : vector<1x8xf32>
    %1719 = arith.addf %1715, %1718 : vector<1x8xf32>
    %1720 = vector.extract_strided_slice %1713 {offsets = [0, 1], sizes = [1, 1], strides = [1, 1]} : vector<1x2xf32> to vector<1x1xf32>
    %1721 = vector.broadcast %1720 : vector<1x1xf32> to vector<1x8xf32>
    %1722 = arith.mulf %1721, %1661 : vector<1x8xf32>
    %1723 = arith.addf %1719, %1722 : vector<1x8xf32>
    %1724 = arith.negf %1723 : vector<1x8xf32>
    %1725 = math.exp %1724 : vector<1x8xf32>
    %cst_234 = arith.constant 1.000000e+00 : f32
    %1726 = vector.broadcast %cst_234 : f32 to vector<1x8xf32>
    %1727 = arith.addf %1726, %1725 : vector<1x8xf32>
    %1728 = arith.divf %1726, %1727 : vector<1x8xf32>
    %1729 = math.tanh %1723 : vector<1x8xf32>
    %1730 = vector.extract_strided_slice %1728 {offsets = [0, 0], sizes = [1, 2], strides = [1, 1]} : vector<1x8xf32> to vector<1x2xf32>
    %1731 = vector.extract_strided_slice %1728 {offsets = [0, 2], sizes = [1, 2], strides = [1, 1]} : vector<1x8xf32> to vector<1x2xf32>
    %1732 = vector.extract_strided_slice %1729 {offsets = [0, 4], sizes = [1, 2], strides = [1, 1]} : vector<1x8xf32> to vector<1x2xf32>
    %1733 = vector.extract_strided_slice %1728 {offsets = [0, 6], sizes = [1, 2], strides = [1, 1]} : vector<1x8xf32> to vector<1x2xf32>
    %1734 = arith.mulf %1731, %1711 : vector<1x2xf32>
    %1735 = arith.mulf %1730, %1732 : vector<1x2xf32>
    %1736 = arith.addf %1734, %1735 : vector<1x2xf32>
    %1737 = math.tanh %1736 : vector<1x2xf32>
    %1738 = arith.mulf %1733, %1737 : vector<1x2xf32>
    %c11_235 = arith.constant 11 : index
    %c0_236 = arith.constant 0 : index
    %1739 = vector.load %arg11[%c11_235, %c0_236] : memref<15x16xf32, #tpu.memory_space<vmem>>, vector<1x16xf32>
    %1740 = vector.extract_strided_slice %1739 {offsets = [0, 8], sizes = [1, 8], strides = [1, 1]} : vector<1x16xf32> to vector<1x8xf32>
    %1741 = vector.extract_strided_slice %1738 {offsets = [0, 0], sizes = [1, 1], strides = [1, 1]} : vector<1x2xf32> to vector<1x1xf32>
    %1742 = vector.broadcast %1741 : vector<1x1xf32> to vector<1x8xf32>
    %1743 = arith.mulf %1742, %1660 : vector<1x8xf32>
    %1744 = arith.addf %1740, %1743 : vector<1x8xf32>
    %1745 = vector.extract_strided_slice %1738 {offsets = [0, 1], sizes = [1, 1], strides = [1, 1]} : vector<1x2xf32> to vector<1x1xf32>
    %1746 = vector.broadcast %1745 : vector<1x1xf32> to vector<1x8xf32>
    %1747 = arith.mulf %1746, %1661 : vector<1x8xf32>
    %1748 = arith.addf %1744, %1747 : vector<1x8xf32>
    %1749 = arith.negf %1748 : vector<1x8xf32>
    %1750 = math.exp %1749 : vector<1x8xf32>
    %cst_237 = arith.constant 1.000000e+00 : f32
    %1751 = vector.broadcast %cst_237 : f32 to vector<1x8xf32>
    %1752 = arith.addf %1751, %1750 : vector<1x8xf32>
    %1753 = arith.divf %1751, %1752 : vector<1x8xf32>
    %1754 = math.tanh %1748 : vector<1x8xf32>
    %1755 = vector.extract_strided_slice %1753 {offsets = [0, 0], sizes = [1, 2], strides = [1, 1]} : vector<1x8xf32> to vector<1x2xf32>
    %1756 = vector.extract_strided_slice %1753 {offsets = [0, 2], sizes = [1, 2], strides = [1, 1]} : vector<1x8xf32> to vector<1x2xf32>
    %1757 = vector.extract_strided_slice %1754 {offsets = [0, 4], sizes = [1, 2], strides = [1, 1]} : vector<1x8xf32> to vector<1x2xf32>
    %1758 = vector.extract_strided_slice %1753 {offsets = [0, 6], sizes = [1, 2], strides = [1, 1]} : vector<1x8xf32> to vector<1x2xf32>
    %1759 = arith.mulf %1756, %1736 : vector<1x2xf32>
    %1760 = arith.mulf %1755, %1757 : vector<1x2xf32>
    %1761 = arith.addf %1759, %1760 : vector<1x2xf32>
    %1762 = math.tanh %1761 : vector<1x2xf32>
    %1763 = arith.mulf %1758, %1762 : vector<1x2xf32>
    %c10_238 = arith.constant 10 : index
    %c0_239 = arith.constant 0 : index
    %1764 = vector.load %arg11[%c10_238, %c0_239] : memref<15x16xf32, #tpu.memory_space<vmem>>, vector<1x16xf32>
    %1765 = vector.extract_strided_slice %1764 {offsets = [0, 8], sizes = [1, 8], strides = [1, 1]} : vector<1x16xf32> to vector<1x8xf32>
    %1766 = vector.extract_strided_slice %1763 {offsets = [0, 0], sizes = [1, 1], strides = [1, 1]} : vector<1x2xf32> to vector<1x1xf32>
    %1767 = vector.broadcast %1766 : vector<1x1xf32> to vector<1x8xf32>
    %1768 = arith.mulf %1767, %1660 : vector<1x8xf32>
    %1769 = arith.addf %1765, %1768 : vector<1x8xf32>
    %1770 = vector.extract_strided_slice %1763 {offsets = [0, 1], sizes = [1, 1], strides = [1, 1]} : vector<1x2xf32> to vector<1x1xf32>
    %1771 = vector.broadcast %1770 : vector<1x1xf32> to vector<1x8xf32>
    %1772 = arith.mulf %1771, %1661 : vector<1x8xf32>
    %1773 = arith.addf %1769, %1772 : vector<1x8xf32>
    %1774 = arith.negf %1773 : vector<1x8xf32>
    %1775 = math.exp %1774 : vector<1x8xf32>
    %cst_240 = arith.constant 1.000000e+00 : f32
    %1776 = vector.broadcast %cst_240 : f32 to vector<1x8xf32>
    %1777 = arith.addf %1776, %1775 : vector<1x8xf32>
    %1778 = arith.divf %1776, %1777 : vector<1x8xf32>
    %1779 = math.tanh %1773 : vector<1x8xf32>
    %1780 = vector.extract_strided_slice %1778 {offsets = [0, 0], sizes = [1, 2], strides = [1, 1]} : vector<1x8xf32> to vector<1x2xf32>
    %1781 = vector.extract_strided_slice %1778 {offsets = [0, 2], sizes = [1, 2], strides = [1, 1]} : vector<1x8xf32> to vector<1x2xf32>
    %1782 = vector.extract_strided_slice %1779 {offsets = [0, 4], sizes = [1, 2], strides = [1, 1]} : vector<1x8xf32> to vector<1x2xf32>
    %1783 = vector.extract_strided_slice %1778 {offsets = [0, 6], sizes = [1, 2], strides = [1, 1]} : vector<1x8xf32> to vector<1x2xf32>
    %1784 = arith.mulf %1781, %1761 : vector<1x2xf32>
    %1785 = arith.mulf %1780, %1782 : vector<1x2xf32>
    %1786 = arith.addf %1784, %1785 : vector<1x2xf32>
    %1787 = math.tanh %1786 : vector<1x2xf32>
    %1788 = arith.mulf %1783, %1787 : vector<1x2xf32>
    %c9_241 = arith.constant 9 : index
    %c0_242 = arith.constant 0 : index
    %1789 = vector.load %arg11[%c9_241, %c0_242] : memref<15x16xf32, #tpu.memory_space<vmem>>, vector<1x16xf32>
    %1790 = vector.extract_strided_slice %1789 {offsets = [0, 8], sizes = [1, 8], strides = [1, 1]} : vector<1x16xf32> to vector<1x8xf32>
    %1791 = vector.extract_strided_slice %1788 {offsets = [0, 0], sizes = [1, 1], strides = [1, 1]} : vector<1x2xf32> to vector<1x1xf32>
    %1792 = vector.broadcast %1791 : vector<1x1xf32> to vector<1x8xf32>
    %1793 = arith.mulf %1792, %1660 : vector<1x8xf32>
    %1794 = arith.addf %1790, %1793 : vector<1x8xf32>
    %1795 = vector.extract_strided_slice %1788 {offsets = [0, 1], sizes = [1, 1], strides = [1, 1]} : vector<1x2xf32> to vector<1x1xf32>
    %1796 = vector.broadcast %1795 : vector<1x1xf32> to vector<1x8xf32>
    %1797 = arith.mulf %1796, %1661 : vector<1x8xf32>
    %1798 = arith.addf %1794, %1797 : vector<1x8xf32>
    %1799 = arith.negf %1798 : vector<1x8xf32>
    %1800 = math.exp %1799 : vector<1x8xf32>
    %cst_243 = arith.constant 1.000000e+00 : f32
    %1801 = vector.broadcast %cst_243 : f32 to vector<1x8xf32>
    %1802 = arith.addf %1801, %1800 : vector<1x8xf32>
    %1803 = arith.divf %1801, %1802 : vector<1x8xf32>
    %1804 = math.tanh %1798 : vector<1x8xf32>
    %1805 = vector.extract_strided_slice %1803 {offsets = [0, 0], sizes = [1, 2], strides = [1, 1]} : vector<1x8xf32> to vector<1x2xf32>
    %1806 = vector.extract_strided_slice %1803 {offsets = [0, 2], sizes = [1, 2], strides = [1, 1]} : vector<1x8xf32> to vector<1x2xf32>
    %1807 = vector.extract_strided_slice %1804 {offsets = [0, 4], sizes = [1, 2], strides = [1, 1]} : vector<1x8xf32> to vector<1x2xf32>
    %1808 = vector.extract_strided_slice %1803 {offsets = [0, 6], sizes = [1, 2], strides = [1, 1]} : vector<1x8xf32> to vector<1x2xf32>
    %1809 = arith.mulf %1806, %1786 : vector<1x2xf32>
    %1810 = arith.mulf %1805, %1807 : vector<1x2xf32>
    %1811 = arith.addf %1809, %1810 : vector<1x2xf32>
    %1812 = math.tanh %1811 : vector<1x2xf32>
    %1813 = arith.mulf %1808, %1812 : vector<1x2xf32>
    %c8_244 = arith.constant 8 : index
    %c0_245 = arith.constant 0 : index
    %1814 = vector.load %arg11[%c8_244, %c0_245] : memref<15x16xf32, #tpu.memory_space<vmem>>, vector<1x16xf32>
    %1815 = vector.extract_strided_slice %1814 {offsets = [0, 8], sizes = [1, 8], strides = [1, 1]} : vector<1x16xf32> to vector<1x8xf32>
    %1816 = vector.extract_strided_slice %1813 {offsets = [0, 0], sizes = [1, 1], strides = [1, 1]} : vector<1x2xf32> to vector<1x1xf32>
    %1817 = vector.broadcast %1816 : vector<1x1xf32> to vector<1x8xf32>
    %1818 = arith.mulf %1817, %1660 : vector<1x8xf32>
    %1819 = arith.addf %1815, %1818 : vector<1x8xf32>
    %1820 = vector.extract_strided_slice %1813 {offsets = [0, 1], sizes = [1, 1], strides = [1, 1]} : vector<1x2xf32> to vector<1x1xf32>
    %1821 = vector.broadcast %1820 : vector<1x1xf32> to vector<1x8xf32>
    %1822 = arith.mulf %1821, %1661 : vector<1x8xf32>
    %1823 = arith.addf %1819, %1822 : vector<1x8xf32>
    %1824 = arith.negf %1823 : vector<1x8xf32>
    %1825 = math.exp %1824 : vector<1x8xf32>
    %cst_246 = arith.constant 1.000000e+00 : f32
    %1826 = vector.broadcast %cst_246 : f32 to vector<1x8xf32>
    %1827 = arith.addf %1826, %1825 : vector<1x8xf32>
    %1828 = arith.divf %1826, %1827 : vector<1x8xf32>
    %1829 = math.tanh %1823 : vector<1x8xf32>
    %1830 = vector.extract_strided_slice %1828 {offsets = [0, 0], sizes = [1, 2], strides = [1, 1]} : vector<1x8xf32> to vector<1x2xf32>
    %1831 = vector.extract_strided_slice %1828 {offsets = [0, 2], sizes = [1, 2], strides = [1, 1]} : vector<1x8xf32> to vector<1x2xf32>
    %1832 = vector.extract_strided_slice %1829 {offsets = [0, 4], sizes = [1, 2], strides = [1, 1]} : vector<1x8xf32> to vector<1x2xf32>
    %1833 = vector.extract_strided_slice %1828 {offsets = [0, 6], sizes = [1, 2], strides = [1, 1]} : vector<1x8xf32> to vector<1x2xf32>
    %1834 = arith.mulf %1831, %1811 : vector<1x2xf32>
    %1835 = arith.mulf %1830, %1832 : vector<1x2xf32>
    %1836 = arith.addf %1834, %1835 : vector<1x2xf32>
    %1837 = math.tanh %1836 : vector<1x2xf32>
    %1838 = arith.mulf %1833, %1837 : vector<1x2xf32>
    %c7_247 = arith.constant 7 : index
    %c0_248 = arith.constant 0 : index
    %1839 = vector.load %arg11[%c7_247, %c0_248] : memref<15x16xf32, #tpu.memory_space<vmem>>, vector<1x16xf32>
    %1840 = vector.extract_strided_slice %1839 {offsets = [0, 8], sizes = [1, 8], strides = [1, 1]} : vector<1x16xf32> to vector<1x8xf32>
    %1841 = vector.extract_strided_slice %1838 {offsets = [0, 0], sizes = [1, 1], strides = [1, 1]} : vector<1x2xf32> to vector<1x1xf32>
    %1842 = vector.broadcast %1841 : vector<1x1xf32> to vector<1x8xf32>
    %1843 = arith.mulf %1842, %1660 : vector<1x8xf32>
    %1844 = arith.addf %1840, %1843 : vector<1x8xf32>
    %1845 = vector.extract_strided_slice %1838 {offsets = [0, 1], sizes = [1, 1], strides = [1, 1]} : vector<1x2xf32> to vector<1x1xf32>
    %1846 = vector.broadcast %1845 : vector<1x1xf32> to vector<1x8xf32>
    %1847 = arith.mulf %1846, %1661 : vector<1x8xf32>
    %1848 = arith.addf %1844, %1847 : vector<1x8xf32>
    %1849 = arith.negf %1848 : vector<1x8xf32>
    %1850 = math.exp %1849 : vector<1x8xf32>
    %cst_249 = arith.constant 1.000000e+00 : f32
    %1851 = vector.broadcast %cst_249 : f32 to vector<1x8xf32>
    %1852 = arith.addf %1851, %1850 : vector<1x8xf32>
    %1853 = arith.divf %1851, %1852 : vector<1x8xf32>
    %1854 = math.tanh %1848 : vector<1x8xf32>
    %1855 = vector.extract_strided_slice %1853 {offsets = [0, 0], sizes = [1, 2], strides = [1, 1]} : vector<1x8xf32> to vector<1x2xf32>
    %1856 = vector.extract_strided_slice %1853 {offsets = [0, 2], sizes = [1, 2], strides = [1, 1]} : vector<1x8xf32> to vector<1x2xf32>
    %1857 = vector.extract_strided_slice %1854 {offsets = [0, 4], sizes = [1, 2], strides = [1, 1]} : vector<1x8xf32> to vector<1x2xf32>
    %1858 = vector.extract_strided_slice %1853 {offsets = [0, 6], sizes = [1, 2], strides = [1, 1]} : vector<1x8xf32> to vector<1x2xf32>
    %1859 = arith.mulf %1856, %1836 : vector<1x2xf32>
    %1860 = arith.mulf %1855, %1857 : vector<1x2xf32>
    %1861 = arith.addf %1859, %1860 : vector<1x2xf32>
    %1862 = math.tanh %1861 : vector<1x2xf32>
    %1863 = arith.mulf %1858, %1862 : vector<1x2xf32>
    %c6_250 = arith.constant 6 : index
    %c0_251 = arith.constant 0 : index
    %1864 = vector.load %arg11[%c6_250, %c0_251] : memref<15x16xf32, #tpu.memory_space<vmem>>, vector<1x16xf32>
    %1865 = vector.extract_strided_slice %1864 {offsets = [0, 8], sizes = [1, 8], strides = [1, 1]} : vector<1x16xf32> to vector<1x8xf32>
    %1866 = vector.extract_strided_slice %1863 {offsets = [0, 0], sizes = [1, 1], strides = [1, 1]} : vector<1x2xf32> to vector<1x1xf32>
    %1867 = vector.broadcast %1866 : vector<1x1xf32> to vector<1x8xf32>
    %1868 = arith.mulf %1867, %1660 : vector<1x8xf32>
    %1869 = arith.addf %1865, %1868 : vector<1x8xf32>
    %1870 = vector.extract_strided_slice %1863 {offsets = [0, 1], sizes = [1, 1], strides = [1, 1]} : vector<1x2xf32> to vector<1x1xf32>
    %1871 = vector.broadcast %1870 : vector<1x1xf32> to vector<1x8xf32>
    %1872 = arith.mulf %1871, %1661 : vector<1x8xf32>
    %1873 = arith.addf %1869, %1872 : vector<1x8xf32>
    %1874 = arith.negf %1873 : vector<1x8xf32>
    %1875 = math.exp %1874 : vector<1x8xf32>
    %cst_252 = arith.constant 1.000000e+00 : f32
    %1876 = vector.broadcast %cst_252 : f32 to vector<1x8xf32>
    %1877 = arith.addf %1876, %1875 : vector<1x8xf32>
    %1878 = arith.divf %1876, %1877 : vector<1x8xf32>
    %1879 = math.tanh %1873 : vector<1x8xf32>
    %1880 = vector.extract_strided_slice %1878 {offsets = [0, 0], sizes = [1, 2], strides = [1, 1]} : vector<1x8xf32> to vector<1x2xf32>
    %1881 = vector.extract_strided_slice %1878 {offsets = [0, 2], sizes = [1, 2], strides = [1, 1]} : vector<1x8xf32> to vector<1x2xf32>
    %1882 = vector.extract_strided_slice %1879 {offsets = [0, 4], sizes = [1, 2], strides = [1, 1]} : vector<1x8xf32> to vector<1x2xf32>
    %1883 = vector.extract_strided_slice %1878 {offsets = [0, 6], sizes = [1, 2], strides = [1, 1]} : vector<1x8xf32> to vector<1x2xf32>
    %1884 = arith.mulf %1881, %1861 : vector<1x2xf32>
    %1885 = arith.mulf %1880, %1882 : vector<1x2xf32>
    %1886 = arith.addf %1884, %1885 : vector<1x2xf32>
    %1887 = math.tanh %1886 : vector<1x2xf32>
    %1888 = arith.mulf %1883, %1887 : vector<1x2xf32>
    %c5_253 = arith.constant 5 : index
    %c0_254 = arith.constant 0 : index
    %1889 = vector.load %arg11[%c5_253, %c0_254] : memref<15x16xf32, #tpu.memory_space<vmem>>, vector<1x16xf32>
    %1890 = vector.extract_strided_slice %1889 {offsets = [0, 8], sizes = [1, 8], strides = [1, 1]} : vector<1x16xf32> to vector<1x8xf32>
    %1891 = vector.extract_strided_slice %1888 {offsets = [0, 0], sizes = [1, 1], strides = [1, 1]} : vector<1x2xf32> to vector<1x1xf32>
    %1892 = vector.broadcast %1891 : vector<1x1xf32> to vector<1x8xf32>
    %1893 = arith.mulf %1892, %1660 : vector<1x8xf32>
    %1894 = arith.addf %1890, %1893 : vector<1x8xf32>
    %1895 = vector.extract_strided_slice %1888 {offsets = [0, 1], sizes = [1, 1], strides = [1, 1]} : vector<1x2xf32> to vector<1x1xf32>
    %1896 = vector.broadcast %1895 : vector<1x1xf32> to vector<1x8xf32>
    %1897 = arith.mulf %1896, %1661 : vector<1x8xf32>
    %1898 = arith.addf %1894, %1897 : vector<1x8xf32>
    %1899 = arith.negf %1898 : vector<1x8xf32>
    %1900 = math.exp %1899 : vector<1x8xf32>
    %cst_255 = arith.constant 1.000000e+00 : f32
    %1901 = vector.broadcast %cst_255 : f32 to vector<1x8xf32>
    %1902 = arith.addf %1901, %1900 : vector<1x8xf32>
    %1903 = arith.divf %1901, %1902 : vector<1x8xf32>
    %1904 = math.tanh %1898 : vector<1x8xf32>
    %1905 = vector.extract_strided_slice %1903 {offsets = [0, 0], sizes = [1, 2], strides = [1, 1]} : vector<1x8xf32> to vector<1x2xf32>
    %1906 = vector.extract_strided_slice %1903 {offsets = [0, 2], sizes = [1, 2], strides = [1, 1]} : vector<1x8xf32> to vector<1x2xf32>
    %1907 = vector.extract_strided_slice %1904 {offsets = [0, 4], sizes = [1, 2], strides = [1, 1]} : vector<1x8xf32> to vector<1x2xf32>
    %1908 = vector.extract_strided_slice %1903 {offsets = [0, 6], sizes = [1, 2], strides = [1, 1]} : vector<1x8xf32> to vector<1x2xf32>
    %1909 = arith.mulf %1906, %1886 : vector<1x2xf32>
    %1910 = arith.mulf %1905, %1907 : vector<1x2xf32>
    %1911 = arith.addf %1909, %1910 : vector<1x2xf32>
    %1912 = math.tanh %1911 : vector<1x2xf32>
    %1913 = arith.mulf %1908, %1912 : vector<1x2xf32>
    %c4_256 = arith.constant 4 : index
    %c0_257 = arith.constant 0 : index
    %1914 = vector.load %arg11[%c4_256, %c0_257] : memref<15x16xf32, #tpu.memory_space<vmem>>, vector<1x16xf32>
    %1915 = vector.extract_strided_slice %1914 {offsets = [0, 8], sizes = [1, 8], strides = [1, 1]} : vector<1x16xf32> to vector<1x8xf32>
    %1916 = vector.extract_strided_slice %1913 {offsets = [0, 0], sizes = [1, 1], strides = [1, 1]} : vector<1x2xf32> to vector<1x1xf32>
    %1917 = vector.broadcast %1916 : vector<1x1xf32> to vector<1x8xf32>
    %1918 = arith.mulf %1917, %1660 : vector<1x8xf32>
    %1919 = arith.addf %1915, %1918 : vector<1x8xf32>
    %1920 = vector.extract_strided_slice %1913 {offsets = [0, 1], sizes = [1, 1], strides = [1, 1]} : vector<1x2xf32> to vector<1x1xf32>
    %1921 = vector.broadcast %1920 : vector<1x1xf32> to vector<1x8xf32>
    %1922 = arith.mulf %1921, %1661 : vector<1x8xf32>
    %1923 = arith.addf %1919, %1922 : vector<1x8xf32>
    %1924 = arith.negf %1923 : vector<1x8xf32>
    %1925 = math.exp %1924 : vector<1x8xf32>
    %cst_258 = arith.constant 1.000000e+00 : f32
    %1926 = vector.broadcast %cst_258 : f32 to vector<1x8xf32>
    %1927 = arith.addf %1926, %1925 : vector<1x8xf32>
    %1928 = arith.divf %1926, %1927 : vector<1x8xf32>
    %1929 = math.tanh %1923 : vector<1x8xf32>
    %1930 = vector.extract_strided_slice %1928 {offsets = [0, 0], sizes = [1, 2], strides = [1, 1]} : vector<1x8xf32> to vector<1x2xf32>
    %1931 = vector.extract_strided_slice %1928 {offsets = [0, 2], sizes = [1, 2], strides = [1, 1]} : vector<1x8xf32> to vector<1x2xf32>
    %1932 = vector.extract_strided_slice %1929 {offsets = [0, 4], sizes = [1, 2], strides = [1, 1]} : vector<1x8xf32> to vector<1x2xf32>
    %1933 = vector.extract_strided_slice %1928 {offsets = [0, 6], sizes = [1, 2], strides = [1, 1]} : vector<1x8xf32> to vector<1x2xf32>
    %1934 = arith.mulf %1931, %1911 : vector<1x2xf32>
    %1935 = arith.mulf %1930, %1932 : vector<1x2xf32>
    %1936 = arith.addf %1934, %1935 : vector<1x2xf32>
    %1937 = math.tanh %1936 : vector<1x2xf32>
    %1938 = arith.mulf %1933, %1937 : vector<1x2xf32>
    %c3_259 = arith.constant 3 : index
    %c0_260 = arith.constant 0 : index
    %1939 = vector.load %arg11[%c3_259, %c0_260] : memref<15x16xf32, #tpu.memory_space<vmem>>, vector<1x16xf32>
    %1940 = vector.extract_strided_slice %1939 {offsets = [0, 8], sizes = [1, 8], strides = [1, 1]} : vector<1x16xf32> to vector<1x8xf32>
    %1941 = vector.extract_strided_slice %1938 {offsets = [0, 0], sizes = [1, 1], strides = [1, 1]} : vector<1x2xf32> to vector<1x1xf32>
    %1942 = vector.broadcast %1941 : vector<1x1xf32> to vector<1x8xf32>
    %1943 = arith.mulf %1942, %1660 : vector<1x8xf32>
    %1944 = arith.addf %1940, %1943 : vector<1x8xf32>
    %1945 = vector.extract_strided_slice %1938 {offsets = [0, 1], sizes = [1, 1], strides = [1, 1]} : vector<1x2xf32> to vector<1x1xf32>
    %1946 = vector.broadcast %1945 : vector<1x1xf32> to vector<1x8xf32>
    %1947 = arith.mulf %1946, %1661 : vector<1x8xf32>
    %1948 = arith.addf %1944, %1947 : vector<1x8xf32>
    %1949 = arith.negf %1948 : vector<1x8xf32>
    %1950 = math.exp %1949 : vector<1x8xf32>
    %cst_261 = arith.constant 1.000000e+00 : f32
    %1951 = vector.broadcast %cst_261 : f32 to vector<1x8xf32>
    %1952 = arith.addf %1951, %1950 : vector<1x8xf32>
    %1953 = arith.divf %1951, %1952 : vector<1x8xf32>
    %1954 = math.tanh %1948 : vector<1x8xf32>
    %1955 = vector.extract_strided_slice %1953 {offsets = [0, 0], sizes = [1, 2], strides = [1, 1]} : vector<1x8xf32> to vector<1x2xf32>
    %1956 = vector.extract_strided_slice %1953 {offsets = [0, 2], sizes = [1, 2], strides = [1, 1]} : vector<1x8xf32> to vector<1x2xf32>
    %1957 = vector.extract_strided_slice %1954 {offsets = [0, 4], sizes = [1, 2], strides = [1, 1]} : vector<1x8xf32> to vector<1x2xf32>
    %1958 = vector.extract_strided_slice %1953 {offsets = [0, 6], sizes = [1, 2], strides = [1, 1]} : vector<1x8xf32> to vector<1x2xf32>
    %1959 = arith.mulf %1956, %1936 : vector<1x2xf32>
    %1960 = arith.mulf %1955, %1957 : vector<1x2xf32>
    %1961 = arith.addf %1959, %1960 : vector<1x2xf32>
    %1962 = math.tanh %1961 : vector<1x2xf32>
    %1963 = arith.mulf %1958, %1962 : vector<1x2xf32>
    %c2_262 = arith.constant 2 : index
    %c0_263 = arith.constant 0 : index
    %1964 = vector.load %arg11[%c2_262, %c0_263] : memref<15x16xf32, #tpu.memory_space<vmem>>, vector<1x16xf32>
    %1965 = vector.extract_strided_slice %1964 {offsets = [0, 8], sizes = [1, 8], strides = [1, 1]} : vector<1x16xf32> to vector<1x8xf32>
    %1966 = vector.extract_strided_slice %1963 {offsets = [0, 0], sizes = [1, 1], strides = [1, 1]} : vector<1x2xf32> to vector<1x1xf32>
    %1967 = vector.broadcast %1966 : vector<1x1xf32> to vector<1x8xf32>
    %1968 = arith.mulf %1967, %1660 : vector<1x8xf32>
    %1969 = arith.addf %1965, %1968 : vector<1x8xf32>
    %1970 = vector.extract_strided_slice %1963 {offsets = [0, 1], sizes = [1, 1], strides = [1, 1]} : vector<1x2xf32> to vector<1x1xf32>
    %1971 = vector.broadcast %1970 : vector<1x1xf32> to vector<1x8xf32>
    %1972 = arith.mulf %1971, %1661 : vector<1x8xf32>
    %1973 = arith.addf %1969, %1972 : vector<1x8xf32>
    %1974 = arith.negf %1973 : vector<1x8xf32>
    %1975 = math.exp %1974 : vector<1x8xf32>
    %cst_264 = arith.constant 1.000000e+00 : f32
    %1976 = vector.broadcast %cst_264 : f32 to vector<1x8xf32>
    %1977 = arith.addf %1976, %1975 : vector<1x8xf32>
    %1978 = arith.divf %1976, %1977 : vector<1x8xf32>
    %1979 = math.tanh %1973 : vector<1x8xf32>
    %1980 = vector.extract_strided_slice %1978 {offsets = [0, 0], sizes = [1, 2], strides = [1, 1]} : vector<1x8xf32> to vector<1x2xf32>
    %1981 = vector.extract_strided_slice %1978 {offsets = [0, 2], sizes = [1, 2], strides = [1, 1]} : vector<1x8xf32> to vector<1x2xf32>
    %1982 = vector.extract_strided_slice %1979 {offsets = [0, 4], sizes = [1, 2], strides = [1, 1]} : vector<1x8xf32> to vector<1x2xf32>
    %1983 = vector.extract_strided_slice %1978 {offsets = [0, 6], sizes = [1, 2], strides = [1, 1]} : vector<1x8xf32> to vector<1x2xf32>
    %1984 = arith.mulf %1981, %1961 : vector<1x2xf32>
    %1985 = arith.mulf %1980, %1982 : vector<1x2xf32>
    %1986 = arith.addf %1984, %1985 : vector<1x2xf32>
    %1987 = math.tanh %1986 : vector<1x2xf32>
    %1988 = arith.mulf %1983, %1987 : vector<1x2xf32>
    %c1_265 = arith.constant 1 : index
    %c0_266 = arith.constant 0 : index
    %1989 = vector.load %arg11[%c1_265, %c0_266] : memref<15x16xf32, #tpu.memory_space<vmem>>, vector<1x16xf32>
    %1990 = vector.extract_strided_slice %1989 {offsets = [0, 8], sizes = [1, 8], strides = [1, 1]} : vector<1x16xf32> to vector<1x8xf32>
    %1991 = vector.extract_strided_slice %1988 {offsets = [0, 0], sizes = [1, 1], strides = [1, 1]} : vector<1x2xf32> to vector<1x1xf32>
    %1992 = vector.broadcast %1991 : vector<1x1xf32> to vector<1x8xf32>
    %1993 = arith.mulf %1992, %1660 : vector<1x8xf32>
    %1994 = arith.addf %1990, %1993 : vector<1x8xf32>
    %1995 = vector.extract_strided_slice %1988 {offsets = [0, 1], sizes = [1, 1], strides = [1, 1]} : vector<1x2xf32> to vector<1x1xf32>
    %1996 = vector.broadcast %1995 : vector<1x1xf32> to vector<1x8xf32>
    %1997 = arith.mulf %1996, %1661 : vector<1x8xf32>
    %1998 = arith.addf %1994, %1997 : vector<1x8xf32>
    %1999 = arith.negf %1998 : vector<1x8xf32>
    %2000 = math.exp %1999 : vector<1x8xf32>
    %cst_267 = arith.constant 1.000000e+00 : f32
    %2001 = vector.broadcast %cst_267 : f32 to vector<1x8xf32>
    %2002 = arith.addf %2001, %2000 : vector<1x8xf32>
    %2003 = arith.divf %2001, %2002 : vector<1x8xf32>
    %2004 = math.tanh %1998 : vector<1x8xf32>
    %2005 = vector.extract_strided_slice %2003 {offsets = [0, 0], sizes = [1, 2], strides = [1, 1]} : vector<1x8xf32> to vector<1x2xf32>
    %2006 = vector.extract_strided_slice %2003 {offsets = [0, 2], sizes = [1, 2], strides = [1, 1]} : vector<1x8xf32> to vector<1x2xf32>
    %2007 = vector.extract_strided_slice %2004 {offsets = [0, 4], sizes = [1, 2], strides = [1, 1]} : vector<1x8xf32> to vector<1x2xf32>
    %2008 = vector.extract_strided_slice %2003 {offsets = [0, 6], sizes = [1, 2], strides = [1, 1]} : vector<1x8xf32> to vector<1x2xf32>
    %2009 = arith.mulf %2006, %1986 : vector<1x2xf32>
    %2010 = arith.mulf %2005, %2007 : vector<1x2xf32>
    %2011 = arith.addf %2009, %2010 : vector<1x2xf32>
    %2012 = math.tanh %2011 : vector<1x2xf32>
    %2013 = arith.mulf %2008, %2012 : vector<1x2xf32>
    %c0_268 = arith.constant 0 : index
    %c0_269 = arith.constant 0 : index
    %2014 = vector.load %arg11[%c0_268, %c0_269] : memref<15x16xf32, #tpu.memory_space<vmem>>, vector<1x16xf32>
    %2015 = vector.extract_strided_slice %2014 {offsets = [0, 8], sizes = [1, 8], strides = [1, 1]} : vector<1x16xf32> to vector<1x8xf32>
    %2016 = vector.extract_strided_slice %2013 {offsets = [0, 0], sizes = [1, 1], strides = [1, 1]} : vector<1x2xf32> to vector<1x1xf32>
    %2017 = vector.broadcast %2016 : vector<1x1xf32> to vector<1x8xf32>
    %2018 = arith.mulf %2017, %1660 : vector<1x8xf32>
    %2019 = arith.addf %2015, %2018 : vector<1x8xf32>
    %2020 = vector.extract_strided_slice %2013 {offsets = [0, 1], sizes = [1, 1], strides = [1, 1]} : vector<1x2xf32> to vector<1x1xf32>
    %2021 = vector.broadcast %2020 : vector<1x1xf32> to vector<1x8xf32>
    %2022 = arith.mulf %2021, %1661 : vector<1x8xf32>
    %2023 = arith.addf %2019, %2022 : vector<1x8xf32>
    %2024 = arith.negf %2023 : vector<1x8xf32>
    %2025 = math.exp %2024 : vector<1x8xf32>
    %cst_270 = arith.constant 1.000000e+00 : f32
    %2026 = vector.broadcast %cst_270 : f32 to vector<1x8xf32>
    %2027 = arith.addf %2026, %2025 : vector<1x8xf32>
    %2028 = arith.divf %2026, %2027 : vector<1x8xf32>
    %2029 = math.tanh %2023 : vector<1x8xf32>
    %2030 = vector.extract_strided_slice %2028 {offsets = [0, 0], sizes = [1, 2], strides = [1, 1]} : vector<1x8xf32> to vector<1x2xf32>
    %2031 = vector.extract_strided_slice %2028 {offsets = [0, 2], sizes = [1, 2], strides = [1, 1]} : vector<1x8xf32> to vector<1x2xf32>
    %2032 = vector.extract_strided_slice %2029 {offsets = [0, 4], sizes = [1, 2], strides = [1, 1]} : vector<1x8xf32> to vector<1x2xf32>
    %2033 = vector.extract_strided_slice %2028 {offsets = [0, 6], sizes = [1, 2], strides = [1, 1]} : vector<1x8xf32> to vector<1x2xf32>
    %2034 = arith.mulf %2031, %2011 : vector<1x2xf32>
    %2035 = arith.mulf %2030, %2032 : vector<1x2xf32>
    %2036 = arith.addf %2034, %2035 : vector<1x2xf32>
    %2037 = math.tanh %2036 : vector<1x2xf32>
    %2038 = arith.mulf %2033, %2037 : vector<1x2xf32>
    %2039 = tpu.iota {dimensions = array<i32: 1>} : vector<1x4xi32>
    %c0_i32_271 = arith.constant 0 : i32
    %2040 = vector.broadcast %c0_i32_271 : i32 to vector<1x4xi32>
    %2041 = arith.cmpi eq, %2039, %2040 : vector<1x4xi32>
    %2042 = arith.extui %2041 : vector<1x4xi1> to vector<1x4xi32>
    %2043 = arith.sitofp %2042 : vector<1x4xi32> to vector<1x4xf32>
    %c1_i32_272 = arith.constant 1 : i32
    %2044 = vector.broadcast %c1_i32_272 : i32 to vector<1x4xi32>
    %2045 = arith.cmpi eq, %2039, %2044 : vector<1x4xi32>
    %2046 = arith.extui %2045 : vector<1x4xi1> to vector<1x4xi32>
    %2047 = arith.sitofp %2046 : vector<1x4xi32> to vector<1x4xf32>
    %c2_i32_273 = arith.constant 2 : i32
    %2048 = vector.broadcast %c2_i32_273 : i32 to vector<1x4xi32>
    %2049 = arith.cmpi eq, %2039, %2048 : vector<1x4xi32>
    %2050 = arith.extui %2049 : vector<1x4xi1> to vector<1x4xi32>
    %2051 = arith.sitofp %2050 : vector<1x4xi32> to vector<1x4xf32>
    %c3_i32 = arith.constant 3 : i32
    %2052 = vector.broadcast %c3_i32 : i32 to vector<1x4xi32>
    %2053 = arith.cmpi eq, %2039, %2052 : vector<1x4xi32>
    %2054 = arith.extui %2053 : vector<1x4xi1> to vector<1x4xi32>
    %2055 = arith.sitofp %2054 : vector<1x4xi32> to vector<1x4xf32>
    %2056 = tpu.iota {dimensions = array<i32: 0>} : vector<15x1xi32>
    %cst_274 = arith.constant 0.000000e+00 : f32
    %2057 = vector.broadcast %cst_274 : f32 to vector<15x4xf32>
    %2058 = vector.extract_strided_slice %1308 {offsets = [0, 0], sizes = [1, 1], strides = [1, 1]} : vector<1x2xf32> to vector<1x1xf32>
    %2059 = vector.broadcast %2058 : vector<1x1xf32> to vector<1x4xf32>
    %2060 = arith.mulf %2059, %2043 : vector<1x4xf32>
    %2061 = vector.extract_strided_slice %1308 {offsets = [0, 1], sizes = [1, 1], strides = [1, 1]} : vector<1x2xf32> to vector<1x1xf32>
    %2062 = vector.broadcast %2061 : vector<1x1xf32> to vector<1x4xf32>
    %2063 = arith.mulf %2062, %2047 : vector<1x4xf32>
    %2064 = arith.addf %2060, %2063 : vector<1x4xf32>
    %2065 = vector.extract_strided_slice %2038 {offsets = [0, 0], sizes = [1, 1], strides = [1, 1]} : vector<1x2xf32> to vector<1x1xf32>
    %2066 = vector.broadcast %2065 : vector<1x1xf32> to vector<1x4xf32>
    %2067 = arith.mulf %2066, %2051 : vector<1x4xf32>
    %2068 = arith.addf %2064, %2067 : vector<1x4xf32>
    %2069 = vector.extract_strided_slice %2038 {offsets = [0, 1], sizes = [1, 1], strides = [1, 1]} : vector<1x2xf32> to vector<1x1xf32>
    %2070 = vector.broadcast %2069 : vector<1x1xf32> to vector<1x4xf32>
    %2071 = arith.mulf %2070, %2055 : vector<1x4xf32>
    %2072 = arith.addf %2068, %2071 : vector<1x4xf32>
    %c0_i32_275 = arith.constant 0 : i32
    %2073 = vector.broadcast %c0_i32_275 : i32 to vector<15x1xi32>
    %2074 = arith.cmpi eq, %2056, %2073 : vector<15x1xi32>
    %2075 = arith.extui %2074 : vector<15x1xi1> to vector<15x1xi32>
    %2076 = arith.sitofp %2075 : vector<15x1xi32> to vector<15x1xf32>
    %2077 = vector.broadcast %2076 : vector<15x1xf32> to vector<15x4xf32>
    %2078 = vector.broadcast %2072 : vector<1x4xf32> to vector<15x4xf32>
    %2079 = arith.mulf %2077, %2078 : vector<15x4xf32>
    %2080 = arith.addf %2057, %2079 : vector<15x4xf32>
    %2081 = vector.extract_strided_slice %1333 {offsets = [0, 0], sizes = [1, 1], strides = [1, 1]} : vector<1x2xf32> to vector<1x1xf32>
    %2082 = vector.broadcast %2081 : vector<1x1xf32> to vector<1x4xf32>
    %2083 = arith.mulf %2082, %2043 : vector<1x4xf32>
    %2084 = vector.extract_strided_slice %1333 {offsets = [0, 1], sizes = [1, 1], strides = [1, 1]} : vector<1x2xf32> to vector<1x1xf32>
    %2085 = vector.broadcast %2084 : vector<1x1xf32> to vector<1x4xf32>
    %2086 = arith.mulf %2085, %2047 : vector<1x4xf32>
    %2087 = arith.addf %2083, %2086 : vector<1x4xf32>
    %2088 = vector.extract_strided_slice %2013 {offsets = [0, 0], sizes = [1, 1], strides = [1, 1]} : vector<1x2xf32> to vector<1x1xf32>
    %2089 = vector.broadcast %2088 : vector<1x1xf32> to vector<1x4xf32>
    %2090 = arith.mulf %2089, %2051 : vector<1x4xf32>
    %2091 = arith.addf %2087, %2090 : vector<1x4xf32>
    %2092 = vector.extract_strided_slice %2013 {offsets = [0, 1], sizes = [1, 1], strides = [1, 1]} : vector<1x2xf32> to vector<1x1xf32>
    %2093 = vector.broadcast %2092 : vector<1x1xf32> to vector<1x4xf32>
    %2094 = arith.mulf %2093, %2055 : vector<1x4xf32>
    %2095 = arith.addf %2091, %2094 : vector<1x4xf32>
    %c1_i32_276 = arith.constant 1 : i32
    %2096 = vector.broadcast %c1_i32_276 : i32 to vector<15x1xi32>
    %2097 = arith.cmpi eq, %2056, %2096 : vector<15x1xi32>
    %2098 = arith.extui %2097 : vector<15x1xi1> to vector<15x1xi32>
    %2099 = arith.sitofp %2098 : vector<15x1xi32> to vector<15x1xf32>
    %2100 = vector.broadcast %2099 : vector<15x1xf32> to vector<15x4xf32>
    %2101 = vector.broadcast %2095 : vector<1x4xf32> to vector<15x4xf32>
    %2102 = arith.mulf %2100, %2101 : vector<15x4xf32>
    %2103 = arith.addf %2080, %2102 : vector<15x4xf32>
    %2104 = vector.extract_strided_slice %1358 {offsets = [0, 0], sizes = [1, 1], strides = [1, 1]} : vector<1x2xf32> to vector<1x1xf32>
    %2105 = vector.broadcast %2104 : vector<1x1xf32> to vector<1x4xf32>
    %2106 = arith.mulf %2105, %2043 : vector<1x4xf32>
    %2107 = vector.extract_strided_slice %1358 {offsets = [0, 1], sizes = [1, 1], strides = [1, 1]} : vector<1x2xf32> to vector<1x1xf32>
    %2108 = vector.broadcast %2107 : vector<1x1xf32> to vector<1x4xf32>
    %2109 = arith.mulf %2108, %2047 : vector<1x4xf32>
    %2110 = arith.addf %2106, %2109 : vector<1x4xf32>
    %2111 = vector.extract_strided_slice %1988 {offsets = [0, 0], sizes = [1, 1], strides = [1, 1]} : vector<1x2xf32> to vector<1x1xf32>
    %2112 = vector.broadcast %2111 : vector<1x1xf32> to vector<1x4xf32>
    %2113 = arith.mulf %2112, %2051 : vector<1x4xf32>
    %2114 = arith.addf %2110, %2113 : vector<1x4xf32>
    %2115 = vector.extract_strided_slice %1988 {offsets = [0, 1], sizes = [1, 1], strides = [1, 1]} : vector<1x2xf32> to vector<1x1xf32>
    %2116 = vector.broadcast %2115 : vector<1x1xf32> to vector<1x4xf32>
    %2117 = arith.mulf %2116, %2055 : vector<1x4xf32>
    %2118 = arith.addf %2114, %2117 : vector<1x4xf32>
    %c2_i32_277 = arith.constant 2 : i32
    %2119 = vector.broadcast %c2_i32_277 : i32 to vector<15x1xi32>
    %2120 = arith.cmpi eq, %2056, %2119 : vector<15x1xi32>
    %2121 = arith.extui %2120 : vector<15x1xi1> to vector<15x1xi32>
    %2122 = arith.sitofp %2121 : vector<15x1xi32> to vector<15x1xf32>
    %2123 = vector.broadcast %2122 : vector<15x1xf32> to vector<15x4xf32>
    %2124 = vector.broadcast %2118 : vector<1x4xf32> to vector<15x4xf32>
    %2125 = arith.mulf %2123, %2124 : vector<15x4xf32>
    %2126 = arith.addf %2103, %2125 : vector<15x4xf32>
    %2127 = vector.extract_strided_slice %1383 {offsets = [0, 0], sizes = [1, 1], strides = [1, 1]} : vector<1x2xf32> to vector<1x1xf32>
    %2128 = vector.broadcast %2127 : vector<1x1xf32> to vector<1x4xf32>
    %2129 = arith.mulf %2128, %2043 : vector<1x4xf32>
    %2130 = vector.extract_strided_slice %1383 {offsets = [0, 1], sizes = [1, 1], strides = [1, 1]} : vector<1x2xf32> to vector<1x1xf32>
    %2131 = vector.broadcast %2130 : vector<1x1xf32> to vector<1x4xf32>
    %2132 = arith.mulf %2131, %2047 : vector<1x4xf32>
    %2133 = arith.addf %2129, %2132 : vector<1x4xf32>
    %2134 = vector.extract_strided_slice %1963 {offsets = [0, 0], sizes = [1, 1], strides = [1, 1]} : vector<1x2xf32> to vector<1x1xf32>
    %2135 = vector.broadcast %2134 : vector<1x1xf32> to vector<1x4xf32>
    %2136 = arith.mulf %2135, %2051 : vector<1x4xf32>
    %2137 = arith.addf %2133, %2136 : vector<1x4xf32>
    %2138 = vector.extract_strided_slice %1963 {offsets = [0, 1], sizes = [1, 1], strides = [1, 1]} : vector<1x2xf32> to vector<1x1xf32>
    %2139 = vector.broadcast %2138 : vector<1x1xf32> to vector<1x4xf32>
    %2140 = arith.mulf %2139, %2055 : vector<1x4xf32>
    %2141 = arith.addf %2137, %2140 : vector<1x4xf32>
    %c3_i32_278 = arith.constant 3 : i32
    %2142 = vector.broadcast %c3_i32_278 : i32 to vector<15x1xi32>
    %2143 = arith.cmpi eq, %2056, %2142 : vector<15x1xi32>
    %2144 = arith.extui %2143 : vector<15x1xi1> to vector<15x1xi32>
    %2145 = arith.sitofp %2144 : vector<15x1xi32> to vector<15x1xf32>
    %2146 = vector.broadcast %2145 : vector<15x1xf32> to vector<15x4xf32>
    %2147 = vector.broadcast %2141 : vector<1x4xf32> to vector<15x4xf32>
    %2148 = arith.mulf %2146, %2147 : vector<15x4xf32>
    %2149 = arith.addf %2126, %2148 : vector<15x4xf32>
    %2150 = vector.extract_strided_slice %1408 {offsets = [0, 0], sizes = [1, 1], strides = [1, 1]} : vector<1x2xf32> to vector<1x1xf32>
    %2151 = vector.broadcast %2150 : vector<1x1xf32> to vector<1x4xf32>
    %2152 = arith.mulf %2151, %2043 : vector<1x4xf32>
    %2153 = vector.extract_strided_slice %1408 {offsets = [0, 1], sizes = [1, 1], strides = [1, 1]} : vector<1x2xf32> to vector<1x1xf32>
    %2154 = vector.broadcast %2153 : vector<1x1xf32> to vector<1x4xf32>
    %2155 = arith.mulf %2154, %2047 : vector<1x4xf32>
    %2156 = arith.addf %2152, %2155 : vector<1x4xf32>
    %2157 = vector.extract_strided_slice %1938 {offsets = [0, 0], sizes = [1, 1], strides = [1, 1]} : vector<1x2xf32> to vector<1x1xf32>
    %2158 = vector.broadcast %2157 : vector<1x1xf32> to vector<1x4xf32>
    %2159 = arith.mulf %2158, %2051 : vector<1x4xf32>
    %2160 = arith.addf %2156, %2159 : vector<1x4xf32>
    %2161 = vector.extract_strided_slice %1938 {offsets = [0, 1], sizes = [1, 1], strides = [1, 1]} : vector<1x2xf32> to vector<1x1xf32>
    %2162 = vector.broadcast %2161 : vector<1x1xf32> to vector<1x4xf32>
    %2163 = arith.mulf %2162, %2055 : vector<1x4xf32>
    %2164 = arith.addf %2160, %2163 : vector<1x4xf32>
    %c4_i32_279 = arith.constant 4 : i32
    %2165 = vector.broadcast %c4_i32_279 : i32 to vector<15x1xi32>
    %2166 = arith.cmpi eq, %2056, %2165 : vector<15x1xi32>
    %2167 = arith.extui %2166 : vector<15x1xi1> to vector<15x1xi32>
    %2168 = arith.sitofp %2167 : vector<15x1xi32> to vector<15x1xf32>
    %2169 = vector.broadcast %2168 : vector<15x1xf32> to vector<15x4xf32>
    %2170 = vector.broadcast %2164 : vector<1x4xf32> to vector<15x4xf32>
    %2171 = arith.mulf %2169, %2170 : vector<15x4xf32>
    %2172 = arith.addf %2149, %2171 : vector<15x4xf32>
    %2173 = vector.extract_strided_slice %1433 {offsets = [0, 0], sizes = [1, 1], strides = [1, 1]} : vector<1x2xf32> to vector<1x1xf32>
    %2174 = vector.broadcast %2173 : vector<1x1xf32> to vector<1x4xf32>
    %2175 = arith.mulf %2174, %2043 : vector<1x4xf32>
    %2176 = vector.extract_strided_slice %1433 {offsets = [0, 1], sizes = [1, 1], strides = [1, 1]} : vector<1x2xf32> to vector<1x1xf32>
    %2177 = vector.broadcast %2176 : vector<1x1xf32> to vector<1x4xf32>
    %2178 = arith.mulf %2177, %2047 : vector<1x4xf32>
    %2179 = arith.addf %2175, %2178 : vector<1x4xf32>
    %2180 = vector.extract_strided_slice %1913 {offsets = [0, 0], sizes = [1, 1], strides = [1, 1]} : vector<1x2xf32> to vector<1x1xf32>
    %2181 = vector.broadcast %2180 : vector<1x1xf32> to vector<1x4xf32>
    %2182 = arith.mulf %2181, %2051 : vector<1x4xf32>
    %2183 = arith.addf %2179, %2182 : vector<1x4xf32>
    %2184 = vector.extract_strided_slice %1913 {offsets = [0, 1], sizes = [1, 1], strides = [1, 1]} : vector<1x2xf32> to vector<1x1xf32>
    %2185 = vector.broadcast %2184 : vector<1x1xf32> to vector<1x4xf32>
    %2186 = arith.mulf %2185, %2055 : vector<1x4xf32>
    %2187 = arith.addf %2183, %2186 : vector<1x4xf32>
    %c5_i32 = arith.constant 5 : i32
    %2188 = vector.broadcast %c5_i32 : i32 to vector<15x1xi32>
    %2189 = arith.cmpi eq, %2056, %2188 : vector<15x1xi32>
    %2190 = arith.extui %2189 : vector<15x1xi1> to vector<15x1xi32>
    %2191 = arith.sitofp %2190 : vector<15x1xi32> to vector<15x1xf32>
    %2192 = vector.broadcast %2191 : vector<15x1xf32> to vector<15x4xf32>
    %2193 = vector.broadcast %2187 : vector<1x4xf32> to vector<15x4xf32>
    %2194 = arith.mulf %2192, %2193 : vector<15x4xf32>
    %2195 = arith.addf %2172, %2194 : vector<15x4xf32>
    %2196 = vector.extract_strided_slice %1458 {offsets = [0, 0], sizes = [1, 1], strides = [1, 1]} : vector<1x2xf32> to vector<1x1xf32>
    %2197 = vector.broadcast %2196 : vector<1x1xf32> to vector<1x4xf32>
    %2198 = arith.mulf %2197, %2043 : vector<1x4xf32>
    %2199 = vector.extract_strided_slice %1458 {offsets = [0, 1], sizes = [1, 1], strides = [1, 1]} : vector<1x2xf32> to vector<1x1xf32>
    %2200 = vector.broadcast %2199 : vector<1x1xf32> to vector<1x4xf32>
    %2201 = arith.mulf %2200, %2047 : vector<1x4xf32>
    %2202 = arith.addf %2198, %2201 : vector<1x4xf32>
    %2203 = vector.extract_strided_slice %1888 {offsets = [0, 0], sizes = [1, 1], strides = [1, 1]} : vector<1x2xf32> to vector<1x1xf32>
    %2204 = vector.broadcast %2203 : vector<1x1xf32> to vector<1x4xf32>
    %2205 = arith.mulf %2204, %2051 : vector<1x4xf32>
    %2206 = arith.addf %2202, %2205 : vector<1x4xf32>
    %2207 = vector.extract_strided_slice %1888 {offsets = [0, 1], sizes = [1, 1], strides = [1, 1]} : vector<1x2xf32> to vector<1x1xf32>
    %2208 = vector.broadcast %2207 : vector<1x1xf32> to vector<1x4xf32>
    %2209 = arith.mulf %2208, %2055 : vector<1x4xf32>
    %2210 = arith.addf %2206, %2209 : vector<1x4xf32>
    %c6_i32 = arith.constant 6 : i32
    %2211 = vector.broadcast %c6_i32 : i32 to vector<15x1xi32>
    %2212 = arith.cmpi eq, %2056, %2211 : vector<15x1xi32>
    %2213 = arith.extui %2212 : vector<15x1xi1> to vector<15x1xi32>
    %2214 = arith.sitofp %2213 : vector<15x1xi32> to vector<15x1xf32>
    %2215 = vector.broadcast %2214 : vector<15x1xf32> to vector<15x4xf32>
    %2216 = vector.broadcast %2210 : vector<1x4xf32> to vector<15x4xf32>
    %2217 = arith.mulf %2215, %2216 : vector<15x4xf32>
    %2218 = arith.addf %2195, %2217 : vector<15x4xf32>
    %2219 = vector.extract_strided_slice %1483 {offsets = [0, 0], sizes = [1, 1], strides = [1, 1]} : vector<1x2xf32> to vector<1x1xf32>
    %2220 = vector.broadcast %2219 : vector<1x1xf32> to vector<1x4xf32>
    %2221 = arith.mulf %2220, %2043 : vector<1x4xf32>
    %2222 = vector.extract_strided_slice %1483 {offsets = [0, 1], sizes = [1, 1], strides = [1, 1]} : vector<1x2xf32> to vector<1x1xf32>
    %2223 = vector.broadcast %2222 : vector<1x1xf32> to vector<1x4xf32>
    %2224 = arith.mulf %2223, %2047 : vector<1x4xf32>
    %2225 = arith.addf %2221, %2224 : vector<1x4xf32>
    %2226 = vector.extract_strided_slice %1863 {offsets = [0, 0], sizes = [1, 1], strides = [1, 1]} : vector<1x2xf32> to vector<1x1xf32>
    %2227 = vector.broadcast %2226 : vector<1x1xf32> to vector<1x4xf32>
    %2228 = arith.mulf %2227, %2051 : vector<1x4xf32>
    %2229 = arith.addf %2225, %2228 : vector<1x4xf32>
    %2230 = vector.extract_strided_slice %1863 {offsets = [0, 1], sizes = [1, 1], strides = [1, 1]} : vector<1x2xf32> to vector<1x1xf32>
    %2231 = vector.broadcast %2230 : vector<1x1xf32> to vector<1x4xf32>
    %2232 = arith.mulf %2231, %2055 : vector<1x4xf32>
    %2233 = arith.addf %2229, %2232 : vector<1x4xf32>
    %c7_i32 = arith.constant 7 : i32
    %2234 = vector.broadcast %c7_i32 : i32 to vector<15x1xi32>
    %2235 = arith.cmpi eq, %2056, %2234 : vector<15x1xi32>
    %2236 = arith.extui %2235 : vector<15x1xi1> to vector<15x1xi32>
    %2237 = arith.sitofp %2236 : vector<15x1xi32> to vector<15x1xf32>
    %2238 = vector.broadcast %2237 : vector<15x1xf32> to vector<15x4xf32>
    %2239 = vector.broadcast %2233 : vector<1x4xf32> to vector<15x4xf32>
    %2240 = arith.mulf %2238, %2239 : vector<15x4xf32>
    %2241 = arith.addf %2218, %2240 : vector<15x4xf32>
    %2242 = vector.extract_strided_slice %1508 {offsets = [0, 0], sizes = [1, 1], strides = [1, 1]} : vector<1x2xf32> to vector<1x1xf32>
    %2243 = vector.broadcast %2242 : vector<1x1xf32> to vector<1x4xf32>
    %2244 = arith.mulf %2243, %2043 : vector<1x4xf32>
    %2245 = vector.extract_strided_slice %1508 {offsets = [0, 1], sizes = [1, 1], strides = [1, 1]} : vector<1x2xf32> to vector<1x1xf32>
    %2246 = vector.broadcast %2245 : vector<1x1xf32> to vector<1x4xf32>
    %2247 = arith.mulf %2246, %2047 : vector<1x4xf32>
    %2248 = arith.addf %2244, %2247 : vector<1x4xf32>
    %2249 = vector.extract_strided_slice %1838 {offsets = [0, 0], sizes = [1, 1], strides = [1, 1]} : vector<1x2xf32> to vector<1x1xf32>
    %2250 = vector.broadcast %2249 : vector<1x1xf32> to vector<1x4xf32>
    %2251 = arith.mulf %2250, %2051 : vector<1x4xf32>
    %2252 = arith.addf %2248, %2251 : vector<1x4xf32>
    %2253 = vector.extract_strided_slice %1838 {offsets = [0, 1], sizes = [1, 1], strides = [1, 1]} : vector<1x2xf32> to vector<1x1xf32>
    %2254 = vector.broadcast %2253 : vector<1x1xf32> to vector<1x4xf32>
    %2255 = arith.mulf %2254, %2055 : vector<1x4xf32>
    %2256 = arith.addf %2252, %2255 : vector<1x4xf32>
    %c8_i32 = arith.constant 8 : i32
    %2257 = vector.broadcast %c8_i32 : i32 to vector<15x1xi32>
    %2258 = arith.cmpi eq, %2056, %2257 : vector<15x1xi32>
    %2259 = arith.extui %2258 : vector<15x1xi1> to vector<15x1xi32>
    %2260 = arith.sitofp %2259 : vector<15x1xi32> to vector<15x1xf32>
    %2261 = vector.broadcast %2260 : vector<15x1xf32> to vector<15x4xf32>
    %2262 = vector.broadcast %2256 : vector<1x4xf32> to vector<15x4xf32>
    %2263 = arith.mulf %2261, %2262 : vector<15x4xf32>
    %2264 = arith.addf %2241, %2263 : vector<15x4xf32>
    %2265 = vector.extract_strided_slice %1533 {offsets = [0, 0], sizes = [1, 1], strides = [1, 1]} : vector<1x2xf32> to vector<1x1xf32>
    %2266 = vector.broadcast %2265 : vector<1x1xf32> to vector<1x4xf32>
    %2267 = arith.mulf %2266, %2043 : vector<1x4xf32>
    %2268 = vector.extract_strided_slice %1533 {offsets = [0, 1], sizes = [1, 1], strides = [1, 1]} : vector<1x2xf32> to vector<1x1xf32>
    %2269 = vector.broadcast %2268 : vector<1x1xf32> to vector<1x4xf32>
    %2270 = arith.mulf %2269, %2047 : vector<1x4xf32>
    %2271 = arith.addf %2267, %2270 : vector<1x4xf32>
    %2272 = vector.extract_strided_slice %1813 {offsets = [0, 0], sizes = [1, 1], strides = [1, 1]} : vector<1x2xf32> to vector<1x1xf32>
    %2273 = vector.broadcast %2272 : vector<1x1xf32> to vector<1x4xf32>
    %2274 = arith.mulf %2273, %2051 : vector<1x4xf32>
    %2275 = arith.addf %2271, %2274 : vector<1x4xf32>
    %2276 = vector.extract_strided_slice %1813 {offsets = [0, 1], sizes = [1, 1], strides = [1, 1]} : vector<1x2xf32> to vector<1x1xf32>
    %2277 = vector.broadcast %2276 : vector<1x1xf32> to vector<1x4xf32>
    %2278 = arith.mulf %2277, %2055 : vector<1x4xf32>
    %2279 = arith.addf %2275, %2278 : vector<1x4xf32>
    %c9_i32 = arith.constant 9 : i32
    %2280 = vector.broadcast %c9_i32 : i32 to vector<15x1xi32>
    %2281 = arith.cmpi eq, %2056, %2280 : vector<15x1xi32>
    %2282 = arith.extui %2281 : vector<15x1xi1> to vector<15x1xi32>
    %2283 = arith.sitofp %2282 : vector<15x1xi32> to vector<15x1xf32>
    %2284 = vector.broadcast %2283 : vector<15x1xf32> to vector<15x4xf32>
    %2285 = vector.broadcast %2279 : vector<1x4xf32> to vector<15x4xf32>
    %2286 = arith.mulf %2284, %2285 : vector<15x4xf32>
    %2287 = arith.addf %2264, %2286 : vector<15x4xf32>
    %2288 = vector.extract_strided_slice %1558 {offsets = [0, 0], sizes = [1, 1], strides = [1, 1]} : vector<1x2xf32> to vector<1x1xf32>
    %2289 = vector.broadcast %2288 : vector<1x1xf32> to vector<1x4xf32>
    %2290 = arith.mulf %2289, %2043 : vector<1x4xf32>
    %2291 = vector.extract_strided_slice %1558 {offsets = [0, 1], sizes = [1, 1], strides = [1, 1]} : vector<1x2xf32> to vector<1x1xf32>
    %2292 = vector.broadcast %2291 : vector<1x1xf32> to vector<1x4xf32>
    %2293 = arith.mulf %2292, %2047 : vector<1x4xf32>
    %2294 = arith.addf %2290, %2293 : vector<1x4xf32>
    %2295 = vector.extract_strided_slice %1788 {offsets = [0, 0], sizes = [1, 1], strides = [1, 1]} : vector<1x2xf32> to vector<1x1xf32>
    %2296 = vector.broadcast %2295 : vector<1x1xf32> to vector<1x4xf32>
    %2297 = arith.mulf %2296, %2051 : vector<1x4xf32>
    %2298 = arith.addf %2294, %2297 : vector<1x4xf32>
    %2299 = vector.extract_strided_slice %1788 {offsets = [0, 1], sizes = [1, 1], strides = [1, 1]} : vector<1x2xf32> to vector<1x1xf32>
    %2300 = vector.broadcast %2299 : vector<1x1xf32> to vector<1x4xf32>
    %2301 = arith.mulf %2300, %2055 : vector<1x4xf32>
    %2302 = arith.addf %2298, %2301 : vector<1x4xf32>
    %c10_i32 = arith.constant 10 : i32
    %2303 = vector.broadcast %c10_i32 : i32 to vector<15x1xi32>
    %2304 = arith.cmpi eq, %2056, %2303 : vector<15x1xi32>
    %2305 = arith.extui %2304 : vector<15x1xi1> to vector<15x1xi32>
    %2306 = arith.sitofp %2305 : vector<15x1xi32> to vector<15x1xf32>
    %2307 = vector.broadcast %2306 : vector<15x1xf32> to vector<15x4xf32>
    %2308 = vector.broadcast %2302 : vector<1x4xf32> to vector<15x4xf32>
    %2309 = arith.mulf %2307, %2308 : vector<15x4xf32>
    %2310 = arith.addf %2287, %2309 : vector<15x4xf32>
    %2311 = vector.extract_strided_slice %1583 {offsets = [0, 0], sizes = [1, 1], strides = [1, 1]} : vector<1x2xf32> to vector<1x1xf32>
    %2312 = vector.broadcast %2311 : vector<1x1xf32> to vector<1x4xf32>
    %2313 = arith.mulf %2312, %2043 : vector<1x4xf32>
    %2314 = vector.extract_strided_slice %1583 {offsets = [0, 1], sizes = [1, 1], strides = [1, 1]} : vector<1x2xf32> to vector<1x1xf32>
    %2315 = vector.broadcast %2314 : vector<1x1xf32> to vector<1x4xf32>
    %2316 = arith.mulf %2315, %2047 : vector<1x4xf32>
    %2317 = arith.addf %2313, %2316 : vector<1x4xf32>
    %2318 = vector.extract_strided_slice %1763 {offsets = [0, 0], sizes = [1, 1], strides = [1, 1]} : vector<1x2xf32> to vector<1x1xf32>
    %2319 = vector.broadcast %2318 : vector<1x1xf32> to vector<1x4xf32>
    %2320 = arith.mulf %2319, %2051 : vector<1x4xf32>
    %2321 = arith.addf %2317, %2320 : vector<1x4xf32>
    %2322 = vector.extract_strided_slice %1763 {offsets = [0, 1], sizes = [1, 1], strides = [1, 1]} : vector<1x2xf32> to vector<1x1xf32>
    %2323 = vector.broadcast %2322 : vector<1x1xf32> to vector<1x4xf32>
    %2324 = arith.mulf %2323, %2055 : vector<1x4xf32>
    %2325 = arith.addf %2321, %2324 : vector<1x4xf32>
    %c11_i32 = arith.constant 11 : i32
    %2326 = vector.broadcast %c11_i32 : i32 to vector<15x1xi32>
    %2327 = arith.cmpi eq, %2056, %2326 : vector<15x1xi32>
    %2328 = arith.extui %2327 : vector<15x1xi1> to vector<15x1xi32>
    %2329 = arith.sitofp %2328 : vector<15x1xi32> to vector<15x1xf32>
    %2330 = vector.broadcast %2329 : vector<15x1xf32> to vector<15x4xf32>
    %2331 = vector.broadcast %2325 : vector<1x4xf32> to vector<15x4xf32>
    %2332 = arith.mulf %2330, %2331 : vector<15x4xf32>
    %2333 = arith.addf %2310, %2332 : vector<15x4xf32>
    %2334 = vector.extract_strided_slice %1608 {offsets = [0, 0], sizes = [1, 1], strides = [1, 1]} : vector<1x2xf32> to vector<1x1xf32>
    %2335 = vector.broadcast %2334 : vector<1x1xf32> to vector<1x4xf32>
    %2336 = arith.mulf %2335, %2043 : vector<1x4xf32>
    %2337 = vector.extract_strided_slice %1608 {offsets = [0, 1], sizes = [1, 1], strides = [1, 1]} : vector<1x2xf32> to vector<1x1xf32>
    %2338 = vector.broadcast %2337 : vector<1x1xf32> to vector<1x4xf32>
    %2339 = arith.mulf %2338, %2047 : vector<1x4xf32>
    %2340 = arith.addf %2336, %2339 : vector<1x4xf32>
    %2341 = vector.extract_strided_slice %1738 {offsets = [0, 0], sizes = [1, 1], strides = [1, 1]} : vector<1x2xf32> to vector<1x1xf32>
    %2342 = vector.broadcast %2341 : vector<1x1xf32> to vector<1x4xf32>
    %2343 = arith.mulf %2342, %2051 : vector<1x4xf32>
    %2344 = arith.addf %2340, %2343 : vector<1x4xf32>
    %2345 = vector.extract_strided_slice %1738 {offsets = [0, 1], sizes = [1, 1], strides = [1, 1]} : vector<1x2xf32> to vector<1x1xf32>
    %2346 = vector.broadcast %2345 : vector<1x1xf32> to vector<1x4xf32>
    %2347 = arith.mulf %2346, %2055 : vector<1x4xf32>
    %2348 = arith.addf %2344, %2347 : vector<1x4xf32>
    %c12_i32 = arith.constant 12 : i32
    %2349 = vector.broadcast %c12_i32 : i32 to vector<15x1xi32>
    %2350 = arith.cmpi eq, %2056, %2349 : vector<15x1xi32>
    %2351 = arith.extui %2350 : vector<15x1xi1> to vector<15x1xi32>
    %2352 = arith.sitofp %2351 : vector<15x1xi32> to vector<15x1xf32>
    %2353 = vector.broadcast %2352 : vector<15x1xf32> to vector<15x4xf32>
    %2354 = vector.broadcast %2348 : vector<1x4xf32> to vector<15x4xf32>
    %2355 = arith.mulf %2353, %2354 : vector<15x4xf32>
    %2356 = arith.addf %2333, %2355 : vector<15x4xf32>
    %2357 = vector.extract_strided_slice %1633 {offsets = [0, 0], sizes = [1, 1], strides = [1, 1]} : vector<1x2xf32> to vector<1x1xf32>
    %2358 = vector.broadcast %2357 : vector<1x1xf32> to vector<1x4xf32>
    %2359 = arith.mulf %2358, %2043 : vector<1x4xf32>
    %2360 = vector.extract_strided_slice %1633 {offsets = [0, 1], sizes = [1, 1], strides = [1, 1]} : vector<1x2xf32> to vector<1x1xf32>
    %2361 = vector.broadcast %2360 : vector<1x1xf32> to vector<1x4xf32>
    %2362 = arith.mulf %2361, %2047 : vector<1x4xf32>
    %2363 = arith.addf %2359, %2362 : vector<1x4xf32>
    %2364 = vector.extract_strided_slice %1713 {offsets = [0, 0], sizes = [1, 1], strides = [1, 1]} : vector<1x2xf32> to vector<1x1xf32>
    %2365 = vector.broadcast %2364 : vector<1x1xf32> to vector<1x4xf32>
    %2366 = arith.mulf %2365, %2051 : vector<1x4xf32>
    %2367 = arith.addf %2363, %2366 : vector<1x4xf32>
    %2368 = vector.extract_strided_slice %1713 {offsets = [0, 1], sizes = [1, 1], strides = [1, 1]} : vector<1x2xf32> to vector<1x1xf32>
    %2369 = vector.broadcast %2368 : vector<1x1xf32> to vector<1x4xf32>
    %2370 = arith.mulf %2369, %2055 : vector<1x4xf32>
    %2371 = arith.addf %2367, %2370 : vector<1x4xf32>
    %c13_i32 = arith.constant 13 : i32
    %2372 = vector.broadcast %c13_i32 : i32 to vector<15x1xi32>
    %2373 = arith.cmpi eq, %2056, %2372 : vector<15x1xi32>
    %2374 = arith.extui %2373 : vector<15x1xi1> to vector<15x1xi32>
    %2375 = arith.sitofp %2374 : vector<15x1xi32> to vector<15x1xf32>
    %2376 = vector.broadcast %2375 : vector<15x1xf32> to vector<15x4xf32>
    %2377 = vector.broadcast %2371 : vector<1x4xf32> to vector<15x4xf32>
    %2378 = arith.mulf %2376, %2377 : vector<15x4xf32>
    %2379 = arith.addf %2356, %2378 : vector<15x4xf32>
    %2380 = vector.extract_strided_slice %1658 {offsets = [0, 0], sizes = [1, 1], strides = [1, 1]} : vector<1x2xf32> to vector<1x1xf32>
    %2381 = vector.broadcast %2380 : vector<1x1xf32> to vector<1x4xf32>
    %2382 = arith.mulf %2381, %2043 : vector<1x4xf32>
    %2383 = vector.extract_strided_slice %1658 {offsets = [0, 1], sizes = [1, 1], strides = [1, 1]} : vector<1x2xf32> to vector<1x1xf32>
    %2384 = vector.broadcast %2383 : vector<1x1xf32> to vector<1x4xf32>
    %2385 = arith.mulf %2384, %2047 : vector<1x4xf32>
    %2386 = arith.addf %2382, %2385 : vector<1x4xf32>
    %2387 = vector.extract_strided_slice %1688 {offsets = [0, 0], sizes = [1, 1], strides = [1, 1]} : vector<1x2xf32> to vector<1x1xf32>
    %2388 = vector.broadcast %2387 : vector<1x1xf32> to vector<1x4xf32>
    %2389 = arith.mulf %2388, %2051 : vector<1x4xf32>
    %2390 = arith.addf %2386, %2389 : vector<1x4xf32>
    %2391 = vector.extract_strided_slice %1688 {offsets = [0, 1], sizes = [1, 1], strides = [1, 1]} : vector<1x2xf32> to vector<1x1xf32>
    %2392 = vector.broadcast %2391 : vector<1x1xf32> to vector<1x4xf32>
    %2393 = arith.mulf %2392, %2055 : vector<1x4xf32>
    %2394 = arith.addf %2390, %2393 : vector<1x4xf32>
    %c14_i32 = arith.constant 14 : i32
    %2395 = vector.broadcast %c14_i32 : i32 to vector<15x1xi32>
    %2396 = arith.cmpi eq, %2056, %2395 : vector<15x1xi32>
    %2397 = arith.extui %2396 : vector<15x1xi1> to vector<15x1xi32>
    %2398 = arith.sitofp %2397 : vector<15x1xi32> to vector<15x1xf32>
    %2399 = vector.broadcast %2398 : vector<15x1xf32> to vector<15x4xf32>
    %2400 = vector.broadcast %2394 : vector<1x4xf32> to vector<15x4xf32>
    %2401 = arith.mulf %2399, %2400 : vector<15x4xf32>
    %2402 = arith.addf %2379, %2401 : vector<15x4xf32>
    %c0_280 = arith.constant 0 : index
    %c0_281 = arith.constant 0 : index
    %2403 = vector.load %arg9[%c0_280, %c0_281] : memref<15x4xf32, #tpu.memory_space<vmem>>, vector<15x4xf32>
    tpu.vector_store %arg9[%c0_280, %c0_281], %2402 {strides = array<i32>} : memref<15x4xf32, #tpu.memory_space<vmem>>, vector<15x4xf32>,
    return
  }
}

</mosaic_0001>

<bundles_post_ra>
// kernel: _lambda_.1
= control target key start
LH: loop header
LB: loop body
LE: loop exit
PB: predicated region body
PF: predicated region fallthrough
CT: control target
= control target key end

     0   :  { %14 = vsyncpa [#allocation5], 0  ;;  %s6778_s0 = inlined_call_operand.vmem [shape: f32[1,1,10,10], index: 0, kind: input, shape index: {}]   ;;  %s6779_s1 = inlined_call_operand.vmem [shape: f32[27], index: 1, kind: input, shape index: {}]   ;;  %s6780_s2 = inlined_call_operand.vmem [shape: f32[3], index: 2, kind: input, shape index: {}]   ;;  %s6781_s3 = inlined_call_operand.vmem [shape: f32[10,16], index: 3, kind: input, shape index: {}]   ;;  %s6782_s4 = inlined_call_operand.vmem [shape: f32[2,16], index: 4, kind: input, shape index: {}, may-alias: {4,7}]   ;;  %s6783_s5 = inlined_call_operand.vmem [shape: f32[1,16], index: 5, kind: input, shape index: {}, may-alias: {5,8}]   ;;  %s6784_s6 = inlined_call_operand.vmem [shape: f32[4,16], index: 6, kind: input, shape index: {}]   ;;  %s6785_s7 = inlined_call_operand.vmem [shape: f32[2,16], index: 7, kind: input, shape index: {}, may-alias: {4,7}]   ;;  %s6786_s8 = inlined_call_operand.vmem [shape: f32[1,16], index: 8, kind: input, shape index: {}, may-alias: {5,8}]   ;;  %s6787_s9 = inlined_call_operand.vmem [shape: f32[15,4], index: 9, kind: output, shape index: {}]  }
   0x1   :  { %s24_s11 = sshll.u32 %s6779_s1, 4  ;;  %s25_s11 = int_to_ptr.vmem [resolvable:$true] %s24_s11 }
   0x2   :  { %15 = vsyncpa [#allocation7], 0  ;;  %s34_s14 = sshll.u32 %s6780_s2, 4  ;;  %s5175_s15 = scalar_lea.vmem %s25_s11, 16  ;;  %s35_s14 = int_to_ptr.vmem [resolvable:$true] %s34_s14 }
   0x3   :  { %p5176_p0 = scmp.ne.s32.totalorder %s25_s11, %s5175_s15  ;;  %p5180_p1 = scmp.lt.s32.totalorder %s25_s11, %s25_s11 }
   0x4   :  { %p5181_p2 = scmp.lt.s32.totalorder %s5175_s15, %s5175_s15 }
   0x6   :  { %p5182_p3 = por %p5181_p2, %p5180_p1 }
   0x8   :  { %p5183_p4 = pnand %p5182_p3, %p5176_p0 }
   0xa   :  { %5186 = shalt.err (!%p5183_p4)
}
   0xb   :  { %s5203_s16 = smov [#allocation4]   ;;  %s5187_s17 = scalar_lea.vmem %s35_s14, 16 }
   0xc   :  { %27 = dma.vmem_to_smem %s25_s11, 16, %s5203_s16, [#allocation5]  }
   0xd   :  { %p5188_p5 = scmp.ne.s32.totalorder %s35_s14, %s5187_s17  ;;  %p5192_p6 = scmp.lt.s32.totalorder %s35_s14, %s35_s14 }
   0xe   :  { %p5193_p7 = scmp.lt.s32.totalorder %s5187_s17, %s5187_s17 }
  0x10   :  { %p5194_p8 = por %p5193_p7, %p5192_p6 }
  0x12   :  { %p5195_p9 = pnand %p5194_p8, %p5188_p5 }
  0x14   :  { %5198 = shalt.err (!%p5195_p9)
}
  0x15   :  { %s5204_s1 = smov [#allocation6]  }
  0x16   :  { %37 = dma.vmem_to_smem %s35_s14, 16, %s5204_s1, [#allocation7]  }
  0x17   :  { %5199 = dma.done.wait [#allocation5], 16  }
  0x18   :  { %5200 = vsyncadd [#allocation5], 4294967280 }
  0x19   :  { %5201 = dma.done.wait [#allocation7], 16  }
  0x1a   :  { %5202 = vsyncadd [#allocation7], 4294967280 }
  0x1b   :  { %56 = sfence }
  0x1c   :  { %v57_v0 = vld [vmem:[%s6778_s0] sm:$0xff]  ;;  %v58_v1 = vld [vmem:[%s6778_s0 + $0x8] sm:$0x3]  ;;  %vm94_vm0 = vcmask 1041408   ;;  %v59_v2 = vlaneseq  ;;  %v5205_v3 = vmov 0.0|0.0   ;;  %vm5206_vm1 = vmmov 1  }
  0x1d   :  { %4487 = vmatprep.subr.bf16.mxu0 %v5205_v3  ;;  %v5282_v4 = vpack.c.bf16 %v58_v1, %v57_v0  ;;  %vm5285_vm2 = vmpackc.low %vm94_vm0, %vm5206_vm1  ;;  %4491 = vmatprep.subr.bf16.mxu1 %v5205_v3  ;;  %vm5207_vm3 = vmmov 0   ;;  %v6788_v6 = vmov 0.0   ;;  %vm90_vm8 = vcmask 80896   ;;  %s975_s0 = sld [smem:[#allocation4]]  ;;  %s4235_s21 = sld [smem:[#allocation4 + $0x9]]  ;;  %v970_v25 = vld [vmem:[%s6781_s3] sm:$0xff] }
  0x1e   :  { %4386 = vmatprep.mubr.msk.f32.mxu0 %vm5207_vm3, %v6788_v6  ;;  %v5292_v7 = vshrl.u32 %v59_v2, 7  ;;  %v5294_v8 = vand.u32 127, %v59_v2  ;;  %4393 = vmatprep.mubr.msk.f32.mxu1 %vm5207_vm3, %v6788_v6  ;;  %v5209_v16 = vmov 1.0   ;;  %s4247_s22 = sld [smem:[#allocation4 + $0x12]]  ;;  %s5387_s23 = sld [smem:[#allocation6]]  ;;  %vm1093_vm1 = vcmask 126976  }
  0x1f   :  { %4490 = vmatpush3.bf16.msk.msra.mxu0 %vm5285_vm2, %v5282_v4  ;;  %s4223_s24 = sld [smem:[#allocation4 + $0x1]]  ;;  %s4236_s26 = sld [smem:[#allocation4 + $0xa]]  ;;  %v5476_v5 = vld [vmem:[%s6782_s4] sm:$0x3] }
  0x20   :  { %v5302_v9 = vmul.u32 2, %v5292_v7  ;;  %4495 = vmatprep.subr.bf16.mxu0 %v5205_v3  ;;  %v5306_v10 = vadd.s32 8, %v5292_v7  ;;  %v4177_v11 = vadd.s32 4294967295, %v5294_v8  ;;  %vm71_vm4 = vcmp.eq.s32.totalorder %v5292_v7, %v5294_v8  ;;  %s5389_s25 = sld [smem:[#allocation6 + $0x1]]  ;;  %s4246_s27 = sld [smem:[#allocation6 + $0x2]] }
  0x21   :  { %vm5327_vm11 = vmpackc.low %vm94_vm0, %vm71_vm4  ;;  %v77_v21 = vadd.s32 2, %v5294_v8  ;;  %s4248_s28 = sld [smem:[#allocation4 + $0x13]]  ;;  %s5391_s29 = sld [smem:[#allocation4 + $0x2]]  ;;  %vm3825_vm4 = vcmp.eq.s32.totalorder %v5294_v8, 1 }
  0x22   :  { %6817 = vst [vmem:[#allocation10_spill] sm:$0xff] %v5306_v10  ;;  %v4185_v12 = vadd.s32 4294967294, %v5302_v9  ;;  %vm72_vm5 = vcmp.eq.s32.totalorder %v5306_v10, %v5294_v8  ;;  %vm65_vm6 = vcmp.eq.s32.totalorder %v5292_v7, %v4177_v11  ;;  %vm66_vm7 = vcmp.eq.s32.totalorder %v5306_v10, %v4177_v11  ;;  %s5393_s30 = sld [smem:[#allocation4 + $0xb]]  ;;  %s5395_s10 = sld [smem:[#allocation4 + $0x14]] }
  0x23   :  { %v4181_v13 = vsel %vm72_vm5, 1.0, %v6788_v6  ;;  %v4179_v14 = vsel %vm66_vm7, 1.0, %v6788_v6  ;;  %vm5319_vm9 = vmpackc.low %vm94_vm0, %vm65_vm6  ;;  %v4182_v22 = vadd.s32 4294967295, %v77_v21  ;;  %vm390_vm15 = vcmp.eq.s32.totalorder %v5294_v8, %v5302_v9  ;;  %s4225_s11 = sld [smem:[#allocation4 + $0x3]]  ;;  %s4238_s12 = sld [smem:[#allocation4 + $0xc]] }
  0x24   :  { %vm87_vm10 = vcmp.eq.s32.totalorder %v5294_v8, %v4185_v12  ;;  %v5324_v17 = vpack.c.bf16 %v4181_v13, %v5209_v16  ;;  %v5331_v19 = vpack.c.bf16 %v4179_v14, %v5209_v16  ;;  %v4198_v28 = vsel %vm390_vm15, 1.0, %v6788_v6  ;;  %s4250_s13 = sld [smem:[#allocation4 + $0x15]]  ;;  %s4226_s14 = sld [smem:[#allocation4 + $0x4]] }
  0x25   :  { %v4186_v20 = vsel %vm87_vm10, 1.0, %v6788_v6  ;;  %vm80_vm12 = vcmp.eq.s32.totalorder %v5306_v10, %v4182_v22  ;;  %vm79_vm13 = vcmp.eq.s32.totalorder %v5292_v7, %v4182_v22  ;;  %v679_v29 = vadd.s32 4, %v5302_v9  ;;  %s4239_s15 = sld [smem:[#allocation4 + $0xd]]  ;;  %s4251_s16 = sld [smem:[#allocation4 + $0x16]] }
  0x26   :  { %4387 = vmatmul.mubr.msk.f32.vlgmr.msra.gmra.mrb[0].mxu0 %vm90_vm8, %v4186_v20  ;;  %4494 = vmatpush3.bf16.msk.msra.mxu1 %vm5319_vm9, %v5331_v19  ;;  %v4184_v23 = vsel %vm80_vm12, 1.0, %v6788_v6  ;;  %vm5352_vm14 = vmpackc.low %vm94_vm0, %vm79_vm13  ;;  %v976_v30 = vstv %s975_s0  ;;  %v1098_v31 = vstv %s4235_s21  ;;  %v1210_v32 = vstv %s4247_s22  ;;  %s4227_s17 = sld [smem:[#allocation4 + $0x5]]  ;;  %s5433_s1 = sld [smem:[#allocation4 + $0xe]] }
  0x27   :  { %4498 = vmatpush3.bf16.msk.msra.mxu0 %vm5327_vm11, %v5324_v17  ;;  %4400 = vmatprep.mubr.msk.f32.mxu0 %vm5207_vm3, %v6788_v6  ;;  %v5349_v24 = vpack.c.bf16 %v4184_v23, %v5209_v16  ;;  %v974_v33 = vstv %s5387_s23  ;;  %v980_v34 = vstv %s4223_s24  ;;  %v1102_v35 = vstv %s4236_s26  ;;  %s5435_s2 = sld [smem:[#allocation4 + $0x17]]  ;;  %s4228_s21 = sld [smem:[#allocation4 + $0x6]] }
  0x28   :  { %4503 = vmatprep.subr.bf16.mxu0 %v5205_v3  ;;  %4499 = vmatprep.subr.bf16.mxu1 %v5205_v3  ;;  %v1096_v37 = vstv %s5389_s25  ;;  %v1208_v38 = vstv %s4246_s27  ;;  %v1214_v40 = vstv %s4248_s28  ;;  %v4210_v41 = vadd.s32 4294967294, %v679_v29  ;;  %s4241_s22 = sld [smem:[#allocation4 + $0xf]]  ;;  %s4253_s23 = sld [smem:[#allocation4 + $0x18]] }
  0x29   :  { %v984_v47 = vstv %s5391_s29  ;;  %v1106_v50 = vstv %s5393_s30  ;;  %v1218_v51 = vstv %s5395_s10  ;;  %v1110_v13 = vstv %s4238_s12  ;;  %s4229_s24 = sld [smem:[#allocation4 + $0x7]]  ;;  %s4242_s25 = sld [smem:[#allocation4 + $0x10]] }
  0x2a   :  { %vm681_vm0 = vcmp.eq.s32.totalorder %v5294_v8, %v4210_v41  ;;  %v1222_v14 = vstv %s4250_s13  ;;  %v992_v15 = vstv %s4226_s14  ;;  %s4254_s26 = sld [smem:[#allocation4 + $0x19]]  ;;  %s4230_s27 = sld [smem:[#allocation4 + $0x8]]  ;;  %vm3831_vm5 = vcmp.eq.s32.totalorder %v5294_v8, 3 }
  0x2b   :  { %v4211_v9 = vsel %vm681_vm0, 1.0, %v6788_v6  ;;  %v1114_v16 = vstv %s4239_s15  ;;  %v1226_v18 = vstv %s4251_s16  ;;  %s4243_s28 = sld [smem:[#allocation4 + $0x11]]  ;;  %s4255_s29 = sld [smem:[#allocation4 + $0x1a]]  ;;  %vm3828_vm6 = vcmp.eq.s32.totalorder %v5294_v8, 2 }
  0x2c   :  { %s5211_s12 = smov 2   ;;  %s5214_s13 = smov 4   ;;  %vm3976_vm7 = vcmp.eq.s32.totalorder %v5292_v7, 6  ;;  %vm3934_vm10 = vcmp.eq.s32.totalorder %v5292_v7, 4  ;;  %vm3850_vm12 = vcmp.eq.s32.totalorder %v5292_v7, 0  ;;  %vm3913_vm13 = vcmp.eq.s32.totalorder %v5292_v7, 3 }
  0x2d   :  { %s5215_s14 = smov 120   ;;  %s5218_s15 = smov 8  }
  0xf9   :  { %v164_v26 = vpop.f32.mrb[0].mxu0 }
  0xfa   :  { %v4388_v27 = vpop.f32.mrb[1].mxu0  ;;  %4394 = vmatmul.mubr.msk.f32.vlgmr.msra.gmra.mrb[0].mxu1 %vm90_vm8, %v164_v26  ;;  %4401 = vmatmul.mubr.msk.f32.vlgmr.msra.gmra.mrb[2].mxu0 %vm90_vm8, %v164_v26 }
  0xfb   :  { %4506 = vmatpush3.bf16.msk.msra.mxu0 %vm5285_vm2, %v5282_v4  ;;  %4502 = vmatpush3.bf16.msk.msra.mxu1 %vm5352_vm14, %v5349_v24 }
  0xfc   :  { %4407 = vmatprep.mubr.msk.f32.mxu1 %vm5207_vm3, %v6788_v6  ;;  %4414 = vmatprep.mubr.msk.f32.mxu0 %vm5207_vm3, %v6788_v6 }
  0xfd   :  { %4511 = vmatprep.subr.bf16.mxu0 %v5205_v3  ;;  %4507 = vmatprep.subr.bf16.mxu1 %v5205_v3 }
  0xfe   :  { %4408 = vmatmul.mubr.msk.f32.vlgmr.msra.gmra.mrb[2].mxu1 %vm90_vm8, %v164_v26  ;;  %4415 = vmatmul.mubr.msk.f32.vlgmr.msra.gmra.mrb[4].mxu0 %vm90_vm8, %v4198_v28  ;;  %v996_v26 = vstv %s4227_s17 }
  0xff   :  { %4514 = vmatpush3.bf16.msk.msra.mxu0 %vm5327_vm11, %v5324_v17  ;;  %4510 = vmatpush3.bf16.msk.msra.mxu1 %vm5319_vm9, %v5331_v19 }
 0x100   :  { %4421 = vmatprep.mubr.msk.f32.mxu1 %vm5207_vm3, %v6788_v6  ;;  %4428 = vmatprep.mubr.msk.f32.mxu0 %vm5207_vm3, %v6788_v6 }
 0x101   :  { %4519 = vmatprep.subr.bf16.mxu0 %v5205_v3  ;;  %4515 = vmatprep.subr.bf16.mxu1 %v5205_v3 }
 0x1cd   :  { %v240_v36 = vpop.f32.mrb[0].mxu1  ;;  %v313_v39 = vpop.f32.mrb[2].mxu0 }
 0x1ce   :  { %v977_v42 = vmul.f32 %v976_v30, %v240_v36  ;;  %v1099_v43 = vmul.f32 %v1098_v31, %v240_v36  ;;  %v1211_v44 = vmul.f32 %v1210_v32, %v240_v36  ;;  %v4395_v45 = vpop.f32.mrb[1].mxu1  ;;  %v4402_v46 = vpop.f32.mrb[3].mxu0  ;;  %v981_v48 = vmul.f32 %v980_v34, %v313_v39 }
 0x1cf   :  { %v1103_v49 = vmul.f32 %v1102_v35, %v313_v39  ;;  %v1215_v55 = vmul.f32 %v1214_v40, %v313_v39  ;;  %v1118_v30 = vstv %s5433_s1  ;;  %v1230_v31 = vstv %s5435_s2 }
 0x1d0   :  { %v978_v52 = vadd.f32 %v977_v42, %v974_v33  ;;  %v1100_v53 = vadd.f32 %v1099_v43, %v1096_v37  ;;  %v1212_v54 = vadd.f32 %v1211_v44, %v1208_v38 }
 0x1d1   :  { %v386_v56 = vpop.f32.mrb[2].mxu1  ;;  %v462_v57 = vpop.f32.mrb[4].mxu0 }
 0x1d2   :  { %v982_v58 = vadd.f32 %v981_v48, %v978_v52  ;;  %v1104_v59 = vadd.f32 %v1103_v49, %v1100_v53  ;;  %v1216_v60 = vadd.f32 %v1215_v55, %v1212_v54  ;;  %v985_v61 = vmul.f32 %v984_v47, %v386_v56  ;;  %v4409_v62 = vpop.f32.mrb[3].mxu1  ;;  %v4416_v63 = vpop.f32.mrb[5].mxu0  ;;  %4422 = vmatmul.mubr.msk.f32.vlgmr.msra.gmra.mrb[4].mxu1 %vm90_vm8, %v462_v57 }
 0x1d3   :  { %v1107_v0 = vmul.f32 %v1106_v50, %v386_v56  ;;  %v1219_v1 = vmul.f32 %v1218_v51, %v386_v56  ;;  %4429 = vmatmul.mubr.msk.f32.vlgmr.msra.gmra.mrb[6].mxu0 %vm90_vm8, %v462_v57  ;;  %4518 = vmatpush3.bf16.msk.msra.mxu1 %vm5352_vm14, %v5349_v24  ;;  %v1000_v50 = vstv %s4228_s21  ;;  %v1122_v51 = vstv %s4241_s22 }
 0x1d4   :  { %v986_v2 = vadd.f32 %v985_v61, %v982_v58  ;;  %4522 = vmatpush3.bf16.msk.msra.mxu0 %vm5285_vm2, %v5282_v4  ;;  %4435 = vmatprep.mubr.msk.f32.mxu1 %vm5207_vm3, %v6788_v6  ;;  %v988_v4 = vstv %s4225_s11  ;;  %v1234_v52 = vstv %s4253_s23  ;;  %v1004_v53 = vstv %s4229_s24 }
 0x1d5   :  { %v1108_v11 = vadd.f32 %v1107_v0, %v1104_v59  ;;  %v1220_v12 = vadd.f32 %v1219_v1, %v1216_v60  ;;  %4442 = vmatprep.mubr.msk.f32.mxu0 %vm5207_vm3, %v6788_v6  ;;  %4523 = vmatprep.subr.bf16.mxu1 %v5205_v3  ;;  %v1126_v54 = vstv %s4242_s25  ;;  %v1008_v62 = vstv %s4230_s27 }
 0x1d6   :  { %4436 = vmatmul.mubr.msk.f32.vlgmr.msra.gmra.mrb[6].mxu1 %vm90_vm8, %v462_v57  ;;  %4527 = vmatprep.subr.bf16.mxu0 %v5205_v3  ;;  %v1238_v57 = vstv %s4254_s26  ;;  %v1130_v1 = vstv %s4243_s28 }
 0x1d7   :  { %4443 = vmatmul.mubr.msk.f32.vlgmr.msra.gmra.mrb[8].mxu0 %vm90_vm8, %v4211_v9  ;;  %4526 = vmatpush3.bf16.msk.msra.mxu1 %vm5319_vm9, %v5331_v19  ;;  %vm3955_vm9 = vcmp.eq.s32.totalorder %v5292_v7, 5 }
 0x1d8   :  { %4530 = vmatpush3.bf16.msk.msra.mxu0 %vm5327_vm11, %v5324_v17  ;;  %4449 = vmatprep.mubr.msk.f32.mxu1 %vm5207_vm3, %v6788_v6  ;;  %vm3871_vm11 = vcmp.eq.s32.totalorder %v5292_v7, 1 }
 0x1d9   :  { %4456 = vmatprep.mubr.msk.f32.mxu0 %vm5207_vm3, %v6788_v6  ;;  %4531 = vmatprep.subr.bf16.mxu1 %v5205_v3 }
 0x1da   :  { %4535 = vmatprep.subr.bf16.mxu0 %v5205_v3 }
 0x2a5   :  { %v535_v17 = vpop.f32.mrb[4].mxu1 }
 0x2a6   :  { %v989_v19 = vmul.f32 %v988_v4, %v535_v17  ;;  %v1111_v20 = vmul.f32 %v1110_v13, %v535_v17  ;;  %v1223_v21 = vmul.f32 %v1222_v14, %v535_v17  ;;  %v605_v22 = vpop.f32.mrb[6].mxu0  ;;  %v4423_v23 = vpop.f32.mrb[5].mxu1 }
 0x2a7   :  { %v993_v27 = vmul.f32 %v992_v15, %v605_v22  ;;  %v1115_v28 = vmul.f32 %v1114_v16, %v605_v22  ;;  %v4430_v29 = vpop.f32.mrb[7].mxu0  ;;  %v1227_v35 = vmul.f32 %v1226_v18, %v605_v22 }
 0x2a8   :  { %v990_v32 = vadd.f32 %v989_v19, %v986_v2  ;;  %v1112_v33 = vadd.f32 %v1111_v20, %v1108_v11  ;;  %v1224_v34 = vadd.f32 %v1223_v21, %v1220_v12  ;;  %v1242_v2 = vstv %s4255_s29 }
 0x2a9   :  { %v675_v36 = vpop.f32.mrb[6].mxu1 }
 0x2aa   :  { %v994_v37 = vadd.f32 %v993_v27, %v990_v32  ;;  %v1116_v38 = vadd.f32 %v1115_v28, %v1112_v33  ;;  %v1228_v39 = vadd.f32 %v1227_v35, %v1224_v34  ;;  %v997_v40 = vmul.f32 %v996_v26, %v675_v36  ;;  %v753_v41 = vpop.f32.mrb[8].mxu0  ;;  %v4437_v42 = vpop.f32.mrb[7].mxu1  ;;  %v4231_v26 = vld [vmem:[%s6783_s5] ss:$0 sm:$0xff]  ;;  %s5210_s5 = smov 124  }
 0x2ab   :  { %v1119_v43 = vmul.f32 %v1118_v30, %v675_v36  ;;  %v1231_v44 = vmul.f32 %v1230_v31, %v675_v36  ;;  %v4444_v45 = vpop.f32.mrb[9].mxu0  ;;  %4450 = vmatmul.mubr.msk.f32.vlgmr.msra.gmra.mrb[8].mxu1 %vm90_vm8, %v753_v41  ;;  %4457 = vmatmul.mubr.msk.f32.vlgmr.msra.gmra.mrb[10].mxu0 %vm90_vm8, %v753_v41  ;;  %v1321_v36 = vmul.f32 0.0, %v5476_v5 }
 0x2ac   :  { %v998_v46 = vadd.f32 %v997_v40, %v994_v37  ;;  %4534 = vmatpush3.bf16.msk.msra.mxu1 %vm5352_vm14, %v5349_v24  ;;  %4463 = vmatprep.mubr.msk.f32.mxu1 %vm5207_vm3, %v6788_v6  ;;  %v971_v24 = vld [vmem:[%s6781_s3 + $0x8] sm:$0x3]  ;;  %vm3892_vm14 = vcmp.eq.s32.totalorder %v5292_v7, 2 }
 0x2ad   :  { %v1120_v47 = vadd.f32 %v1119_v43, %v1116_v38  ;;  %v1232_v48 = vadd.f32 %v1231_v44, %v1228_v39  ;;  %4539 = vmatprep.subr.bf16.mxu1 %v5205_v3  ;;  %4470 = vmatprep.mubr.msk.f32.mxu0 %vm5207_vm3, %v6788_v6  ;;  %v4536_v49 = vpack.c.bf16 %v971_v24, %v970_v25  ;;  %v1324_v37 = vrot.slane %v1321_v36, 1 }
 0x2af   :  { %4464 = vmatmul.mubr.msk.f32.vlgmr.msra.gmra.mrb[10].mxu1 %vm90_vm8, %v753_v41  ;;  %4538 = vmatpush3.bf16.msk.msra.mxu0 %vm5285_vm2, %v4536_v49 }
 0x2b0   :  { %4477 = vmatprep.mubr.msk.f32.mxu1 %vm5207_vm3, %v6788_v6  ;;  %4542 = vmatpush3.bf16.msk.msra.mxu1 %vm5285_vm2, %v4536_v49 }
 0x2b1   :  { %4543 = vmatprep.subr.bf16.mxu0 %v5205_v3 }
 0x37e   :  { %v826_v55 = vpop.f32.mrb[8].mxu1  ;;  %v896_v56 = vpop.f32.mrb[10].mxu0 }
 0x37f   :  { %v1001_v58 = vmul.f32 %v1000_v50, %v826_v55  ;;  %v1123_v59 = vmul.f32 %v1122_v51, %v826_v55  ;;  %v1235_v3 = vmul.f32 %v1234_v52, %v826_v55  ;;  %v4451_v60 = vpop.f32.mrb[9].mxu1  ;;  %v4458_v61 = vpop.f32.mrb[11].mxu0  ;;  %v1005_v63 = vmul.f32 %v1004_v53, %v896_v56 }
 0x380   :  { %v1127_v0 = vmul.f32 %v1126_v54, %v896_v56  ;;  %v1239_v4 = vmul.f32 %v1238_v57, %v896_v56 }
 0x381   :  { %v1002_v9 = vadd.f32 %v1001_v58, %v998_v46  ;;  %v1124_v11 = vadd.f32 %v1123_v59, %v1120_v47  ;;  %v1236_v12 = vadd.f32 %v1235_v3, %v1232_v48  ;;  %v6796_v59 = vmov 7  }
 0x382   :  { %v966_v13 = vpop.f32.mrb[10].mxu1  ;;  %4564 = vset.pattern.permute.xlu1 %v6796_v59  ;;  %v6794_v3 = vmov 6  }
 0x383   :  { %v1006_v14 = vadd.f32 %v1005_v63, %v1002_v9  ;;  %v1128_v15 = vadd.f32 %v1127_v0, %v1124_v11  ;;  %v1240_v16 = vadd.f32 %v1239_v4, %v1236_v12  ;;  %v1009_v17 = vmul.f32 %v1008_v62, %v966_v13  ;;  %v4465_v18 = vpop.f32.mrb[11].mxu1  ;;  %4563 = vset.pattern.permute.xlu0 %v6794_v3 }
 0x384   :  { %v1131_v19 = vmul.f32 %v1130_v1, %v966_v13  ;;  %v1243_v20 = vmul.f32 %v1242_v2, %v966_v13  ;;  %v5494_v9 = vrot.slane %v5476_v5, 1  ;;  %v6792_v4 = vmov 15  }
 0x385   :  { %v1010_v21 = vadd.f32 %v1009_v17, %v1006_v14  ;;  %v6790_v13 = vmov 14  }
 0x386   :  { %v1132_v22 = vadd.f32 %v1131_v19, %v1128_v15  ;;  %v1244_v23 = vadd.f32 %v1243_v20, %v1240_v16 }
 0x387   :  { %4471 = vmatmul.mubr.msk.f32.vlgmr.msra.gmra.mrb[12].mxu0 %vm90_vm8, %v1010_v21 }
 0x388   :  { %4478 = vmatmul.mubr.msk.f32.vlgmr.msra.gmra.mrb[12].mxu1 %vm90_vm8, %v1132_v22  ;;  %4546 = vmatpush3.bf16.msk.msra.mxu0 %vm5285_vm2, %v4536_v49  ;;  %vm2515_vm2 = vcmask 122880  }
 0x389   :  { %4484 = vmatprep.mubr.msk.f32.mxu0 %vm5207_vm3, %v6788_v6  ;;  %vm3822_vm3 = vcmp.eq.s32.totalorder %v5294_v8, 0 }
 0x38b   :  { %4485 = vmatmul.mubr.msk.f32.vlgmr.msra.gmra.mrb[14].mxu0 %vm90_vm8, %v1244_v23  ;;  %vm3997_vm8 = vcmp.eq.s32.totalorder %v5292_v7, 7 }
 0x45a   :  { %v1089_v27 = vpop.f32.mrb[12].mxu0 }
 0x45b   :  { %v1090_v28 = vadd.f32 %v4231_v26, %v1089_v27  ;;  %v1202_v29 = vpop.f32.mrb[12].mxu1  ;;  %v4472_v30 = vpop.f32.mrb[13].mxu0 }
 0x45c   :  { %v1203_v31 = vadd.f32 %v4231_v26, %v1202_v29  ;;  %v4479_v32 = vpop.f32.mrb[13].mxu1 }
 0x45d   :  { %1094 = vst.msk [vmem:[#allocation2] sm:$0x1f] %vm1093_vm1, %v1090_v28 }
 0x45e   :  { %1206 = vst.msk [vmem:[#allocation2 + $0x5] sm:$0x1f] %vm1093_vm1, %v1203_v31  ;;  %v1314_v33 = vpop.f32.mrb[14].mxu0 }
 0x45f   :  { %v1315_v34 = vadd.f32 %v4231_v26, %v1314_v33  ;;  %v4486_v35 = vpop.f32.mrb[15].mxu0 }
 0x461   :  { %1318 = vst.msk [vmem:[#allocation2 + $0xa] sm:$0x1f] %vm1093_vm1, %v1315_v34 }
 0x464   :  { %v1320_v38 = vld [vmem:[#allocation2] sm:$0x1]  ;;  %v1351_v17 = vld [vmem:[#allocation2 + $0x1] sm:$0x1] }
 0x465   :  { %v1322_v39 = vadd.f32 %v1321_v36, %v1320_v38 }
 0x467   :  { %v1326_v40 = vadd.f32 %v1324_v37, %v1322_v39 }
 0x468   :  { %v1848_v41 = vld [vmem:[#allocation2 + $0xe] sm:$0x1]  ;;  %v1810_v35 = vld [vmem:[#allocation2 + $0xd] sm:$0x1] }
 0x469   :  { %4675 = vtanh.f32 %v1326_v40  ;;  %v1886_v42 = vadd.f32 %v1848_v41, %v1321_v36  ;;  %v4258_v46 = vmul.f32 -1.442695, %v1326_v40 }
 0x46b   :  { %v1887_v43 = vadd.f32 %v1886_v42, %v1324_v37 }
 0x46d   :  { %4677 = vtanh.f32 %v1887_v43  ;;  %v4273_v47 = vmul.f32 -1.442695, %v1887_v43 }
 0x46e   :  { %4679 = vpow2.f32 %v4258_v46 }
 0x46f   :  { %4681 = vpow2.f32 %v4273_v47 }
 0x473   :  { %v4676_v44 = vpop.eup %4675 }
 0x474   :  { %1336 = vrot.lane.b32.xlu0 %v4676_v44, %s5210_s5 }
 0x477   :  { %v4678_v45 = vpop.eup %4677 }
 0x478   :  { %1897 = vrot.lane.b32.xlu0 %v4678_v45, %s5210_s5  ;;  %v4680_v48 = vpop.eup %4679 }
 0x479   :  { %v1330_v25 = vadd.f32 1.0, %v4680_v48  ;;  %v4682_v24 = vpop.eup %4681 }
 0x47a   :  { %v1891_v49 = vadd.f32 1.0, %v4682_v24 }
 0x47b   :  { %4683 = vrcp.f32 %v1330_v25 }
 0x47c   :  { %4685 = vrcp.f32 %v1891_v49 }
 0x485   :  { %v4684_v50 = vpop.eup %4683 }
 0x486   :  { %v4686_v53 = vpop.eup %4685  ;;  %v1334_v56 = vmul.f32 0.0, %v4684_v50 }
 0x487   :  { %v1895_v60 = vmul.f32 0.0, %v4686_v53 }
 0x4e6   :  { %v1337_v51 = vpop.permute.xlu0 %1336 }
 0x4e7   :  { %v1339_v52 = vmul.f32 %v4684_v50, %v1337_v51 }
 0x4e9   :  { %1341 = vrot.lane.b32.xlu1 %v1339_v52, %s5211_s12 }
 0x4ea   :  { %v1898_v54 = vpop.permute.xlu0 %1897 }
 0x4eb   :  { %v1900_v55 = vmul.f32 %v4686_v53, %v1898_v54 }
 0x4ed   :  { %1902 = vrot.lane.b32.xlu1 %v1900_v55, %s5211_s12 }
 0x55b   :  { %v1342_v57 = vpop.permute.xlu1 %1341 }
 0x55c   :  { %v5483_v58 = vadd.f32 %v1342_v57, %v1334_v56  ;;  %v1392_v57 = vld [vmem:[#allocation2 + $0x2] sm:$0x1] }
 0x55e   :  { %4687 = vtanh.f32 %v5483_v58 }
 0x55f   :  { %v1903_v61 = vpop.permute.xlu1 %1902 }
 0x560   :  { %v5488_v62 = vadd.f32 %v1903_v61, %v1895_v60 }
 0x562   :  { %4689 = vtanh.f32 %v5488_v62 }
 0x568   :  { %v4688_v63 = vpop.eup %4687 }
 0x569   :  { %1347 = vrot.lane.b32.xlu0 %v4688_v63, %s5214_s13 }
 0x56c   :  { %v4690_v0 = vpop.eup %4689 }
 0x56d   :  { %1908 = vrot.lane.b32.xlu1 %v4690_v0, %s5214_s13 }
 0x5db   :  { %v1348_v1 = vpop.permute.xlu0 %1347 }
 0x5dc   :  { %v1350_v2 = vmul.f32 %v4684_v50, %v1348_v1 }
 0x5de   :  { %1354 = vperm.xlu0 %4563, %v1350_v2   ;;  %1360 = vperm.xlu1 %4564, %v1350_v2  }
 0x5df   :  { %v1909_v11 = vpop.permute.xlu1 %1908 }
 0x5e0   :  { %v1911_v12 = vmul.f32 %v4686_v53, %v1909_v11 }
 0x5e2   :  { %1923 = vrot.lane.b32.xlu0 %v5494_v9, %s5215_s14  ;;  %4565 = vset.pattern.permute.xlu1 %v6792_v4 }
 0x5e3   :  { %1920 = vperm.xlu1 %4565, %v1911_v12   ;;  %4566 = vset.pattern.permute.xlu0 %v6790_v13 }
 0x5e6   :  { %1914 = vperm.xlu0 %4566, %v1911_v12  }
 0x5e7   :  { %4567 = vset.pattern.permute.xlu1 %v6794_v3 }
 0x5ea   :  { %4568 = vset.pattern.permute.xlu0 %v6796_v59 }
 0x65d   :  { %v5502_v14 = vpop.permute.xlu0 %1354  ;;  %v5504_v15 = vpop.permute.xlu1 %1360 }
 0x65e   :  { %v1357_v16 = vmul.f32 %v5502_v14, %v5476_v5  ;;  %v1366_v19 = vmul.f32 %v5494_v9, %v5504_v15 }
 0x660   :  { %v1358_v18 = vadd.f32 %v1357_v16, %v1351_v17 }
 0x661   :  { %v5510_v22 = vpop.permute.xlu0 %1923 }
 0x662   :  { %v1367_v20 = vadd.f32 %v1366_v19, %v1358_v18  ;;  %v5512_v23 = vpop.permute.xlu1 %1920 }
 0x663   :  { %v1926_v26 = vmul.f32 %v5510_v22, %v5512_v23 }
 0x664   :  { %4691 = vtanh.f32 %v1367_v20  ;;  %v4259_v27 = vmul.f32 -1.442695, %v1367_v20 }
 0x665   :  { %v5518_v30 = vpop.permute.xlu0 %1914 }
 0x666   :  { %4693 = vpow2.f32 %v4259_v27  ;;  %v1917_v31 = vmul.f32 %v5518_v30, %v5476_v5 }
 0x668   :  { %v1918_v36 = vadd.f32 %v1917_v31, %v1810_v35 }
 0x66e   :  { %v4692_v21 = vpop.eup %4691 }
 0x66f   :  { %1377 = vrot.lane.b32.xlu1 %v4692_v21, %s5210_s5 }
 0x670   :  { %v4694_v28 = vpop.eup %4693 }
 0x671   :  { %v1371_v29 = vadd.f32 1.0, %v4694_v28  ;;  %v1772_v28 = vld [vmem:[#allocation2 + $0xc] sm:$0x1] }
 0x673   :  { %1928 = vrot.lane.b32.xlu1 %v1926_v26, %s5218_s15  ;;  %4695 = vrcp.f32 %v1371_v29 }
 0x67d   :  { %v4696_v32 = vpop.eup %4695 }
 0x67e   :  { %v1375_v42 = vmul.f32 %v4696_v32, %v5483_v58 }
 0x6e1   :  { %v1378_v33 = vpop.permute.xlu1 %1377 }
 0x6e2   :  { %v1380_v34 = vmul.f32 %v4696_v32, %v1378_v33 }
 0x6e4   :  { %1382 = vrot.lane.b32.xlu1 %v1380_v34, %s5211_s12 }
 0x6e5   :  { %v1929_v37 = vpop.permute.xlu1 %1928 }
 0x6e6   :  { %v1931_v38 = vadd.f32 %v1929_v37, %v1918_v36 }
 0x6e8   :  { %4697 = vtanh.f32 %v1931_v38  ;;  %v4274_v40 = vmul.f32 -1.442695, %v1931_v38 }
 0x6ea   :  { %4699 = vpow2.f32 %v4274_v40 }
 0x6f2   :  { %v4698_v39 = vpop.eup %4697 }
 0x6f3   :  { %1941 = vrot.lane.b32.xlu0 %v4698_v39, %s5210_s5 }
 0x6f4   :  { %v4700_v41 = vpop.eup %4699 }
 0x6f5   :  { %v1935_v44 = vadd.f32 1.0, %v4700_v41 }
 0x756   :  { %v1383_v43 = vpop.permute.xlu1 %1382 }
 0x757   :  { %v1385_v45 = vadd.f32 %v1383_v43, %v1375_v42 }
 0x759   :  { %4701 = vtanh.f32 %v1385_v45 }
 0x75a   :  { %4703 = vrcp.f32 %v1935_v44 }
 0x763   :  { %v4702_v46 = vpop.eup %4701 }
 0x764   :  { %1388 = vrot.lane.b32.xlu1 %v4702_v46, %s5214_s13  ;;  %v4704_v47 = vpop.eup %4703 }
 0x765   :  { %v1942_v48 = vpop.permute.xlu0 %1941  ;;  %v1939_v50 = vmul.f32 %v4704_v47, %v5488_v62 }
 0x766   :  { %v1944_v25 = vmul.f32 %v4704_v47, %v1942_v48 }
 0x768   :  { %1946 = vrot.lane.b32.xlu0 %v1944_v25, %s5211_s12 }
 0x7d6   :  { %v1389_v24 = vpop.permute.xlu1 %1388 }
 0x7d7   :  { %v1391_v49 = vmul.f32 %v4696_v32, %v1389_v24 }
 0x7d9   :  { %1395 = vperm.xlu1 %4567, %v1391_v49   ;;  %1401 = vperm.xlu0 %4568, %v1391_v49  }
 0x7da   :  { %v1947_v51 = vpop.permute.xlu0 %1946 }
 0x7db   :  { %v5528_v52 = vadd.f32 %v1947_v51, %v1939_v50 }
 0x7dd   :  { %4705 = vtanh.f32 %v5528_v52  ;;  %4569 = vset.pattern.permute.xlu0 %v6792_v4  ;;  %4570 = vset.pattern.permute.xlu1 %v6790_v13 }
 0x7e7   :  { %v4706_v53 = vpop.eup %4705 }
 0x7e8   :  { %1952 = vrot.lane.b32.xlu1 %v4706_v53, %s5214_s13 }
 0x858   :  { %v5534_v54 = vpop.permute.xlu1 %1395  ;;  %v5536_v55 = vpop.permute.xlu0 %1401 }
 0x859   :  { %v1398_v56 = vmul.f32 %v5534_v54, %v5476_v5  ;;  %v1404_v60 = vmul.f32 %v5536_v55, %v5494_v9 }
 0x85b   :  { %v1399_v58 = vadd.f32 %v1398_v56, %v1392_v57 }
 0x85c   :  { %v1953_v61 = vpop.permute.xlu1 %1952 }
 0x85d   :  { %v1405_v62 = vadd.f32 %v1404_v60, %v1399_v58  ;;  %v1955_v63 = vmul.f32 %v4704_v47, %v1953_v61  ;;  %v1430_v47 = vld [vmem:[#allocation2 + $0x3] sm:$0x1] }
 0x85f   :  { %4707 = vtanh.f32 %v1405_v62  ;;  %1964 = vperm.xlu0 %4569, %v1955_v63   ;;  %v4260_v1 = vmul.f32 -1.442695, %v1405_v62 }
 0x861   :  { %4709 = vpow2.f32 %v4260_v1 }
 0x863   :  { %4572 = vset.pattern.permute.xlu0 %v6796_v59 }
 0x869   :  { %v4708_v0 = vpop.eup %4707 }
 0x86a   :  { %1415 = vrot.lane.b32.xlu1 %v4708_v0, %s5210_s5 }
 0x86b   :  { %v4710_v2 = vpop.eup %4709 }
 0x86c   :  { %v1409_v11 = vadd.f32 1.0, %v4710_v2 }
 0x86e   :  { %1958 = vperm.xlu1 %4570, %v1955_v63   ;;  %4711 = vrcp.f32 %v1409_v11 }
 0x872   :  { %4571 = vset.pattern.permute.xlu1 %v6794_v3 }
 0x878   :  { %v4712_v12 = vpop.eup %4711 }
 0x879   :  { %v1413_v26 = vmul.f32 %v4712_v12, %v1385_v45 }
 0x8dc   :  { %v1416_v16 = vpop.permute.xlu1 %1415 }
 0x8dd   :  { %v1418_v17 = vmul.f32 %v4712_v12, %v1416_v16 }
 0x8de   :  { %v5545_v18 = vpop.permute.xlu0 %1964 }
 0x8df   :  { %v1967_v19 = vmul.f32 %v5545_v18, %v5510_v22  ;;  %1420 = vrot.lane.b32.xlu1 %v1418_v17, %s5211_s12 }
 0x8e1   :  { %1969 = vrot.lane.b32.xlu0 %v1967_v19, %s5218_s15 }
 0x8ed   :  { %v5551_v20 = vpop.permute.xlu1 %1958 }
 0x8ee   :  { %v1961_v21 = vmul.f32 %v5551_v20, %v5476_v5 }
 0x8f0   :  { %v1962_v31 = vadd.f32 %v1961_v21, %v1772_v28  ;;  %v5587_v28 = vld [vmem:[#allocation2 + $0xb] sm:$0x1] }
 0x951   :  { %v1421_v27 = vpop.permute.xlu1 %1420 }
 0x952   :  { %v1423_v29 = vadd.f32 %v1421_v27, %v1413_v26 }
 0x953   :  { %v1970_v32 = vpop.permute.xlu0 %1969 }
 0x954   :  { %4713 = vtanh.f32 %v1423_v29  ;;  %v1972_v33 = vadd.f32 %v1970_v32, %v1962_v31 }
 0x956   :  { %4715 = vtanh.f32 %v1972_v33  ;;  %v4275_v36 = vmul.f32 -1.442695, %v1972_v33 }
 0x958   :  { %4717 = vpow2.f32 %v4275_v36 }
 0x95e   :  { %v4714_v34 = vpop.eup %4713 }
 0x95f   :  { %1426 = vrot.lane.b32.xlu1 %v4714_v34, %s5214_s13 }
 0x960   :  { %v4716_v35 = vpop.eup %4715 }
 0x961   :  { %1982 = vrot.lane.b32.xlu0 %v4716_v35, %s5210_s5 }
 0x962   :  { %v4718_v37 = vpop.eup %4717 }
 0x963   :  { %v1976_v38 = vadd.f32 1.0, %v4718_v37 }
 0x965   :  { %4719 = vrcp.f32 %v1976_v38 }
 0x96f   :  { %v4720_v42 = vpop.eup %4719 }
 0x970   :  { %v1980_v24 = vmul.f32 %v4720_v42, %v5528_v52 }
 0x9d1   :  { %v1427_v39 = vpop.permute.xlu1 %1426 }
 0x9d2   :  { %v1429_v40 = vmul.f32 %v4712_v12, %v1427_v39 }
 0x9d3   :  { %v1983_v41 = vpop.permute.xlu0 %1982 }
 0x9d4   :  { %1433 = vperm.xlu1 %4571, %v1429_v40   ;;  %1439 = vperm.xlu0 %4572, %v1429_v40   ;;  %v1985_v43 = vmul.f32 %v4720_v42, %v1983_v41  ;;  %v1468_v40 = vld [vmem:[#allocation2 + $0x4] sm:$0x1] }
 0x9d8   :  { %1987 = vrot.lane.b32.xlu1 %v1985_v43, %s5211_s12  ;;  %4575 = vset.pattern.permute.xlu0 %v6794_v3 }
 0x9d9   :  { %4573 = vset.pattern.permute.xlu1 %v6792_v4 }
 0xa53   :  { %v5560_v44 = vpop.permute.xlu1 %1433  ;;  %v5562_v45 = vpop.permute.xlu0 %1439 }
 0xa54   :  { %v1436_v46 = vmul.f32 %v5560_v44, %v5476_v5  ;;  %v1442_v25 = vmul.f32 %v5562_v45, %v5494_v9 }
 0xa56   :  { %v1437_v48 = vadd.f32 %v1436_v46, %v1430_v47 }
 0xa57   :  { %v1988_v49 = vpop.permute.xlu1 %1987 }
 0xa58   :  { %v1443_v50 = vadd.f32 %v1442_v25, %v1437_v48  ;;  %v5569_v51 = vadd.f32 %v1988_v49, %v1980_v24 }
 0xa5a   :  { %4721 = vtanh.f32 %v1443_v50  ;;  %v4261_v57 = vmul.f32 -1.442695, %v1443_v50 }
 0xa5b   :  { %4723 = vtanh.f32 %v5569_v51 }
 0xa5c   :  { %4725 = vpow2.f32 %v4261_v57 }
 0xa64   :  { %v4722_v53 = vpop.eup %4721 }
 0xa65   :  { %v4724_v56 = vpop.eup %4723  ;;  %1453 = vrot.lane.b32.xlu0 %v4722_v53, %s5210_s5 }
 0xa66   :  { %1993 = vrot.lane.b32.xlu1 %v4724_v56, %s5214_s13  ;;  %v4726_v58 = vpop.eup %4725 }
 0xa67   :  { %v1447_v60 = vadd.f32 1.0, %v4726_v58 }
 0xa69   :  { %4727 = vrcp.f32 %v1447_v60 }
 0xa73   :  { %v4728_v61 = vpop.eup %4727 }
 0xa74   :  { %v1451_v1 = vmul.f32 %v4728_v61, %v1423_v29 }
 0xad7   :  { %v1454_v52 = vpop.permute.xlu0 %1453 }
 0xad8   :  { %v1456_v62 = vmul.f32 %v4728_v61, %v1454_v52  ;;  %v1994_v63 = vpop.permute.xlu1 %1993 }
 0xad9   :  { %v1996_v0 = vmul.f32 %v4720_v42, %v1994_v63 }
 0xada   :  { %1458 = vrot.lane.b32.xlu0 %v1456_v62, %s5211_s12 }
 0xadb   :  { %2005 = vperm.xlu1 %4573, %v1996_v0  }
 0xadf   :  { %4574 = vset.pattern.permute.xlu1 %v6790_v13 }
 0xae0   :  { %1999 = vperm.xlu1 %4574, %v1996_v0  }
 0xae4   :  { %4576 = vset.pattern.permute.xlu1 %v6796_v59 }
 0xb4c   :  { %v1459_v2 = vpop.permute.xlu0 %1458 }
 0xb4d   :  { %v1461_v11 = vadd.f32 %v1459_v2, %v1451_v1 }
 0xb4f   :  { %4729 = vtanh.f32 %v1461_v11 }
 0xb59   :  { %v4730_v12 = vpop.eup %4729 }
 0xb5a   :  { %v5577_v16 = vpop.permute.xlu1 %2005  ;;  %1464 = vrot.lane.b32.xlu1 %v4730_v12, %s5214_s13 }
 0xb5b   :  { %v2008_v17 = vmul.f32 %v5577_v16, %v5510_v22 }
 0xb5d   :  { %2010 = vrot.lane.b32.xlu0 %v2008_v17, %s5218_s15 }
 0xb5f   :  { %v5583_v19 = vpop.permute.xlu1 %1999 }
 0xb60   :  { %v2002_v21 = vmul.f32 %v5583_v19, %v5476_v5 }
 0xb62   :  { %v2003_v29 = vadd.f32 %v2002_v21, %v5587_v28 }
 0xbcc   :  { %v1465_v26 = vpop.permute.xlu1 %1464 }
 0xbcd   :  { %v1467_v27 = vmul.f32 %v4728_v61, %v1465_v26 }
 0xbcf   :  { %v2011_v31 = vpop.permute.xlu0 %2010  ;;  %1477 = vperm.xlu1 %4576, %v1467_v27   ;;  %1471 = vperm.xlu0 %4575, %v1467_v27  }
 0xbd0   :  { %v2013_v32 = vadd.f32 %v2011_v31, %v2003_v29  ;;  %v5622_v29 = vld [vmem:[#allocation2 + $0xa] sm:$0x1] }
 0xbd2   :  { %4731 = vtanh.f32 %v2013_v32  ;;  %v4276_v34 = vmul.f32 -1.442695, %v2013_v32 }
 0xbd3   :  { %4577 = vset.pattern.permute.xlu0 %v6792_v4  ;;  %4578 = vset.pattern.permute.xlu1 %v6790_v13 }
 0xbd4   :  { %4733 = vpow2.f32 %v4276_v34 }
 0xbdc   :  { %v4732_v33 = vpop.eup %4731 }
 0xbdd   :  { %2023 = vrot.lane.b32.xlu1 %v4732_v33, %s5210_s5 }
 0xbde   :  { %v4734_v35 = vpop.eup %4733 }
 0xbdf   :  { %v2017_v36 = vadd.f32 1.0, %v4734_v35 }
 0xbe1   :  { %4735 = vrcp.f32 %v2017_v36 }
 0xbeb   :  { %v4736_v43 = vpop.eup %4735 }
 0xbec   :  { %v2021_v53 = vmul.f32 %v4736_v43, %v5569_v51 }
 0xc4e   :  { %v5593_v37 = vpop.permute.xlu1 %1477  ;;  %v5595_v38 = vpop.permute.xlu0 %1471 }
 0xc4f   :  { %v1474_v39 = vmul.f32 %v5595_v38, %v5476_v5  ;;  %v1480_v41 = vmul.f32 %v5593_v37, %v5494_v9 }
 0xc51   :  { %v1475_v42 = vadd.f32 %v1474_v39, %v1468_v40  ;;  %v5630_v39 = vld [vmem:[#allocation2 + $0x5] sm:$0x1] }
 0xc52   :  { %v2024_v46 = vpop.permute.xlu1 %2023 }
 0xc53   :  { %v1481_v47 = vadd.f32 %v1480_v41, %v1475_v42  ;;  %v2026_v48 = vmul.f32 %v4736_v43, %v2024_v46 }
 0xc55   :  { %4737 = vtanh.f32 %v1481_v47  ;;  %2028 = vrot.lane.b32.xlu0 %v2026_v48, %s5211_s12  ;;  %v4262_v24 = vmul.f32 -1.442695, %v1481_v47 }
 0xc57   :  { %4739 = vpow2.f32 %v4262_v24 }
 0xc5f   :  { %v4738_v25 = vpop.eup %4737 }
 0xc60   :  { %1491 = vrot.lane.b32.xlu1 %v4738_v25, %s5210_s5 }
 0xc61   :  { %v4740_v49 = vpop.eup %4739 }
 0xc62   :  { %v1485_v50 = vadd.f32 1.0, %v4740_v49 }
 0xc64   :  { %4741 = vrcp.f32 %v1485_v50 }
 0xc6e   :  { %v4742_v58 = vpop.eup %4741 }
 0xc6f   :  { %v1489_v62 = vmul.f32 %v4742_v58, %v1461_v11 }
 0xcc7   :  { %v2029_v56 = vpop.permute.xlu0 %2028 }
 0xcc8   :  { %v5604_v57 = vadd.f32 %v2029_v56, %v2021_v53 }
 0xcca   :  { %4743 = vtanh.f32 %v5604_v57 }
 0xcd2   :  { %v1492_v60 = vpop.permute.xlu1 %1491 }
 0xcd3   :  { %v1494_v61 = vmul.f32 %v4742_v58, %v1492_v60 }
 0xcd4   :  { %v4744_v52 = vpop.eup %4743 }
 0xcd5   :  { %1496 = vrot.lane.b32.xlu1 %v1494_v61, %s5211_s12  ;;  %2034 = vrot.lane.b32.xlu0 %v4744_v52, %s5214_s13 }
 0xd47   :  { %v1497_v63 = vpop.permute.xlu1 %1496  ;;  %v2035_v0 = vpop.permute.xlu0 %2034 }
 0xd48   :  { %v1499_v1 = vadd.f32 %v1497_v63, %v1489_v62  ;;  %v2037_v2 = vmul.f32 %v4736_v43, %v2035_v0 }
 0xd4a   :  { %4745 = vtanh.f32 %v1499_v1  ;;  %2046 = vperm.xlu0 %4577, %v2037_v2  }
 0xd4e   :  { %4580 = vset.pattern.permute.xlu0 %v6796_v59 }
 0xd54   :  { %v4746_v51 = vpop.eup %4745 }
 0xd55   :  { %1502 = vrot.lane.b32.xlu1 %v4746_v51, %s5214_s13 }
 0xd59   :  { %2040 = vperm.xlu1 %4578, %v2037_v2  }
 0xd5d   :  { %4579 = vset.pattern.permute.xlu1 %v6794_v3 }
 0xdc7   :  { %v1503_v12 = vpop.permute.xlu1 %1502 }
 0xdc8   :  { %v1505_v17 = vmul.f32 %v4742_v58, %v1503_v12 }
 0xdc9   :  { %v5612_v21 = vpop.permute.xlu0 %2046 }
 0xdca   :  { %v2049_v11 = vmul.f32 %v5612_v21, %v5510_v22  ;;  %1509 = vperm.xlu1 %4579, %v1505_v17  }
 0xdcc   :  { %2051 = vrot.lane.b32.xlu0 %v2049_v11, %s5218_s15 }
 0xdd0   :  { %1515 = vperm.xlu0 %4580, %v1505_v17  }
 0xdd4   :  { %4581 = vset.pattern.permute.xlu0 %v6792_v4 }
 0xdd8   :  { %v5618_v26 = vpop.permute.xlu1 %2040 }
 0xdd9   :  { %v2043_v27 = vmul.f32 %v5618_v26, %v5476_v5 }
 0xddb   :  { %v2044_v31 = vadd.f32 %v2043_v27, %v5622_v29 }
 0xe3e   :  { %v2052_v32 = vpop.permute.xlu0 %2051 }
 0xe3f   :  { %v2054_v33 = vadd.f32 %v2052_v32, %v2044_v31 }
 0xe41   :  { %4747 = vtanh.f32 %v2054_v33  ;;  %v4277_v47 = vmul.f32 -1.442695, %v2054_v33 }
 0xe49   :  { %v5625_v34 = vpop.permute.xlu1 %1509 }
 0xe4a   :  { %v1512_v36 = vmul.f32 %v5625_v34, %v5476_v5 }
 0xe4b   :  { %v4748_v35 = vpop.eup %4747 }
 0xe4c   :  { %2064 = vrot.lane.b32.xlu1 %v4748_v35, %s5210_s5  ;;  %v1513_v41 = vadd.f32 %v1512_v36, %v5630_v39 }
 0xe4f   :  { %v5632_v40 = vpop.permute.xlu0 %1515 }
 0xe50   :  { %v1518_v42 = vmul.f32 %v5632_v40, %v5494_v9 }
 0xe52   :  { %v1519_v43 = vadd.f32 %v1518_v42, %v1513_v41  ;;  %v5659_v41 = vld [vmem:[#allocation2 + $0x6] sm:$0x1] }
 0xe54   :  { %4749 = vtanh.f32 %v1519_v43  ;;  %v4263_v24 = vmul.f32 -1.442695, %v1519_v43 }
 0xe55   :  { %4751 = vpow2.f32 %v4277_v47 }
 0xe5e   :  { %v4750_v46 = vpop.eup %4749 }
 0xe5f   :  { %1529 = vrot.lane.b32.xlu1 %v4750_v46, %s5210_s5  ;;  %v4752_v48 = vpop.eup %4751 }
 0xe60   :  { %v2058_v25 = vadd.f32 1.0, %v4752_v48 }
 0xe62   :  { %4753 = vrcp.f32 %v2058_v25 }
 0xe63   :  { %4755 = vpow2.f32 %v4263_v24 }
 0xe6c   :  { %v4754_v49 = vpop.eup %4753 }
 0xe6d   :  { %v4756_v56 = vpop.eup %4755  ;;  %v2062_v62 = vmul.f32 %v4754_v49, %v5604_v57 }
 0xe6e   :  { %v1523_v58 = vadd.f32 1.0, %v4756_v56 }
 0xe70   :  { %4757 = vrcp.f32 %v1523_v58 }
 0xe7a   :  { %v4758_v60 = vpop.eup %4757 }
 0xe7b   :  { %v1527_v51 = vmul.f32 %v4758_v60, %v1499_v1 }
 0xebe   :  { %v2065_v50 = vpop.permute.xlu1 %2064 }
 0xebf   :  { %v2067_v53 = vmul.f32 %v4754_v49, %v2065_v50 }
 0xec1   :  { %2069 = vrot.lane.b32.xlu0 %v2067_v53, %s5211_s12 }
 0xed1   :  { %v1530_v61 = vpop.permute.xlu1 %1529 }
 0xed2   :  { %v1532_v52 = vmul.f32 %v4758_v60, %v1530_v61 }
 0xed4   :  { %1534 = vrot.lane.b32.xlu1 %v1532_v52, %s5211_s12 }
 0xf33   :  { %v2070_v63 = vpop.permute.xlu0 %2069 }
 0xf34   :  { %v5641_v0 = vadd.f32 %v2070_v63, %v2062_v62 }
 0xf36   :  { %4759 = vtanh.f32 %v5641_v0 }
 0xf40   :  { %v4760_v2 = vpop.eup %4759 }
 0xf41   :  { %2075 = vrot.lane.b32.xlu0 %v4760_v2, %s5214_s13 }
 0xf46   :  { %v1535_v12 = vpop.permute.xlu1 %1534 }
 0xf47   :  { %v1537_v17 = vadd.f32 %v1535_v12, %v1527_v51 }
 0xf49   :  { %4761 = vtanh.f32 %v1537_v17 }
 0xf53   :  { %v4762_v11 = vpop.eup %4761 }
 0xf54   :  { %1540 = vrot.lane.b32.xlu1 %v4762_v11, %s5214_s13 }
 0xfb3   :  { %v2076_v27 = vpop.permute.xlu0 %2075 }
 0xfb4   :  { %v2078_v31 = vmul.f32 %v4754_v49, %v2076_v27  ;;  %v5671_v49 = vld [vmem:[#allocation2 + $0x9] sm:$0x1] }
 0xfb6   :  { %2087 = vperm.xlu0 %4581, %v2078_v31  }
 0xfba   :  { %4583 = vset.pattern.permute.xlu0 %v6790_v13 }
 0xfbb   :  { %2081 = vperm.xlu0 %4583, %v2078_v31  }
 0xfbf   :  { %4585 = vset.pattern.permute.xlu0 %v6796_v59 }
 0xfc6   :  { %v1541_v57 = vpop.permute.xlu1 %1540 }
 0xfc7   :  { %v1543_v32 = vmul.f32 %v4758_v60, %v1541_v57 }
 0xfc9   :  { %1547 = vperm.xlu1 %4579, %v1543_v32  }
 0xfcd   :  { %4582 = vset.pattern.permute.xlu1 %v6796_v59 }
 0xfce   :  { %1553 = vperm.xlu1 %4582, %v1543_v32  }
 0xfd2   :  { %4584 = vset.pattern.permute.xlu1 %v6794_v3 }
0x1035   :  { %v5650_v1 = vpop.permute.xlu0 %2087 }
0x1036   :  { %v2090_v33 = vmul.f32 %v5650_v1, %v5510_v22 }
0x1038   :  { %2092 = vrot.lane.b32.xlu1 %v2090_v33, %s5218_s15 }
0x103a   :  { %v5667_v25 = vpop.permute.xlu0 %2081 }
0x103b   :  { %v2084_v24 = vmul.f32 %v5667_v25, %v5476_v5 }
0x103d   :  { %v2085_v50 = vadd.f32 %v2084_v24, %v5671_v49 }
0x1048   :  { %v5655_v35 = vpop.permute.xlu1 %1547 }
0x1049   :  { %v1550_v36 = vmul.f32 %v5655_v35, %v5476_v5 }
0x104b   :  { %v1551_v43 = vadd.f32 %v1550_v36, %v5659_v41 }
0x104d   :  { %v5661_v42 = vpop.permute.xlu1 %1553 }
0x104e   :  { %v1556_v46 = vmul.f32 %v5661_v42, %v5494_v9 }
0x1050   :  { %v1557_v47 = vadd.f32 %v1556_v46, %v1551_v43 }
0x1052   :  { %4763 = vtanh.f32 %v1557_v47  ;;  %v4264_v58 = vmul.f32 -1.442695, %v1557_v47 }
0x105c   :  { %v4764_v48 = vpop.eup %4763 }
0x105d   :  { %1567 = vrot.lane.b32.xlu1 %v4764_v48, %s5210_s5 }
0x10aa   :  { %v2093_v53 = vpop.permute.xlu1 %2092 }
0x10ab   :  { %v2095_v56 = vadd.f32 %v2093_v53, %v2085_v50 }
0x10ad   :  { %4765 = vtanh.f32 %v2095_v56  ;;  %v4278_v51 = vmul.f32 -1.442695, %v2095_v56 }
0x10ae   :  { %4767 = vpow2.f32 %v4264_v58 }
0x10b7   :  { %v4766_v60 = vpop.eup %4765 }
0x10b8   :  { %2105 = vrot.lane.b32.xlu0 %v4766_v60, %s5210_s5  ;;  %v4768_v61 = vpop.eup %4767 }
0x10b9   :  { %v1561_v52 = vadd.f32 1.0, %v4768_v61  ;;  %v5693_v61 = vld [vmem:[#allocation2 + $0x7] sm:$0x1] }
0x10bb   :  { %4769 = vrcp.f32 %v1561_v52 }
0x10bc   :  { %4771 = vpow2.f32 %v4278_v51 }
0x10c5   :  { %v4770_v62 = vpop.eup %4769 }
0x10c6   :  { %v4772_v12 = vpop.eup %4771  ;;  %v1565_v32 = vmul.f32 %v4770_v62, %v1537_v17 }
0x10c7   :  { %v2099_v11 = vadd.f32 1.0, %v4772_v12 }
0x10c9   :  { %4773 = vrcp.f32 %v2099_v11 }
0x10cf   :  { %v1568_v63 = vpop.permute.xlu1 %1567 }
0x10d0   :  { %v1570_v2 = vmul.f32 %v4770_v62, %v1568_v63 }
0x10d2   :  { %1572 = vrot.lane.b32.xlu1 %v1570_v2, %s5211_s12 }
0x10d3   :  { %v4774_v27 = vpop.eup %4773 }
0x10d4   :  { %v2103_v46 = vmul.f32 %v4774_v27, %v5641_v0 }
0x112a   :  { %v2106_v31 = vpop.permute.xlu0 %2105 }
0x112b   :  { %v2108_v57 = vmul.f32 %v4774_v27, %v2106_v31 }
0x112d   :  { %2110 = vrot.lane.b32.xlu0 %v2108_v57, %s5211_s12 }
0x1144   :  { %v1573_v33 = vpop.permute.xlu1 %1572 }
0x1145   :  { %v1575_v36 = vadd.f32 %v1573_v33, %v1565_v32 }
0x1147   :  { %4775 = vtanh.f32 %v1575_v36 }
0x1151   :  { %v4776_v43 = vpop.eup %4775 }
0x1152   :  { %1578 = vrot.lane.b32.xlu1 %v4776_v43, %s5214_s13 }
0x119f   :  { %v2111_v47 = vpop.permute.xlu0 %2110 }
0x11a0   :  { %v5679_v48 = vadd.f32 %v2111_v47, %v2103_v46  ;;  %v1620_v47 = vld [vmem:[#allocation2 + $0x8] sm:$0x1] }
0x11a2   :  { %4777 = vtanh.f32 %v5679_v48 }
0x11ac   :  { %v4778_v24 = vpop.eup %4777 }
0x11ad   :  { %2116 = vrot.lane.b32.xlu0 %v4778_v24, %s5214_s13 }
0x11c4   :  { %v1579_v50 = vpop.permute.xlu1 %1578 }
0x11c5   :  { %v1581_v53 = vmul.f32 %v4770_v62, %v1579_v50 }
0x11c7   :  { %1585 = vperm.xlu1 %4584, %v1581_v53   ;;  %1591 = vperm.xlu0 %4585, %v1581_v53  }
0x11cb   :  { %4586 = vset.pattern.permute.xlu1 %v6792_v4  ;;  %4587 = vset.pattern.permute.xlu0 %v6790_v13 }
0x121f   :  { %v2117_v17 = vpop.permute.xlu0 %2116 }
0x1220   :  { %v2119_v56 = vmul.f32 %v4774_v27, %v2117_v17 }
0x1222   :  { %2122 = vperm.xlu0 %4587, %v2119_v56   ;;  %2128 = vperm.xlu1 %4586, %v2119_v56  }
0x1226   :  { %4589 = vset.pattern.permute.xlu0 %v6796_v59  ;;  %4588 = vset.pattern.permute.xlu1 %v6794_v3 }
0x1246   :  { %v5687_v0 = vpop.permute.xlu1 %1585  ;;  %v5689_v58 = vpop.permute.xlu0 %1591 }
0x1247   :  { %v1588_v60 = vmul.f32 %v5687_v0, %v5476_v5  ;;  %v1594_v62 = vmul.f32 %v5689_v58, %v5494_v9 }
0x1249   :  { %v1589_v52 = vadd.f32 %v1588_v60, %v5693_v61 }
0x124b   :  { %v1595_v63 = vadd.f32 %v1594_v62, %v1589_v52 }
0x124d   :  { %4779 = vtanh.f32 %v1595_v63  ;;  %v4265_v11 = vmul.f32 -1.442695, %v1595_v63 }
0x124f   :  { %4781 = vpow2.f32 %v4265_v11 }
0x1257   :  { %v4780_v2 = vpop.eup %4779 }
0x1258   :  { %1605 = vrot.lane.b32.xlu1 %v4780_v2, %s5210_s5 }
0x1259   :  { %v4782_v27 = vpop.eup %4781 }
0x125a   :  { %v1599_v31 = vadd.f32 1.0, %v4782_v27 }
0x125c   :  { %4783 = vrcp.f32 %v1599_v31 }
0x1266   :  { %v4784_v57 = vpop.eup %4783 }
0x1267   :  { %v1603_v56 = vmul.f32 %v4784_v57, %v1575_v36 }
0x12a1   :  { %v5699_v51 = vpop.permute.xlu1 %2128  ;;  %v5705_v43 = vpop.permute.xlu0 %2122 }
0x12a2   :  { %v2131_v12 = vmul.f32 %v5699_v51, %v5510_v22  ;;  %v2125_v46 = vmul.f32 %v5705_v43, %v5476_v5 }
0x12a4   :  { %2133 = vrot.lane.b32.xlu1 %v2131_v12, %s5218_s15  ;;  %v2126_v24 = vadd.f32 %v2125_v46, %v1620_v47 }
0x12ca   :  { %v1606_v32 = vpop.permute.xlu1 %1605 }
0x12cb   :  { %v1608_v33 = vmul.f32 %v4784_v57, %v1606_v32 }
0x12cd   :  { %1610 = vrot.lane.b32.xlu1 %v1608_v33, %s5211_s12 }
0x1316   :  { %v2134_v50 = vpop.permute.xlu1 %2133 }
0x1317   :  { %v2136_v53 = vadd.f32 %v2134_v50, %v2126_v24 }
0x1319   :  { %4785 = vtanh.f32 %v2136_v53  ;;  %v4279_v63 = vmul.f32 -1.442695, %v2136_v53 }
0x1323   :  { %v4786_v17 = vpop.eup %4785 }
0x1324   :  { %2146 = vrot.lane.b32.xlu0 %v4786_v17, %s5210_s5 }
0x133f   :  { %v1611_v60 = vpop.permute.xlu1 %1610 }
0x1340   :  { %v1613_v52 = vadd.f32 %v1611_v60, %v1603_v56 }
0x1342   :  { %4787 = vtanh.f32 %v1613_v52 }
0x1343   :  { %4789 = vpow2.f32 %v4279_v63 }
0x134c   :  { %v4788_v62 = vpop.eup %4787 }
0x134d   :  { %1616 = vrot.lane.b32.xlu1 %v4788_v62, %s5214_s13  ;;  %v4790_v2 = vpop.eup %4789 }
0x134e   :  { %v2140_v12 = vadd.f32 1.0, %v4790_v2 }
0x1350   :  { %4791 = vrcp.f32 %v2140_v12 }
0x135a   :  { %v4792_v11 = vpop.eup %4791 }
0x135b   :  { %v2144_v36 = vmul.f32 %v4792_v11, %v5679_v48 }
0x1396   :  { %v2147_v27 = vpop.permute.xlu0 %2146 }
0x1397   :  { %v2149_v31 = vmul.f32 %v4792_v11, %v2147_v27 }
0x1399   :  { %2151 = vrot.lane.b32.xlu0 %v2149_v31, %s5211_s12 }
0x13bf   :  { %v1617_v32 = vpop.permute.xlu1 %1616 }
0x13c0   :  { %v1619_v33 = vmul.f32 %v4784_v57, %v1617_v32 }
0x13c2   :  { %1623 = vperm.xlu1 %4588, %v1619_v33   ;;  %1629 = vperm.xlu0 %4589, %v1619_v33  }
0x13c6   :  { %4590 = vset.pattern.permute.xlu0 %v6792_v4  ;;  %4591 = vset.pattern.permute.xlu1 %v6790_v13 }
0x140b   :  { %v2152_v46 = vpop.permute.xlu0 %2151 }
0x140c   :  { %v5715_v24 = vadd.f32 %v2152_v46, %v2144_v36 }
0x140e   :  { %4793 = vtanh.f32 %v5715_v24 }
0x1418   :  { %v4794_v50 = vpop.eup %4793 }
0x1419   :  { %2157 = vrot.lane.b32.xlu1 %v4794_v50, %s5214_s13 }
0x1441   :  { %v5719_v53 = vpop.permute.xlu1 %1623  ;;  %v5721_v17 = vpop.permute.xlu0 %1629 }
0x1442   :  { %v1626_v57 = vmul.f32 %v5719_v53, %v5476_v5  ;;  %v1632_v60 = vmul.f32 %v5721_v17, %v5494_v9 }
0x1444   :  { %v1627_v56 = vadd.f32 %v1626_v57, %v1620_v47 }
0x1446   :  { %v1633_v48 = vadd.f32 %v1632_v60, %v1627_v56  ;;  %v5740_v60 = vld [vmem:[%s6782_s4] sm:$0x3] }
0x1448   :  { %4795 = vtanh.f32 %v1633_v48  ;;  %v4266_v12 = vmul.f32 -1.442695, %v1633_v48 }
0x144a   :  { %4797 = vpow2.f32 %v4266_v12 }
0x1452   :  { %v4796_v62 = vpop.eup %4795 }
0x1453   :  { %1643 = vrot.lane.b32.xlu1 %v4796_v62, %s5210_s5 }
0x1454   :  { %v4798_v27 = vpop.eup %4797 }
0x1455   :  { %v1637_v31 = vadd.f32 1.0, %v4798_v27 }
0x1457   :  { %4799 = vrcp.f32 %v1637_v31 }
0x1461   :  { %v4800_v5 = vpop.eup %4799 }
0x148b   :  { %v2158_v63 = vpop.permute.xlu1 %2157 }
0x148c   :  { %v2160_v2 = vmul.f32 %v4792_v11, %v2158_v63  ;;  %v1641_v11 = vmul.f32 %v4800_v5, %v1613_v52 }
0x148e   :  { %2169 = vperm.xlu0 %4590, %v2160_v2  }
0x1492   :  { %4593 = vset.pattern.permute.xlu0 %v6796_v59 }
0x14c5   :  { %v1644_v47 = vpop.permute.xlu1 %1643 }
0x14c6   :  { %v1646_v32 = vmul.f32 %v4800_v5, %v1644_v47 }
0x14c8   :  { %1648 = vrot.lane.b32.xlu1 %v1646_v32, %s5211_s12 }
0x14cc   :  { %2163 = vperm.xlu1 %4591, %v2160_v2  }
0x14d0   :  { %4592 = vset.pattern.permute.xlu1 %v6794_v3 }
0x150d   :  { %v2170_v33 = vpop.permute.xlu0 %2169 }
0x150e   :  { %v2172_v36 = vmul.f32 %v2170_v33, %v5510_v22 }
0x1510   :  { %2174 = vrot.lane.b32.xlu0 %v2172_v36, %s5218_s15 }
0x153a   :  { %v1649_v46 = vpop.permute.xlu1 %1648 }
0x153b   :  { %v5733_v50 = vadd.f32 %v1649_v46, %v1641_v11 }
0x153d   :  { %4801 = vtanh.f32 %v5733_v50 }
0x1547   :  { %v4802_v57 = vpop.eup %4801 }
0x1548   :  { %1654 = vrot.lane.b32.xlu1 %v4802_v57, %s5214_s13 }
0x154b   :  { %v2164_v56 = vpop.permute.xlu1 %2163 }
0x154c   :  { %v2166_v48 = vmul.f32 %v5740_v60, %v2164_v56 }
0x154e   :  { %v2167_v62 = vadd.f32 %v2166_v48, %v5693_v61 }
0x1582   :  { %v2175_v63 = vpop.permute.xlu0 %2174 }
0x1583   :  { %v2177_v52 = vadd.f32 %v2175_v63, %v2167_v62 }
0x1585   :  { %4803 = vtanh.f32 %v2177_v52  ;;  %v4280_v31 = vmul.f32 -1.442695, %v2177_v52  ;;  %v5761_v52 = vld [vmem:[%s6786_s8] sm:$0x1] }
0x1587   :  { %4805 = vpow2.f32 %v4280_v31 }
0x158f   :  { %v4804_v2 = vpop.eup %4803 }
0x1590   :  { %2187 = vrot.lane.b32.xlu0 %v4804_v2, %s5210_s5 }
0x1591   :  { %v4806_v47 = vpop.eup %4805 }
0x1592   :  { %v2181_v32 = vadd.f32 1.0, %v4806_v47 }
0x1594   :  { %4807 = vrcp.f32 %v2181_v32 }
0x159e   :  { %v4808_v61 = vpop.eup %4807 }
0x15ba   :  { %v1655_v12 = vpop.permute.xlu1 %1654 }
0x15bb   :  { %v1657_v27 = vmul.f32 %v4800_v5, %v1655_v12  ;;  %v5751_v5 = vld [vmem:[%s6784_s6] sm:$0xf] }
0x15bc   :  { %v5754_v48 = vrot.slane %v5751_v5, 1  ;;  %v5764_v2 = vrot.slane %v5751_v5, 2  ;;  %v5771_v32 = vrot.slane %v5751_v5, 3 }
0x15bd   :  { %1667 = vperm.xlu0 %4593, %v1657_v27   ;;  %1661 = vperm.xlu1 %4592, %v1657_v27  }
0x15be   :  { %v2586_v6 = vmul.f32 %v5771_v32, %v2170_v33 }
0x15c1   :  { %4594 = vset.pattern.permute.xlu0 %v6792_v4  ;;  %4595 = vset.pattern.permute.xlu1 %v6790_v13 }
0x1602   :  { %v2188_v36 = vpop.permute.xlu0 %2187 }
0x1603   :  { %v2190_v11 = vmul.f32 %v4808_v61, %v2188_v36  ;;  %v2584_v36 = vmul.f32 %v5764_v2, %v2164_v56 }
0x1605   :  { %2192 = vrot.lane.b32.xlu1 %v2190_v11, %s5211_s12 }
0x163c   :  { %v1668_v46 = vpop.permute.xlu0 %1667  ;;  %v1662_v57 = vpop.permute.xlu1 %1661 }
0x163d   :  { %v1664_v62 = vmul.f32 %v5740_v60, %v1662_v57  ;;  %v2580_v63 = vmul.f32 %v5751_v5, %v1662_v57  ;;  %v1670_v12 = vmul.f32 %v1668_v46, %v5494_v9  ;;  %v2582_v27 = vmul.f32 %v5754_v48, %v1668_v46 }
0x163f   :  { %v1665_v31 = vadd.f32 %v1664_v62, %v5671_v49  ;;  %v2581_v47 = vadd.f32 %v2580_v63, %v5761_v52  ;;  %v2185_v49 = vmul.f32 %v4808_v61, %v5715_v24 }
0x1641   :  { %v1671_v11 = vadd.f32 %v1670_v12, %v1665_v31  ;;  %v2583_v57 = vadd.f32 %v2582_v27, %v2581_v47 }
0x1643   :  { %4809 = vtanh.f32 %v1671_v11  ;;  %v2585_v13 = vadd.f32 %v2584_v36, %v2583_v57  ;;  %v4267_v33 = vmul.f32 -1.442695, %v1671_v11 }
0x1645   :  { %v2587_v4 = vadd.f32 %v2586_v6, %v2585_v13 }
0x1647   :  { %2588 = vst.msk [vmem:[#allocation3 + $0x8] sm:$0x1] %vm2515_vm2, %v2587_v4 }
0x164d   :  { %v4810_v46 = vpop.eup %4809 }
0x164e   :  { %1681 = vrot.lane.b32.xlu1 %v4810_v46, %s5210_s5  ;;  %v2571_v46 = vmul.f32 %v5751_v5, %v5719_v53 }
0x1677   :  { %v2193_v62 = vpop.permute.xlu1 %2192 }
0x1678   :  { %v5778_v63 = vadd.f32 %v2193_v62, %v2185_v49  ;;  %v2573_v49 = vmul.f32 %v5754_v48, %v5721_v17  ;;  %v6824_v17 = vmov 15  }
0x167a   :  { %4811 = vtanh.f32 %v5778_v63 }
0x167b   :  { %4813 = vpow2.f32 %v4267_v33 }
0x1684   :  { %v4812_v56 = vpop.eup %4811 }
0x1685   :  { %2198 = vrot.lane.b32.xlu0 %v4812_v56, %s5214_s13  ;;  %v4814_v12 = vpop.eup %4813 }
0x1686   :  { %v1675_v27 = vadd.f32 1.0, %v4814_v12 }
0x1688   :  { %4815 = vrcp.f32 %v1675_v27 }
0x1692   :  { %v4816_v6 = vpop.eup %4815 }
0x1693   :  { %v1679_v47 = vmul.f32 %v4816_v6, %v5733_v50 }
0x16c0   :  { %v1682_v4 = vpop.permute.xlu1 %1681 }
0x16c1   :  { %v1684_v13 = vmul.f32 %v4816_v6, %v1682_v4 }
0x16c3   :  { %1686 = vrot.lane.b32.xlu1 %v1684_v13, %s5211_s12 }
0x16f7   :  { %v2199_v31 = vpop.permute.xlu0 %2198 }
0x16f8   :  { %v2201_v24 = vmul.f32 %v4808_v61, %v2199_v31  ;;  %v2572_v61 = vadd.f32 %v2571_v46, %v5761_v52 }
0x16fa   :  { %2210 = vperm.xlu0 %4594, %v2201_v24   ;;  %2204 = vperm.xlu1 %4595, %v2201_v24   ;;  %v2574_v33 = vadd.f32 %v2573_v49, %v2572_v61 }
0x16fe   :  { %4597 = vset.pattern.permute.xlu0 %v6796_v59  ;;  %4596 = vset.pattern.permute.xlu1 %v6794_v3 }
0x1735   :  { %v1687_v36 = vpop.permute.xlu1 %1686 }
0x1736   :  { %v5786_v11 = vadd.f32 %v1687_v36, %v1679_v47 }
0x1738   :  { %4817 = vtanh.f32 %v5786_v11 }
0x1742   :  { %v4818_v57 = vpop.eup %4817 }
0x1743   :  { %1692 = vrot.lane.b32.xlu1 %v4818_v57, %s5214_s13 }
0x1779   :  { %v2211_v62 = vpop.permute.xlu0 %2210  ;;  %v2205_v56 = vpop.permute.xlu1 %2204 }
0x177a   :  { %v2213_v50 = vmul.f32 %v2211_v62, %v5510_v22  ;;  %v2575_v12 = vmul.f32 %v5764_v2, %v2205_v56  ;;  %v2577_v27 = vmul.f32 %v5771_v32, %v2211_v62  ;;  %v2207_v24 = vmul.f32 %v5740_v60, %v2205_v56 }
0x177c   :  { %v2576_v4 = vadd.f32 %v2575_v12, %v2574_v33  ;;  %2215 = vrot.lane.b32.xlu0 %v2213_v50, %s5218_s15  ;;  %v2208_v47 = vadd.f32 %v2207_v24, %v5659_v41  ;;  %v2593_v12 = vmul.f32 %v5764_v2, %v5705_v43 }
0x177e   :  { %v2578_v13 = vadd.f32 %v2577_v27, %v2576_v4 }
0x1780   :  { %2579 = vst.msk [vmem:[#allocation3 + $0x7] sm:$0x1] %vm2515_vm2, %v2578_v13  ;;  %v2595_v13 = vmul.f32 %v5771_v32, %v5699_v51 }
0x17b5   :  { %v1693_v53 = vpop.permute.xlu1 %1692 }
0x17b6   :  { %v1695_v31 = vmul.f32 %v4816_v6, %v1693_v53 }
0x17b8   :  { %1705 = vperm.xlu0 %4597, %v1695_v31   ;;  %1699 = vperm.xlu1 %4596, %v1695_v31  }
0x17bc   :  { %4598 = vset.pattern.permute.xlu1 %v6824_v17 }
0x17ee   :  { %v2216_v36 = vpop.permute.xlu0 %2215 }
0x17ef   :  { %v2218_v57 = vadd.f32 %v2216_v36, %v2208_v47 }
0x17f1   :  { %4819 = vtanh.f32 %v2218_v57  ;;  %v4281_v47 = vmul.f32 -1.442695, %v2218_v57 }
0x17fb   :  { %v4820_v46 = vpop.eup %4819 }
0x17fc   :  { %2228 = vrot.lane.b32.xlu1 %v4820_v46, %s5210_s5 }
0x1837   :  { %v1706_v61 = vpop.permute.xlu0 %1705  ;;  %v1700_v49 = vpop.permute.xlu1 %1699 }
0x1838   :  { %v1702_v62 = vmul.f32 %v5740_v60, %v1700_v49  ;;  %v2589_v6 = vmul.f32 %v5751_v5, %v1700_v49  ;;  %v1708_v33 = vmul.f32 %v1706_v61, %v5494_v9  ;;  %v2591_v50 = vmul.f32 %v5754_v48, %v1706_v61 }
0x183a   :  { %v1703_v56 = vadd.f32 %v1702_v62, %v5622_v29  ;;  %v2590_v41 = vadd.f32 %v2589_v6, %v5761_v52 }
0x183c   :  { %v1709_v27 = vadd.f32 %v1708_v33, %v1703_v56  ;;  %v2592_v4 = vadd.f32 %v2591_v50, %v2590_v41 }
0x183e   :  { %4821 = vtanh.f32 %v1709_v27  ;;  %v2594_v53 = vadd.f32 %v2593_v12, %v2592_v4  ;;  %v4268_v49 = vmul.f32 -1.442695, %v1709_v27 }
0x183f   :  { %4823 = vpow2.f32 %v4281_v47 }
0x1840   :  { %v2596_v31 = vadd.f32 %v2595_v13, %v2594_v53 }
0x1842   :  { %2597 = vst.msk [vmem:[#allocation3 + $0x9] sm:$0x1] %vm2515_vm2, %v2596_v31 }
0x1848   :  { %v4822_v24 = vpop.eup %4821 }
0x1849   :  { %1719 = vrot.lane.b32.xlu0 %v4822_v24, %s5210_s5  ;;  %v4824_v29 = vpop.eup %4823  ;;  %v6825_v24 = vmov 14  }
0x184a   :  { %v2222_v36 = vadd.f32 1.0, %v4824_v29 }
0x184c   :  { %4825 = vrcp.f32 %v2222_v36 }
0x184d   :  { %4827 = vpow2.f32 %v4268_v49 }
0x1856   :  { %v4826_v46 = vpop.eup %4825 }
0x1857   :  { %v4828_v51 = vpop.eup %4827  ;;  %v2226_v57 = vmul.f32 %v4826_v46, %v5778_v63 }
0x1858   :  { %v1713_v62 = vadd.f32 1.0, %v4828_v51 }
0x185a   :  { %4829 = vrcp.f32 %v1713_v62 }
0x1864   :  { %v4830_v6 = vpop.eup %4829 }
0x1865   :  { %v1717_v27 = vmul.f32 %v4830_v6, %v5786_v11  ;;  %v2562_v11 = vmul.f32 %v5751_v5, %v5687_v0 }
0x186e   :  { %v2229_v43 = vpop.permute.xlu1 %2228 }
0x186f   :  { %v2231_v61 = vmul.f32 %v4826_v46, %v2229_v43 }
0x1871   :  { %2233 = vrot.lane.b32.xlu1 %v2231_v61, %s5211_s12  ;;  %v2563_v61 = vadd.f32 %v2562_v11, %v5761_v52  ;;  %v2602_v11 = vmul.f32 %v5764_v2, %v5667_v25 }
0x18bb   :  { %v1720_v33 = vpop.permute.xlu0 %1719 }
0x18bc   :  { %v1722_v50 = vmul.f32 %v4830_v6, %v1720_v33 }
0x18be   :  { %1724 = vrot.lane.b32.xlu1 %v1722_v50, %s5211_s12 }
0x18e3   :  { %v2234_v56 = vpop.permute.xlu1 %2233 }
0x18e4   :  { %v5819_v41 = vadd.f32 %v2234_v56, %v2226_v57 }
0x18e6   :  { %4831 = vtanh.f32 %v5819_v41 }
0x18f0   :  { %v4832_v12 = vpop.eup %4831 }
0x18f1   :  { %2239 = vrot.lane.b32.xlu0 %v4832_v12, %s5214_s13 }
0x1930   :  { %v1725_v4 = vpop.permute.xlu1 %1724 }
0x1931   :  { %v5824_v13 = vadd.f32 %v1725_v4, %v1717_v27 }
0x1933   :  { %4833 = vtanh.f32 %v5824_v13 }
0x193d   :  { %v4834_v53 = vpop.eup %4833 }
0x193e   :  { %1730 = vrot.lane.b32.xlu0 %v4834_v53, %s5214_s13 }
0x1963   :  { %v2240_v31 = vpop.permute.xlu0 %2239 }
0x1964   :  { %v2242_v63 = vmul.f32 %v4826_v46, %v2240_v31  ;;  %v2564_v46 = vmul.f32 %v5754_v48, %v5689_v58 }
0x1966   :  { %2251 = vperm.xlu1 %4598, %v2242_v63   ;;  %v2565_v51 = vadd.f32 %v2564_v46, %v2563_v61  ;;  %v2604_v61 = vmul.f32 %v5771_v32, %v5650_v1 }
0x196a   :  { %4599 = vset.pattern.permute.xlu1 %v6825_v24 }
0x196b   :  { %2245 = vperm.xlu1 %4599, %v2242_v63  }
0x196f   :  { %4600 = vset.pattern.permute.xlu1 %v6794_v3 }
0x19b0   :  { %v1731_v47 = vpop.permute.xlu0 %1730 }
0x19b1   :  { %v1733_v29 = vmul.f32 %v4830_v6, %v1731_v47 }
0x19b3   :  { %1737 = vperm.xlu1 %4600, %v1733_v29  }
0x19b7   :  { %4601 = vset.pattern.permute.xlu1 %v6824_v17 }
0x19e5   :  { %v2252_v36 = vpop.permute.xlu1 %2251 }
0x19e6   :  { %v2254_v43 = vmul.f32 %v2252_v36, %v5510_v22  ;;  %v2568_v6 = vmul.f32 %v5771_v32, %v2252_v36 }
0x19e8   :  { %2256 = vrot.lane.b32.xlu0 %v2254_v43, %s5218_s15 }
0x19ea   :  { %v2246_v49 = vpop.permute.xlu1 %2245 }
0x19eb   :  { %v2566_v62 = vmul.f32 %v5764_v2, %v2246_v49  ;;  %v2248_v0 = vmul.f32 %v5740_v60, %v2246_v49 }
0x19ec   :  { %1743 = vperm.xlu0 %4597, %v1733_v29  }
0x19ed   :  { %v2567_v33 = vadd.f32 %v2566_v62, %v2565_v51  ;;  %v2249_v57 = vadd.f32 %v2248_v0, %v5630_v39 }
0x19ef   :  { %v2569_v50 = vadd.f32 %v2568_v6, %v2567_v33 }
0x19f0   :  { %4602 = vset.pattern.permute.xlu0 %v6794_v3 }
0x19f1   :  { %2570 = vst.msk [vmem:[#allocation3 + $0x6] sm:$0x1] %vm2515_vm2, %v2569_v50 }
0x1a32   :  { %v1738_v58 = vpop.permute.xlu1 %1737 }
0x1a33   :  { %v1740_v4 = vmul.f32 %v5740_v60, %v1738_v58  ;;  %v2598_v53 = vmul.f32 %v5751_v5, %v1738_v58 }
0x1a35   :  { %v1741_v63 = vadd.f32 %v1740_v4, %v5587_v28  ;;  %v2599_v47 = vadd.f32 %v2598_v53, %v5761_v52 }
0x1a5a   :  { %v2257_v56 = vpop.permute.xlu0 %2256 }
0x1a5b   :  { %v2259_v12 = vadd.f32 %v2257_v56, %v2249_v57 }
0x1a5d   :  { %4835 = vtanh.f32 %v2259_v12  ;;  %v4282_v51 = vmul.f32 -1.442695, %v2259_v12 }
0x1a67   :  { %v4836_v27 = vpop.eup %4835 }
0x1a68   :  { %2269 = vrot.lane.b32.xlu1 %v4836_v27, %s5210_s5 }
0x1a6b   :  { %v1744_v31 = vpop.permute.xlu0 %1743 }
0x1a6c   :  { %v1746_v29 = vmul.f32 %v1744_v31, %v5494_v9  ;;  %v2600_v39 = vmul.f32 %v5754_v48, %v1744_v31 }
0x1a6e   :  { %v1747_v36 = vadd.f32 %v1746_v29, %v1741_v63  ;;  %v2601_v43 = vadd.f32 %v2600_v39, %v2599_v47 }
0x1a70   :  { %4837 = vtanh.f32 %v1747_v36  ;;  %v2603_v46 = vadd.f32 %v2602_v11, %v2601_v43  ;;  %v4269_v33 = vmul.f32 -1.442695, %v1747_v36 }
0x1a71   :  { %4839 = vpow2.f32 %v4282_v51 }
0x1a72   :  { %v2605_v49 = vadd.f32 %v2604_v61, %v2603_v46  ;;  %v2553_v46 = vmul.f32 %v5751_v5, %v5655_v35  ;;  %v2611_v35 = vmul.f32 %v5764_v2, %v5618_v26 }
0x1a74   :  { %2606 = vst.msk [vmem:[#allocation3 + $0xa] sm:$0x1] %vm2515_vm2, %v2605_v49 }
0x1a7a   :  { %v4838_v28 = vpop.eup %4837 }
0x1a7b   :  { %1757 = vrot.lane.b32.xlu0 %v4838_v28, %s5210_s5  ;;  %v4840_v62 = vpop.eup %4839 }
0x1a7c   :  { %v2263_v6 = vadd.f32 1.0, %v4840_v62 }
0x1a7e   :  { %4841 = vrcp.f32 %v2263_v6  ;;  %v2555_v6 = vmul.f32 %v5754_v48, %v5661_v42  ;;  %v2613_v42 = vmul.f32 %v5771_v32, %v5612_v21 }
0x1a7f   :  { %4843 = vpow2.f32 %v4269_v33  ;;  %v5156_v33 = vld [vmem:[#allocation2 + $0xc] sm:$0x1] }
0x1a88   :  { %v4842_v25 = vpop.eup %4841 }
0x1a89   :  { %v4844_v57 = vpop.eup %4843  ;;  %v2267_v12 = vmul.f32 %v4842_v25, %v5819_v41 }
0x1a8a   :  { %v1751_v1 = vadd.f32 1.0, %v4844_v57 }
0x1a8c   :  { %4845 = vrcp.f32 %v1751_v1  ;;  %v2554_v1 = vadd.f32 %v2553_v46, %v5761_v52 }
0x1a96   :  { %v4846_v56 = vpop.eup %4845 }
0x1a97   :  { %v1755_v63 = vmul.f32 %v4846_v56, %v5824_v13 }
0x1ada   :  { %v2270_v50 = vpop.permute.xlu1 %2269 }
0x1adb   :  { %v2272_v0 = vmul.f32 %v4842_v25, %v2270_v50 }
0x1add   :  { %2274 = vrot.lane.b32.xlu1 %v2272_v0, %s5211_s12 }
0x1aed   :  { %v1758_v58 = vpop.permute.xlu0 %1757 }
0x1aee   :  { %v1760_v27 = vmul.f32 %v4846_v56, %v1758_v58 }
0x1af0   :  { %1762 = vrot.lane.b32.xlu0 %v1760_v27, %s5211_s12 }
0x1b4f   :  { %v2275_v4 = vpop.permute.xlu1 %2274 }
0x1b50   :  { %v5860_v53 = vadd.f32 %v2275_v4, %v2267_v12  ;;  %v2556_v12 = vadd.f32 %v2555_v6, %v2554_v1 }
0x1b52   :  { %4847 = vtanh.f32 %v5860_v53 }
0x1b5c   :  { %v4848_v31 = vpop.eup %4847 }
0x1b5d   :  { %2280 = vrot.lane.b32.xlu1 %v4848_v31, %s5214_s13 }
0x1b62   :  { %v1763_v47 = vpop.permute.xlu0 %1762 }
0x1b63   :  { %v5865_v29 = vadd.f32 %v1763_v47, %v1755_v63 }
0x1b65   :  { %4849 = vtanh.f32 %v5865_v29 }
0x1b6f   :  { %v4850_v39 = vpop.eup %4849 }
0x1b70   :  { %1768 = vrot.lane.b32.xlu0 %v4850_v39, %s5214_s13 }
0x1bcf   :  { %v2281_v11 = vpop.permute.xlu1 %2280 }
0x1bd0   :  { %v2283_v41 = vmul.f32 %v4842_v25, %v2281_v11 }
0x1bd2   :  { %2292 = vperm.xlu1 %4601, %v2283_v41  }
0x1bd6   :  { %4603 = vset.pattern.permute.xlu1 %v6796_v59 }
0x1be2   :  { %v1769_v36 = vpop.permute.xlu0 %1768 }
0x1be3   :  { %v1771_v43 = vmul.f32 %v4846_v56, %v1769_v36  ;;  %v5157_v36 = vld [vmem:[#allocation2 + $0x4] sm:$0x1] }
0x1be5   :  { %1775 = vperm.xlu0 %4602, %v1771_v43   ;;  %1781 = vperm.xlu1 %4603, %v1771_v43  }
0x1be9   :  { %4604 = vset.pattern.permute.xlu1 %v6825_v24  ;;  %4606 = vset.pattern.permute.xlu0 %v6796_v59 }
0x1bea   :  { %2286 = vperm.xlu1 %4604, %v2283_v41  }
0x1bee   :  { %4605 = vset.pattern.permute.xlu1 %v6794_v3 }
0x1c51   :  { %v2293_v13 = vpop.permute.xlu1 %2292 }
0x1c52   :  { %v2295_v61 = vmul.f32 %v2293_v13, %v5510_v22  ;;  %v2559_v63 = vmul.f32 %v5771_v32, %v2293_v13 }
0x1c54   :  { %2297 = vrot.lane.b32.xlu0 %v2295_v61, %s5218_s15 }
0x1c64   :  { %v1776_v49 = vpop.permute.xlu0 %1775  ;;  %v1782_v28 = vpop.permute.xlu1 %1781 }
0x1c65   :  { %v1778_v51 = vmul.f32 %v5740_v60, %v1776_v49  ;;  %v2607_v62 = vmul.f32 %v5751_v5, %v1776_v49  ;;  %v1784_v0 = vmul.f32 %v1782_v28, %v5494_v9  ;;  %v2609_v57 = vmul.f32 %v5754_v48, %v1782_v28 }
0x1c67   :  { %v1779_v25 = vadd.f32 %v5156_v33, %v1778_v51  ;;  %v2608_v50 = vadd.f32 %v2607_v62, %v5761_v52 }
0x1c69   :  { %v1785_v56 = vadd.f32 %v1784_v0, %v1779_v25  ;;  %v2610_v58 = vadd.f32 %v2609_v57, %v2608_v50  ;;  %v2287_v27 = vpop.permute.xlu1 %2286 }
0x1c6a   :  { %v2557_v4 = vmul.f32 %v5764_v2, %v2287_v27  ;;  %v2289_v41 = vmul.f32 %v5740_v60, %v2287_v27 }
0x1c6b   :  { %4851 = vtanh.f32 %v1785_v56  ;;  %v2612_v31 = vadd.f32 %v2611_v35, %v2610_v58  ;;  %v4270_v46 = vmul.f32 -1.442695, %v1785_v56 }
0x1c6c   :  { %v2558_v47 = vadd.f32 %v2557_v4, %v2556_v12  ;;  %v2290_v43 = vadd.f32 %v5157_v36, %v2289_v41 }
0x1c6d   :  { %v2614_v39 = vadd.f32 %v2613_v42, %v2612_v31 }
0x1c6e   :  { %v2560_v11 = vadd.f32 %v2559_v63, %v2558_v47 }
0x1c6f   :  { %2615 = vst.msk [vmem:[#allocation3 + $0xb] sm:$0x1] %vm2515_vm2, %v2614_v39 }
0x1c70   :  { %2561 = vst.msk [vmem:[#allocation3 + $0x5] sm:$0x1] %vm2515_vm2, %v2560_v11 }
0x1c75   :  { %v4852_v26 = vpop.eup %4851 }
0x1c76   :  { %1795 = vrot.lane.b32.xlu1 %v4852_v26, %s5210_s5 }
0x1cc6   :  { %v2298_v61 = vpop.permute.xlu0 %2297 }
0x1cc7   :  { %v2300_v21 = vadd.f32 %v2298_v61, %v2290_v43  ;;  %v5158_v61 = vld [vmem:[#allocation2 + $0xd] sm:$0x1] }
0x1cc9   :  { %4853 = vtanh.f32 %v2300_v21  ;;  %v4283_v33 = vmul.f32 -1.442695, %v2300_v21 }
0x1cca   :  { %4855 = vpow2.f32 %v4270_v46 }
0x1cd3   :  { %v4854_v13 = vpop.eup %4853 }
0x1cd4   :  { %2310 = vrot.lane.b32.xlu0 %v4854_v13, %s5210_s5  ;;  %v4856_v49 = vpop.eup %4855  ;;  %v2620_v13 = vmul.f32 %v5764_v2, %v5583_v19 }
0x1cd5   :  { %v1789_v28 = vadd.f32 1.0, %v4856_v49 }
0x1cd7   :  { %4857 = vrcp.f32 %v1789_v28 }
0x1cd8   :  { %4859 = vpow2.f32 %v4283_v33 }
0x1ce1   :  { %v4858_v51 = vpop.eup %4857 }
0x1ce2   :  { %v4860_v25 = vpop.eup %4859  ;;  %v1793_v35 = vmul.f32 %v4858_v51, %v5865_v29 }
0x1ce3   :  { %v2304_v50 = vadd.f32 1.0, %v4860_v25  ;;  %v2544_v25 = vmul.f32 %v5751_v5, %v5625_v34 }
0x1ce5   :  { %4861 = vrcp.f32 %v2304_v50  ;;  %v2546_v50 = vmul.f32 %v5754_v48, %v5632_v40  ;;  %v2545_v19 = vadd.f32 %v2544_v25, %v5761_v52 }
0x1ce8   :  { %v1796_v62 = vpop.permute.xlu1 %1795 }
0x1ce9   :  { %v1798_v6 = vmul.f32 %v4858_v51, %v1796_v62 }
0x1ceb   :  { %1800 = vrot.lane.b32.xlu1 %v1798_v6, %s5211_s12 }
0x1cef   :  { %v4862_v0 = vpop.eup %4861 }
0x1cf0   :  { %v2308_v12 = vmul.f32 %v4862_v0, %v5860_v53 }
0x1d46   :  { %v2311_v57 = vpop.permute.xlu0 %2310 }
0x1d47   :  { %v2313_v1 = vmul.f32 %v4862_v0, %v2311_v57 }
0x1d49   :  { %2315 = vrot.lane.b32.xlu0 %v2313_v1, %s5211_s12  ;;  %v2547_v1 = vadd.f32 %v2546_v50, %v2545_v19 }
0x1d5d   :  { %v1801_v56 = vpop.permute.xlu1 %1800 }
0x1d5e   :  { %v5899_v58 = vadd.f32 %v1801_v56, %v1793_v35 }
0x1d60   :  { %4863 = vtanh.f32 %v5899_v58 }
0x1d6a   :  { %v4864_v27 = vpop.eup %4863 }
0x1d6b   :  { %1806 = vrot.lane.b32.xlu1 %v4864_v27, %s5214_s13 }
0x1dbb   :  { %v2316_v4 = vpop.permute.xlu0 %2315 }
0x1dbc   :  { %v5904_v42 = vadd.f32 %v2316_v4, %v2308_v12 }
0x1dbe   :  { %4865 = vtanh.f32 %v5904_v42 }
0x1dc8   :  { %v4866_v31 = vpop.eup %4865 }
0x1dc9   :  { %2321 = vrot.lane.b32.xlu0 %v4866_v31, %s5214_s13 }
0x1ddd   :  { %v1807_v63 = vpop.permute.xlu1 %1806 }
0x1dde   :  { %v1809_v29 = vmul.f32 %v4858_v51, %v1807_v63  ;;  %v2622_v51 = vmul.f32 %v5771_v32, %v5577_v16 }
0x1de0   :  { %1819 = vperm.xlu0 %4606, %v1809_v29   ;;  %1813 = vperm.xlu1 %4605, %v1809_v29  }
0x1de4   :  { %4608 = vset.pattern.permute.xlu0 %v6825_v24  ;;  %4607 = vset.pattern.permute.xlu1 %v6824_v17 }
0x1e3b   :  { %v2322_v47 = vpop.permute.xlu0 %2321 }
0x1e3c   :  { %v2324_v39 = vmul.f32 %v4862_v0, %v2322_v47 }
0x1e3e   :  { %2327 = vperm.xlu0 %4608, %v2324_v39   ;;  %2333 = vperm.xlu1 %4607, %v2324_v39   ;;  %v5159_v39 = vld [vmem:[#allocation2 + $0x3] sm:$0x1] }
0x1e42   :  { %4610 = vset.pattern.permute.xlu0 %v6796_v59  ;;  %4609 = vset.pattern.permute.xlu1 %v6794_v3 }
0x1e5f   :  { %v1820_v53 = vpop.permute.xlu0 %1819  ;;  %v1814_v11 = vpop.permute.xlu1 %1813 }
0x1e60   :  { %v1816_v26 = vmul.f32 %v5740_v60, %v1814_v11  ;;  %v2616_v41 = vmul.f32 %v5751_v5, %v1814_v11  ;;  %v1822_v36 = vmul.f32 %v1820_v53, %v5494_v9  ;;  %v2618_v43 = vmul.f32 %v5754_v48, %v1820_v53 }
0x1e62   :  { %v1817_v21 = vadd.f32 %v5158_v61, %v1816_v26  ;;  %v2617_v46 = vadd.f32 %v2616_v41, %v5761_v52 }
0x1e64   :  { %v1823_v49 = vadd.f32 %v1822_v36, %v1817_v21  ;;  %v2619_v28 = vadd.f32 %v2618_v43, %v2617_v46 }
0x1e66   :  { %4867 = vtanh.f32 %v1823_v49  ;;  %v2621_v62 = vadd.f32 %v2620_v13, %v2619_v28  ;;  %v4271_v4 = vmul.f32 -1.442695, %v1823_v49 }
0x1e68   :  { %v2623_v6 = vadd.f32 %v2622_v51, %v2621_v62  ;;  %4869 = vpow2.f32 %v4271_v4  ;;  %v2629_v4 = vmul.f32 %v5764_v2, %v5551_v20 }
0x1e6a   :  { %2624 = vst.msk [vmem:[#allocation3 + $0xc] sm:$0x1] %vm2515_vm2, %v2623_v6 }
0x1e70   :  { %v4868_v33 = vpop.eup %4867 }
0x1e71   :  { %1833 = vrot.lane.b32.xlu1 %v4868_v33, %s5210_s5 }
0x1e72   :  { %v4870_v34 = vpop.eup %4869 }
0x1e73   :  { %v1827_v40 = vadd.f32 1.0, %v4870_v34 }
0x1e75   :  { %4871 = vrcp.f32 %v1827_v40 }
0x1e7f   :  { %v4872_v31 = vpop.eup %4871 }
0x1e80   :  { %v1831_v36 = vmul.f32 %v4872_v31, %v5899_v58 }
0x1ebd   :  { %v2328_v0 = vpop.permute.xlu0 %2327  ;;  %v2334_v57 = vpop.permute.xlu1 %2333 }
0x1ebe   :  { %v2548_v16 = vmul.f32 %v5764_v2, %v2328_v0  ;;  %v2336_v35 = vmul.f32 %v2334_v57, %v5510_v22  ;;  %v2550_v27 = vmul.f32 %v5771_v32, %v2334_v57  ;;  %v2330_v47 = vmul.f32 %v5740_v60, %v2328_v0 }
0x1ec0   :  { %v2549_v56 = vadd.f32 %v2548_v16, %v2547_v1  ;;  %2338 = vrot.lane.b32.xlu1 %v2336_v35, %s5218_s15  ;;  %v2331_v53 = vadd.f32 %v5159_v39, %v2330_v47 }
0x1ec2   :  { %v2551_v12 = vadd.f32 %v2550_v27, %v2549_v56  ;;  %v5160_v27 = vld [vmem:[#allocation2 + $0xe] sm:$0x1] }
0x1ec4   :  { %2552 = vst.msk [vmem:[#allocation3 + $0x4] sm:$0x1] %vm2515_vm2, %v2551_v12 }
0x1ee3   :  { %v1834_v63 = vpop.permute.xlu1 %1833 }
0x1ee4   :  { %v1836_v29 = vmul.f32 %v4872_v31, %v1834_v63 }
0x1ee6   :  { %1838 = vrot.lane.b32.xlu1 %v1836_v29, %s5211_s12 }
0x1f32   :  { %v2339_v11 = vpop.permute.xlu1 %2338 }
0x1f33   :  { %v2341_v26 = vadd.f32 %v2339_v11, %v2331_v53 }
0x1f35   :  { %4873 = vtanh.f32 %v2341_v26  ;;  %v4284_v46 = vmul.f32 -1.442695, %v2341_v26 }
0x1f3f   :  { %v4874_v41 = vpop.eup %4873 }
0x1f40   :  { %2351 = vrot.lane.b32.xlu0 %v4874_v41, %s5210_s5 }
0x1f58   :  { %v1839_v43 = vpop.permute.xlu1 %1838 }
0x1f59   :  { %v1841_v61 = vadd.f32 %v1839_v43, %v1831_v36 }
0x1f5b   :  { %4875 = vtanh.f32 %v1841_v61 }
0x1f5c   :  { %4877 = vpow2.f32 %v4284_v46 }
0x1f65   :  { %v4876_v21 = vpop.eup %4875 }
0x1f66   :  { %1844 = vrot.lane.b32.xlu1 %v4876_v21, %s5214_s13  ;;  %v4878_v13 = vpop.eup %4877 }
0x1f67   :  { %v2345_v49 = vadd.f32 1.0, %v4878_v13 }
0x1f69   :  { %4879 = vrcp.f32 %v2345_v49  ;;  %v2535_v49 = vmul.f32 %v5751_v5, %v5595_v38 }
0x1f73   :  { %v4880_v28 = vpop.eup %4879 }
0x1f74   :  { %v2349_v58 = vmul.f32 %v4880_v28, %v5904_v42 }
0x1fb2   :  { %v2352_v51 = vpop.permute.xlu0 %2351 }
0x1fb3   :  { %v2354_v62 = vmul.f32 %v4880_v28, %v2352_v51  ;;  %v2536_v51 = vadd.f32 %v2535_v49, %v5761_v52 }
0x1fb5   :  { %2356 = vrot.lane.b32.xlu0 %v2354_v62, %s5211_s12  ;;  %v2537_v62 = vmul.f32 %v5754_v48, %v5593_v37 }
0x1fd8   :  { %v1845_v6 = vpop.permute.xlu1 %1844 }
0x1fd9   :  { %v1847_v33 = vmul.f32 %v4872_v31, %v1845_v6  ;;  %v2631_v31 = vmul.f32 %v5771_v32, %v5545_v18 }
0x1fdb   :  { %1857 = vperm.xlu0 %4610, %v1847_v33   ;;  %1851 = vperm.xlu1 %4609, %v1847_v33   ;;  %v2538_v33 = vadd.f32 %v2537_v62, %v2536_v51 }
0x1fdf   :  { %4611 = vset.pattern.permute.xlu0 %v6824_v17  ;;  %4612 = vset.pattern.permute.xlu1 %v6825_v24 }
0x2027   :  { %v2357_v25 = vpop.permute.xlu0 %2356 }
0x2028   :  { %v5942_v50 = vadd.f32 %v2357_v25, %v2349_v58 }
0x202a   :  { %4881 = vtanh.f32 %v5942_v50 }
0x2034   :  { %v4882_v19 = vpop.eup %4881 }
0x2035   :  { %2362 = vrot.lane.b32.xlu1 %v4882_v19, %s5214_s13 }
0x205a   :  { %v1858_v0 = vpop.permute.xlu0 %1857  ;;  %v1852_v57 = vpop.permute.xlu1 %1851 }
0x205b   :  { %v1854_v1 = vmul.f32 %v5740_v60, %v1852_v57  ;;  %v2625_v16 = vmul.f32 %v5751_v5, %v1852_v57  ;;  %v1860_v35 = vmul.f32 %v1858_v0, %v5494_v9  ;;  %v2627_v56 = vmul.f32 %v5754_v48, %v1858_v0  ;;  %v5161_v0 = vld [vmem:[#allocation2 + $0x2] sm:$0x1] }
0x205d   :  { %v1855_v42 = vadd.f32 %v5160_v27, %v1854_v1  ;;  %v2626_v12 = vadd.f32 %v2625_v16, %v5761_v52 }
0x205f   :  { %v1861_v34 = vadd.f32 %v1860_v35, %v1855_v42  ;;  %v2628_v40 = vadd.f32 %v2627_v56, %v2626_v12 }
0x2061   :  { %4883 = vtanh.f32 %v1861_v34  ;;  %v2630_v63 = vadd.f32 %v2629_v4, %v2628_v40  ;;  %v4272_v53 = vmul.f32 -1.442695, %v1861_v34 }
0x2063   :  { %v2632_v29 = vadd.f32 %v2631_v31, %v2630_v63  ;;  %4885 = vpow2.f32 %v4272_v53  ;;  %v2649_v53 = vmul.f32 %v5771_v32, %v5512_v23 }
0x2065   :  { %2633 = vst.msk [vmem:[#allocation3 + $0xd] sm:$0x1] %vm2515_vm2, %v2632_v29 }
0x206b   :  { %v4884_v9 = vpop.eup %4883 }
0x206c   :  { %1871 = vrot.lane.b32.xlu1 %v4884_v9, %s5210_s5 }
0x206d   :  { %v4886_v20 = vpop.eup %4885 }
0x206e   :  { %v1865_v11 = vadd.f32 1.0, %v4886_v20 }
0x2070   :  { %4887 = vrcp.f32 %v1865_v11 }
0x207a   :  { %v4888_v26 = vpop.eup %4887 }
0x207b   :  { %v1869_v21 = vmul.f32 %v4888_v26, %v1841_v61 }
0x20a7   :  { %v2363_v47 = vpop.permute.xlu1 %2362 }
0x20a8   :  { %v2365_v39 = vmul.f32 %v4880_v28, %v2363_v47  ;;  %v2647_v47 = vmul.f32 %v5764_v2, %v5518_v30 }
0x20aa   :  { %2374 = vperm.xlu0 %4611, %v2365_v39  }
0x20ae   :  { %4614 = vset.pattern.permute.xlu0 %v6796_v59 }
0x20de   :  { %v1872_v18 = vpop.permute.xlu1 %1871 }
0x20df   :  { %v1874_v41 = vmul.f32 %v4888_v26, %v1872_v18 }
0x20e1   :  { %1876 = vrot.lane.b32.xlu1 %v1874_v41, %s5211_s12 }
0x20e5   :  { %2368 = vperm.xlu1 %4612, %v2365_v39  }
0x20e9   :  { %4613 = vset.pattern.permute.xlu1 %v6794_v3 }
0x2129   :  { %v2375_v36 = vpop.permute.xlu0 %2374 }
0x212a   :  { %v2377_v43 = vmul.f32 %v2375_v36, %v5510_v22  ;;  %v2541_v61 = vmul.f32 %v5771_v32, %v2375_v36 }
0x212c   :  { %2379 = vrot.lane.b32.xlu0 %v2377_v43, %s5218_s15 }
0x2153   :  { %v1877_v46 = vpop.permute.xlu1 %1876 }
0x2154   :  { %v1879_v13 = vadd.f32 %v1877_v46, %v1869_v21 }
0x2156   :  { %4889 = vtanh.f32 %v1879_v13 }
0x2160   :  { %v4890_v28 = vpop.eup %4889 }
0x2161   :  { %1882 = vrot.lane.b32.xlu1 %v4890_v28, %s5214_s13 }
0x2164   :  { %v2369_v6 = vpop.permute.xlu1 %2368 }
0x2165   :  { %v2539_v58 = vmul.f32 %v5764_v2, %v2369_v6  ;;  %v2371_v38 = vmul.f32 %v5740_v60, %v2369_v6 }
0x2167   :  { %v2540_v25 = vadd.f32 %v2539_v58, %v2538_v33  ;;  %v2372_v57 = vadd.f32 %v5161_v0, %v2371_v38 }
0x2169   :  { %v2542_v19 = vadd.f32 %v2541_v61, %v2540_v25 }
0x216b   :  { %2543 = vst.msk [vmem:[#allocation3 + $0x3] sm:$0x1] %vm2515_vm2, %v2542_v19 }
0x219e   :  { %v2380_v1 = vpop.permute.xlu0 %2379 }
0x219f   :  { %v2382_v16 = vadd.f32 %v2380_v1, %v2372_v57  ;;  %v2526_v57 = vmul.f32 %v5751_v5, %v5560_v44 }
0x21a1   :  { %4891 = vtanh.f32 %v2382_v16  ;;  %v4285_v27 = vmul.f32 -1.442695, %v2382_v16 }
0x21a3   :  { %4893 = vpow2.f32 %v4285_v27 }
0x21ab   :  { %v4892_v35 = vpop.eup %4891 }
0x21ac   :  { %2392 = vrot.lane.b32.xlu0 %v4892_v35, %s5210_s5  ;;  %v2527_v35 = vadd.f32 %v2526_v57, %v5761_v52 }
0x21ad   :  { %v4894_v42 = vpop.eup %4893 }
0x21ae   :  { %v2386_v60 = vadd.f32 1.0, %v4894_v42 }
0x21b0   :  { %4895 = vrcp.f32 %v2386_v60 }
0x21ba   :  { %v4896_v12 = vpop.eup %4895 }
0x21bb   :  { %v2390_v21 = vmul.f32 %v4896_v12, %v5942_v50 }
0x21d3   :  { %v1883_v37 = vpop.permute.xlu1 %1882 }
0x21d4   :  { %v1885_v56 = vmul.f32 %v4888_v26, %v1883_v37  ;;  %v5986_v26 = vld [vmem:[%s6785_s7] sm:$0x3]  ;;  %v2528_v37 = vmul.f32 %v5754_v48, %v5562_v45 }
0x21d5   :  { %v5990_v18 = vmul.f32 0.0, %v5986_v26  ;;  %v6023_v45 = vld [vmem:[%s6782_s4] sm:$0x3] }
0x21d6   :  { %2642 = vperm.xlu0 %4614, %v1885_v56   ;;  %2636 = vperm.xlu1 %4613, %v1885_v56   ;;  %v2529_v27 = vadd.f32 %v2528_v37, %v2527_v35 }
0x21d7   :  { %v2657_v41 = vrot.slane %v5990_v18, 1 }
0x21da   :  { %4615 = vset.pattern.permute.xlu1 %v6824_v17  ;;  %4617 = vset.pattern.permute.xlu0 %v6824_v17 }
0x221e   :  { %v2393_v4 = vpop.permute.xlu0 %2392 }
0x221f   :  { %v2395_v34 = vmul.f32 %v4896_v12, %v2393_v4 }
0x2221   :  { %2397 = vrot.lane.b32.xlu1 %v2395_v34, %s5211_s12  ;;  %v5163_v34 = vld [vmem:[#allocation2 + $0x1] sm:$0x1] }
0x2255   :  { %v2643_v40 = vpop.permute.xlu0 %2642  ;;  %v2637_v31 = vpop.permute.xlu1 %2636 }
0x2256   :  { %v2639_v63 = vmul.f32 %v2637_v31, %v5751_v5  ;;  %v2645_v29 = vmul.f32 %v2643_v40, %v5754_v48 }
0x2258   :  { %v2640_v9 = vadd.f32 %v2639_v63, %v5761_v52 }
0x225a   :  { %v2646_v39 = vadd.f32 %v2645_v29, %v2640_v9  ;;  %v6028_v9 = vrot.slane %v5986_v26, 1 }
0x225c   :  { %v2648_v20 = vadd.f32 %v2647_v47, %v2646_v39 }
0x225e   :  { %v2650_v11 = vadd.f32 %v2649_v53, %v2648_v20 }
0x2260   :  { %2651 = vst.msk [vmem:[#allocation3 + $0xe] sm:$0x1] %vm2515_vm2, %v2650_v11 }
0x2267   :  { %v3181_v36 = vld [vmem:[#allocation3 + $0xe] sm:$0x1] }
0x2268   :  { %v3219_v30 = vadd.f32 %v3181_v36, %v5990_v18 }
0x226a   :  { %v3220_v23 = vadd.f32 %v3219_v30, %v2657_v41 }
0x226c   :  { %4897 = vtanh.f32 %v3220_v23  ;;  %v4303_v28 = vmul.f32 -1.442695, %v3220_v23 }
0x2276   :  { %v4898_v43 = vpop.eup %4897 }
0x2277   :  { %3230 = vrot.lane.b32.xlu0 %v4898_v43, %s5210_s5 }
0x2293   :  { %v2398_v46 = vpop.permute.xlu1 %2397 }
0x2294   :  { %v5998_v13 = vadd.f32 %v2398_v46, %v2390_v21 }
0x2296   :  { %4899 = vtanh.f32 %v5998_v13 }
0x2297   :  { %4901 = vpow2.f32 %v4303_v28 }
0x22a0   :  { %v4900_v49 = vpop.eup %4899 }
0x22a1   :  { %2403 = vrot.lane.b32.xlu1 %v4900_v49, %s5214_s13  ;;  %v4902_v51 = vpop.eup %4901 }
0x22a2   :  { %v3224_v62 = vadd.f32 1.0, %v4902_v51 }
0x22a4   :  { %4903 = vrcp.f32 %v3224_v62  ;;  %v3143_v62 = vld [vmem:[#allocation3 + $0xd] sm:$0x1] }
0x22ae   :  { %v4904_v6 = vpop.eup %4903 }
0x22af   :  { %v3228_v25 = vmul.f32 0.0, %v4904_v6 }
0x22e9   :  { %v3231_v33 = vpop.permute.xlu0 %3230 }
0x22ea   :  { %v3233_v58 = vmul.f32 %v4904_v6, %v3231_v33 }
0x22ec   :  { %3235 = vrot.lane.b32.xlu0 %v3233_v58, %s5211_s12 }
0x2313   :  { %v2404_v61 = vpop.permute.xlu1 %2403 }
0x2314   :  { %v2406_v50 = vmul.f32 %v4896_v12, %v2404_v61 }
0x2316   :  { %2415 = vperm.xlu1 %4615, %v2406_v50  }
0x231a   :  { %4616 = vset.pattern.permute.xlu1 %v6825_v24 }
0x231b   :  { %2409 = vperm.xlu1 %4616, %v2406_v50  }
0x235e   :  { %v3236_v19 = vpop.permute.xlu0 %3235 }
0x235f   :  { %v6004_v38 = vadd.f32 %v3236_v19, %v3228_v25 }
0x2361   :  { %4905 = vtanh.f32 %v6004_v38 }
0x236b   :  { %v4906_v0 = vpop.eup %4905 }
0x236c   :  { %3241 = vrot.lane.b32.xlu1 %v4906_v0, %s5214_s13 }
0x2395   :  { %v2416_v1 = vpop.permute.xlu1 %2415 }
0x2396   :  { %v2418_v16 = vmul.f32 %v2416_v1, %v5510_v22  ;;  %v2532_v60 = vmul.f32 %v5771_v32, %v2416_v1 }
0x2398   :  { %2420 = vrot.lane.b32.xlu0 %v2418_v16, %s5218_s15 }
0x239a   :  { %v2410_v56 = vpop.permute.xlu1 %2409 }
0x239b   :  { %v2530_v42 = vmul.f32 %v5764_v2, %v2410_v56  ;;  %v2412_v52 = vmul.f32 %v6023_v45, %v2410_v56 }
0x239d   :  { %v2531_v12 = vadd.f32 %v2530_v42, %v2529_v27  ;;  %v2413_v40 = vadd.f32 %v5163_v34, %v2412_v52  ;;  %v2519_v52 = vmul.f32 %v5754_v48, %v5536_v55 }
0x239f   :  { %v2533_v4 = vadd.f32 %v2532_v60, %v2531_v12  ;;  %v6059_v60 = vld [vmem:[%s6784_s6] sm:$0xf] }
0x23a0   :  { %v2517_v12 = vmul.f32 %v6059_v60, %v5534_v54 }
0x23a1   :  { %2534 = vst.msk [vmem:[#allocation3 + $0x2] sm:$0x1] %vm2515_vm2, %v2533_v4 }
0x23de   :  { %v3242_v44 = vpop.permute.xlu1 %3241 }
0x23df   :  { %v3244_v5 = vmul.f32 %v4904_v6, %v3242_v44 }
0x23e1   :  { %3253 = vperm.xlu0 %4617, %v3244_v5  }
0x23e5   :  { %4618 = vset.pattern.permute.xlu0 %v6825_v24 }
0x23e6   :  { %3247 = vperm.xlu0 %4618, %v3244_v5  }
0x23ea   :  { %4619 = vset.pattern.permute.xlu0 %v6824_v17 }
0x240a   :  { %v2421_v31 = vpop.permute.xlu0 %2420 }
0x240b   :  { %v2423_v63 = vadd.f32 %v2421_v31, %v2413_v40 }
0x240d   :  { %4907 = vtanh.f32 %v2423_v63  ;;  %v4286_v47 = vmul.f32 -1.442695, %v2423_v63 }
0x240f   :  { %4909 = vpow2.f32 %v4286_v47  ;;  %v5166_v47 = vld [vmem:[#allocation2] sm:$0x1] }
0x2417   :  { %v4908_v29 = vpop.eup %4907 }
0x2418   :  { %2433 = vrot.lane.b32.xlu1 %v4908_v29, %s5210_s5 }
0x2419   :  { %v4910_v39 = vpop.eup %4909 }
0x241a   :  { %v2427_v53 = vadd.f32 1.0, %v4910_v39 }
0x241c   :  { %3256 = vrot.lane.b32.xlu1 %v6028_v9, %s5215_s14  ;;  %4911 = vrcp.f32 %v2427_v53 }
0x2426   :  { %v4912_v20 = vpop.eup %4911 }
0x2427   :  { %v2431_v49 = vmul.f32 %v4912_v20, %v5998_v13 }
0x2460   :  { %v6033_v30 = vpop.permute.xlu0 %3253 }
0x2465   :  { %v6040_v21 = vpop.permute.xlu0 %3247 }
0x2466   :  { %v3250_v46 = vmul.f32 %v6040_v21, %v5986_v26 }
0x2468   :  { %v3251_v6 = vadd.f32 %v3250_v46, %v3143_v62 }
0x248a   :  { %v2434_v11 = vpop.permute.xlu1 %2433 }
0x248b   :  { %v2436_v36 = vmul.f32 %v4912_v20, %v2434_v11 }
0x248d   :  { %2438 = vrot.lane.b32.xlu1 %v2436_v36, %s5211_s12 }
0x248e   :  { %v6035_v23 = vpop.permute.xlu1 %3256 }
0x248f   :  { %v3259_v43 = vmul.f32 %v6035_v23, %v6033_v30 }
0x2491   :  { %3261 = vrot.lane.b32.xlu1 %v3259_v43, %s5218_s15 }
0x24ff   :  { %v2439_v28 = vpop.permute.xlu1 %2438 }
0x2500   :  { %v6045_v51 = vadd.f32 %v2439_v28, %v2431_v49 }
0x2502   :  { %4913 = vtanh.f32 %v6045_v51 }
0x2503   :  { %v3262_v33 = vpop.permute.xlu1 %3261 }
0x2504   :  { %v3264_v58 = vadd.f32 %v3262_v33, %v3251_v6 }
0x2506   :  { %4915 = vtanh.f32 %v3264_v58  ;;  %v4304_v25 = vmul.f32 -1.442695, %v3264_v58 }
0x2508   :  { %4917 = vpow2.f32 %v4304_v25 }
0x250c   :  { %v4914_v61 = vpop.eup %4913 }
0x250d   :  { %2444 = vrot.lane.b32.xlu0 %v4914_v61, %s5214_s13 }
0x2510   :  { %v4916_v50 = vpop.eup %4915 }
0x2511   :  { %3274 = vrot.lane.b32.xlu1 %v4916_v50, %s5210_s5 }
0x2512   :  { %v4918_v19 = vpop.eup %4917 }
0x2513   :  { %v3268_v13 = vadd.f32 1.0, %v4918_v19 }
0x2515   :  { %4919 = vrcp.f32 %v3268_v13  ;;  %v3105_v13 = vld [vmem:[#allocation3 + $0xc] sm:$0x1] }
0x251f   :  { %v4920_v1 = vpop.eup %4919 }
0x2520   :  { %v3272_v37 = vmul.f32 %v4920_v1, %v6004_v38  ;;  %v6068_v38 = vld [vmem:[%s6786_s8] sm:$0x1] }
0x2521   :  { %v2518_v5 = vadd.f32 %v6068_v38, %v2517_v12 }
0x2523   :  { %v2520_v40 = vadd.f32 %v2519_v52, %v2518_v5  ;;  %v2491_v52 = vmul.f32 %v6059_v60, %v5502_v14 }
0x257f   :  { %v2445_v0 = vpop.permute.xlu0 %2444 }
0x2580   :  { %v2447_v57 = vmul.f32 %v4912_v20, %v2445_v0 }
0x2582   :  { %2456 = vperm.xlu0 %4619, %v2447_v57  }
0x2583   :  { %v3275_v16 = vpop.permute.xlu1 %3274 }
0x2584   :  { %v3277_v35 = vmul.f32 %v4920_v1, %v3275_v16 }
0x2586   :  { %3279 = vrot.lane.b32.xlu1 %v3277_v35, %s5211_s12 }
0x258a   :  { %2450 = vperm.xlu1 %4616, %v2447_v57  }
0x258e   :  { %4621 = vset.pattern.permute.xlu1 %v6824_v17 }
0x25f8   :  { %v3280_v56 = vpop.permute.xlu1 %3279 }
0x25f9   :  { %v6053_v27 = vadd.f32 %v3280_v56, %v3272_v37 }
0x25fb   :  { %4921 = vtanh.f32 %v6053_v27 }
0x2601   :  { %v2457_v42 = vpop.permute.xlu0 %2456 }
0x2602   :  { %v2459_v4 = vmul.f32 %v2457_v42, %v5510_v22  ;;  %v2523_v22 = vmul.f32 %v5771_v32, %v2457_v42 }
0x2604   :  { %2461 = vrot.lane.b32.xlu0 %v2459_v4, %s5218_s15 }
0x2605   :  { %v4922_v44 = vpop.eup %4921 }
0x2606   :  { %3285 = vrot.lane.b32.xlu1 %v4922_v44, %s5214_s13 }
0x2609   :  { %v2451_v34 = vpop.permute.xlu1 %2450 }
0x260a   :  { %v2521_v54 = vmul.f32 %v5764_v2, %v2451_v34  ;;  %v2453_v29 = vmul.f32 %v6023_v45, %v2451_v34  ;;  %v2492_v34 = vadd.f32 %v6068_v38, %v2491_v52 }
0x260c   :  { %v2522_v31 = vadd.f32 %v2521_v54, %v2520_v40  ;;  %v2454_v39 = vadd.f32 %v5166_v47, %v2453_v29  ;;  %v2496_v40 = vmul.f32 %v5754_v48, %v5504_v15 }
0x260e   :  { %v2524_v63 = vadd.f32 %v2523_v22, %v2522_v31  ;;  %v2497_v31 = vadd.f32 %v2496_v40, %v2492_v34 }
0x2610   :  { %2525 = vst.msk [vmem:[#allocation3 + $0x1] sm:$0x1] %vm2515_vm2, %v2524_v63 }
0x2676   :  { %v2462_v53 = vpop.permute.xlu0 %2461 }
0x2677   :  { %v2464_v20 = vadd.f32 %v2462_v53, %v2454_v39 }
0x2678   :  { %v3286_v11 = vpop.permute.xlu1 %3285 }
0x2679   :  { %4923 = vtanh.f32 %v2464_v20  ;;  %v3288_v36 = vmul.f32 %v4920_v1, %v3286_v11  ;;  %v4287_v43 = vmul.f32 -1.442695, %v2464_v20 }
0x267b   :  { %3297 = vperm.xlu0 %4619, %v3288_v36   ;;  %4925 = vpow2.f32 %v4287_v43 }
0x267f   :  { %4620 = vset.pattern.permute.xlu0 %v6825_v24 }
0x2680   :  { %3291 = vperm.xlu0 %4620, %v3288_v36  }
0x2683   :  { %v4924_v55 = vpop.eup %4923 }
0x2684   :  { %2474 = vrot.lane.b32.xlu1 %v4924_v55, %s5210_s5 }
0x2685   :  { %v4926_v46 = vpop.eup %4925 }
0x2686   :  { %v2468_v49 = vadd.f32 1.0, %v4926_v46 }
0x2688   :  { %4927 = vrcp.f32 %v2468_v49 }
0x2692   :  { %v4928_v45 = vpop.eup %4927 }
0x2693   :  { %v2472_v50 = vmul.f32 %v4928_v45, %v6045_v51 }
0x26f6   :  { %v2475_v28 = vpop.permute.xlu1 %2474 }
0x26f7   :  { %v2477_v62 = vmul.f32 %v4928_v45, %v2475_v28 }
0x26f9   :  { %2479 = vrot.lane.b32.xlu1 %v2477_v62, %s5211_s12 }
0x26fa   :  { %v6081_v6 = vpop.permute.xlu0 %3297 }
0x26fb   :  { %v3300_v33 = vmul.f32 %v6081_v6, %v6035_v23 }
0x26fd   :  { %3302 = vrot.lane.b32.xlu1 %v3300_v33, %s5218_s15 }
0x26ff   :  { %v6086_v58 = vpop.permute.xlu0 %3291 }
0x2700   :  { %v3294_v61 = vmul.f32 %v6086_v58, %v5986_v26 }
0x2702   :  { %v3295_v0 = vadd.f32 %v3294_v61, %v3105_v13 }
0x276b   :  { %v2480_v25 = vpop.permute.xlu1 %2479 }
0x276c   :  { %v2482_v19 = vadd.f32 %v2480_v25, %v2472_v50  ;;  %v3067_v25 = vld [vmem:[#allocation3 + $0xb] sm:$0x1] }
0x276e   :  { %4929 = vtanh.f32 %v2482_v19 }
0x276f   :  { %v3303_v57 = vpop.permute.xlu1 %3302 }
0x2770   :  { %v3305_v1 = vadd.f32 %v3303_v57, %v3295_v0 }
0x2772   :  { %4931 = vtanh.f32 %v3305_v1  ;;  %v4305_v37 = vmul.f32 -1.442695, %v3305_v1 }
0x2774   :  { %4933 = vpow2.f32 %v4305_v37 }
0x2778   :  { %v4930_v16 = vpop.eup %4929 }
0x2779   :  { %2485 = vrot.lane.b32.xlu0 %v4930_v16, %s5214_s13 }
0x277c   :  { %v4932_v35 = vpop.eup %4931 }
0x277d   :  { %3315 = vrot.lane.b32.xlu1 %v4932_v35, %s5210_s5 }
0x277e   :  { %v4934_v56 = vpop.eup %4933 }
0x277f   :  { %v3309_v42 = vadd.f32 1.0, %v4934_v56 }
0x2781   :  { %4935 = vrcp.f32 %v3309_v42 }
0x278b   :  { %v4936_v4 = vpop.eup %4935 }
0x278c   :  { %v3313_v39 = vmul.f32 %v4936_v4, %v6053_v27 }
0x27eb   :  { %v2486_v51 = vpop.permute.xlu0 %2485 }
0x27ec   :  { %v2488_v12 = vmul.f32 %v4928_v45, %v2486_v51 }
0x27ee   :  { %2500 = vperm.xlu0 %4620, %v2488_v12   ;;  %2508 = vperm.xlu1 %4621, %v2488_v12  }
0x27ef   :  { %v3316_v44 = vpop.permute.xlu1 %3315 }
0x27f0   :  { %v3318_v5 = vmul.f32 %v4936_v4, %v3316_v44 }
0x27f2   :  { %3320 = vrot.lane.b32.xlu0 %v3318_v5, %s5211_s12  ;;  %v2684_v5 = vld [vmem:[#allocation3 + $0x1] sm:$0x1] }
0x27f3   :  { %4624 = vset.pattern.permute.xlu0 %v6796_v59 }
0x286d   :  { %v2501_v54 = vpop.permute.xlu0 %2500  ;;  %v2509_v22 = vpop.permute.xlu1 %2508 }
0x286e   :  { %v2505_v63 = vmul.f32 %v5764_v2, %v2501_v54  ;;  %v2513_v47 = vmul.f32 %v5771_v32, %v2509_v22 }
0x2870   :  { %v2506_v29 = vadd.f32 %v2505_v63, %v2497_v31 }
0x2871   :  { %v3321_v53 = vpop.permute.xlu0 %3320 }
0x2872   :  { %v2514_v20 = vadd.f32 %v2513_v47, %v2506_v29  ;;  %v6103_v11 = vadd.f32 %v3321_v53, %v3313_v39 }
0x2874   :  { %2516 = vst.msk [vmem:[#allocation3] sm:$0x1] %vm2515_vm2, %v2514_v20  ;;  %4937 = vtanh.f32 %v6103_v11 }
0x287b   :  { %v2653_v14 = vld [vmem:[#allocation3] sm:$0x1] }
0x287c   :  { %v2655_v15 = vadd.f32 %v5990_v18, %v2653_v14 }
0x287e   :  { %v4938_v48 = vpop.eup %4937  ;;  %v2659_v2 = vadd.f32 %v2657_v41, %v2655_v15 }
0x287f   :  { %3326 = vrot.lane.b32.xlu1 %v4938_v48, %s5214_s13 }
0x2880   :  { %4939 = vtanh.f32 %v2659_v2  ;;  %v4288_v27 = vmul.f32 -1.442695, %v2659_v2 }
0x2882   :  { %4941 = vpow2.f32 %v4288_v27 }
0x288a   :  { %v4940_v32 = vpop.eup %4939 }
0x288b   :  { %2669 = vrot.lane.b32.xlu0 %v4940_v32, %s5210_s5 }
0x288c   :  { %v4942_v60 = vpop.eup %4941 }
0x288d   :  { %v2663_v38 = vadd.f32 1.0, %v4942_v60 }
0x288f   :  { %4943 = vrcp.f32 %v2663_v38 }
0x2899   :  { %v4944_v43 = vpop.eup %4943 }
0x289a   :  { %v2667_v46 = vmul.f32 0.0, %v4944_v43 }
0x28f1   :  { %v3327_v36 = vpop.permute.xlu1 %3326 }
0x28f2   :  { %v3329_v55 = vmul.f32 %v4936_v4, %v3327_v36 }
0x28f4   :  { %3338 = vperm.xlu1 %4621, %v3329_v55  }
0x28f8   :  { %4622 = vset.pattern.permute.xlu1 %v6825_v24 }
0x28f9   :  { %3332 = vperm.xlu1 %4622, %v3329_v55  }
0x28fd   :  { %v2670_v18 = vpop.permute.xlu0 %2669  ;;  %4623 = vset.pattern.permute.xlu1 %v6794_v3 }
0x28fe   :  { %v2672_v41 = vmul.f32 %v4944_v43, %v2670_v18 }
0x2900   :  { %2674 = vrot.lane.b32.xlu0 %v2672_v41, %s5211_s12 }
0x2972   :  { %v2675_v49 = vpop.permute.xlu0 %2674 }
0x2973   :  { %v2677_v45 = vadd.f32 %v2675_v49, %v2667_v46  ;;  %v6115_v28 = vpop.permute.xlu1 %3338  ;;  %v6157_v49 = vld [vmem:[#allocation3 + $0xa] sm:$0x1] }
0x2974   :  { %v3341_v62 = vmul.f32 %v6115_v28, %v6035_v23 }
0x2975   :  { %4945 = vtanh.f32 %v2677_v45 }
0x2976   :  { %3343 = vrot.lane.b32.xlu0 %v3341_v62, %s5218_s15 }
0x2978   :  { %v6121_v61 = vpop.permute.xlu1 %3332 }
0x2979   :  { %v3335_v50 = vmul.f32 %v6121_v61, %v5986_v26 }
0x297b   :  { %v3336_v19 = vadd.f32 %v3335_v50, %v3067_v25 }
0x297f   :  { %v4946_v33 = vpop.eup %4945 }
0x2980   :  { %2680 = vrot.lane.b32.xlu1 %v4946_v33, %s5214_s13 }
0x29e8   :  { %v3344_v13 = vpop.permute.xlu0 %3343 }
0x29e9   :  { %v3346_v0 = vadd.f32 %v3344_v13, %v3336_v19 }
0x29eb   :  { %4947 = vtanh.f32 %v3346_v0  ;;  %v4306_v35 = vmul.f32 -1.442695, %v3346_v0  ;;  %v2725_v0 = vld [vmem:[#allocation3 + $0x2] sm:$0x1] }
0x29ed   :  { %4949 = vpow2.f32 %v4306_v35 }
0x29f2   :  { %v2681_v57 = vpop.permute.xlu1 %2680 }
0x29f3   :  { %v2683_v1 = vmul.f32 %v4944_v43, %v2681_v57 }
0x29f5   :  { %v4948_v16 = vpop.eup %4947  ;;  %2687 = vperm.xlu1 %4623, %v2683_v1  }
0x29f6   :  { %3356 = vrot.lane.b32.xlu0 %v4948_v16, %s5210_s5 }
0x29f7   :  { %v4950_v37 = vpop.eup %4949 }
0x29f8   :  { %v3350_v56 = vadd.f32 1.0, %v4950_v37 }
0x29f9   :  { %4626 = vset.pattern.permute.xlu1 %v6825_v24 }
0x29fa   :  { %2693 = vperm.xlu0 %4624, %v2683_v1   ;;  %4951 = vrcp.f32 %v3350_v56 }
0x29fe   :  { %4625 = vset.pattern.permute.xlu0 %v6824_v17 }
0x2a04   :  { %v4952_v42 = vpop.eup %4951 }
0x2a05   :  { %v3354_v63 = vmul.f32 %v4952_v42, %v6103_v11 }
0x2a68   :  { %v3357_v51 = vpop.permute.xlu0 %3356 }
0x2a69   :  { %v3359_v12 = vmul.f32 %v4952_v42, %v3357_v51 }
0x2a6b   :  { %3361 = vrot.lane.b32.xlu1 %v3359_v12, %s5211_s12 }
0x2a74   :  { %v6129_v4 = vpop.permute.xlu1 %2687 }
0x2a75   :  { %v2690_v44 = vmul.f32 %v6129_v4, %v5986_v26 }
0x2a77   :  { %v2691_v34 = vadd.f32 %v2690_v44, %v2684_v5 }
0x2a79   :  { %v6133_v52 = vpop.permute.xlu0 %2693 }
0x2a7a   :  { %v2699_v40 = vmul.f32 %v6028_v9, %v6133_v52 }
0x2a7c   :  { %v2700_v54 = vadd.f32 %v2699_v40, %v2691_v34 }
0x2a7e   :  { %4953 = vtanh.f32 %v2700_v54  ;;  %v4289_v31 = vmul.f32 -1.442695, %v2700_v54 }
0x2a80   :  { %4955 = vpow2.f32 %v4289_v31 }
0x2a88   :  { %v4954_v22 = vpop.eup %4953 }
0x2a89   :  { %2710 = vrot.lane.b32.xlu1 %v4954_v22, %s5210_s5 }
0x2a8a   :  { %v4956_v39 = vpop.eup %4955 }
0x2a8b   :  { %v2704_v20 = vadd.f32 1.0, %v4956_v39 }
0x2add   :  { %v3362_v29 = vpop.permute.xlu1 %3361 }
0x2ade   :  { %v6139_v47 = vadd.f32 %v3362_v29, %v3354_v63 }
0x2ae0   :  { %4957 = vtanh.f32 %v6139_v47 }
0x2ae1   :  { %4959 = vrcp.f32 %v2704_v20 }
0x2aea   :  { %v4958_v53 = vpop.eup %4957 }
0x2aeb   :  { %3367 = vrot.lane.b32.xlu0 %v4958_v53, %s5214_s13  ;;  %v4960_v14 = vpop.eup %4959 }
0x2aec   :  { %v2708_v11 = vmul.f32 %v4960_v14, %v2677_v45 }
0x2afb   :  { %v2711_v15 = vpop.permute.xlu1 %2710 }
0x2afc   :  { %v2713_v48 = vmul.f32 %v4960_v14, %v2711_v15 }
0x2afe   :  { %2715 = vrot.lane.b32.xlu1 %v2713_v48, %s5211_s12 }
0x2b5d   :  { %v3368_v2 = vpop.permute.xlu0 %3367 }
0x2b5e   :  { %v3370_v32 = vmul.f32 %v4952_v42, %v3368_v2 }
0x2b60   :  { %3379 = vperm.xlu0 %4625, %v3370_v32  }
0x2b64   :  { %4628 = vset.pattern.permute.xlu0 %v6796_v59 }
0x2b70   :  { %v2716_v27 = vpop.permute.xlu1 %2715 }
0x2b71   :  { %v2718_v60 = vadd.f32 %v2716_v27, %v2708_v11 }
0x2b73   :  { %4961 = vtanh.f32 %v2718_v60 }
0x2b7d   :  { %v4962_v38 = vpop.eup %4961 }
0x2b7e   :  { %2721 = vrot.lane.b32.xlu1 %v4962_v38, %s5214_s13 }
0x2b82   :  { %3373 = vperm.xlu1 %4626, %v3370_v32  }
0x2b86   :  { %4627 = vset.pattern.permute.xlu1 %v6794_v3 }
0x2bdf   :  { %v6147_v36 = vpop.permute.xlu0 %3379 }
0x2be0   :  { %v3382_v55 = vmul.f32 %v6147_v36, %v6035_v23 }
0x2be2   :  { %3384 = vrot.lane.b32.xlu0 %v3382_v55, %s5218_s15 }
0x2bf0   :  { %v2722_v43 = vpop.permute.xlu1 %2721 }
0x2bf1   :  { %v2724_v18 = vmul.f32 %v4960_v14, %v2722_v43  ;;  %v6191_v43 = vld [vmem:[#allocation3 + $0x3] sm:$0x1] }
0x2bf3   :  { %2734 = vperm.xlu0 %4628, %v2724_v18   ;;  %2728 = vperm.xlu1 %4627, %v2724_v18  }
0x2bf7   :  { %4629 = vset.pattern.permute.xlu0 %v6824_v17 }
0x2c01   :  { %v6153_v41 = vpop.permute.xlu1 %3373 }
0x2c02   :  { %v3376_v46 = vmul.f32 %v6153_v41, %v5986_v26 }
0x2c04   :  { %v3377_v45 = vadd.f32 %v3376_v46, %v6157_v49 }
0x2c54   :  { %v3385_v62 = vpop.permute.xlu0 %3384 }
0x2c55   :  { %v3387_v33 = vadd.f32 %v3385_v62, %v3377_v45 }
0x2c57   :  { %4963 = vtanh.f32 %v3387_v33  ;;  %v4307_v37 = vmul.f32 -1.442695, %v3387_v33 }
0x2c61   :  { %v4964_v50 = vpop.eup %4963 }
0x2c62   :  { %3397 = vrot.lane.b32.xlu1 %v4964_v50, %s5210_s5 }
0x2c72   :  { %v6161_v25 = vpop.permute.xlu0 %2734  ;;  %v6163_v19 = vpop.permute.xlu1 %2728 }
0x2c73   :  { %v2731_v13 = vmul.f32 %v6163_v19, %v5986_v26  ;;  %v2737_v57 = vmul.f32 %v6161_v25, %v6028_v9 }
0x2c75   :  { %v2732_v1 = vadd.f32 %v2731_v13, %v2725_v0  ;;  %v6203_v0 = vld [vmem:[#allocation3 + $0x9] sm:$0x1] }
0x2c77   :  { %v2738_v16 = vadd.f32 %v2737_v57, %v2732_v1 }
0x2c79   :  { %4965 = vtanh.f32 %v2738_v16  ;;  %v4290_v5 = vmul.f32 -1.442695, %v2738_v16 }
0x2c7a   :  { %4967 = vpow2.f32 %v4307_v37 }
0x2c83   :  { %v4966_v35 = vpop.eup %4965 }
0x2c84   :  { %2748 = vrot.lane.b32.xlu1 %v4966_v35, %s5210_s5  ;;  %v4968_v56 = vpop.eup %4967 }
0x2c85   :  { %v3391_v42 = vadd.f32 1.0, %v4968_v56 }
0x2c87   :  { %4969 = vrcp.f32 %v3391_v42 }
0x2c88   :  { %4971 = vpow2.f32 %v4290_v5 }
0x2c91   :  { %v4970_v51 = vpop.eup %4969 }
0x2c92   :  { %v4972_v34 = vpop.eup %4971  ;;  %v3395_v63 = vmul.f32 %v4970_v51, %v6139_v47 }
0x2c93   :  { %v2742_v40 = vadd.f32 1.0, %v4972_v34 }
0x2c95   :  { %4973 = vrcp.f32 %v2742_v40 }
0x2c9f   :  { %v4974_v54 = vpop.eup %4973 }
0x2ca0   :  { %v2746_v20 = vmul.f32 %v4974_v54, %v2718_v60 }
0x2cd4   :  { %v3398_v12 = vpop.permute.xlu1 %3397 }
0x2cd5   :  { %v3400_v44 = vmul.f32 %v4970_v51, %v3398_v12 }
0x2cd7   :  { %3402 = vrot.lane.b32.xlu0 %v3400_v44, %s5211_s12 }
0x2cf6   :  { %v2749_v22 = vpop.permute.xlu1 %2748 }
0x2cf7   :  { %v2751_v31 = vmul.f32 %v4974_v54, %v2749_v22 }
0x2cf9   :  { %2753 = vrot.lane.b32.xlu1 %v2751_v31, %s5211_s12 }
0x2d49   :  { %v3403_v29 = vpop.permute.xlu0 %3402 }
0x2d4a   :  { %v6173_v39 = vadd.f32 %v3403_v29, %v3395_v63 }
0x2d4c   :  { %4975 = vtanh.f32 %v6173_v39 }
0x2d56   :  { %v4976_v53 = vpop.eup %4975 }
0x2d57   :  { %3408 = vrot.lane.b32.xlu0 %v4976_v53, %s5214_s13 }
0x2d6b   :  { %v2754_v14 = vpop.permute.xlu1 %2753 }
0x2d6c   :  { %v2756_v15 = vadd.f32 %v2754_v14, %v2746_v20 }
0x2d6e   :  { %4977 = vtanh.f32 %v2756_v15 }
0x2d78   :  { %v4978_v48 = vpop.eup %4977 }
0x2d79   :  { %2759 = vrot.lane.b32.xlu1 %v4978_v48, %s5214_s13 }
0x2dc9   :  { %v3409_v2 = vpop.permute.xlu0 %3408 }
0x2dca   :  { %v3411_v32 = vmul.f32 %v4970_v51, %v3409_v2 }
0x2dcc   :  { %3420 = vperm.xlu0 %4629, %v3411_v32  }
0x2dd0   :  { %4631 = vset.pattern.permute.xlu0 %v6825_v24 }
0x2dd1   :  { %3414 = vperm.xlu0 %4631, %v3411_v32  }
0x2dd5   :  { %4633 = vset.pattern.permute.xlu0 %v6796_v59 }
0x2deb   :  { %v2760_v47 = vpop.permute.xlu1 %2759 }
0x2dec   :  { %v2762_v11 = vmul.f32 %v4974_v54, %v2760_v47 }
0x2dee   :  { %2766 = vperm.xlu1 %4627, %v2762_v11  }
0x2df2   :  { %4630 = vset.pattern.permute.xlu1 %v6796_v59 }
0x2df3   :  { %2772 = vperm.xlu1 %4630, %v2762_v11  }
0x2df7   :  { %4632 = vset.pattern.permute.xlu1 %v6794_v3 }
0x2e4b   :  { %v6182_v27 = vpop.permute.xlu0 %3420 }
0x2e4c   :  { %v3423_v60 = vmul.f32 %v6182_v27, %v6035_v23 }
0x2e4e   :  { %3425 = vrot.lane.b32.xlu1 %v3423_v60, %s5218_s15 }
0x2e50   :  { %v6199_v50 = vpop.permute.xlu0 %3414 }
0x2e51   :  { %v3417_v13 = vmul.f32 %v6199_v50, %v5986_v26 }
0x2e53   :  { %v3418_v57 = vadd.f32 %v3417_v13, %v6203_v0 }
0x2e6d   :  { %v6187_v38 = vpop.permute.xlu1 %2766 }
0x2e6e   :  { %v2769_v55 = vmul.f32 %v6187_v38, %v5986_v26 }
0x2e70   :  { %v2770_v46 = vadd.f32 %v2769_v55, %v6191_v43 }
0x2e72   :  { %v6193_v18 = vpop.permute.xlu1 %2772 }
0x2e73   :  { %v2775_v45 = vmul.f32 %v6193_v18, %v6028_v9 }
0x2e75   :  { %v2776_v62 = vadd.f32 %v2775_v45, %v2770_v46  ;;  %v6225_v45 = vld [vmem:[#allocation3 + $0x4] sm:$0x1] }
0x2e77   :  { %4979 = vtanh.f32 %v2776_v62  ;;  %v4291_v37 = vmul.f32 -1.442695, %v2776_v62 }
0x2e81   :  { %v4980_v33 = vpop.eup %4979 }
0x2e82   :  { %2786 = vrot.lane.b32.xlu1 %v4980_v33, %s5210_s5 }
0x2ec0   :  { %v3426_v1 = vpop.permute.xlu1 %3425 }
0x2ec1   :  { %v3428_v16 = vadd.f32 %v3426_v1, %v3418_v57 }
0x2ec3   :  { %4981 = vtanh.f32 %v3428_v16  ;;  %v4308_v5 = vmul.f32 -1.442695, %v3428_v16 }
0x2ec4   :  { %4983 = vpow2.f32 %v4291_v37 }
0x2ecd   :  { %v4982_v35 = vpop.eup %4981 }
0x2ece   :  { %3438 = vrot.lane.b32.xlu0 %v4982_v35, %s5210_s5  ;;  %v4984_v56 = vpop.eup %4983 }
0x2ecf   :  { %v2780_v42 = vadd.f32 1.0, %v4984_v56 }
0x2ed1   :  { %4985 = vrcp.f32 %v2780_v42 }
0x2ed2   :  { %4987 = vpow2.f32 %v4308_v5 }
0x2edb   :  { %v4986_v51 = vpop.eup %4985 }
0x2edc   :  { %v4988_v34 = vpop.eup %4987  ;;  %v2784_v63 = vmul.f32 %v4986_v51, %v2756_v15 }
0x2edd   :  { %v3432_v40 = vadd.f32 1.0, %v4988_v34  ;;  %v6241_v34 = vld [vmem:[#allocation3 + $0x8] sm:$0x1] }
0x2edf   :  { %4989 = vrcp.f32 %v3432_v40 }
0x2ee9   :  { %v4990_v54 = vpop.eup %4989 }
0x2eea   :  { %v3436_v14 = vmul.f32 %v4990_v54, %v6173_v39 }
0x2ef4   :  { %v2787_v12 = vpop.permute.xlu1 %2786 }
0x2ef5   :  { %v2789_v44 = vmul.f32 %v4986_v51, %v2787_v12 }
0x2ef7   :  { %2791 = vrot.lane.b32.xlu1 %v2789_v44, %s5211_s12 }
0x2f40   :  { %v3439_v22 = vpop.permute.xlu0 %3438 }
0x2f41   :  { %v3441_v31 = vmul.f32 %v4990_v54, %v3439_v22 }
0x2f43   :  { %3443 = vrot.lane.b32.xlu0 %v3441_v31, %s5211_s12 }
0x2f69   :  { %v2792_v29 = vpop.permute.xlu1 %2791 }
0x2f6a   :  { %v2794_v53 = vadd.f32 %v2792_v29, %v2784_v63 }
0x2f6c   :  { %4991 = vtanh.f32 %v2794_v53 }
0x2f76   :  { %v4992_v20 = vpop.eup %4991 }
0x2f77   :  { %2797 = vrot.lane.b32.xlu1 %v4992_v20, %s5214_s13 }
0x2fb5   :  { %v3444_v48 = vpop.permute.xlu0 %3443 }
0x2fb6   :  { %v6211_v2 = vadd.f32 %v3444_v48, %v3436_v14 }
0x2fb8   :  { %4993 = vtanh.f32 %v6211_v2 }
0x2fc2   :  { %v4994_v32 = vpop.eup %4993 }
0x2fc3   :  { %3449 = vrot.lane.b32.xlu0 %v4994_v32, %s5214_s13 }
0x2fe9   :  { %v2798_v47 = vpop.permute.xlu1 %2797 }
0x2fea   :  { %v2800_v11 = vmul.f32 %v4986_v51, %v2798_v47 }
0x2fec   :  { %2810 = vperm.xlu0 %4633, %v2800_v11   ;;  %2804 = vperm.xlu1 %4632, %v2800_v11  }
0x2ff0   :  { %4634 = vset.pattern.permute.xlu1 %v6824_v17  ;;  %4636 = vset.pattern.permute.xlu0 %v6794_v3 }
0x3035   :  { %v3450_v15 = vpop.permute.xlu0 %3449 }
0x3036   :  { %v3452_v60 = vmul.f32 %v4990_v54, %v3450_v15 }
0x3038   :  { %3461 = vperm.xlu1 %4634, %v3452_v60  }
0x303c   :  { %4635 = vset.pattern.permute.xlu1 %v6825_v24 }
0x303d   :  { %3455 = vperm.xlu1 %4635, %v3452_v60  }
0x3041   :  { %4637 = vset.pattern.permute.xlu1 %v6796_v59 }
0x306b   :  { %v6219_v39 = vpop.permute.xlu0 %2810  ;;  %v6221_v55 = vpop.permute.xlu1 %2804 }
0x306c   :  { %v2807_v46 = vmul.f32 %v6221_v55, %v5986_v26  ;;  %v2813_v62 = vmul.f32 %v6219_v39, %v6028_v9 }
0x306e   :  { %v2808_v33 = vadd.f32 %v2807_v46, %v6225_v45 }
0x3070   :  { %v2814_v13 = vadd.f32 %v2813_v62, %v2808_v33 }
0x3072   :  { %4995 = vtanh.f32 %v2814_v13  ;;  %v4292_v35 = vmul.f32 -1.442695, %v2814_v13 }
0x3074   :  { %4997 = vpow2.f32 %v4292_v35 }
0x307c   :  { %v4996_v57 = vpop.eup %4995 }
0x307d   :  { %2824 = vrot.lane.b32.xlu0 %v4996_v57, %s5210_s5 }
0x307e   :  { %v4998_v37 = vpop.eup %4997 }
0x307f   :  { %v2818_v56 = vadd.f32 1.0, %v4998_v37 }
0x3081   :  { %4999 = vrcp.f32 %v2818_v56  ;;  %v6260_v56 = vld [vmem:[#allocation3 + $0x5] sm:$0x1] }
0x308b   :  { %v5000_v42 = vpop.eup %4999 }
0x308c   :  { %v2822_v63 = vmul.f32 %v5000_v42, %v2794_v53 }
0x30b7   :  { %v6231_v1 = vpop.permute.xlu1 %3461 }
0x30b8   :  { %v3464_v16 = vmul.f32 %v6231_v1, %v6035_v23 }
0x30ba   :  { %3466 = vrot.lane.b32.xlu1 %v3464_v16, %s5218_s15 }
0x30bc   :  { %v6237_v44 = vpop.permute.xlu1 %3455 }
0x30bd   :  { %v3458_v5 = vmul.f32 %v6237_v44, %v5986_v26 }
0x30bf   :  { %v3459_v40 = vadd.f32 %v3458_v5, %v6241_v34 }
0x30ef   :  { %v2825_v51 = vpop.permute.xlu0 %2824 }
0x30f0   :  { %v2827_v12 = vmul.f32 %v5000_v42, %v2825_v51 }
0x30f2   :  { %2829 = vrot.lane.b32.xlu0 %v2827_v12, %s5211_s12 }
0x312c   :  { %v3467_v54 = vpop.permute.xlu1 %3466 }
0x312d   :  { %v3469_v22 = vadd.f32 %v3467_v54, %v3459_v40 }
0x312f   :  { %5001 = vtanh.f32 %v3469_v22  ;;  %v4309_v48 = vmul.f32 -1.442695, %v3469_v22 }
0x3139   :  { %v5002_v31 = vpop.eup %5001 }
0x313a   :  { %3479 = vrot.lane.b32.xlu1 %v5002_v31, %s5210_s5 }
0x3164   :  { %v2830_v29 = vpop.permute.xlu0 %2829 }
0x3165   :  { %v2832_v20 = vadd.f32 %v2830_v29, %v2822_v63 }
0x3167   :  { %5003 = vtanh.f32 %v2832_v20 }
0x3168   :  { %5005 = vpow2.f32 %v4309_v48 }
0x3171   :  { %v5004_v14 = vpop.eup %5003 }
0x3172   :  { %2835 = vrot.lane.b32.xlu0 %v5004_v14, %s5214_s13  ;;  %v5006_v32 = vpop.eup %5005 }
0x3173   :  { %v3473_v47 = vadd.f32 1.0, %v5006_v32 }
0x3175   :  { %5007 = vrcp.f32 %v3473_v47 }
0x317f   :  { %v5008_v11 = vpop.eup %5007 }
0x3180   :  { %v3477_v53 = vmul.f32 %v5008_v11, %v6211_v2 }
0x31ac   :  { %v3480_v15 = vpop.permute.xlu1 %3479 }
0x31ad   :  { %v3482_v60 = vmul.f32 %v5008_v11, %v3480_v15 }
0x31af   :  { %3484 = vrot.lane.b32.xlu1 %v3482_v60, %s5211_s12 }
0x31e4   :  { %v2836_v46 = vpop.permute.xlu0 %2835 }
0x31e5   :  { %v2838_v62 = vmul.f32 %v5000_v42, %v2836_v46  ;;  %v6280_v46 = vld [vmem:[%s6785_s7] sm:$0x3] }
0x31e7   :  { %2842 = vperm.xlu0 %4636, %v2838_v62   ;;  %2848 = vperm.xlu1 %4637, %v2838_v62  }
0x31eb   :  { %4638 = vset.pattern.permute.xlu0 %v6824_v17  ;;  %4639 = vset.pattern.permute.xlu1 %v6825_v24 }
0x3221   :  { %v3485_v33 = vpop.permute.xlu1 %3484 }
0x3222   :  { %v6250_v13 = vadd.f32 %v3485_v33, %v3477_v53  ;;  %v6284_v53 = vld [vmem:[#allocation3 + $0x7] sm:$0x1] }
0x3224   :  { %5009 = vtanh.f32 %v6250_v13 }
0x322e   :  { %v5010_v57 = vpop.eup %5009 }
0x322f   :  { %3490 = vrot.lane.b32.xlu1 %v5010_v57, %s5214_s13 }
0x3266   :  { %v6254_v16 = vpop.permute.xlu0 %2842  ;;  %v6256_v35 = vpop.permute.xlu1 %2848 }
0x3267   :  { %v2845_v37 = vmul.f32 %v6254_v16, %v5986_v26  ;;  %v2851_v2 = vmul.f32 %v6256_v35, %v6028_v9 }
0x3269   :  { %v2846_v42 = vadd.f32 %v2845_v37, %v6260_v56 }
0x326b   :  { %v2852_v51 = vadd.f32 %v2851_v2, %v2846_v42 }
0x326d   :  { %5011 = vtanh.f32 %v2852_v51  ;;  %v4293_v26 = vmul.f32 -1.442695, %v2852_v51 }
0x326f   :  { %5013 = vpow2.f32 %v4293_v26 }
0x3277   :  { %v5012_v12 = vpop.eup %5011 }
0x3278   :  { %2862 = vrot.lane.b32.xlu1 %v5012_v12, %s5210_s5 }
0x3279   :  { %v5014_v54 = vpop.eup %5013 }
0x327a   :  { %v2856_v22 = vadd.f32 1.0, %v5014_v54 }
0x327c   :  { %5015 = vrcp.f32 %v2856_v22 }
0x3286   :  { %v5016_v31 = vpop.eup %5015 }
0x3287   :  { %v2860_v47 = vmul.f32 %v5016_v31, %v2832_v20 }
0x32a1   :  { %v3491_v5 = vpop.permute.xlu1 %3490 }
0x32a2   :  { %v3493_v40 = vmul.f32 %v5008_v11, %v3491_v5 }
0x32a4   :  { %3496 = vperm.xlu1 %4639, %v3493_v40   ;;  %3502 = vperm.xlu0 %4638, %v3493_v40  }
0x32a8   :  { %4640 = vset.pattern.permute.xlu1 %v6794_v3  ;;  %4641 = vset.pattern.permute.xlu0 %v6796_v59 }
0x32ea   :  { %v2863_v63 = vpop.permute.xlu1 %2862 }
0x32eb   :  { %v2865_v29 = vmul.f32 %v5016_v31, %v2863_v63 }
0x32ed   :  { %2867 = vrot.lane.b32.xlu1 %v2865_v29, %s5211_s12 }
0x3323   :  { %v6269_v14 = vpop.permute.xlu0 %3502  ;;  %v6274_v32 = vpop.permute.xlu1 %3496 }
0x3324   :  { %v3505_v48 = vmul.f32 %v6269_v14, %v6035_v23  ;;  %6826 = vst [vmem:[#allocation11_spill] sm:$0xff] %v6274_v32  ;;  %v3499_v62 = vmul.f32 %v6280_v46, %v6274_v32 }
0x3326   :  { %3507 = vrot.lane.b32.xlu0 %v3505_v48, %s5218_s15  ;;  %v3500_v33 = vadd.f32 %v3499_v62, %v6284_v53 }
0x335f   :  { %v2868_v11 = vpop.permute.xlu1 %2867 }
0x3360   :  { %v2870_v15 = vadd.f32 %v2868_v11, %v2860_v47  ;;  %v2877_v11 = vld [vmem:[#allocation3 + $0x6] sm:$0x1] }
0x3362   :  { %5017 = vtanh.f32 %v2870_v15 }
0x336c   :  { %v5018_v60 = vpop.eup %5017 }
0x336d   :  { %2873 = vrot.lane.b32.xlu1 %v5018_v60, %s5214_s13 }
0x3398   :  { %v3508_v57 = vpop.permute.xlu0 %3507 }
0x3399   :  { %v3510_v20 = vadd.f32 %v3508_v57, %v3500_v33 }
0x339b   :  { %5019 = vtanh.f32 %v3510_v20  ;;  %v4310_v51 = vmul.f32 -1.442695, %v3510_v20 }
0x339d   :  { %5021 = vpow2.f32 %v4310_v51 }
0x33a5   :  { %v5020_v37 = vpop.eup %5019 }
0x33a6   :  { %3520 = vrot.lane.b32.xlu0 %v5020_v37, %s5210_s5 }
0x33a7   :  { %v5022_v12 = vpop.eup %5021 }
0x33a8   :  { %v3514_v5 = vadd.f32 1.0, %v5022_v12 }
0x33aa   :  { %5023 = vrcp.f32 %v3514_v5 }
0x33b4   :  { %v5024_v40 = vpop.eup %5023 }
0x33b5   :  { %v3518_v22 = vmul.f32 %v5024_v40, %v6250_v13 }
0x33df   :  { %v2874_v42 = vpop.permute.xlu1 %2873 }
0x33e0   :  { %v2876_v2 = vmul.f32 %v5016_v31, %v2874_v42 }
0x33e2   :  { %2880 = vperm.xlu1 %4640, %v2876_v2  }
0x33e6   :  { %4643 = vset.pattern.permute.xlu1 %v6825_v24 }
0x3418   :  { %v3521_v26 = vpop.permute.xlu0 %3520 }
0x3419   :  { %v3523_v54 = vmul.f32 %v5024_v40, %v3521_v26 }
0x341b   :  { %3525 = vrot.lane.b32.xlu0 %v3523_v54, %s5211_s12 }
0x341f   :  { %2886 = vperm.xlu0 %4641, %v2876_v2  }
0x3423   :  { %4642 = vset.pattern.permute.xlu0 %v6824_v17 }
0x3461   :  { %v6295_v29 = vpop.permute.xlu1 %2880 }
0x3462   :  { %v2883_v47 = vmul.f32 %v6280_v46, %v6295_v29 }
0x3464   :  { %v2884_v62 = vadd.f32 %v2883_v47, %v2877_v11 }
0x348d   :  { %v3526_v63 = vpop.permute.xlu0 %3525 }
0x348e   :  { %v6292_v31 = vadd.f32 %v3526_v63, %v3518_v22 }
0x3490   :  { %5025 = vtanh.f32 %v6292_v31 }
0x349a   :  { %v5026_v48 = vpop.eup %5025 }
0x349b   :  { %3531 = vrot.lane.b32.xlu1 %v5026_v48, %s5214_s13 }
0x349e   :  { %v6300_v60 = vpop.permute.xlu0 %2886 }
0x349f   :  { %v2889_v13 = vmul.f32 %v6300_v60, %v6028_v9 }
0x34a1   :  { %v2890_v33 = vadd.f32 %v2889_v13, %v2884_v62 }
0x34a3   :  { %5027 = vtanh.f32 %v2890_v33  ;;  %v4294_v20 = vmul.f32 -1.442695, %v2890_v33 }
0x34a5   :  { %5029 = vpow2.f32 %v4294_v20 }
0x34ad   :  { %v5028_v57 = vpop.eup %5027 }
0x34ae   :  { %2900 = vrot.lane.b32.xlu1 %v5028_v57, %s5210_s5 }
0x34af   :  { %v5030_v2 = vpop.eup %5029 }
0x34b0   :  { %v2894_v51 = vadd.f32 1.0, %v5030_v2 }
0x34b2   :  { %5031 = vrcp.f32 %v2894_v51 }
0x34bc   :  { %v5032_v12 = vpop.eup %5031 }
0x350d   :  { %v3532_v37 = vpop.permute.xlu1 %3531 }
0x350e   :  { %v3534_v42 = vmul.f32 %v5024_v40, %v3532_v37  ;;  %v2898_v40 = vmul.f32 %v5032_v12, %v2870_v15 }
0x3510   :  { %3543 = vperm.xlu0 %4642, %v3534_v42  }
0x3514   :  { %4645 = vset.pattern.permute.xlu0 %v6796_v59 }
0x3520   :  { %v2901_v5 = vpop.permute.xlu1 %2900 }
0x3521   :  { %v2903_v26 = vmul.f32 %v5032_v12, %v2901_v5 }
0x3523   :  { %2905 = vrot.lane.b32.xlu1 %v2903_v26, %s5211_s12 }
0x3527   :  { %3537 = vperm.xlu1 %4643, %v3534_v42  }
0x352b   :  { %4644 = vset.pattern.permute.xlu1 %v6794_v3 }
0x358f   :  { %v6308_v54 = vpop.permute.xlu0 %3543 }
0x3590   :  { %v3546_v22 = vmul.f32 %v6308_v54, %v6035_v23 }
0x3592   :  { %3548 = vrot.lane.b32.xlu0 %v3546_v22, %s5218_s15 }
0x3595   :  { %v2906_v63 = vpop.permute.xlu1 %2905 }
0x3596   :  { %v2908_v48 = vadd.f32 %v2906_v63, %v2898_v40 }
0x3598   :  { %5033 = vtanh.f32 %v2908_v48 }
0x35a2   :  { %v5034_v47 = vpop.eup %5033 }
0x35a3   :  { %2911 = vrot.lane.b32.xlu1 %v5034_v47, %s5214_s13 }
0x35a6   :  { %v6314_v62 = vpop.permute.xlu1 %3537 }
0x35a7   :  { %v3540_v13 = vmul.f32 %v6280_v46, %v6314_v62 }
0x35a9   :  { %v3541_v33 = vadd.f32 %v3540_v13, %v2877_v11 }
0x3604   :  { %v3549_v57 = vpop.permute.xlu0 %3548 }
0x3605   :  { %v3551_v20 = vadd.f32 %v3549_v57, %v3541_v33 }
0x3607   :  { %5035 = vtanh.f32 %v3551_v20  ;;  %v4311_v2 = vmul.f32 -1.442695, %v3551_v20 }
0x3609   :  { %5037 = vpow2.f32 %v4311_v2 }
0x3611   :  { %v5036_v37 = vpop.eup %5035 }
0x3612   :  { %3561 = vrot.lane.b32.xlu0 %v5036_v37, %s5210_s5 }
0x3613   :  { %v5038_v51 = vpop.eup %5037 }
0x3614   :  { %v3555_v5 = vadd.f32 1.0, %v5038_v51 }
0x3615   :  { %v2912_v42 = vpop.permute.xlu1 %2911 }
0x3616   :  { %v2914_v15 = vmul.f32 %v5032_v12, %v2912_v42  ;;  %5039 = vrcp.f32 %v3555_v5 }
0x3618   :  { %2924 = vperm.xlu0 %4645, %v2914_v15   ;;  %2918 = vperm.xlu1 %4644, %v2914_v15  }
0x361c   :  { %4646 = vset.pattern.permute.xlu0 %v6824_v17  ;;  %4647 = vset.pattern.permute.xlu1 %v6825_v24 }
0x3620   :  { %v5040_v11 = vpop.eup %5039 }
0x3621   :  { %v3559_v20 = vmul.f32 %v5040_v11, %v6292_v31 }
0x3684   :  { %v3562_v26 = vpop.permute.xlu0 %3561 }
0x3685   :  { %v3564_v22 = vmul.f32 %v5040_v11, %v3562_v26 }
0x3687   :  { %3566 = vrot.lane.b32.xlu1 %v3564_v22, %s5211_s12 }
0x3697   :  { %v6322_v40 = vpop.permute.xlu0 %2924  ;;  %v6324_v63 = vpop.permute.xlu1 %2918 }
0x3698   :  { %v2921_v12 = vmul.f32 %v6280_v46, %v6324_v63  ;;  %v2927_v47 = vmul.f32 %v6322_v40, %v6028_v9 }
0x369a   :  { %v2922_v13 = vadd.f32 %v2921_v12, %v6284_v53 }
0x369c   :  { %v2928_v33 = vadd.f32 %v2927_v47, %v2922_v13 }
0x369e   :  { %5041 = vtanh.f32 %v2928_v33  ;;  %v4295_v15 = vmul.f32 -1.442695, %v2928_v33 }
0x36a8   :  { %v5042_v57 = vpop.eup %5041 }
0x36a9   :  { %2938 = vrot.lane.b32.xlu1 %v5042_v57, %s5210_s5 }
0x36f9   :  { %v3567_v37 = vpop.permute.xlu1 %3566 }
0x36fa   :  { %v6333_v42 = vadd.f32 %v3567_v37, %v3559_v20 }
0x36fc   :  { %5043 = vtanh.f32 %v6333_v42 }
0x36fd   :  { %5045 = vpow2.f32 %v4295_v15 }
0x3706   :  { %v5044_v2 = vpop.eup %5043 }
0x3707   :  { %3572 = vrot.lane.b32.xlu0 %v5044_v2, %s5214_s13  ;;  %v5046_v51 = vpop.eup %5045 }
0x3708   :  { %v2932_v5 = vadd.f32 1.0, %v5046_v51 }
0x370a   :  { %5047 = vrcp.f32 %v2932_v5 }
0x3714   :  { %v5048_v53 = vpop.eup %5047 }
0x3715   :  { %v2936_v47 = vmul.f32 %v5048_v53, %v2908_v48 }
0x371b   :  { %v2939_v26 = vpop.permute.xlu1 %2938 }
0x371c   :  { %v2941_v22 = vmul.f32 %v5048_v53, %v2939_v26 }
0x371e   :  { %2943 = vrot.lane.b32.xlu1 %v2941_v22, %s5211_s12 }
0x3779   :  { %v3573_v12 = vpop.permute.xlu0 %3572 }
0x377a   :  { %v3575_v31 = vmul.f32 %v5040_v11, %v3573_v12 }
0x377c   :  { %3584 = vperm.xlu0 %4646, %v3575_v31  }
0x3780   :  { %4649 = vset.pattern.permute.xlu0 %v6796_v59 }
0x3790   :  { %v2944_v13 = vpop.permute.xlu1 %2943 }
0x3791   :  { %v2946_v33 = vadd.f32 %v2944_v13, %v2936_v47 }
0x3793   :  { %5049 = vtanh.f32 %v2946_v33 }
0x379d   :  { %v5050_v57 = vpop.eup %5049 }
0x379e   :  { %2949 = vrot.lane.b32.xlu1 %v5050_v57, %s5214_s13 }
0x37a2   :  { %3578 = vperm.xlu1 %4647, %v3575_v31  }
0x37a6   :  { %4648 = vset.pattern.permute.xlu1 %v6794_v3 }
0x37fb   :  { %v6341_v20 = vpop.permute.xlu0 %3584 }
0x37fc   :  { %v3587_v37 = vmul.f32 %v6341_v20, %v6035_v23 }
0x37fe   :  { %3589 = vrot.lane.b32.xlu0 %v3587_v37, %s5218_s15 }
0x3810   :  { %v2950_v11 = vpop.permute.xlu1 %2949 }
0x3811   :  { %v2952_v15 = vmul.f32 %v5048_v53, %v2950_v11 }
0x3813   :  { %2962 = vperm.xlu0 %4649, %v2952_v15   ;;  %2956 = vperm.xlu1 %4648, %v2952_v15  }
0x3817   :  { %4650 = vset.pattern.permute.xlu0 %v6824_v17 }
0x3821   :  { %v6347_v48 = vpop.permute.xlu1 %3578 }
0x3822   :  { %v3581_v2 = vmul.f32 %v6280_v46, %v6347_v48 }
0x3824   :  { %v3582_v51 = vadd.f32 %v3581_v2, %v6260_v56 }
0x3870   :  { %v3590_v5 = vpop.permute.xlu0 %3589 }
0x3871   :  { %v3592_v26 = vadd.f32 %v3590_v5, %v3582_v51 }
0x3873   :  { %5051 = vtanh.f32 %v3592_v26  ;;  %v4312_v37 = vmul.f32 -1.442695, %v3592_v26 }
0x387d   :  { %v5052_v22 = vpop.eup %5051 }
0x387e   :  { %3602 = vrot.lane.b32.xlu1 %v5052_v22, %s5210_s5 }
0x3892   :  { %v6353_v12 = vpop.permute.xlu0 %2962  ;;  %v6355_v53 = vpop.permute.xlu1 %2956 }
0x3893   :  { %v2959_v31 = vmul.f32 %v6280_v46, %v6355_v53  ;;  %v2965_v47 = vmul.f32 %v6353_v12, %v6028_v9 }
0x3895   :  { %v2960_v13 = vadd.f32 %v2959_v31, %v6241_v34 }
0x3897   :  { %v2966_v57 = vadd.f32 %v2965_v47, %v2960_v13 }
0x3899   :  { %5053 = vtanh.f32 %v2966_v57  ;;  %v4296_v22 = vmul.f32 -1.442695, %v2966_v57 }
0x389a   :  { %5055 = vpow2.f32 %v4312_v37 }
0x38a3   :  { %v5054_v56 = vpop.eup %5053 }
0x38a4   :  { %2976 = vrot.lane.b32.xlu1 %v5054_v56, %s5210_s5  ;;  %v5056_v11 = vpop.eup %5055 }
0x38a5   :  { %v3596_v15 = vadd.f32 1.0, %v5056_v11 }
0x38a7   :  { %5057 = vrcp.f32 %v3596_v15 }
0x38a8   :  { %5059 = vpow2.f32 %v4296_v22 }
0x38b1   :  { %v5058_v2 = vpop.eup %5057 }
0x38b2   :  { %v5060_v3 = vpop.eup %5059  ;;  %v3600_v26 = vmul.f32 %v5058_v2, %v6333_v42  ;;  %v6827_v42 = vmov 7  }
0x38b3   :  { %v2970_v59 = vadd.f32 1.0, %v5060_v3 }
0x38b5   :  { %5061 = vrcp.f32 %v2970_v59 }
0x38bf   :  { %v5062_v34 = vpop.eup %5061 }
0x38c0   :  { %v2974_v57 = vmul.f32 %v5062_v34, %v2946_v33  ;;  %v6828_v33 = vmov 6  }
0x38f0   :  { %v3603_v51 = vpop.permute.xlu1 %3602 }
0x38f1   :  { %v3605_v5 = vmul.f32 %v5058_v2, %v3603_v51 }
0x38f3   :  { %3607 = vrot.lane.b32.xlu0 %v3605_v5, %s5211_s12 }
0x3916   :  { %v2977_v31 = vpop.permute.xlu1 %2976 }
0x3917   :  { %v2979_v47 = vmul.f32 %v5062_v34, %v2977_v31 }
0x3919   :  { %2981 = vrot.lane.b32.xlu1 %v2979_v47, %s5211_s12 }
0x3965   :  { %v3608_v13 = vpop.permute.xlu0 %3607 }
0x3966   :  { %v6366_v56 = vadd.f32 %v3608_v13, %v3600_v26 }
0x3968   :  { %5063 = vtanh.f32 %v6366_v56 }
0x3972   :  { %v5064_v37 = vpop.eup %5063 }
0x3973   :  { %3613 = vrot.lane.b32.xlu0 %v5064_v37, %s5214_s13 }
0x398b   :  { %v2982_v11 = vpop.permute.xlu1 %2981 }
0x398c   :  { %v2984_v15 = vadd.f32 %v2982_v11, %v2974_v57 }
0x398e   :  { %5065 = vtanh.f32 %v2984_v15 }
0x3998   :  { %v5066_v59 = vpop.eup %5065 }
0x3999   :  { %2987 = vrot.lane.b32.xlu1 %v5066_v59, %s5214_s13 }
0x39e5   :  { %v3614_v3 = vpop.permute.xlu0 %3613 }
0x39e6   :  { %v3616_v51 = vmul.f32 %v5058_v2, %v3614_v3 }
0x39e8   :  { %3625 = vperm.xlu0 %4650, %v3616_v51  }
0x39ec   :  { %4652 = vset.pattern.permute.xlu0 %v6825_v24 }
0x39ed   :  { %3619 = vperm.xlu0 %4652, %v3616_v51  }
0x39f1   :  { %4654 = vset.pattern.permute.xlu0 %v6827_v42 }
0x3a0b   :  { %v2988_v5 = vpop.permute.xlu1 %2987 }
0x3a0c   :  { %v2990_v22 = vmul.f32 %v5062_v34, %v2988_v5 }
0x3a0e   :  { %2994 = vperm.xlu1 %4648, %v2990_v22  }
0x3a12   :  { %4651 = vset.pattern.permute.xlu1 %v6827_v42 }
0x3a13   :  { %3000 = vperm.xlu1 %4651, %v2990_v22  }
0x3a17   :  { %4653 = vset.pattern.permute.xlu1 %v6828_v33 }
0x3a67   :  { %v6375_v31 = vpop.permute.xlu0 %3625 }
0x3a68   :  { %6829 = vst [vmem:[#allocation12_spill] sm:$0xff] %v6375_v31  ;;  %v3628_v47 = vmul.f32 %v6375_v31, %v6035_v23 }
0x3a6a   :  { %3630 = vrot.lane.b32.xlu1 %v3628_v47, %s5218_s15 }
0x3a6c   :  { %v6390_v59 = vpop.permute.xlu0 %3619 }
0x3a6d   :  { %v3622_v3 = vmul.f32 %v6280_v46, %v6390_v59 }
0x3a6f   :  { %v3623_v51 = vadd.f32 %v3622_v3, %v6225_v45 }
0x3a8d   :  { %v6380_v2 = vpop.permute.xlu1 %2994 }
0x3a8e   :  { %v2997_v26 = vmul.f32 %v6280_v46, %v6380_v2 }
0x3a90   :  { %v2998_v34 = vadd.f32 %v2997_v26, %v6203_v0 }
0x3a92   :  { %v6384_v13 = vpop.permute.xlu1 %3000 }
0x3a93   :  { %v3003_v37 = vmul.f32 %v6384_v13, %v6028_v9 }
0x3a95   :  { %v3004_v57 = vadd.f32 %v3003_v37, %v2998_v34 }
0x3a97   :  { %5067 = vtanh.f32 %v3004_v57  ;;  %v4297_v0 = vmul.f32 -1.442695, %v3004_v57 }
0x3aa1   :  { %v5068_v11 = vpop.eup %5067 }
0x3aa2   :  { %3014 = vrot.lane.b32.xlu1 %v5068_v11, %s5210_s5 }
0x3adc   :  { %v3631_v5 = vpop.permute.xlu1 %3630 }
0x3add   :  { %v3633_v22 = vadd.f32 %v3631_v5, %v3623_v51 }
0x3adf   :  { %5069 = vtanh.f32 %v3633_v22  ;;  %v4313_v31 = vmul.f32 -1.442695, %v3633_v22 }
0x3ae0   :  { %5071 = vpow2.f32 %v4297_v0 }
0x3ae9   :  { %v5070_v47 = vpop.eup %5069 }
0x3aea   :  { %3643 = vrot.lane.b32.xlu0 %v5070_v47, %s5210_s5  ;;  %v5072_v26 = vpop.eup %5071 }
0x3aeb   :  { %v3008_v34 = vadd.f32 1.0, %v5072_v26 }
0x3aed   :  { %5073 = vrcp.f32 %v3008_v34 }
0x3aee   :  { %5075 = vpow2.f32 %v4313_v31 }
0x3af7   :  { %v5074_v37 = vpop.eup %5073 }
0x3af8   :  { %v5076_v32 = vpop.eup %5075  ;;  %v3012_v57 = vmul.f32 %v5074_v37, %v2984_v15 }
0x3af9   :  { %v3637_v45 = vadd.f32 1.0, %v5076_v32 }
0x3afb   :  { %5077 = vrcp.f32 %v3637_v45 }
0x3b05   :  { %v5078_v3 = vpop.eup %5077 }
0x3b06   :  { %v3641_v34 = vmul.f32 %v5078_v3, %v6366_v56 }
0x3b14   :  { %v3015_v11 = vpop.permute.xlu1 %3014 }
0x3b15   :  { %v3017_v10 = vmul.f32 %v5074_v37, %v3015_v11 }
0x3b17   :  { %3019 = vrot.lane.b32.xlu1 %v3017_v10, %s5211_s12 }
0x3b5c   :  { %v3644_v51 = vpop.permute.xlu0 %3643 }
0x3b5d   :  { %v3646_v5 = vmul.f32 %v5078_v3, %v3644_v51 }
0x3b5f   :  { %3648 = vrot.lane.b32.xlu0 %v3646_v5, %s5211_s12 }
0x3b89   :  { %v3020_v47 = vpop.permute.xlu1 %3019 }
0x3b8a   :  { %v3022_v0 = vadd.f32 %v3020_v47, %v3012_v57 }
0x3b8c   :  { %5079 = vtanh.f32 %v3022_v0 }
0x3b96   :  { %v5080_v26 = vpop.eup %5079 }
0x3b97   :  { %3025 = vrot.lane.b32.xlu1 %v5080_v26, %s5214_s13 }
0x3bd1   :  { %v3649_v10 = vpop.permute.xlu0 %3648 }
0x3bd2   :  { %v6400_v22 = vadd.f32 %v3649_v10, %v3641_v34 }
0x3bd4   :  { %5081 = vtanh.f32 %v6400_v22 }
0x3bde   :  { %v5082_v32 = vpop.eup %5081 }
0x3bdf   :  { %3654 = vrot.lane.b32.xlu0 %v5082_v32, %s5214_s13 }
0x3c09   :  { %v3026_v31 = vpop.permute.xlu1 %3025 }
0x3c0a   :  { %v3028_v11 = vmul.f32 %v5074_v37, %v3026_v31 }
0x3c0c   :  { %3038 = vperm.xlu0 %4654, %v3028_v11   ;;  %3032 = vperm.xlu1 %4653, %v3028_v11  }
0x3c10   :  { %4655 = vset.pattern.permute.xlu1 %v6824_v17  ;;  %4657 = vset.pattern.permute.xlu0 %v6828_v33 }
0x3c51   :  { %v3655_v15 = vpop.permute.xlu0 %3654 }
0x3c52   :  { %v3657_v45 = vmul.f32 %v5078_v3, %v3655_v15 }
0x3c54   :  { %3666 = vperm.xlu1 %4655, %v3657_v45  }
0x3c58   :  { %4656 = vset.pattern.permute.xlu1 %v6825_v24 }
0x3c59   :  { %3660 = vperm.xlu1 %4656, %v3657_v45  }
0x3c5d   :  { %4658 = vset.pattern.permute.xlu1 %v6827_v42 }
0x3c8b   :  { %v6408_v56 = vpop.permute.xlu0 %3038  ;;  %v6410_v51 = vpop.permute.xlu1 %3032 }
0x3c8c   :  { %6830 = vst [vmem:[#allocation13_spill] sm:$0xff] %v6408_v56  ;;  %6831 = vst [vmem:[#allocation14_spill] sm:$0xff] %v6410_v51  ;;  %v3035_v37 = vmul.f32 %v6280_v46, %v6410_v51  ;;  %v3041_v5 = vmul.f32 %v6408_v56, %v6028_v9 }
0x3c8e   :  { %v3036_v57 = vadd.f32 %v3035_v37, %v6157_v49 }
0x3c90   :  { %v3042_v47 = vadd.f32 %v3041_v5, %v3036_v57 }
0x3c92   :  { %5083 = vtanh.f32 %v3042_v47  ;;  %v4298_v10 = vmul.f32 -1.442695, %v3042_v47 }
0x3c94   :  { %5085 = vpow2.f32 %v4298_v10 }
0x3c9c   :  { %v5084_v3 = vpop.eup %5083 }
0x3c9d   :  { %3052 = vrot.lane.b32.xlu0 %v5084_v3, %s5210_s5 }
0x3c9e   :  { %v5086_v32 = vpop.eup %5085 }
0x3c9f   :  { %v3046_v31 = vadd.f32 1.0, %v5086_v32 }
0x3ca1   :  { %5087 = vrcp.f32 %v3046_v31 }
0x3cab   :  { %v5088_v11 = vpop.eup %5087 }
0x3cd3   :  { %v6418_v26 = vpop.permute.xlu1 %3666 }
0x3cd4   :  { %6832 = vst [vmem:[#allocation15_spill] sm:$0xff] %v6418_v26  ;;  %v3669_v34 = vmul.f32 %v6418_v26, %v6035_v23 }
0x3cd6   :  { %3671 = vrot.lane.b32.xlu1 %v3669_v34, %s5218_s15  ;;  %v3050_v34 = vmul.f32 %v5088_v11, %v3022_v0 }
0x3cd8   :  { %v6424_v45 = vpop.permute.xlu1 %3660 }
0x3cd9   :  { %6833 = vst [vmem:[#allocation16_spill] sm:$0xff] %v6424_v45  ;;  %v3663_v37 = vmul.f32 %v6280_v46, %v6424_v45 }
0x3cdb   :  { %v3664_v5 = vadd.f32 %v3663_v37, %v6191_v43 }
0x3d0f   :  { %v3053_v15 = vpop.permute.xlu0 %3052 }
0x3d10   :  { %v3055_v49 = vmul.f32 %v5088_v11, %v3053_v15 }
0x3d12   :  { %3057 = vrot.lane.b32.xlu0 %v3055_v49, %s5211_s12 }
0x3d48   :  { %v3672_v57 = vpop.permute.xlu1 %3671 }
0x3d49   :  { %v3674_v3 = vadd.f32 %v3672_v57, %v3664_v5 }
0x3d4b   :  { %5089 = vtanh.f32 %v3674_v3  ;;  %v4314_v15 = vmul.f32 -1.442695, %v3674_v3 }
0x3d55   :  { %v5090_v47 = vpop.eup %5089 }
0x3d56   :  { %3684 = vrot.lane.b32.xlu1 %v5090_v47, %s5210_s5 }
0x3d84   :  { %v3058_v10 = vpop.permute.xlu0 %3057 }
0x3d85   :  { %v3060_v32 = vadd.f32 %v3058_v10, %v3050_v34 }
0x3d87   :  { %5091 = vtanh.f32 %v3060_v32 }
0x3d88   :  { %5093 = vpow2.f32 %v4314_v15 }
0x3d91   :  { %v5092_v31 = vpop.eup %5091 }
0x3d92   :  { %3063 = vrot.lane.b32.xlu0 %v5092_v31, %s5214_s13  ;;  %v5094_v49 = vpop.eup %5093  ;;  %v5168_v31 = vld [vmem:[#allocation3 + $0xb] sm:$0x1] }
0x3d93   :  { %v3678_v26 = vadd.f32 1.0, %v5094_v49 }
0x3d95   :  { %5095 = vrcp.f32 %v3678_v26 }
0x3d9f   :  { %v5096_v51 = vpop.eup %5095 }
0x3da0   :  { %v3682_v0 = vmul.f32 %v5096_v51, %v6400_v22 }
0x3dc8   :  { %v3685_v43 = vpop.permute.xlu1 %3684 }
0x3dc9   :  { %v3687_v37 = vmul.f32 %v5096_v51, %v3685_v43 }
0x3dcb   :  { %3689 = vrot.lane.b32.xlu1 %v3687_v37, %s5211_s12 }
0x3e04   :  { %v3064_v5 = vpop.permute.xlu0 %3063 }
0x3e05   :  { %v3066_v57 = vmul.f32 %v5088_v11, %v3064_v5 }
0x3e07   :  { %3070 = vperm.xlu0 %4657, %v3066_v57   ;;  %3076 = vperm.xlu1 %4658, %v3066_v57  }
0x3e0b   :  { %4659 = vset.pattern.permute.xlu0 %v6824_v17  ;;  %4660 = vset.pattern.permute.xlu1 %v6825_v24 }
0x3e3d   :  { %v3690_v3 = vpop.permute.xlu1 %3689 }
0x3e3e   :  { %v6435_v47 = vadd.f32 %v3690_v3, %v3682_v0 }
0x3e40   :  { %5097 = vtanh.f32 %v6435_v47 }
0x3e4a   :  { %v5098_v26 = vpop.eup %5097 }
0x3e4b   :  { %3695 = vrot.lane.b32.xlu1 %v5098_v26, %s5214_s13 }
0x3e86   :  { %v6439_v34 = vpop.permute.xlu0 %3070  ;;  %v6441_v10 = vpop.permute.xlu1 %3076 }
0x3e87   :  { %6834 = vst [vmem:[#allocation17_spill] sm:$0xff] %v6439_v34  ;;  %6835 = vst [vmem:[#allocation18_spill] sm:$0xff] %v6441_v10  ;;  %v3073_v11 = vmul.f32 %v6280_v46, %v6439_v34  ;;  %v3079_v22 = vmul.f32 %v6441_v10, %v6028_v9 }
0x3e89   :  { %v3074_v15 = vadd.f32 %v5168_v31, %v3073_v11 }
0x3e8b   :  { %v3080_v49 = vadd.f32 %v3079_v22, %v3074_v15 }
0x3e8d   :  { %5099 = vtanh.f32 %v3080_v49  ;;  %v4299_v57 = vmul.f32 -1.442695, %v3080_v49 }
0x3e8f   :  { %5101 = vpow2.f32 %v4299_v57 }
0x3e97   :  { %v5100_v43 = vpop.eup %5099 }
0x3e98   :  { %3090 = vrot.lane.b32.xlu1 %v5100_v43, %s5210_s5 }
0x3e99   :  { %v5102_v0 = vpop.eup %5101 }
0x3e9a   :  { %v3084_v3 = vadd.f32 1.0, %v5102_v0  ;;  %v5169_v0 = vld [vmem:[#allocation3 + $0x2] sm:$0x1] }
0x3e9c   :  { %5103 = vrcp.f32 %v3084_v3 }
0x3ea6   :  { %v5104_v26 = vpop.eup %5103 }
0x3ea7   :  { %v3088_v22 = vmul.f32 %v5104_v26, %v3060_v32 }
0x3ebd   :  { %v3696_v37 = vpop.permute.xlu1 %3695 }
0x3ebe   :  { %v3698_v5 = vmul.f32 %v5096_v51, %v3696_v37 }
0x3ec0   :  { %3701 = vperm.xlu1 %4660, %v3698_v5   ;;  %3707 = vperm.xlu0 %4659, %v3698_v5  }
0x3ec4   :  { %4662 = vset.pattern.permute.xlu1 %v6827_v42  ;;  %4661 = vset.pattern.permute.xlu0 %v6828_v33 }
0x3f0a   :  { %v3091_v11 = vpop.permute.xlu1 %3090 }
0x3f0b   :  { %v3093_v31 = vmul.f32 %v5104_v26, %v3091_v11 }
0x3f0d   :  { %3095 = vrot.lane.b32.xlu0 %v3093_v31, %s5211_s12 }
0x3f3f   :  { %v6451_v15 = vpop.permute.xlu0 %3707  ;;  %v6457_v5 = vpop.permute.xlu1 %3701 }
0x3f40   :  { %6836 = vst [vmem:[#allocation19_spill] sm:$0xff] %v6451_v15  ;;  %v3710_v51 = vmul.f32 %v6451_v15, %v6035_v23  ;;  %6837 = vst [vmem:[#allocation20_spill] sm:$0xff] %v6457_v5  ;;  %v3704_v57 = vmul.f32 %v6280_v46, %v6457_v5 }
0x3f42   :  { %3712 = vrot.lane.b32.xlu1 %v3710_v51, %s5218_s15  ;;  %v3705_v3 = vadd.f32 %v5169_v0, %v3704_v57 }
0x3f7f   :  { %v3096_v43 = vpop.permute.xlu0 %3095 }
0x3f80   :  { %v3098_v37 = vadd.f32 %v3096_v43, %v3088_v22 }
0x3f82   :  { %5105 = vtanh.f32 %v3098_v37 }
0x3f8c   :  { %v5106_v49 = vpop.eup %5105 }
0x3f8d   :  { %3101 = vrot.lane.b32.xlu0 %v5106_v49, %s5214_s13 }
0x3fb4   :  { %v3713_v11 = vpop.permute.xlu1 %3712 }
0x3fb5   :  { %v3715_v31 = vadd.f32 %v3713_v11, %v3705_v3 }
0x3fb7   :  { %5107 = vtanh.f32 %v3715_v31  ;;  %v4315_v22 = vmul.f32 -1.442695, %v3715_v31 }
0x3fb9   :  { %5109 = vpow2.f32 %v4315_v22 }
0x3fc1   :  { %v5108_v10 = vpop.eup %5107 }
0x3fc2   :  { %3725 = vrot.lane.b32.xlu1 %v5108_v10, %s5210_s5 }
0x3fc3   :  { %v5110_v43 = vpop.eup %5109 }
0x3fc4   :  { %v3719_v49 = vadd.f32 1.0, %v5110_v43 }
0x3fc6   :  { %5111 = vrcp.f32 %v3719_v49 }
0x3fd0   :  { %v5112_v57 = vpop.eup %5111 }
0x3fd1   :  { %v3723_v49 = vmul.f32 %v5112_v57, %v6435_v47 }
0x3fff   :  { %v3102_v32 = vpop.permute.xlu0 %3101 }
0x4000   :  { %v3104_v51 = vmul.f32 %v5104_v26, %v3102_v32  ;;  %v5170_v32 = vld [vmem:[#allocation3 + $0xc] sm:$0x1] }
0x4002   :  { %3108 = vperm.xlu0 %4661, %v3104_v51   ;;  %3114 = vperm.xlu1 %4662, %v3104_v51  }
0x4006   :  { %4663 = vset.pattern.permute.xlu0 %v6824_v17  ;;  %4664 = vset.pattern.permute.xlu1 %v6825_v24 }
0x4034   :  { %v3726_v0 = vpop.permute.xlu1 %3725 }
0x4035   :  { %v3728_v3 = vmul.f32 %v5112_v57, %v3726_v0 }
0x4037   :  { %3730 = vrot.lane.b32.xlu1 %v3728_v3, %s5211_s12 }
0x4081   :  { %v6465_v11 = vpop.permute.xlu0 %3108  ;;  %v6467_v10 = vpop.permute.xlu1 %3114 }
0x4082   :  { %6838 = vst [vmem:[#allocation21_spill] sm:$0xff] %v6465_v11  ;;  %6839 = vst [vmem:[#allocation22_spill] sm:$0xff] %v6467_v10  ;;  %v3111_v26 = vmul.f32 %v6280_v46, %v6465_v11  ;;  %v3117_v31 = vmul.f32 %v6467_v10, %v6028_v9 }
0x4084   :  { %v3112_v51 = vadd.f32 %v5170_v32, %v3111_v26 }
0x4086   :  { %v3118_v22 = vadd.f32 %v3117_v31, %v3112_v51 }
0x4088   :  { %5113 = vtanh.f32 %v3118_v22  ;;  %v4300_v11 = vmul.f32 -1.442695, %v3118_v22 }
0x4092   :  { %v5114_v43 = vpop.eup %5113 }
0x4093   :  { %3128 = vrot.lane.b32.xlu1 %v5114_v43, %s5210_s5 }
0x40a9   :  { %v3731_v0 = vpop.permute.xlu1 %3730 }
0x40aa   :  { %v6475_v3 = vadd.f32 %v3731_v0, %v3723_v49 }
0x40ac   :  { %5115 = vtanh.f32 %v6475_v3 }
0x40ad   :  { %5117 = vpow2.f32 %v4300_v11 }
0x40b6   :  { %v5116_v34 = vpop.eup %5115 }
0x40b7   :  { %3736 = vrot.lane.b32.xlu0 %v5116_v34, %s5214_s13  ;;  %v5118_v26 = vpop.eup %5117 }
0x40b8   :  { %v3122_v32 = vadd.f32 1.0, %v5118_v26 }
0x40ba   :  { %5119 = vrcp.f32 %v3122_v32 }
0x40c4   :  { %v5120_v51 = vpop.eup %5119 }
0x40c5   :  { %v3126_v49 = vmul.f32 %v5120_v51, %v3098_v37 }
0x4105   :  { %v3129_v31 = vpop.permute.xlu1 %3128 }
0x4106   :  { %v3131_v10 = vmul.f32 %v5120_v51, %v3129_v31  ;;  %v5171_v31 = vld [vmem:[#allocation3 + $0x1] sm:$0x1] }
0x4108   :  { %3133 = vrot.lane.b32.xlu1 %v3131_v10, %s5211_s12 }
0x4129   :  { %v3737_v43 = vpop.permute.xlu0 %3736 }
0x412a   :  { %v3739_v47 = vmul.f32 %v5112_v57, %v3737_v43 }
0x412c   :  { %3742 = vperm.xlu1 %4664, %v3739_v47   ;;  %3748 = vperm.xlu0 %4663, %v3739_v47  }
0x4130   :  { %4666 = vset.pattern.permute.xlu1 %v6827_v42  ;;  %4665 = vset.pattern.permute.xlu0 %v6828_v33 }
0x417a   :  { %v3134_v34 = vpop.permute.xlu1 %3133 }
0x417b   :  { %v3136_v22 = vadd.f32 %v3134_v34, %v3126_v49 }
0x417d   :  { %5121 = vtanh.f32 %v3136_v22 }
0x4187   :  { %v5122_v11 = vpop.eup %5121 }
0x4188   :  { %3139 = vrot.lane.b32.xlu1 %v5122_v11, %s5214_s13 }
0x41ab   :  { %v6483_v0 = vpop.permute.xlu0 %3748  ;;  %v6488_v57 = vpop.permute.xlu1 %3742 }
0x41ac   :  { %6840 = vst [vmem:[#allocation23_spill] sm:$0xff] %v6483_v0  ;;  %v3751_v10 = vmul.f32 %v6483_v0, %v6035_v23  ;;  %v3745_v37 = vmul.f32 %v6280_v46, %v6488_v57 }
0x41ae   :  { %3753 = vrot.lane.b32.xlu0 %v3751_v10, %s5218_s15  ;;  %v3746_v43 = vadd.f32 %v5171_v31, %v3745_v37 }
0x41fa   :  { %v3140_v26 = vpop.permute.xlu1 %3139 }
0x41fb   :  { %v3142_v32 = vmul.f32 %v5120_v51, %v3140_v26 }
0x41fd   :  { %3152 = vperm.xlu1 %4666, %v3142_v32   ;;  %3146 = vperm.xlu0 %4665, %v3142_v32   ;;  %v5172_v32 = vld [vmem:[#allocation3 + $0xd] sm:$0x1] }
0x4201   :  { %4668 = vset.pattern.permute.xlu1 %v6825_v24  ;;  %4667 = vset.pattern.permute.xlu0 %v6824_v17 }
0x4220   :  { %v3754_v47 = vpop.permute.xlu0 %3753 }
0x4221   :  { %v3756_v49 = vadd.f32 %v3754_v47, %v3746_v43 }
0x4223   :  { %5123 = vtanh.f32 %v3756_v49  ;;  %v4316_v0 = vmul.f32 -1.442695, %v3756_v49 }
0x422d   :  { %v5124_v34 = vpop.eup %5123 }
0x422e   :  { %3766 = vrot.lane.b32.xlu1 %v5124_v34, %s5210_s5 }
0x427c   :  { %v6495_v11 = vpop.permute.xlu1 %3152  ;;  %v6497_v51 = vpop.permute.xlu0 %3146 }
0x427d   :  { %6841 = vst [vmem:[#allocation24_spill] sm:$0xff] %v6495_v11  ;;  %6842 = vst [vmem:[#allocation25_spill] sm:$0xff] %v6497_v51  ;;  %v3149_v10 = vmul.f32 %v6280_v46, %v6497_v51  ;;  %v3155_v26 = vmul.f32 %v6495_v11, %v6028_v9 }
0x427f   :  { %v3150_v15 = vadd.f32 %v5172_v32, %v3149_v10 }
0x4281   :  { %v3156_v37 = vadd.f32 %v3155_v26, %v3150_v15 }
0x4283   :  { %5125 = vtanh.f32 %v3156_v37  ;;  %v4301_v51 = vmul.f32 -1.442695, %v3156_v37 }
0x4284   :  { %5127 = vpow2.f32 %v4316_v0 }
0x428d   :  { %v5126_v31 = vpop.eup %5125 }
0x428e   :  { %3166 = vrot.lane.b32.xlu1 %v5126_v31, %s5210_s5  ;;  %v5128_v43 = vpop.eup %5127 }
0x428f   :  { %v3760_v47 = vadd.f32 1.0, %v5128_v43 }
0x4291   :  { %5129 = vrcp.f32 %v3760_v47 }
0x4292   :  { %5131 = vpow2.f32 %v4301_v51 }
0x429b   :  { %v5130_v34 = vpop.eup %5129 }
0x429c   :  { %v5132_v11 = vpop.eup %5131  ;;  %v3764_v0 = vmul.f32 %v5130_v34, %v6475_v3 }
0x429d   :  { %v3160_v5 = vadd.f32 1.0, %v5132_v11 }
0x429f   :  { %5133 = vrcp.f32 %v3160_v5 }
0x42a0   :  { %v3767_v56 = vpop.permute.xlu1 %3766 }
0x42a1   :  { %v3769_v45 = vmul.f32 %v5130_v34, %v3767_v56 }
0x42a3   :  { %3771 = vrot.lane.b32.xlu0 %v3769_v45, %s5211_s12 }
0x42a9   :  { %v5134_v49 = vpop.eup %5133 }
0x42aa   :  { %v3164_v56 = vmul.f32 %v5134_v49, %v3136_v22 }
0x4300   :  { %v3167_v15 = vpop.permute.xlu1 %3166 }
0x4301   :  { %v3169_v10 = vmul.f32 %v5134_v49, %v3167_v15 }
0x4303   :  { %3171 = vrot.lane.b32.xlu1 %v3169_v10, %s5211_s12  ;;  %v5173_v10 = vld [vmem:[#allocation3] sm:$0x1] }
0x4315   :  { %v3772_v26 = vpop.permute.xlu0 %3771 }
0x4316   :  { %v3774_v32 = vadd.f32 %v3772_v26, %v3764_v0 }
0x4318   :  { %5135 = vtanh.f32 %v3774_v32 }
0x4322   :  { %v5136_v31 = vpop.eup %5135 }
0x4323   :  { %3777 = vrot.lane.b32.xlu0 %v5136_v31, %s5214_s13 }
0x4375   :  { %v3172_v45 = vpop.permute.xlu1 %3171 }
0x4376   :  { %v3174_v37 = vadd.f32 %v3172_v45, %v3164_v56 }
0x4378   :  { %5137 = vtanh.f32 %v3174_v37 }
0x4382   :  { %v5138_v51 = vpop.eup %5137 }
0x4383   :  { %3177 = vrot.lane.b32.xlu1 %v5138_v51, %s5214_s13 }
0x4395   :  { %v3778_v5 = vpop.permute.xlu0 %3777 }
0x4396   :  { %v3780_v11 = vmul.f32 %v5130_v34, %v3778_v5 }
0x4398   :  { %3783 = vperm.xlu1 %4668, %v3780_v11   ;;  %3789 = vperm.xlu0 %4667, %v3780_v11  }
0x439c   :  { %4669 = vset.pattern.permute.xlu1 %v6828_v33  ;;  %4670 = vset.pattern.permute.xlu0 %v6827_v42 }
0x43f5   :  { %v3178_v3 = vpop.permute.xlu1 %3177 }
0x43f6   :  { %v3180_v43 = vmul.f32 %v5134_v49, %v3178_v3 }
0x43f8   :  { %3184 = vperm.xlu1 %4669, %v3180_v43  }
0x43fc   :  { %4672 = vset.pattern.permute.xlu1 %v6824_v17 }
0x4417   :  { %v6512_v22 = vpop.permute.xlu0 %3789  ;;  %v6518_v34 = vpop.permute.xlu1 %3783 }
0x4418   :  { %v3792_v47 = vmul.f32 %v6512_v22, %v6035_v23  ;;  %v3786_v15 = vmul.f32 %v6280_v46, %v6518_v34 }
0x441a   :  { %3794 = vrot.lane.b32.xlu0 %v3792_v47, %s5218_s15  ;;  %v3787_v49 = vadd.f32 %v5173_v10, %v3786_v15 }
0x441e   :  { %3190 = vperm.xlu0 %4670, %v3180_v43  }
0x4422   :  { %4671 = vset.pattern.permute.xlu0 %v6825_v24  ;;  %v5174_v24 = vld [vmem:[#allocation3 + $0xe] sm:$0x1] }
0x4477   :  { %v6522_v17 = vpop.permute.xlu1 %3184 }
0x4478   :  { %v3187_v23 = vmul.f32 %v6280_v46, %v6522_v17 }
0x447a   :  { %v3188_v45 = vadd.f32 %v5174_v24, %v3187_v23 }
0x448c   :  { %v3795_v0 = vpop.permute.xlu0 %3794 }
0x448d   :  { %v3797_v26 = vadd.f32 %v3795_v0, %v3787_v49 }
0x448f   :  { %5139 = vtanh.f32 %v3797_v26  ;;  %v4317_v3 = vmul.f32 -1.442695, %v3797_v26 }
0x4499   :  { %v5140_v31 = vpop.eup %5139 }
0x449a   :  { %3807 = vrot.lane.b32.xlu1 %v5140_v31, %s5210_s5 }
0x449d   :  { %v6527_v56 = vpop.permute.xlu0 %3190 }
0x449e   :  { %v3193_v51 = vmul.f32 %v6527_v56, %v6028_v9 }
0x44a0   :  { %v3194_v5 = vadd.f32 %v3193_v51, %v3188_v45 }
0x44a2   :  { %5141 = vtanh.f32 %v3194_v5  ;;  %v4302_v15 = vmul.f32 -1.442695, %v3194_v5 }
0x44a3   :  { %5143 = vpow2.f32 %v4317_v3 }
0x44ac   :  { %v5142_v11 = vpop.eup %5141 }
0x44ad   :  { %3204 = vrot.lane.b32.xlu1 %v5142_v11, %s5210_s5  ;;  %v5144_v43 = vpop.eup %5143 }
0x44ae   :  { %v3801_v47 = vadd.f32 1.0, %v5144_v43 }
0x44b0   :  { %5145 = vrcp.f32 %v3801_v47 }
0x44b1   :  { %5147 = vpow2.f32 %v4302_v15 }
0x44ba   :  { %v5146_v46 = vpop.eup %5145 }
0x44bb   :  { %v5148_v0 = vpop.eup %5147  ;;  %v3805_v26 = vmul.f32 %v5146_v46, %v3774_v32 }
0x44bc   :  { %v3198_v31 = vadd.f32 1.0, %v5148_v0 }
0x44be   :  { %5149 = vrcp.f32 %v3198_v31 }
0x44c8   :  { %v5150_v9 = vpop.eup %5149 }
0x44c9   :  { %v3202_v11 = vmul.f32 %v5150_v9, %v3174_v37  ;;  %v6843_v37 = vmov 0.0  }
0x44ca   :  { %v6546_v0 = vsel %vm3825_vm4, 1.0, %v6843_v37  ;;  %v6557_v8 = vsel %vm3831_vm5, 1.0, %v6843_v37 }
0x44cb   :  { %v3991_v31 = vmul.f32 %v6546_v0, %v6353_v12 }
0x450c   :  { %v3808_v10 = vpop.permute.xlu1 %3807 }
0x450d   :  { %v3810_v49 = vmul.f32 %v5146_v46, %v3808_v10 }
0x450f   :  { %3812 = vrot.lane.b32.xlu0 %v3810_v49, %s5211_s12 }
0x451f   :  { %v3205_v23 = vpop.permute.xlu1 %3204 }
0x4520   :  { %v3207_v24 = vmul.f32 %v5150_v9, %v3205_v23  ;;  %v6560_v23 = vsel %vm3828_vm6, 1.0, %v6843_v37  ;;  %vm4167_vm6 = vcmask 31744  }
0x4522   :  { %3209 = vrot.lane.b32.xlu1 %v3207_v24, %s5211_s12  ;;  %v3972_v24 = vmul.f32 %v6560_v23, %v6347_v48  ;;  %v3865_v48 = vmul.f32 %v6546_v0, %v6161_v25  ;;  %v3886_v25 = vmul.f32 %v6546_v0, %v6193_v18  ;;  %v6614_v18 = vmul.f32 %v6560_v23, %v6153_v41 }
0x4581   :  { %v3813_v45 = vpop.permute.xlu0 %3812 }
0x4582   :  { %v3815_v51 = vadd.f32 %v3813_v45, %v3805_v26  ;;  %v6576_v45 = vmul.f32 %v6557_v8, %v6081_v6  ;;  %v6592_v6 = vmul.f32 %v6557_v8, %v6115_v28  ;;  %v6610_v28 = vmul.f32 %v6557_v8, %v6147_v36 }
0x4584   :  { %5151 = vtanh.f32 %v3815_v51  ;;  %v6584_v51 = vmul.f32 %v6560_v23, %v6086_v58 }
0x458e   :  { %v5152_v5 = vpop.eup %5151 }
0x458f   :  { %3818 = vrot.lane.b32.xlu0 %v5152_v5, %s5214_s13 }
0x4594   :  { %v3210_v3 = vpop.permute.xlu1 %3209 }
0x4595   :  { %v3212_v43 = vadd.f32 %v3210_v3, %v3202_v11 }
0x4597   :  { %5153 = vtanh.f32 %v3212_v43  ;;  %v6625_v43 = vsub.s32 0, %v5292_v7 }
0x45a1   :  { %v5154_v47 = vpop.eup %5153 }
0x45a2   :  { %3215 = vrot.lane.b32.xlu1 %v5154_v47, %s5214_s13  ;;  %v6629_v47 = vmul.f32 %v6560_v23, %v6199_v50  ;;  %v3951_v50 = vmul.f32 %v6560_v23, %v6390_v59 }
0x4601   :  { %v3819_v15 = vpop.permute.xlu0 %3818 }
0x4602   :  { %v3821_v10 = vmul.f32 %v5146_v46, %v3819_v15  ;;  %v6543_v46 = vsel %vm3822_vm3, 1.0, %v6843_v37 }
0x4603   :  { %v3906_v58 = vmul.f32 %v6543_v46, %v6221_v55  ;;  %v3885_v55 = vmul.f32 %v6543_v46, %v6187_v38  ;;  %v3949_v38 = vmul.f32 %v6546_v0, %v6300_v60  ;;  %v4012_v60 = vmul.f32 %v6546_v0, %v6384_v13 }
0x4604   :  { %3845 = vperm.xlu1 %4672, %v3821_v10   ;;  %3839 = vperm.xlu0 %4671, %v3821_v10   ;;  %v3928_v10 = vmul.f32 %v6546_v0, %v6256_v35  ;;  %v4035_v35 = vmul.f32 %v6560_v23, %v6237_v44  ;;  %v4011_v59 = vmul.f32 %v6543_v46, %v6380_v2  ;;  %v4329_v44 = vsel %vm3997_vm8, 1.0, %v6843_v37  ;;  %v6845_v2 = vld [vmem:[#allocation11_spill] sm:$0xff] }
0x4605   :  { %v3887_v41 = vadd.f32 %v3886_v25, %v3885_v55  ;;  %v3888_v13 = vmul.f32 %v6560_v23, %v6488_v57 }
0x4608   :  { %4673 = vset.pattern.permute.xlu1 %v6828_v33  ;;  %4674 = vset.pattern.permute.xlu0 %v6827_v42  ;;  %v3970_v42 = vmul.f32 %v6546_v0, %v6322_v40  ;;  %v3969_v33 = vmul.f32 %v6543_v46, %v6324_v63  ;;  %v6566_v40 = vmul.f32 %v6557_v8, %v6033_v30 }
0x4609   :  { %v3835_v63 = vmul.f32 %v6546_v0, %v6133_v52  ;;  %v3864_v30 = vmul.f32 %v6543_v46, %v6163_v19  ;;  %v3834_v52 = vmul.f32 %v6543_v46, %v6129_v4  ;;  %v3907_v19 = vmul.f32 %v6546_v0, %v6219_v39 }
0x460a   :  { %v3971_v12 = vadd.f32 %v3970_v42, %v3969_v33  ;;  %v6602_v4 = vmul.f32 %v6560_v23, %v6121_v61  ;;  %v6620_v61 = vmul.f32 %v6557_v8, %v6182_v27  ;;  %v3927_v27 = vmul.f32 %v6543_v46, %v6254_v16 }
0x460b   :  { %v6606_v3 = vadd.f32 %v3835_v63, %v3834_v52  ;;  %v3866_v39 = vadd.f32 %v3865_v48, %v3864_v30  ;;  %v3908_v15 = vadd.f32 %v3907_v19, %v3906_v58  ;;  %v6647_v16 = vmul.f32 %v6557_v8, %v6231_v1  ;;  %v6844_v63 = vld [vmem:[#allocation20_spill] sm:$0xff]  ;;  %v6849_v19 = vld [vmem:[#allocation14_spill] sm:$0xff] }
0x460c   :  { %v3973_v5 = vadd.f32 %v3972_v24, %v3971_v12  ;;  %v4328_v33 = vsel %vm3976_vm7, 1.0, %v6843_v37  ;;  %v4016_v1 = vmul.f32 %v6557_v8, %v6269_v14  ;;  %v4013_v24 = vadd.f32 %v4012_v60, %v4011_v59  ;;  %v6846_v48 = vld [vmem:[#allocation16_spill] sm:$0xff]  ;;  %v6852_v59 = vld [vmem:[#allocation19_spill] sm:$0xff] }
0x460d   :  { %v3909_v12 = vmul.f32 %v6560_v23, %v6844_v63  ;;  %v3930_v14 = vmul.f32 %v6560_v23, %v6846_v48  ;;  %v6847_v52 = vld [vmem:[#allocation12_spill] sm:$0xff]  ;;  %v4032_v58 = vmul.f32 %v6543_v46, %v6849_v19  ;;  %vm4169_vm7 = vcmask 30720  }
0x4614   :  { %v3216_v32 = vpop.permute.xlu1 %3215 }
0x4615   :  { %v3218_v49 = vmul.f32 %v5150_v9, %v3216_v32  ;;  %v3990_v9 = vmul.f32 %v6543_v46, %v6355_v53  ;;  %v6572_v53 = vmul.f32 %v6560_v23, %v6040_v21  ;;  %v3993_v21 = vmul.f32 %v6560_v23, %v6314_v62 }
0x4616   :  { %v3974_v62 = vmul.f32 %v6557_v8, %v6341_v20  ;;  %v3995_v20 = vmul.f32 %v6557_v8, %v6308_v54  ;;  %v3948_v32 = vmul.f32 %v6543_v46, %v6295_v29  ;;  %v3867_v29 = vmul.f32 %v6560_v23, %v6518_v34 }
0x4617   :  { %4139 = vperm.xlu1 %4673, %v3218_v49   ;;  %4144 = vperm.xlu0 %4674, %v3218_v49   ;;  %v3992_v26 = vadd.f32 %v3991_v31, %v3990_v9  ;;  %v3929_v31 = vadd.f32 %v3928_v10, %v3927_v27  ;;  %v3910_v27 = vadd.f32 %v3909_v12, %v3908_v15  ;;  %v6850_v10 = vld [vmem:[#allocation23_spill] sm:$0xff] }
0x4618   :  { %v3975_v36 = vadd.f32 %v3974_v62, %v3973_v5  ;;  %v3950_v42 = vadd.f32 %v3949_v38, %v3948_v32  ;;  %v3868_v30 = vadd.f32 %v3867_v29, %v3866_v39  ;;  %v6848_v5 = vld [vmem:[#allocation13_spill] sm:$0xff]  ;;  %v3889_v62 = vadd.f32 %v3888_v13, %v3887_v41 }
0x4619   :  { %v3994_v11 = vadd.f32 %v3993_v21, %v3992_v26  ;;  %v4014_v26 = vmul.f32 %v6560_v23, %v6845_v2  ;;  %v3953_v21 = vmul.f32 %v6557_v8, %v6847_v52  ;;  %v4033_v25 = vmul.f32 %v6546_v0, %v6848_v5  ;;  %v6853_v2 = vld [vmem:[#allocation17_spill] sm:$0xff] }
0x461a   :  { %v3985_v49 = vrot.slane %v3975_v36, %v6625_v43  ;;  %v3952_v34 = vadd.f32 %v3951_v50, %v3950_v42  ;;  %v3869_v39 = vmul.f32 %v6557_v8, %v6512_v22  ;;  %v3931_v41 = vadd.f32 %v3930_v14, %v3929_v31  ;;  %v6851_v42 = vld [vmem:[#allocation15_spill] sm:$0xff]  ;;  %v6855_v14 = vld [vmem:[#allocation10_spill] sm:$0xff] }
0x461b   :  { %v3996_v54 = vadd.f32 %v3995_v20, %v3994_v11  ;;  %v6686_v20 = vsel %vm3955_vm9, 1.0, %v6843_v37  ;;  %v4015_v38 = vadd.f32 %v4014_v26, %v4013_v24  ;;  %v4034_v29 = vadd.f32 %v4033_v25, %v4032_v58  ;;  %v6856_v25 = vld [vmem:[#allocation21_spill] sm:$0xff]  ;;  %v6857_v58 = vld [vmem:[#allocation22_spill] sm:$0xff] }
0x461c   :  { %v6670_v57 = vmul.f32 %v4328_v33, %v3985_v49  ;;  %v6680_v11 = vmul.f32 0.0, %v3985_v49  ;;  %v3954_v36 = vadd.f32 %v3953_v21, %v3952_v34  ;;  %v3870_v60 = vadd.f32 %v3869_v39, %v3868_v30 }
0x461d   :  { %v6663_v9 = vrot.slane %v3996_v54, %v6625_v43  ;;  %v3890_v54 = vmul.f32 %v6557_v8, %v6850_v10  ;;  %v3932_v33 = vmul.f32 %v6557_v8, %v6851_v42  ;;  %v3911_v22 = vmul.f32 %v6557_v8, %v6852_v59 }
0x461e   :  { %v4017_v31 = vadd.f32 %v4016_v1, %v4015_v38  ;;  %v4326_v34 = vsel %vm3934_vm10, 1.0, %v6843_v37  ;;  %v3880_v63 = vrot.slane %v3870_v60, %v6625_v43  ;;  %v4053_v26 = vmul.f32 %v6543_v46, %v6853_v2  ;;  %v6859_v60 = vld [vmem:[#allocation25_spill] sm:$0xff] }
0x461f   :  { %v6683_v55 = vmul.f32 %v4329_v44, %v6663_v9  ;;  %v3891_v13 = vadd.f32 %v3890_v54, %v3889_v62  ;;  %v3933_v24 = vadd.f32 %v3932_v33, %v3931_v41  ;;  %v4322_v1 = vsel %vm3850_vm12, 1.0, %v6843_v37 }
0x4620   :  { %vm4019_vm15 = vcmp.eq.s32.totalorder %v6855_v14, 8  ;;  %v4036_v30 = vadd.f32 %v4035_v35, %v4034_v29  ;;  %v4325_v52 = vsel %vm3913_vm13, 1.0, %v6843_v37  ;;  %v4074_v19 = vmul.f32 %v6543_v46, %v6856_v25 }
0x4621   :  { %v3901_v7 = vrot.slane %v3891_v13, %v6625_v43  ;;  %v4075_v62 = vmul.f32 %v6546_v0, %v6857_v58  ;;  %v4324_v39 = vsel %vm3892_vm14, 1.0, %v6843_v37  ;;  %v3943_v54 = vrot.slane %v3933_v24, %v6625_v43 }
0x4622   :  { %v4027_v13 = vrot.slane %v4017_v31, %v6625_v43  ;;  %v4117_v24 = vmul.f32 %v6546_v0, %v6527_v56  ;;  %v4038_v2 = vadd.f32 %v6647_v16, %v4036_v30  ;;  %vm4040_vm0 = vcmp.eq.s32.totalorder %v6855_v14, 9 }
0x4623   :  { %v3902_v29 = vmul.f32 %v4324_v39, %v3901_v7  ;;  %v3903_v42 = vmul.f32 0.0, %v3901_v7  ;;  %vm4061_vm1 = vcmp.eq.s32.totalorder %v6855_v14, 10  ;;  %vm4082_vm2 = vcmp.eq.s32.totalorder %v6855_v14, 11 }
0x4624   :  { %vm4103_vm3 = vcmp.eq.s32.totalorder %v6855_v14, 12  ;;  %vm4124_vm4 = vcmp.eq.s32.totalorder %v6855_v14, 13  ;;  %vm4154_vm5 = vcmp.eq.s32.totalorder %v6855_v14, 14 }
0x4683   :  { %v3846_v32 = vpop.permute.xlu1 %3845  ;;  %v3840_v50 = vpop.permute.xlu0 %3839 }
0x4684   :  { %v3842_v49 = vmul.f32 %v6560_v23, %v3840_v50  ;;  %v3848_v15 = vmul.f32 %v6557_v8, %v3846_v32  ;;  %v3912_v23 = vadd.f32 %v3911_v22, %v3910_v27  ;;  %v6854_v8 = vld [vmem:[#allocation18_spill] sm:$0xff]  ;;  %v3882_v27 = vmul.f32 0.0, %v3880_v63  ;;  %v6858_v50 = vld [vmem:[#allocation24_spill] sm:$0xff] }
0x4685   :  { %v4054_v48 = vmul.f32 %v6546_v0, %v6854_v8  ;;  %v4096_v41 = vmul.f32 %v6546_v0, %v6858_v50  ;;  %v3964_v22 = vrot.slane %v3954_v36, %v6625_v43  ;;  %v4116_v36 = vmul.f32 %v6543_v46, %v6522_v17 }
0x4686   :  { %v3843_v44 = vadd.f32 %v3842_v49, %v6606_v3  ;;  %v4323_v3 = vsel %vm3871_vm11, 1.0, %v6843_v37  ;;  %v3922_v5 = vrot.slane %v3912_v23, %v6625_v43  ;;  %v4095_v49 = vmul.f32 %v6543_v46, %v6859_v60 }
0x4687   :  { %v3881_v38 = vmul.f32 %v4323_v3, %v3880_v63  ;;  %v4055_v32 = vadd.f32 %v4054_v48, %v4053_v26  ;;  %v3944_v26 = vmul.f32 %v4326_v34, %v3943_v54  ;;  %v3945_v3 = vmul.f32 0.0, %v3943_v54 }
0x4688   :  { %v3849_v12 = vadd.f32 %v3848_v15, %v3843_v44  ;;  %v3923_v15 = vmul.f32 %v4325_v52, %v3922_v5  ;;  %v4076_v44 = vadd.f32 %v4075_v62, %v4074_v19  ;;  %v3924_v23 = vmul.f32 0.0, %v3922_v5 }
0x4689   :  { %v4057_v8 = vadd.f32 %v6629_v47, %v4055_v32  ;;  %v4097_v48 = vadd.f32 %v4096_v41, %v4095_v49  ;;  %v4008_v52 = vmul.f32 0.0, %v6663_v9  ;;  %v3965_v7 = vmul.f32 %v6686_v20, %v3964_v22 }
0x468a   :  { %v3859_v21 = vrot.slane %v3849_v12, %v6625_v43  ;;  %v4078_v56 = vadd.f32 %v6614_v18, %v4076_v44  ;;  %v4118_v16 = vadd.f32 %v4117_v24, %v4116_v36  ;;  %v4330_v47 = vsel %vm4019_vm15, 1.0, %v6843_v37 }
0x468b   :  { %v4028_v5 = vmul.f32 0.0, %v4027_v13  ;;  %v4059_v17 = vadd.f32 %v6620_v61, %v4057_v8  ;;  %v4099_v25 = vadd.f32 %v6602_v4, %v4097_v48  ;;  %v4331_v9 = vsel %vm4040_vm0, 1.0, %v6843_v37 }
0x468c   :  { %v3860_v10 = vmul.f32 %v4322_v1, %v3859_v21  ;;  %v3861_v35 = vmul.f32 0.0, %v3859_v21  ;;  %v3966_v21 = vmul.f32 0.0, %v3964_v22  ;;  %v4048_v20 = vrot.slane %v4038_v2, %v6625_v43 }
0x468d   :  { %v4080_v39 = vadd.f32 %v6610_v28, %v4078_v56  ;;  %v4120_v4 = vadd.f32 %v6584_v51, %v4118_v16  ;;  %v4069_v54 = vrot.slane %v4059_v17, %v6625_v43  ;;  %v4101_v32 = vadd.f32 %v6592_v6, %v4099_v25 }
0x468e   :  { %v3883_v33 = vadd.f32 %v3881_v38, %v3860_v10  ;;  %v3884_v59 = vadd.f32 %v3882_v27, %v3861_v35  ;;  %v4029_v35 = vmul.f32 %v4330_v47, %v4027_v13  ;;  %v4049_v41 = vmul.f32 0.0, %v4048_v20 }
0x468f   :  { %v4332_v28 = vsel %vm4061_vm1, 1.0, %v6843_v37  ;;  %v4050_v60 = vmul.f32 %v4331_v9, %v4048_v20  ;;  %v4333_v49 = vsel %vm4082_vm2, 1.0, %v6843_v37  ;;  %v4090_v51 = vrot.slane %v4080_v39, %v6625_v43 }
0x4690   :  { %v3904_v63 = vadd.f32 %v3902_v29, %v3883_v33  ;;  %v3905_v12 = vadd.f32 %v3903_v42, %v3884_v59  ;;  %v4070_v42 = vmul.f32 0.0, %v4069_v54  ;;  %v4071_v33 = vmul.f32 %v4332_v28, %v4069_v54 }
0x4691   :  { %v4111_v59 = vrot.slane %v4101_v32, %v6625_v43  ;;  %v4092_v44 = vmul.f32 %v4333_v49, %v4090_v51 }
0x4692   :  { %v3925_v1 = vadd.f32 %v3923_v15, %v3904_v63  ;;  %v3926_v31 = vadd.f32 %v3924_v23, %v3905_v12  ;;  %v4091_v15 = vmul.f32 0.0, %v4090_v51  ;;  %v4335_v12 = vsel %vm4124_vm4, 1.0, %v6843_v37 }
0x4693   :  { %v4112_v63 = vmul.f32 0.0, %v4111_v59 }
0x4694   :  { %v3946_v34 = vadd.f32 %v3944_v26, %v3925_v1  ;;  %v3947_v30 = vadd.f32 %v3945_v3, %v3926_v31 }
0x4696   :  { %v3967_v19 = vadd.f32 %v3965_v7, %v3946_v34  ;;  %v3968_v58 = vadd.f32 %v3966_v21, %v3947_v30  ;;  %v4140_v18 = vpop.permute.xlu1 %4139  ;;  %v4145_v62 = vpop.permute.xlu0 %4144 }
0x4697   :  { %v4142_v38 = vmul.f32 %v6543_v46, %v4140_v18  ;;  %v4147_v27 = vmul.f32 %v6546_v0, %v4145_v62 }
0x4698   :  { %v3988_v61 = vadd.f32 %v6670_v57, %v3967_v19  ;;  %v3989_v10 = vadd.f32 %v6680_v11, %v3968_v58  ;;  %v4122_v11 = vadd.f32 %v6576_v45, %v4120_v4 }
0x4699   :  { %v4148_v50 = vadd.f32 %v4147_v27, %v4142_v38 }
0x469a   :  { %v4009_v46 = vadd.f32 %v6683_v55, %v3988_v61  ;;  %v4010_v0 = vadd.f32 %v4008_v52, %v3989_v10  ;;  %v4132_v23 = vrot.slane %v4122_v11, %v6625_v43 }
0x469b   :  { %v4150_v57 = vadd.f32 %v6572_v53, %v4148_v50  ;;  %v4334_v53 = vsel %vm4103_vm3, 1.0, %v6843_v37 }
0x469c   :  { %v4030_v29 = vadd.f32 %v4028_v5, %v4009_v46  ;;  %v4031_v6 = vadd.f32 %v4029_v35, %v4010_v0  ;;  %v4113_v2 = vmul.f32 %v4334_v53, %v4111_v59  ;;  %v4133_v3 = vmul.f32 0.0, %v4132_v23 }
0x469d   :  { %v4152_v13 = vadd.f32 %v6566_v40, %v4150_v57  ;;  %v4336_v40 = vsel %vm4154_vm5, 1.0, %v6843_v37  ;;  %v4134_v36 = vmul.f32 %v4335_v12, %v4132_v23 }
0x469e   :  { %v4051_v55 = vadd.f32 %v4049_v41, %v4030_v29  ;;  %v4052_v22 = vadd.f32 %v4050_v60, %v4031_v6 }
0x469f   :  { %v4162_v48 = vrot.slane %v4152_v13, %v6625_v43 }
0x46a0   :  { %v4072_v24 = vadd.f32 %v4070_v42, %v4051_v55  ;;  %v4073_v45 = vadd.f32 %v4071_v33, %v4052_v22 }
0x46a1   :  { %v4163_v56 = vmul.f32 0.0, %v4162_v48  ;;  %v4164_v21 = vmul.f32 %v4336_v40, %v4162_v48 }
0x46a2   :  { %v4093_v26 = vadd.f32 %v4091_v15, %v4072_v24  ;;  %v4094_v8 = vadd.f32 %v4092_v44, %v4073_v45 }
0x46a4   :  { %v4114_v1 = vadd.f32 %v4112_v63, %v4093_v26  ;;  %v4115_v31 = vadd.f32 %v4113_v2, %v4094_v8 }
0x46a6   :  { %v4135_v52 = vadd.f32 %v4133_v3, %v4114_v1  ;;  %v4136_v7 = vadd.f32 %v4134_v36, %v4115_v31 }
0x46a8   :  { %v4165_v14 = vadd.f32 %v4163_v56, %v4135_v52  ;;  %v4166_v16 = vadd.f32 %v4164_v21, %v4136_v7 }
0x46aa   :  { %4168 = vst.msk [vmem:[%s6787_s9] sm:$0xff] %vm4167_vm6, %v4165_v14 }
0x46ab   :  { %4170 = vst.msk [vmem:[%s6787_s9 + $0x8] sm:$0x7f] %vm4169_vm7, %v4166_v16 }
0x46ac   :  { %4175 = vsyncpa [#allocation5], 1 }
0x46ad   :  { %4176 = vsyncpa [#allocation7], 1 }

</bundles_post_ra>
